<compile_context>
chip_gen: v7x
topology: tpu7x:2x2x1
jax: 0.10.0
libtpu: 0.0.40
codegen_flags: <defaults>
</compile_context>

<pallas_src>
import functools

import numpy as np

import jax
import jax.numpy as jnp
from jax.experimental import pallas as pl
from jax.experimental.pallas import tpu as pltpu

BN_EPS = 1e-5
LRELU_SLOPE = 0.2
HIDDEN = 8            # hidden_channels in the PyTorch module
HEAD_PAD = 128        # lane-padded width of the fused (adv + aux) head matmul
N_BLOCKS = 6

_VMEM = pl.BlockSpec(memory_space=pltpu.MemorySpace.VMEM)
_CPARAMS = pltpu.CompilerParams(vmem_limit_bytes=32 * 1024 * 1024)


# ---------------------------------------------------------------------------
# The single fused kernel: 6 x (conv + BN + LeakyReLU) + both heads
# ---------------------------------------------------------------------------
def _fused_disc_kernel(block_dims, n_classes, x_ref, *refs):
    """Whole Discriminator forward.

    block_dims: static tuple of (m, wo) per block, m = N*Ho output rows.
    refs: per block (s, b, g, gt, gamma, beta), then wh, bh, then the two
          output refs (validity, log-probs).
    """
    nblk = len(block_dims)
    blk_refs = refs[:6 * nblk]
    wh_ref, bh_ref, val_ref, logp_ref = refs[6 * nblk:]

    f32 = jnp.float32
    bf16 = jnp.bfloat16

    x = x_ref[...]                                   # (N*H, W*C_in) bf16
    for k, (m, wo) in enumerate(block_dims):
        s_ref, b_ref, g_ref, gt_ref, gamma_ref, beta_ref = blk_refs[6 * k:6 * k + 6]

        # --- stride-2 3x3 conv as matmuls -------------------------------
        # One selection matmul gathers the three h-taps (rows [dh*m:(dh+1)*m]
        # hold tap dh); zero-padding in h and the per-sample ho==0 mask are
        # baked into the 0/1 selection matrix.  Zero-padding / taps in w are
        # baked into the block-structured weight matrices b_ref[dh].
        p = jnp.dot(s_ref[...], x, preferred_element_type=f32).astype(bf16)
        acc = jnp.dot(p[0:m], b_ref[0], preferred_element_type=f32)
        acc = acc + jnp.dot(p[m:2 * m], b_ref[1], preferred_element_type=f32)
        acc = acc + jnp.dot(p[2 * m:3 * m], b_ref[2], preferred_element_type=f32)
        # acc: (m, wo*c_out) f32, rows=(n, ho), cols=(wo, c_out)

        # --- BatchNorm2d (training-mode batch stats, one pass) + LeakyReLU --
        cnt = m * wo                                          # N*Ho*Wo per channel
        colsum = jnp.sum(acc, axis=0, keepdims=True)          # (1, wo*c_out)
        colsq = jnp.sum(acc * acc, axis=0, keepdims=True)
        ch_sum = jnp.dot(colsum, g_ref[...], preferred_element_type=f32)   # (1, c_out)
        ch_sq = jnp.dot(colsq, g_ref[...], preferred_element_type=f32)
        mean = ch_sum * (1.0 / cnt)
        var = jnp.maximum(ch_sq * (1.0 / cnt) - mean * mean, 0.0)
        a = jax.lax.rsqrt(var + BN_EPS) * gamma_ref[...]
        b = beta_ref[...] - mean * a
        a_wide = jnp.dot(a, gt_ref[...], preferred_element_type=f32)       # (1, wo*c_out)
        b_wide = jnp.dot(b, gt_ref[...], preferred_element_type=f32)
        y = acc * a_wide + b_wide
        y = jnp.where(y > 0, y, LRELU_SLOPE * y)

        x = y.astype(bf16)            # next block's input: rows=(n,ho), cols=(wo,c)

    # --- heads: one lane-padded matmul, slice, log-softmax -------------------
    # x is now the flattened feature (N, 128); cols [0:nc) = aux logits,
    # col nc = adv validity.
    out = jnp.dot(x, wh_ref[...], preferred_element_type=f32) + bh_ref[...]
    logits = out[:, :n_classes]
    val_ref[...] = out[:, n_classes:n_classes + 1]
    mx = jnp.max(logits, axis=1, keepdims=True)
    lse = jnp.log(jnp.sum(jnp.exp(logits - mx), axis=1, keepdims=True)) + mx
    logp_ref[...] = logits - lse


# ---------------------------------------------------------------------------
# Parameter init (mirrors the PyTorch module) and ONE-TIME packing
# ---------------------------------------------------------------------------
def init_params(key, in_channels, img_size, n_classes):
    hc = HIDDEN
    out_channels = hc * 16
    chans = [in_channels, hc, hc * 2, hc * 4, hc * 8, hc * 16, out_channels]
    ds_size = img_size // 2 ** 6
    feat_dim = out_channels * ds_size ** 2

    params = {"convs": []}
    keys = jax.random.split(key, 8)
    for i in range(N_BLOCKS):
        c_in, c_out = chans[i], chans[i + 1]
        w = 0.05 * jax.random.normal(keys[i], (c_out, c_in, 3, 3), jnp.float32)
        params["convs"].append({
            "w": w,
            "gamma": jnp.ones((c_out,), jnp.float32),
            "beta": jnp.zeros((c_out,), jnp.float32),
        })
    params["adv_w"] = 0.05 * jax.random.normal(keys[6], (1, feat_dim), jnp.float32)
    params["adv_b"] = jnp.zeros((1,), jnp.float32)
    params["aux_w"] = 0.05 * jax.random.normal(keys[7], (n_classes, feat_dim),
                                               jnp.float32)
    params["aux_b"] = jnp.zeros((n_classes,), jnp.float32)
    return params


def pack_params(params, in_channels, img_size, n_classes, batch):
    """One-time repacking of the Torch-style params into kernel operands.

    Hoisted out of the per-call forward (perf review): builds, per block,
      s  : (3*M, N*H)       bf16  h-tap selection matrix (pads/masks baked in)
      b  : (3, W*Cin, Wo*Cout) bf16 w-folded conv weights (one per h-tap)
      g  : (Wo*Cout, Cout)  f32   per-channel group-sum matrix for BN stats
      gt : (Cout, Wo*Cout)  f32   broadcast-back matrix (g transposed)
    plus the lane-padded fused head weight/bias.
    """
    assert img_size == 64, "fused kernel assumes 64x64 inputs (6 halvings to 1x1)"
    n = batch
    h = img_size
    packed = {"blocks": []}

    for k in range(N_BLOCKS):
        w = np.asarray(params["convs"][k]["w"], np.float32)       # (co, ci, 3, 3)
        c_out, c_in = w.shape[0], w.shape[1]
        wsp = h
        ho = h // 2
        wo = wsp // 2
        m = n * ho
        nh = n * h

        # h-tap selection: P[dh*m + (i*ho + oh)] = X_row[i*h + (2*oh + dh - 1)]
        # (rows hitting the zero pad, incl. cross-sample ho==0 for dh=0, stay 0)
        s = np.zeros((3 * m, nh), np.float32)
        for dh in range(3):
            for i in range(n):
                for oh in range(ho):
                    ih = 2 * oh + dh - 1
                    if 0 <= ih < h:
                        s[dh * m + i * ho + oh, i * h + ih] = 1.0

        # w-folded conv weight: B[dh, iw*ci + c, ow*co + o] = w[o, c, dh, dw]
        bmat = np.zeros((3, wsp * c_in, wo * c_out), np.float32)
        for dh in range(3):
            for ow in range(wo):
                for dw in range(3):
                    iw = 2 * ow + dw - 1
                    if 0 <= iw < wsp:
                        bmat[dh, iw * c_in:(iw + 1) * c_in,
                             ow * c_out:(ow + 1) * c_out] = w[:, :, dh, dw].T

        g = np.tile(np.eye(c_out, dtype=np.float32), (wo, 1))     # (wo*co, co)

        packed["blocks"].append({
            "s": jnp.asarray(s, jnp.bfloat16),
            "b": jnp.asarray(bmat, jnp.bfloat16),
            "g": jnp.asarray(g, jnp.float32),
            "gt": jnp.asarray(np.ascontiguousarray(g.T), jnp.float32),
            "gamma": jnp.asarray(np.asarray(params["convs"][k]["gamma"],
                                            np.float32).reshape(1, c_out)),
            "beta": jnp.asarray(np.asarray(params["convs"][k]["beta"],
                                           np.float32).reshape(1, c_out)),
        })
        h = ho

    feat_dim = params["aux_w"].shape[1]                            # 128
    assert n_classes + 1 <= HEAD_PAD
    wh = np.zeros((feat_dim, HEAD_PAD), np.float32)
    wh[:, :n_classes] = np.asarray(params["aux_w"], np.float32).T
    wh[:, n_classes] = np.asarray(params["adv_w"], np.float32)[0]
    bh = np.zeros((1, HEAD_PAD), np.float32)
    bh[0, :n_classes] = np.asarray(params["aux_b"], np.float32)
    bh[0, n_classes] = np.asarray(params["adv_b"], np.float32)[0]
    packed["wh"] = jnp.asarray(wh, jnp.bfloat16)
    packed["bh"] = jnp.asarray(bh, jnp.float32)
    return packed


# ---------------------------------------------------------------------------
# Discriminator forward (ACGAN): one pallas_call
# ---------------------------------------------------------------------------
@functools.partial(jax.jit, static_argnames=("n_classes",))
def discriminator_forward(packed, img, *, n_classes):
    """img: (N, C, H, W) float32, NCHW like the PyTorch module."""
    n, c, h, _ = img.shape
    # single NCHW -> (N*H, W*C) relayout of the input; bf16 MXU operands onward
    x = img.astype(jnp.bfloat16).transpose(0, 2, 3, 1).reshape(n * h, -1)

    block_dims = []
    flat_in = [x]
    for blk in packed["blocks"]:
        m = blk["s"].shape[0] // 3
        wo = blk["g"].shape[0] // blk["g"].shape[1]
        block_dims.append((m, wo))
        flat_in.extend([blk["s"], blk["b"], blk["g"], blk["gt"],
                        blk["gamma"], blk["beta"]])
    flat_in.extend([packed["wh"], packed["bh"]])
    assert block_dims[0][0] == n * (h // 2), "packed params / input shape mismatch"

    kernel = functools.partial(_fused_disc_kernel, tuple(block_dims), n_classes)
    validity, logp = pl.pallas_call(
        kernel,
        out_shape=(jax.ShapeDtypeStruct((n, 1), jnp.float32),
                   jax.ShapeDtypeStruct((n, n_classes), jnp.float32)),
        in_specs=[_VMEM] * len(flat_in),
        out_specs=(_VMEM, _VMEM),
        compiler_params=_CPARAMS,
    )(*flat_in)
    return validity, logp


if __name__ == "__main__":
    key = jax.random.PRNGKey(0)
    k_param, k_img = jax.random.split(key)

    batch, in_channels, img_size, n_classes = 2, 3, 64, 10
    params = init_params(k_param, in_channels, img_size, n_classes)
    packed = pack_params(params, in_channels, img_size, n_classes, batch)
    img = jax.random.normal(k_img, (batch, in_channels, img_size, img_size),
                            jnp.float32)

    validity, label = discriminator_forward(packed, img, n_classes=n_classes)
    jax.block_until_ready((validity, label))

    assert validity.shape == (batch, 1)
    assert label.shape == (batch, n_classes)
    assert bool(jnp.all(jnp.isfinite(validity)))
    assert bool(jnp.all(jnp.isfinite(label)))
    # log-softmax rows must sum (in prob space) to ~1
    assert jnp.allclose(jnp.sum(jnp.exp(label), axis=1), 1.0, atol=1e-3)
    print("KERNEL_OK")
</pallas_src>

<mosaic_0001>
module attributes {stable_mosaic.version = 11 : i64} {
  func.func @_fused_disc_kernel(%arg0: memref<128x192xbf16, #tpu.memory_space<vmem>>, %arg1: memref<192x128xbf16, #tpu.memory_space<vmem>>, %arg2: memref<3x192x256xbf16, #tpu.memory_space<vmem>>, %arg3: memref<256x8xf32, #tpu.memory_space<vmem>>, %arg4: memref<8x256xf32, #tpu.memory_space<vmem>>, %arg5: memref<1x8xf32, #tpu.memory_space<vmem>>, %arg6: memref<1x8xf32, #tpu.memory_space<vmem>>, %arg7: memref<96x64xbf16, #tpu.memory_space<vmem>>, %arg8: memref<3x256x256xbf16, #tpu.memory_space<vmem>>, %arg9: memref<256x16xf32, #tpu.memory_space<vmem>>, %arg10: memref<16x256xf32, #tpu.memory_space<vmem>>, %arg11: memref<1x16xf32, #tpu.memory_space<vmem>>, %arg12: memref<1x16xf32, #tpu.memory_space<vmem>>, %arg13: memref<48x32xbf16, #tpu.memory_space<vmem>>, %arg14: memref<3x256x256xbf16, #tpu.memory_space<vmem>>, %arg15: memref<256x32xf32, #tpu.memory_space<vmem>>, %arg16: memref<32x256xf32, #tpu.memory_space<vmem>>, %arg17: memref<1x32xf32, #tpu.memory_space<vmem>>, %arg18: memref<1x32xf32, #tpu.memory_space<vmem>>, %arg19: memref<24x16xbf16, #tpu.memory_space<vmem>>, %arg20: memref<3x256x256xbf16, #tpu.memory_space<vmem>>, %arg21: memref<256x64xf32, #tpu.memory_space<vmem>>, %arg22: memref<64x256xf32, #tpu.memory_space<vmem>>, %arg23: memref<1x64xf32, #tpu.memory_space<vmem>>, %arg24: memref<1x64xf32, #tpu.memory_space<vmem>>, %arg25: memref<12x8xbf16, #tpu.memory_space<vmem>>, %arg26: memref<3x256x256xbf16, #tpu.memory_space<vmem>>, %arg27: memref<256x128xf32, #tpu.memory_space<vmem>>, %arg28: memref<128x256xf32, #tpu.memory_space<vmem>>, %arg29: memref<1x128xf32, #tpu.memory_space<vmem>>, %arg30: memref<1x128xf32, #tpu.memory_space<vmem>>, %arg31: memref<6x4xbf16, #tpu.memory_space<vmem>>, %arg32: memref<3x256x128xbf16, #tpu.memory_space<vmem>>, %arg33: memref<128x128xf32, #tpu.memory_space<vmem>>, %arg34: memref<128x128xf32, #tpu.memory_space<vmem>>, %arg35: memref<1x128xf32, #tpu.memory_space<vmem>>, %arg36: memref<1x128xf32, #tpu.memory_space<vmem>>, %arg37: memref<128x128xbf16, #tpu.memory_space<vmem>>, %arg38: memref<1x128xf32, #tpu.memory_space<vmem>>, %arg39: memref<2x1xf32, #tpu.memory_space<vmem>>, %arg40: memref<2x10xf32, #tpu.memory_space<vmem>>) attributes {dimension_semantics = [], scalar_prefetch = 0 : i64, scratch_operands = 0 : i64, tpu.core_type = #tpu.core_type<tc>} {
    %c0 = arith.constant 0 : index
    %c0_0 = arith.constant 0 : index
    %0 = vector.load %arg0[%c0, %c0_0] : memref<128x192xbf16, #tpu.memory_space<vmem>>, vector<128x192xbf16>
    %c0_1 = arith.constant 0 : index
    %c0_2 = arith.constant 0 : index
    %1 = vector.load %arg1[%c0_1, %c0_2] : memref<192x128xbf16, #tpu.memory_space<vmem>>, vector<192x128xbf16>
    %cst = arith.constant dense<0.000000e+00> : vector<192x192xf32>
    %2 = tpu.matmul %1, %0, %cst {dimension_numbers = #tpu.dot_dimension_numbers<[1], [0], [0], [1], [0, 0, 1, 1], [], []>} : vector<192x128xbf16>, vector<128x192xbf16>, vector<192x192xf32> -> vector<192x192xf32>
    %3 = arith.truncf %2 : vector<192x192xf32> to vector<192x192xbf16>
    %4 = vector.extract_strided_slice %3 {offsets = [0, 0], sizes = [64, 192], strides = [1, 1]} : vector<192x192xbf16> to vector<64x192xbf16>
    %c0_3 = arith.constant 0 : index
    %c0_4 = arith.constant 0 : index
    %c0_5 = arith.constant 0 : index
    %5 = vector.load %arg2[%c0_3, %c0_4, %c0_5] : memref<3x192x256xbf16, #tpu.memory_space<vmem>>, vector<1x192x256xbf16>
    %6 = vector.shape_cast %5 : vector<1x192x256xbf16> to vector<192x256xbf16>
    %cst_6 = arith.constant dense<0.000000e+00> : vector<64x256xf32>
    %7 = tpu.matmul %4, %6, %cst_6 {dimension_numbers = #tpu.dot_dimension_numbers<[1], [0], [0], [1], [0, 0, 1, 1], [], []>} : vector<64x192xbf16>, vector<192x256xbf16>, vector<64x256xf32> -> vector<64x256xf32>
    %8 = vector.extract_strided_slice %3 {offsets = [64, 0], sizes = [64, 192], strides = [1, 1]} : vector<192x192xbf16> to vector<64x192xbf16>
    %c1 = arith.constant 1 : index
    %c0_7 = arith.constant 0 : index
    %c0_8 = arith.constant 0 : index
    %9 = vector.load %arg2[%c1, %c0_7, %c0_8] : memref<3x192x256xbf16, #tpu.memory_space<vmem>>, vector<1x192x256xbf16>
    %10 = vector.shape_cast %9 : vector<1x192x256xbf16> to vector<192x256xbf16>
    %cst_9 = arith.constant dense<0.000000e+00> : vector<64x256xf32>
    %11 = tpu.matmul %8, %10, %cst_9 {dimension_numbers = #tpu.dot_dimension_numbers<[1], [0], [0], [1], [0, 0, 1, 1], [], []>} : vector<64x192xbf16>, vector<192x256xbf16>, vector<64x256xf32> -> vector<64x256xf32>
    %12 = arith.addf %7, %11 : vector<64x256xf32>
    %13 = vector.extract_strided_slice %3 {offsets = [128, 0], sizes = [64, 192], strides = [1, 1]} : vector<192x192xbf16> to vector<64x192xbf16>
    %c2 = arith.constant 2 : index
    %c0_10 = arith.constant 0 : index
    %c0_11 = arith.constant 0 : index
    %14 = vector.load %arg2[%c2, %c0_10, %c0_11] : memref<3x192x256xbf16, #tpu.memory_space<vmem>>, vector<1x192x256xbf16>
    %15 = vector.shape_cast %14 : vector<1x192x256xbf16> to vector<192x256xbf16>
    %cst_12 = arith.constant dense<0.000000e+00> : vector<64x256xf32>
    %16 = tpu.matmul %13, %15, %cst_12 {dimension_numbers = #tpu.dot_dimension_numbers<[1], [0], [0], [1], [0, 0, 1, 1], [], []>} : vector<64x192xbf16>, vector<192x256xbf16>, vector<64x256xf32> -> vector<64x256xf32>
    %17 = arith.addf %12, %16 : vector<64x256xf32>
    %cst_13 = arith.constant dense<0.000000e+00> : vector<256xf32>
    %18 = vector.multi_reduction <add>, %17, %cst_13 [0] : vector<64x256xf32> to vector<256xf32>
    %19 = vector.shape_cast %18 : vector<256xf32> to vector<1x256xf32>
    %20 = arith.mulf %17, %17 : vector<64x256xf32>
    %cst_14 = arith.constant dense<0.000000e+00> : vector<256xf32>
    %21 = vector.multi_reduction <add>, %20, %cst_14 [0] : vector<64x256xf32> to vector<256xf32>
    %22 = vector.shape_cast %21 : vector<256xf32> to vector<1x256xf32>
    %c0_15 = arith.constant 0 : index
    %c0_16 = arith.constant 0 : index
    %23 = vector.load %arg3[%c0_15, %c0_16] : memref<256x8xf32, #tpu.memory_space<vmem>>, vector<256x8xf32>
    %cst_17 = arith.constant dense<0.000000e+00> : vector<1x8xf32>
    %24 = tpu.matmul %19, %23, %cst_17 {dimension_numbers = #tpu.dot_dimension_numbers<[1], [0], [0], [1], [0, 0, 1, 1], [], []>} : vector<1x256xf32>, vector<256x8xf32>, vector<1x8xf32> -> vector<1x8xf32>
    %c0_18 = arith.constant 0 : index
    %c0_19 = arith.constant 0 : index
    %25 = vector.load %arg3[%c0_18, %c0_19] : memref<256x8xf32, #tpu.memory_space<vmem>>, vector<256x8xf32>
    %cst_20 = arith.constant dense<0.000000e+00> : vector<1x8xf32>
    %26 = tpu.matmul %22, %25, %cst_20 {dimension_numbers = #tpu.dot_dimension_numbers<[1], [0], [0], [1], [0, 0, 1, 1], [], []>} : vector<1x256xf32>, vector<256x8xf32>, vector<1x8xf32> -> vector<1x8xf32>
    %cst_21 = arith.constant 4.8828125E-4 : f32
    %27 = vector.broadcast %cst_21 : f32 to vector<1x8xf32>
    %28 = arith.mulf %24, %27 : vector<1x8xf32>
    %cst_22 = arith.constant 4.8828125E-4 : f32
    %29 = vector.broadcast %cst_22 : f32 to vector<1x8xf32>
    %30 = arith.mulf %26, %29 : vector<1x8xf32>
    %31 = arith.mulf %28, %28 : vector<1x8xf32>
    %32 = arith.subf %30, %31 : vector<1x8xf32>
    %cst_23 = arith.constant 0.000000e+00 : f32
    %33 = vector.broadcast %cst_23 : f32 to vector<1x8xf32>
    %34 = arith.maximumf %32, %33 : vector<1x8xf32>
    %cst_24 = arith.constant 9.99999974E-6 : f32
    %35 = vector.broadcast %cst_24 : f32 to vector<1x8xf32>
    %36 = arith.addf %34, %35 : vector<1x8xf32>
    %37 = math.rsqrt %36 : vector<1x8xf32>
    %c0_25 = arith.constant 0 : index
    %c0_26 = arith.constant 0 : index
    %38 = vector.load %arg5[%c0_25, %c0_26] : memref<1x8xf32, #tpu.memory_space<vmem>>, vector<1x8xf32>
    %39 = arith.mulf %37, %38 : vector<1x8xf32>
    %c0_27 = arith.constant 0 : index
    %c0_28 = arith.constant 0 : index
    %40 = vector.load %arg6[%c0_27, %c0_28] : memref<1x8xf32, #tpu.memory_space<vmem>>, vector<1x8xf32>
    %41 = arith.mulf %28, %39 : vector<1x8xf32>
    %42 = arith.subf %40, %41 : vector<1x8xf32>
    %c0_29 = arith.constant 0 : index
    %c0_30 = arith.constant 0 : index
    %43 = vector.load %arg4[%c0_29, %c0_30] : memref<8x256xf32, #tpu.memory_space<vmem>>, vector<8x256xf32>
    %cst_31 = arith.constant dense<0.000000e+00> : vector<1x256xf32>
    %44 = tpu.matmul %39, %43, %cst_31 {dimension_numbers = #tpu.dot_dimension_numbers<[1], [0], [0], [1], [0, 0, 1, 1], [], []>} : vector<1x8xf32>, vector<8x256xf32>, vector<1x256xf32> -> vector<1x256xf32>
    %c0_32 = arith.constant 0 : index
    %c0_33 = arith.constant 0 : index
    %45 = vector.load %arg4[%c0_32, %c0_33] : memref<8x256xf32, #tpu.memory_space<vmem>>, vector<8x256xf32>
    %cst_34 = arith.constant dense<0.000000e+00> : vector<1x256xf32>
    %46 = tpu.matmul %42, %45, %cst_34 {dimension_numbers = #tpu.dot_dimension_numbers<[1], [0], [0], [1], [0, 0, 1, 1], [], []>} : vector<1x8xf32>, vector<8x256xf32>, vector<1x256xf32> -> vector<1x256xf32>
    %47 = vector.broadcast %44 : vector<1x256xf32> to vector<64x256xf32>
    %48 = arith.mulf %17, %47 : vector<64x256xf32>
    %49 = vector.broadcast %46 : vector<1x256xf32> to vector<64x256xf32>
    %50 = arith.addf %48, %49 : vector<64x256xf32>
    %cst_35 = arith.constant 0.000000e+00 : f32
    %51 = vector.broadcast %cst_35 : f32 to vector<64x256xf32>
    %52 = arith.cmpf ogt, %50, %51 : vector<64x256xf32>
    %cst_36 = arith.constant 2.000000e-01 : f32
    %53 = vector.broadcast %cst_36 : f32 to vector<64x256xf32>
    %54 = arith.mulf %53, %50 : vector<64x256xf32>
    %55 = arith.select %52, %50, %54 : vector<64x256xi1>, vector<64x256xf32>
    %56 = arith.truncf %55 : vector<64x256xf32> to vector<64x256xbf16>
    %c0_37 = arith.constant 0 : index
    %c0_38 = arith.constant 0 : index
    %57 = vector.load %arg7[%c0_37, %c0_38] : memref<96x64xbf16, #tpu.memory_space<vmem>>, vector<96x64xbf16>
    %cst_39 = arith.constant dense<0.000000e+00> : vector<96x256xf32>
    %58 = tpu.matmul %57, %56, %cst_39 {dimension_numbers = #tpu.dot_dimension_numbers<[1], [0], [0], [1], [0, 0, 1, 1], [], []>} : vector<96x64xbf16>, vector<64x256xbf16>, vector<96x256xf32> -> vector<96x256xf32>
    %59 = arith.truncf %58 : vector<96x256xf32> to vector<96x256xbf16>
    %60 = vector.extract_strided_slice %59 {offsets = [0, 0], sizes = [32, 256], strides = [1, 1]} : vector<96x256xbf16> to vector<32x256xbf16>
    %c0_40 = arith.constant 0 : index
    %c0_41 = arith.constant 0 : index
    %c0_42 = arith.constant 0 : index
    %61 = vector.load %arg8[%c0_40, %c0_41, %c0_42] : memref<3x256x256xbf16, #tpu.memory_space<vmem>>, vector<1x256x256xbf16>
    %62 = vector.shape_cast %61 : vector<1x256x256xbf16> to vector<256x256xbf16>
    %cst_43 = arith.constant dense<0.000000e+00> : vector<32x256xf32>
    %63 = tpu.matmul %60, %62, %cst_43 {dimension_numbers = #tpu.dot_dimension_numbers<[1], [0], [0], [1], [0, 0, 1, 1], [], []>} : vector<32x256xbf16>, vector<256x256xbf16>, vector<32x256xf32> -> vector<32x256xf32>
    %64 = vector.extract_strided_slice %59 {offsets = [32, 0], sizes = [32, 256], strides = [1, 1]} : vector<96x256xbf16> to vector<32x256xbf16>
    %c1_44 = arith.constant 1 : index
    %c0_45 = arith.constant 0 : index
    %c0_46 = arith.constant 0 : index
    %65 = vector.load %arg8[%c1_44, %c0_45, %c0_46] : memref<3x256x256xbf16, #tpu.memory_space<vmem>>, vector<1x256x256xbf16>
    %66 = vector.shape_cast %65 : vector<1x256x256xbf16> to vector<256x256xbf16>
    %cst_47 = arith.constant dense<0.000000e+00> : vector<32x256xf32>
    %67 = tpu.matmul %64, %66, %cst_47 {dimension_numbers = #tpu.dot_dimension_numbers<[1], [0], [0], [1], [0, 0, 1, 1], [], []>} : vector<32x256xbf16>, vector<256x256xbf16>, vector<32x256xf32> -> vector<32x256xf32>
    %68 = arith.addf %63, %67 : vector<32x256xf32>
    %69 = vector.extract_strided_slice %59 {offsets = [64, 0], sizes = [32, 256], strides = [1, 1]} : vector<96x256xbf16> to vector<32x256xbf16>
    %c2_48 = arith.constant 2 : index
    %c0_49 = arith.constant 0 : index
    %c0_50 = arith.constant 0 : index
    %70 = vector.load %arg8[%c2_48, %c0_49, %c0_50] : memref<3x256x256xbf16, #tpu.memory_space<vmem>>, vector<1x256x256xbf16>
    %71 = vector.shape_cast %70 : vector<1x256x256xbf16> to vector<256x256xbf16>
    %cst_51 = arith.constant dense<0.000000e+00> : vector<32x256xf32>
    %72 = tpu.matmul %69, %71, %cst_51 {dimension_numbers = #tpu.dot_dimension_numbers<[1], [0], [0], [1], [0, 0, 1, 1], [], []>} : vector<32x256xbf16>, vector<256x256xbf16>, vector<32x256xf32> -> vector<32x256xf32>
    %73 = arith.addf %68, %72 : vector<32x256xf32>
    %cst_52 = arith.constant dense<0.000000e+00> : vector<256xf32>
    %74 = vector.multi_reduction <add>, %73, %cst_52 [0] : vector<32x256xf32> to vector<256xf32>
    %75 = vector.shape_cast %74 : vector<256xf32> to vector<1x256xf32>
    %76 = arith.mulf %73, %73 : vector<32x256xf32>
    %cst_53 = arith.constant dense<0.000000e+00> : vector<256xf32>
    %77 = vector.multi_reduction <add>, %76, %cst_53 [0] : vector<32x256xf32> to vector<256xf32>
    %78 = vector.shape_cast %77 : vector<256xf32> to vector<1x256xf32>
    %c0_54 = arith.constant 0 : index
    %c0_55 = arith.constant 0 : index
    %79 = vector.load %arg9[%c0_54, %c0_55] : memref<256x16xf32, #tpu.memory_space<vmem>>, vector<256x16xf32>
    %cst_56 = arith.constant dense<0.000000e+00> : vector<1x16xf32>
    %80 = tpu.matmul %75, %79, %cst_56 {dimension_numbers = #tpu.dot_dimension_numbers<[1], [0], [0], [1], [0, 0, 1, 1], [], []>} : vector<1x256xf32>, vector<256x16xf32>, vector<1x16xf32> -> vector<1x16xf32>
    %c0_57 = arith.constant 0 : index
    %c0_58 = arith.constant 0 : index
    %81 = vector.load %arg9[%c0_57, %c0_58] : memref<256x16xf32, #tpu.memory_space<vmem>>, vector<256x16xf32>
    %cst_59 = arith.constant dense<0.000000e+00> : vector<1x16xf32>
    %82 = tpu.matmul %78, %81, %cst_59 {dimension_numbers = #tpu.dot_dimension_numbers<[1], [0], [0], [1], [0, 0, 1, 1], [], []>} : vector<1x256xf32>, vector<256x16xf32>, vector<1x16xf32> -> vector<1x16xf32>
    %cst_60 = arith.constant 0.001953125 : f32
    %83 = vector.broadcast %cst_60 : f32 to vector<1x16xf32>
    %84 = arith.mulf %80, %83 : vector<1x16xf32>
    %cst_61 = arith.constant 0.001953125 : f32
    %85 = vector.broadcast %cst_61 : f32 to vector<1x16xf32>
    %86 = arith.mulf %82, %85 : vector<1x16xf32>
    %87 = arith.mulf %84, %84 : vector<1x16xf32>
    %88 = arith.subf %86, %87 : vector<1x16xf32>
    %cst_62 = arith.constant 0.000000e+00 : f32
    %89 = vector.broadcast %cst_62 : f32 to vector<1x16xf32>
    %90 = arith.maximumf %88, %89 : vector<1x16xf32>
    %cst_63 = arith.constant 9.99999974E-6 : f32
    %91 = vector.broadcast %cst_63 : f32 to vector<1x16xf32>
    %92 = arith.addf %90, %91 : vector<1x16xf32>
    %93 = math.rsqrt %92 : vector<1x16xf32>
    %c0_64 = arith.constant 0 : index
    %c0_65 = arith.constant 0 : index
    %94 = vector.load %arg11[%c0_64, %c0_65] : memref<1x16xf32, #tpu.memory_space<vmem>>, vector<1x16xf32>
    %95 = arith.mulf %93, %94 : vector<1x16xf32>
    %c0_66 = arith.constant 0 : index
    %c0_67 = arith.constant 0 : index
    %96 = vector.load %arg12[%c0_66, %c0_67] : memref<1x16xf32, #tpu.memory_space<vmem>>, vector<1x16xf32>
    %97 = arith.mulf %84, %95 : vector<1x16xf32>
    %98 = arith.subf %96, %97 : vector<1x16xf32>
    %c0_68 = arith.constant 0 : index
    %c0_69 = arith.constant 0 : index
    %99 = vector.load %arg10[%c0_68, %c0_69] : memref<16x256xf32, #tpu.memory_space<vmem>>, vector<16x256xf32>
    %cst_70 = arith.constant dense<0.000000e+00> : vector<1x256xf32>
    %100 = tpu.matmul %95, %99, %cst_70 {dimension_numbers = #tpu.dot_dimension_numbers<[1], [0], [0], [1], [0, 0, 1, 1], [], []>} : vector<1x16xf32>, vector<16x256xf32>, vector<1x256xf32> -> vector<1x256xf32>
    %c0_71 = arith.constant 0 : index
    %c0_72 = arith.constant 0 : index
    %101 = vector.load %arg10[%c0_71, %c0_72] : memref<16x256xf32, #tpu.memory_space<vmem>>, vector<16x256xf32>
    %cst_73 = arith.constant dense<0.000000e+00> : vector<1x256xf32>
    %102 = tpu.matmul %98, %101, %cst_73 {dimension_numbers = #tpu.dot_dimension_numbers<[1], [0], [0], [1], [0, 0, 1, 1], [], []>} : vector<1x16xf32>, vector<16x256xf32>, vector<1x256xf32> -> vector<1x256xf32>
    %103 = vector.broadcast %100 : vector<1x256xf32> to vector<32x256xf32>
    %104 = arith.mulf %73, %103 : vector<32x256xf32>
    %105 = vector.broadcast %102 : vector<1x256xf32> to vector<32x256xf32>
    %106 = arith.addf %104, %105 : vector<32x256xf32>
    %cst_74 = arith.constant 0.000000e+00 : f32
    %107 = vector.broadcast %cst_74 : f32 to vector<32x256xf32>
    %108 = arith.cmpf ogt, %106, %107 : vector<32x256xf32>
    %cst_75 = arith.constant 2.000000e-01 : f32
    %109 = vector.broadcast %cst_75 : f32 to vector<32x256xf32>
    %110 = arith.mulf %109, %106 : vector<32x256xf32>
    %111 = arith.select %108, %106, %110 : vector<32x256xi1>, vector<32x256xf32>
    %112 = arith.truncf %111 : vector<32x256xf32> to vector<32x256xbf16>
    %c0_76 = arith.constant 0 : index
    %c0_77 = arith.constant 0 : index
    %113 = vector.load %arg13[%c0_76, %c0_77] : memref<48x32xbf16, #tpu.memory_space<vmem>>, vector<48x32xbf16>
    %cst_78 = arith.constant dense<0.000000e+00> : vector<48x256xf32>
    %114 = tpu.matmul %113, %112, %cst_78 {dimension_numbers = #tpu.dot_dimension_numbers<[1], [0], [0], [1], [0, 0, 1, 1], [], []>} : vector<48x32xbf16>, vector<32x256xbf16>, vector<48x256xf32> -> vector<48x256xf32>
    %115 = arith.truncf %114 : vector<48x256xf32> to vector<48x256xbf16>
    %116 = vector.extract_strided_slice %115 {offsets = [0, 0], sizes = [16, 256], strides = [1, 1]} : vector<48x256xbf16> to vector<16x256xbf16>
    %c0_79 = arith.constant 0 : index
    %c0_80 = arith.constant 0 : index
    %c0_81 = arith.constant 0 : index
    %117 = vector.load %arg14[%c0_79, %c0_80, %c0_81] : memref<3x256x256xbf16, #tpu.memory_space<vmem>>, vector<1x256x256xbf16>
    %118 = vector.shape_cast %117 : vector<1x256x256xbf16> to vector<256x256xbf16>
    %cst_82 = arith.constant dense<0.000000e+00> : vector<16x256xf32>
    %119 = tpu.matmul %116, %118, %cst_82 {dimension_numbers = #tpu.dot_dimension_numbers<[1], [0], [0], [1], [0, 0, 1, 1], [], []>} : vector<16x256xbf16>, vector<256x256xbf16>, vector<16x256xf32> -> vector<16x256xf32>
    %120 = vector.extract_strided_slice %115 {offsets = [16, 0], sizes = [16, 256], strides = [1, 1]} : vector<48x256xbf16> to vector<16x256xbf16>
    %c1_83 = arith.constant 1 : index
    %c0_84 = arith.constant 0 : index
    %c0_85 = arith.constant 0 : index
    %121 = vector.load %arg14[%c1_83, %c0_84, %c0_85] : memref<3x256x256xbf16, #tpu.memory_space<vmem>>, vector<1x256x256xbf16>
    %122 = vector.shape_cast %121 : vector<1x256x256xbf16> to vector<256x256xbf16>
    %cst_86 = arith.constant dense<0.000000e+00> : vector<16x256xf32>
    %123 = tpu.matmul %120, %122, %cst_86 {dimension_numbers = #tpu.dot_dimension_numbers<[1], [0], [0], [1], [0, 0, 1, 1], [], []>} : vector<16x256xbf16>, vector<256x256xbf16>, vector<16x256xf32> -> vector<16x256xf32>
    %124 = arith.addf %119, %123 : vector<16x256xf32>
    %125 = vector.extract_strided_slice %115 {offsets = [32, 0], sizes = [16, 256], strides = [1, 1]} : vector<48x256xbf16> to vector<16x256xbf16>
    %c2_87 = arith.constant 2 : index
    %c0_88 = arith.constant 0 : index
    %c0_89 = arith.constant 0 : index
    %126 = vector.load %arg14[%c2_87, %c0_88, %c0_89] : memref<3x256x256xbf16, #tpu.memory_space<vmem>>, vector<1x256x256xbf16>
    %127 = vector.shape_cast %126 : vector<1x256x256xbf16> to vector<256x256xbf16>
    %cst_90 = arith.constant dense<0.000000e+00> : vector<16x256xf32>
    %128 = tpu.matmul %125, %127, %cst_90 {dimension_numbers = #tpu.dot_dimension_numbers<[1], [0], [0], [1], [0, 0, 1, 1], [], []>} : vector<16x256xbf16>, vector<256x256xbf16>, vector<16x256xf32> -> vector<16x256xf32>
    %129 = arith.addf %124, %128 : vector<16x256xf32>
    %cst_91 = arith.constant dense<0.000000e+00> : vector<256xf32>
    %130 = vector.multi_reduction <add>, %129, %cst_91 [0] : vector<16x256xf32> to vector<256xf32>
    %131 = vector.shape_cast %130 : vector<256xf32> to vector<1x256xf32>
    %132 = arith.mulf %129, %129 : vector<16x256xf32>
    %cst_92 = arith.constant dense<0.000000e+00> : vector<256xf32>
    %133 = vector.multi_reduction <add>, %132, %cst_92 [0] : vector<16x256xf32> to vector<256xf32>
    %134 = vector.shape_cast %133 : vector<256xf32> to vector<1x256xf32>
    %c0_93 = arith.constant 0 : index
    %c0_94 = arith.constant 0 : index
    %135 = vector.load %arg15[%c0_93, %c0_94] : memref<256x32xf32, #tpu.memory_space<vmem>>, vector<256x32xf32>
    %cst_95 = arith.constant dense<0.000000e+00> : vector<1x32xf32>
    %136 = tpu.matmul %131, %135, %cst_95 {dimension_numbers = #tpu.dot_dimension_numbers<[1], [0], [0], [1], [0, 0, 1, 1], [], []>} : vector<1x256xf32>, vector<256x32xf32>, vector<1x32xf32> -> vector<1x32xf32>
    %c0_96 = arith.constant 0 : index
    %c0_97 = arith.constant 0 : index
    %137 = vector.load %arg15[%c0_96, %c0_97] : memref<256x32xf32, #tpu.memory_space<vmem>>, vector<256x32xf32>
    %cst_98 = arith.constant dense<0.000000e+00> : vector<1x32xf32>
    %138 = tpu.matmul %134, %137, %cst_98 {dimension_numbers = #tpu.dot_dimension_numbers<[1], [0], [0], [1], [0, 0, 1, 1], [], []>} : vector<1x256xf32>, vector<256x32xf32>, vector<1x32xf32> -> vector<1x32xf32>
    %cst_99 = arith.constant 7.812500e-03 : f32
    %139 = vector.broadcast %cst_99 : f32 to vector<1x32xf32>
    %140 = arith.mulf %136, %139 : vector<1x32xf32>
    %cst_100 = arith.constant 7.812500e-03 : f32
    %141 = vector.broadcast %cst_100 : f32 to vector<1x32xf32>
    %142 = arith.mulf %138, %141 : vector<1x32xf32>
    %143 = arith.mulf %140, %140 : vector<1x32xf32>
    %144 = arith.subf %142, %143 : vector<1x32xf32>
    %cst_101 = arith.constant 0.000000e+00 : f32
    %145 = vector.broadcast %cst_101 : f32 to vector<1x32xf32>
    %146 = arith.maximumf %144, %145 : vector<1x32xf32>
    %cst_102 = arith.constant 9.99999974E-6 : f32
    %147 = vector.broadcast %cst_102 : f32 to vector<1x32xf32>
    %148 = arith.addf %146, %147 : vector<1x32xf32>
    %149 = math.rsqrt %148 : vector<1x32xf32>
    %c0_103 = arith.constant 0 : index
    %c0_104 = arith.constant 0 : index
    %150 = vector.load %arg17[%c0_103, %c0_104] : memref<1x32xf32, #tpu.memory_space<vmem>>, vector<1x32xf32>
    %151 = arith.mulf %149, %150 : vector<1x32xf32>
    %c0_105 = arith.constant 0 : index
    %c0_106 = arith.constant 0 : index
    %152 = vector.load %arg18[%c0_105, %c0_106] : memref<1x32xf32, #tpu.memory_space<vmem>>, vector<1x32xf32>
    %153 = arith.mulf %140, %151 : vector<1x32xf32>
    %154 = arith.subf %152, %153 : vector<1x32xf32>
    %c0_107 = arith.constant 0 : index
    %c0_108 = arith.constant 0 : index
    %155 = vector.load %arg16[%c0_107, %c0_108] : memref<32x256xf32, #tpu.memory_space<vmem>>, vector<32x256xf32>
    %cst_109 = arith.constant dense<0.000000e+00> : vector<1x256xf32>
    %156 = tpu.matmul %151, %155, %cst_109 {dimension_numbers = #tpu.dot_dimension_numbers<[1], [0], [0], [1], [0, 0, 1, 1], [], []>} : vector<1x32xf32>, vector<32x256xf32>, vector<1x256xf32> -> vector<1x256xf32>
    %c0_110 = arith.constant 0 : index
    %c0_111 = arith.constant 0 : index
    %157 = vector.load %arg16[%c0_110, %c0_111] : memref<32x256xf32, #tpu.memory_space<vmem>>, vector<32x256xf32>
    %cst_112 = arith.constant dense<0.000000e+00> : vector<1x256xf32>
    %158 = tpu.matmul %154, %157, %cst_112 {dimension_numbers = #tpu.dot_dimension_numbers<[1], [0], [0], [1], [0, 0, 1, 1], [], []>} : vector<1x32xf32>, vector<32x256xf32>, vector<1x256xf32> -> vector<1x256xf32>
    %159 = vector.broadcast %156 : vector<1x256xf32> to vector<16x256xf32>
    %160 = arith.mulf %129, %159 : vector<16x256xf32>
    %161 = vector.broadcast %158 : vector<1x256xf32> to vector<16x256xf32>
    %162 = arith.addf %160, %161 : vector<16x256xf32>
    %cst_113 = arith.constant 0.000000e+00 : f32
    %163 = vector.broadcast %cst_113 : f32 to vector<16x256xf32>
    %164 = arith.cmpf ogt, %162, %163 : vector<16x256xf32>
    %cst_114 = arith.constant 2.000000e-01 : f32
    %165 = vector.broadcast %cst_114 : f32 to vector<16x256xf32>
    %166 = arith.mulf %165, %162 : vector<16x256xf32>
    %167 = arith.select %164, %162, %166 : vector<16x256xi1>, vector<16x256xf32>
    %168 = arith.truncf %167 : vector<16x256xf32> to vector<16x256xbf16>
    %c0_115 = arith.constant 0 : index
    %c0_116 = arith.constant 0 : index
    %169 = vector.load %arg19[%c0_115, %c0_116] : memref<24x16xbf16, #tpu.memory_space<vmem>>, vector<24x16xbf16>
    %cst_117 = arith.constant dense<0.000000e+00> : vector<24x256xf32>
    %170 = tpu.matmul %169, %168, %cst_117 {dimension_numbers = #tpu.dot_dimension_numbers<[1], [0], [0], [1], [0, 0, 1, 1], [], []>} : vector<24x16xbf16>, vector<16x256xbf16>, vector<24x256xf32> -> vector<24x256xf32>
    %171 = arith.truncf %170 : vector<24x256xf32> to vector<24x256xbf16>
    %172 = vector.extract_strided_slice %171 {offsets = [0, 0], sizes = [8, 256], strides = [1, 1]} : vector<24x256xbf16> to vector<8x256xbf16>
    %c0_118 = arith.constant 0 : index
    %c0_119 = arith.constant 0 : index
    %c0_120 = arith.constant 0 : index
    %173 = vector.load %arg20[%c0_118, %c0_119, %c0_120] : memref<3x256x256xbf16, #tpu.memory_space<vmem>>, vector<1x256x256xbf16>
    %174 = vector.shape_cast %173 : vector<1x256x256xbf16> to vector<256x256xbf16>
    %cst_121 = arith.constant dense<0.000000e+00> : vector<8x256xf32>
    %175 = tpu.matmul %172, %174, %cst_121 {dimension_numbers = #tpu.dot_dimension_numbers<[1], [0], [0], [1], [0, 0, 1, 1], [], []>} : vector<8x256xbf16>, vector<256x256xbf16>, vector<8x256xf32> -> vector<8x256xf32>
    %176 = vector.extract_strided_slice %171 {offsets = [8, 0], sizes = [8, 256], strides = [1, 1]} : vector<24x256xbf16> to vector<8x256xbf16>
    %c1_122 = arith.constant 1 : index
    %c0_123 = arith.constant 0 : index
    %c0_124 = arith.constant 0 : index
    %177 = vector.load %arg20[%c1_122, %c0_123, %c0_124] : memref<3x256x256xbf16, #tpu.memory_space<vmem>>, vector<1x256x256xbf16>
    %178 = vector.shape_cast %177 : vector<1x256x256xbf16> to vector<256x256xbf16>
    %cst_125 = arith.constant dense<0.000000e+00> : vector<8x256xf32>
    %179 = tpu.matmul %176, %178, %cst_125 {dimension_numbers = #tpu.dot_dimension_numbers<[1], [0], [0], [1], [0, 0, 1, 1], [], []>} : vector<8x256xbf16>, vector<256x256xbf16>, vector<8x256xf32> -> vector<8x256xf32>
    %180 = arith.addf %175, %179 : vector<8x256xf32>
    %181 = vector.extract_strided_slice %171 {offsets = [16, 0], sizes = [8, 256], strides = [1, 1]} : vector<24x256xbf16> to vector<8x256xbf16>
    %c2_126 = arith.constant 2 : index
    %c0_127 = arith.constant 0 : index
    %c0_128 = arith.constant 0 : index
    %182 = vector.load %arg20[%c2_126, %c0_127, %c0_128] : memref<3x256x256xbf16, #tpu.memory_space<vmem>>, vector<1x256x256xbf16>
    %183 = vector.shape_cast %182 : vector<1x256x256xbf16> to vector<256x256xbf16>
    %cst_129 = arith.constant dense<0.000000e+00> : vector<8x256xf32>
    %184 = tpu.matmul %181, %183, %cst_129 {dimension_numbers = #tpu.dot_dimension_numbers<[1], [0], [0], [1], [0, 0, 1, 1], [], []>} : vector<8x256xbf16>, vector<256x256xbf16>, vector<8x256xf32> -> vector<8x256xf32>
    %185 = arith.addf %180, %184 : vector<8x256xf32>
    %cst_130 = arith.constant dense<0.000000e+00> : vector<256xf32>
    %186 = vector.multi_reduction <add>, %185, %cst_130 [0] : vector<8x256xf32> to vector<256xf32>
    %187 = vector.shape_cast %186 : vector<256xf32> to vector<1x256xf32>
    %188 = arith.mulf %185, %185 : vector<8x256xf32>
    %cst_131 = arith.constant dense<0.000000e+00> : vector<256xf32>
    %189 = vector.multi_reduction <add>, %188, %cst_131 [0] : vector<8x256xf32> to vector<256xf32>
    %190 = vector.shape_cast %189 : vector<256xf32> to vector<1x256xf32>
    %c0_132 = arith.constant 0 : index
    %c0_133 = arith.constant 0 : index
    %191 = vector.load %arg21[%c0_132, %c0_133] : memref<256x64xf32, #tpu.memory_space<vmem>>, vector<256x64xf32>
    %cst_134 = arith.constant dense<0.000000e+00> : vector<1x64xf32>
    %192 = tpu.matmul %187, %191, %cst_134 {dimension_numbers = #tpu.dot_dimension_numbers<[1], [0], [0], [1], [0, 0, 1, 1], [], []>} : vector<1x256xf32>, vector<256x64xf32>, vector<1x64xf32> -> vector<1x64xf32>
    %c0_135 = arith.constant 0 : index
    %c0_136 = arith.constant 0 : index
    %193 = vector.load %arg21[%c0_135, %c0_136] : memref<256x64xf32, #tpu.memory_space<vmem>>, vector<256x64xf32>
    %cst_137 = arith.constant dense<0.000000e+00> : vector<1x64xf32>
    %194 = tpu.matmul %190, %193, %cst_137 {dimension_numbers = #tpu.dot_dimension_numbers<[1], [0], [0], [1], [0, 0, 1, 1], [], []>} : vector<1x256xf32>, vector<256x64xf32>, vector<1x64xf32> -> vector<1x64xf32>
    %cst_138 = arith.constant 3.125000e-02 : f32
    %195 = vector.broadcast %cst_138 : f32 to vector<1x64xf32>
    %196 = arith.mulf %192, %195 : vector<1x64xf32>
    %cst_139 = arith.constant 3.125000e-02 : f32
    %197 = vector.broadcast %cst_139 : f32 to vector<1x64xf32>
    %198 = arith.mulf %194, %197 : vector<1x64xf32>
    %199 = arith.mulf %196, %196 : vector<1x64xf32>
    %200 = arith.subf %198, %199 : vector<1x64xf32>
    %cst_140 = arith.constant 0.000000e+00 : f32
    %201 = vector.broadcast %cst_140 : f32 to vector<1x64xf32>
    %202 = arith.maximumf %200, %201 : vector<1x64xf32>
    %cst_141 = arith.constant 9.99999974E-6 : f32
    %203 = vector.broadcast %cst_141 : f32 to vector<1x64xf32>
    %204 = arith.addf %202, %203 : vector<1x64xf32>
    %205 = math.rsqrt %204 : vector<1x64xf32>
    %c0_142 = arith.constant 0 : index
    %c0_143 = arith.constant 0 : index
    %206 = vector.load %arg23[%c0_142, %c0_143] : memref<1x64xf32, #tpu.memory_space<vmem>>, vector<1x64xf32>
    %207 = arith.mulf %205, %206 : vector<1x64xf32>
    %c0_144 = arith.constant 0 : index
    %c0_145 = arith.constant 0 : index
    %208 = vector.load %arg24[%c0_144, %c0_145] : memref<1x64xf32, #tpu.memory_space<vmem>>, vector<1x64xf32>
    %209 = arith.mulf %196, %207 : vector<1x64xf32>
    %210 = arith.subf %208, %209 : vector<1x64xf32>
    %c0_146 = arith.constant 0 : index
    %c0_147 = arith.constant 0 : index
    %211 = vector.load %arg22[%c0_146, %c0_147] : memref<64x256xf32, #tpu.memory_space<vmem>>, vector<64x256xf32>
    %cst_148 = arith.constant dense<0.000000e+00> : vector<1x256xf32>
    %212 = tpu.matmul %207, %211, %cst_148 {dimension_numbers = #tpu.dot_dimension_numbers<[1], [0], [0], [1], [0, 0, 1, 1], [], []>} : vector<1x64xf32>, vector<64x256xf32>, vector<1x256xf32> -> vector<1x256xf32>
    %c0_149 = arith.constant 0 : index
    %c0_150 = arith.constant 0 : index
    %213 = vector.load %arg22[%c0_149, %c0_150] : memref<64x256xf32, #tpu.memory_space<vmem>>, vector<64x256xf32>
    %cst_151 = arith.constant dense<0.000000e+00> : vector<1x256xf32>
    %214 = tpu.matmul %210, %213, %cst_151 {dimension_numbers = #tpu.dot_dimension_numbers<[1], [0], [0], [1], [0, 0, 1, 1], [], []>} : vector<1x64xf32>, vector<64x256xf32>, vector<1x256xf32> -> vector<1x256xf32>
    %215 = vector.broadcast %212 : vector<1x256xf32> to vector<8x256xf32>
    %216 = arith.mulf %185, %215 : vector<8x256xf32>
    %217 = vector.broadcast %214 : vector<1x256xf32> to vector<8x256xf32>
    %218 = arith.addf %216, %217 : vector<8x256xf32>
    %cst_152 = arith.constant 0.000000e+00 : f32
    %219 = vector.broadcast %cst_152 : f32 to vector<8x256xf32>
    %220 = arith.cmpf ogt, %218, %219 : vector<8x256xf32>
    %cst_153 = arith.constant 2.000000e-01 : f32
    %221 = vector.broadcast %cst_153 : f32 to vector<8x256xf32>
    %222 = arith.mulf %221, %218 : vector<8x256xf32>
    %223 = arith.select %220, %218, %222 : vector<8x256xi1>, vector<8x256xf32>
    %224 = arith.truncf %223 : vector<8x256xf32> to vector<8x256xbf16>
    %c0_154 = arith.constant 0 : index
    %c0_155 = arith.constant 0 : index
    %225 = vector.load %arg25[%c0_154, %c0_155] : memref<12x8xbf16, #tpu.memory_space<vmem>>, vector<12x8xbf16>
    %cst_156 = arith.constant dense<0.000000e+00> : vector<12x256xf32>
    %226 = tpu.matmul %225, %224, %cst_156 {dimension_numbers = #tpu.dot_dimension_numbers<[1], [0], [0], [1], [0, 0, 1, 1], [], []>} : vector<12x8xbf16>, vector<8x256xbf16>, vector<12x256xf32> -> vector<12x256xf32>
    %227 = arith.truncf %226 : vector<12x256xf32> to vector<12x256xbf16>
    %228 = vector.extract_strided_slice %227 {offsets = [0, 0], sizes = [4, 256], strides = [1, 1]} : vector<12x256xbf16> to vector<4x256xbf16>
    %c0_157 = arith.constant 0 : index
    %c0_158 = arith.constant 0 : index
    %c0_159 = arith.constant 0 : index
    %229 = vector.load %arg26[%c0_157, %c0_158, %c0_159] : memref<3x256x256xbf16, #tpu.memory_space<vmem>>, vector<1x256x256xbf16>
    %230 = vector.shape_cast %229 : vector<1x256x256xbf16> to vector<256x256xbf16>
    %cst_160 = arith.constant dense<0.000000e+00> : vector<4x256xf32>
    %231 = tpu.matmul %228, %230, %cst_160 {dimension_numbers = #tpu.dot_dimension_numbers<[1], [0], [0], [1], [0, 0, 1, 1], [], []>} : vector<4x256xbf16>, vector<256x256xbf16>, vector<4x256xf32> -> vector<4x256xf32>
    %232 = vector.extract_strided_slice %227 {offsets = [4, 0], sizes = [4, 256], strides = [1, 1]} : vector<12x256xbf16> to vector<4x256xbf16>
    %c1_161 = arith.constant 1 : index
    %c0_162 = arith.constant 0 : index
    %c0_163 = arith.constant 0 : index
    %233 = vector.load %arg26[%c1_161, %c0_162, %c0_163] : memref<3x256x256xbf16, #tpu.memory_space<vmem>>, vector<1x256x256xbf16>
    %234 = vector.shape_cast %233 : vector<1x256x256xbf16> to vector<256x256xbf16>
    %cst_164 = arith.constant dense<0.000000e+00> : vector<4x256xf32>
    %235 = tpu.matmul %232, %234, %cst_164 {dimension_numbers = #tpu.dot_dimension_numbers<[1], [0], [0], [1], [0, 0, 1, 1], [], []>} : vector<4x256xbf16>, vector<256x256xbf16>, vector<4x256xf32> -> vector<4x256xf32>
    %236 = arith.addf %231, %235 : vector<4x256xf32>
    %237 = vector.extract_strided_slice %227 {offsets = [8, 0], sizes = [4, 256], strides = [1, 1]} : vector<12x256xbf16> to vector<4x256xbf16>
    %c2_165 = arith.constant 2 : index
    %c0_166 = arith.constant 0 : index
    %c0_167 = arith.constant 0 : index
    %238 = vector.load %arg26[%c2_165, %c0_166, %c0_167] : memref<3x256x256xbf16, #tpu.memory_space<vmem>>, vector<1x256x256xbf16>
    %239 = vector.shape_cast %238 : vector<1x256x256xbf16> to vector<256x256xbf16>
    %cst_168 = arith.constant dense<0.000000e+00> : vector<4x256xf32>
    %240 = tpu.matmul %237, %239, %cst_168 {dimension_numbers = #tpu.dot_dimension_numbers<[1], [0], [0], [1], [0, 0, 1, 1], [], []>} : vector<4x256xbf16>, vector<256x256xbf16>, vector<4x256xf32> -> vector<4x256xf32>
    %241 = arith.addf %236, %240 : vector<4x256xf32>
    %cst_169 = arith.constant dense<0.000000e+00> : vector<256xf32>
    %242 = vector.multi_reduction <add>, %241, %cst_169 [0] : vector<4x256xf32> to vector<256xf32>
    %243 = vector.shape_cast %242 : vector<256xf32> to vector<1x256xf32>
    %244 = arith.mulf %241, %241 : vector<4x256xf32>
    %cst_170 = arith.constant dense<0.000000e+00> : vector<256xf32>
    %245 = vector.multi_reduction <add>, %244, %cst_170 [0] : vector<4x256xf32> to vector<256xf32>
    %246 = vector.shape_cast %245 : vector<256xf32> to vector<1x256xf32>
    %c0_171 = arith.constant 0 : index
    %c0_172 = arith.constant 0 : index
    %247 = vector.load %arg27[%c0_171, %c0_172] : memref<256x128xf32, #tpu.memory_space<vmem>>, vector<256x128xf32>
    %cst_173 = arith.constant dense<0.000000e+00> : vector<1x128xf32>
    %248 = tpu.matmul %243, %247, %cst_173 {dimension_numbers = #tpu.dot_dimension_numbers<[1], [0], [0], [1], [0, 0, 1, 1], [], []>} : vector<1x256xf32>, vector<256x128xf32>, vector<1x128xf32> -> vector<1x128xf32>
    %c0_174 = arith.constant 0 : index
    %c0_175 = arith.constant 0 : index
    %249 = vector.load %arg27[%c0_174, %c0_175] : memref<256x128xf32, #tpu.memory_space<vmem>>, vector<256x128xf32>
    %cst_176 = arith.constant dense<0.000000e+00> : vector<1x128xf32>
    %250 = tpu.matmul %246, %249, %cst_176 {dimension_numbers = #tpu.dot_dimension_numbers<[1], [0], [0], [1], [0, 0, 1, 1], [], []>} : vector<1x256xf32>, vector<256x128xf32>, vector<1x128xf32> -> vector<1x128xf32>
    %cst_177 = arith.constant 1.250000e-01 : f32
    %251 = vector.broadcast %cst_177 : f32 to vector<1x128xf32>
    %252 = arith.mulf %248, %251 : vector<1x128xf32>
    %cst_178 = arith.constant 1.250000e-01 : f32
    %253 = vector.broadcast %cst_178 : f32 to vector<1x128xf32>
    %254 = arith.mulf %250, %253 : vector<1x128xf32>
    %255 = arith.mulf %252, %252 : vector<1x128xf32>
    %256 = arith.subf %254, %255 : vector<1x128xf32>
    %cst_179 = arith.constant 0.000000e+00 : f32
    %257 = vector.broadcast %cst_179 : f32 to vector<1x128xf32>
    %258 = arith.maximumf %256, %257 : vector<1x128xf32>
    %cst_180 = arith.constant 9.99999974E-6 : f32
    %259 = vector.broadcast %cst_180 : f32 to vector<1x128xf32>
    %260 = arith.addf %258, %259 : vector<1x128xf32>
    %261 = math.rsqrt %260 : vector<1x128xf32>
    %c0_181 = arith.constant 0 : index
    %c0_182 = arith.constant 0 : index
    %262 = vector.load %arg29[%c0_181, %c0_182] : memref<1x128xf32, #tpu.memory_space<vmem>>, vector<1x128xf32>
    %263 = arith.mulf %261, %262 : vector<1x128xf32>
    %c0_183 = arith.constant 0 : index
    %c0_184 = arith.constant 0 : index
    %264 = vector.load %arg30[%c0_183, %c0_184] : memref<1x128xf32, #tpu.memory_space<vmem>>, vector<1x128xf32>
    %265 = arith.mulf %252, %263 : vector<1x128xf32>
    %266 = arith.subf %264, %265 : vector<1x128xf32>
    %c0_185 = arith.constant 0 : index
    %c0_186 = arith.constant 0 : index
    %267 = vector.load %arg28[%c0_185, %c0_186] : memref<128x256xf32, #tpu.memory_space<vmem>>, vector<128x256xf32>
    %cst_187 = arith.constant dense<0.000000e+00> : vector<1x256xf32>
    %268 = tpu.matmul %263, %267, %cst_187 {dimension_numbers = #tpu.dot_dimension_numbers<[1], [0], [0], [1], [0, 0, 1, 1], [], []>} : vector<1x128xf32>, vector<128x256xf32>, vector<1x256xf32> -> vector<1x256xf32>
    %c0_188 = arith.constant 0 : index
    %c0_189 = arith.constant 0 : index
    %269 = vector.load %arg28[%c0_188, %c0_189] : memref<128x256xf32, #tpu.memory_space<vmem>>, vector<128x256xf32>
    %cst_190 = arith.constant dense<0.000000e+00> : vector<1x256xf32>
    %270 = tpu.matmul %266, %269, %cst_190 {dimension_numbers = #tpu.dot_dimension_numbers<[1], [0], [0], [1], [0, 0, 1, 1], [], []>} : vector<1x128xf32>, vector<128x256xf32>, vector<1x256xf32> -> vector<1x256xf32>
    %271 = vector.broadcast %268 : vector<1x256xf32> to vector<4x256xf32>
    %272 = arith.mulf %241, %271 : vector<4x256xf32>
    %273 = vector.broadcast %270 : vector<1x256xf32> to vector<4x256xf32>
    %274 = arith.addf %272, %273 : vector<4x256xf32>
    %cst_191 = arith.constant 0.000000e+00 : f32
    %275 = vector.broadcast %cst_191 : f32 to vector<4x256xf32>
    %276 = arith.cmpf ogt, %274, %275 : vector<4x256xf32>
    %cst_192 = arith.constant 2.000000e-01 : f32
    %277 = vector.broadcast %cst_192 : f32 to vector<4x256xf32>
    %278 = arith.mulf %277, %274 : vector<4x256xf32>
    %279 = arith.select %276, %274, %278 : vector<4x256xi1>, vector<4x256xf32>
    %280 = arith.truncf %279 : vector<4x256xf32> to vector<4x256xbf16>
    %c0_193 = arith.constant 0 : index
    %c0_194 = arith.constant 0 : index
    %281 = vector.load %arg31[%c0_193, %c0_194] : memref<6x4xbf16, #tpu.memory_space<vmem>>, vector<6x4xbf16>
    %cst_195 = arith.constant dense<0.000000e+00> : vector<6x256xf32>
    %282 = tpu.matmul %281, %280, %cst_195 {dimension_numbers = #tpu.dot_dimension_numbers<[1], [0], [0], [1], [0, 0, 1, 1], [], []>} : vector<6x4xbf16>, vector<4x256xbf16>, vector<6x256xf32> -> vector<6x256xf32>
    %283 = arith.truncf %282 : vector<6x256xf32> to vector<6x256xbf16>
    %284 = vector.extract_strided_slice %283 {offsets = [0, 0], sizes = [2, 256], strides = [1, 1]} : vector<6x256xbf16> to vector<2x256xbf16>
    %c0_196 = arith.constant 0 : index
    %c0_197 = arith.constant 0 : index
    %c0_198 = arith.constant 0 : index
    %285 = vector.load %arg32[%c0_196, %c0_197, %c0_198] : memref<3x256x128xbf16, #tpu.memory_space<vmem>>, vector<1x256x128xbf16>
    %286 = vector.shape_cast %285 : vector<1x256x128xbf16> to vector<256x128xbf16>
    %cst_199 = arith.constant dense<0.000000e+00> : vector<2x128xf32>
    %287 = tpu.matmul %284, %286, %cst_199 {dimension_numbers = #tpu.dot_dimension_numbers<[1], [0], [0], [1], [0, 0, 1, 1], [], []>} : vector<2x256xbf16>, vector<256x128xbf16>, vector<2x128xf32> -> vector<2x128xf32>
    %288 = vector.extract_strided_slice %283 {offsets = [2, 0], sizes = [2, 256], strides = [1, 1]} : vector<6x256xbf16> to vector<2x256xbf16>
    %c1_200 = arith.constant 1 : index
    %c0_201 = arith.constant 0 : index
    %c0_202 = arith.constant 0 : index
    %289 = vector.load %arg32[%c1_200, %c0_201, %c0_202] : memref<3x256x128xbf16, #tpu.memory_space<vmem>>, vector<1x256x128xbf16>
    %290 = vector.shape_cast %289 : vector<1x256x128xbf16> to vector<256x128xbf16>
    %cst_203 = arith.constant dense<0.000000e+00> : vector<2x128xf32>
    %291 = tpu.matmul %288, %290, %cst_203 {dimension_numbers = #tpu.dot_dimension_numbers<[1], [0], [0], [1], [0, 0, 1, 1], [], []>} : vector<2x256xbf16>, vector<256x128xbf16>, vector<2x128xf32> -> vector<2x128xf32>
    %292 = arith.addf %287, %291 : vector<2x128xf32>
    %293 = vector.extract_strided_slice %283 {offsets = [4, 0], sizes = [2, 256], strides = [1, 1]} : vector<6x256xbf16> to vector<2x256xbf16>
    %c2_204 = arith.constant 2 : index
    %c0_205 = arith.constant 0 : index
    %c0_206 = arith.constant 0 : index
    %294 = vector.load %arg32[%c2_204, %c0_205, %c0_206] : memref<3x256x128xbf16, #tpu.memory_space<vmem>>, vector<1x256x128xbf16>
    %295 = vector.shape_cast %294 : vector<1x256x128xbf16> to vector<256x128xbf16>
    %cst_207 = arith.constant dense<0.000000e+00> : vector<2x128xf32>
    %296 = tpu.matmul %293, %295, %cst_207 {dimension_numbers = #tpu.dot_dimension_numbers<[1], [0], [0], [1], [0, 0, 1, 1], [], []>} : vector<2x256xbf16>, vector<256x128xbf16>, vector<2x128xf32> -> vector<2x128xf32>
    %297 = arith.addf %292, %296 : vector<2x128xf32>
    %cst_208 = arith.constant dense<0.000000e+00> : vector<128xf32>
    %298 = vector.multi_reduction <add>, %297, %cst_208 [0] : vector<2x128xf32> to vector<128xf32>
    %299 = vector.shape_cast %298 : vector<128xf32> to vector<1x128xf32>
    %300 = arith.mulf %297, %297 : vector<2x128xf32>
    %cst_209 = arith.constant dense<0.000000e+00> : vector<128xf32>
    %301 = vector.multi_reduction <add>, %300, %cst_209 [0] : vector<2x128xf32> to vector<128xf32>
    %302 = vector.shape_cast %301 : vector<128xf32> to vector<1x128xf32>
    %c0_210 = arith.constant 0 : index
    %c0_211 = arith.constant 0 : index
    %303 = vector.load %arg33[%c0_210, %c0_211] : memref<128x128xf32, #tpu.memory_space<vmem>>, vector<128x128xf32>
    %cst_212 = arith.constant dense<0.000000e+00> : vector<1x128xf32>
    %304 = tpu.matmul %299, %303, %cst_212 {dimension_numbers = #tpu.dot_dimension_numbers<[1], [0], [0], [1], [0, 0, 1, 1], [], []>} : vector<1x128xf32>, vector<128x128xf32>, vector<1x128xf32> -> vector<1x128xf32>
    %c0_213 = arith.constant 0 : index
    %c0_214 = arith.constant 0 : index
    %305 = vector.load %arg33[%c0_213, %c0_214] : memref<128x128xf32, #tpu.memory_space<vmem>>, vector<128x128xf32>
    %cst_215 = arith.constant dense<0.000000e+00> : vector<1x128xf32>
    %306 = tpu.matmul %302, %305, %cst_215 {dimension_numbers = #tpu.dot_dimension_numbers<[1], [0], [0], [1], [0, 0, 1, 1], [], []>} : vector<1x128xf32>, vector<128x128xf32>, vector<1x128xf32> -> vector<1x128xf32>
    %cst_216 = arith.constant 5.000000e-01 : f32
    %307 = vector.broadcast %cst_216 : f32 to vector<1x128xf32>
    %308 = arith.mulf %304, %307 : vector<1x128xf32>
    %cst_217 = arith.constant 5.000000e-01 : f32
    %309 = vector.broadcast %cst_217 : f32 to vector<1x128xf32>
    %310 = arith.mulf %306, %309 : vector<1x128xf32>
    %311 = arith.mulf %308, %308 : vector<1x128xf32>
    %312 = arith.subf %310, %311 : vector<1x128xf32>
    %cst_218 = arith.constant 0.000000e+00 : f32
    %313 = vector.broadcast %cst_218 : f32 to vector<1x128xf32>
    %314 = arith.maximumf %312, %313 : vector<1x128xf32>
    %cst_219 = arith.constant 9.99999974E-6 : f32
    %315 = vector.broadcast %cst_219 : f32 to vector<1x128xf32>
    %316 = arith.addf %314, %315 : vector<1x128xf32>
    %317 = math.rsqrt %316 : vector<1x128xf32>
    %c0_220 = arith.constant 0 : index
    %c0_221 = arith.constant 0 : index
    %318 = vector.load %arg35[%c0_220, %c0_221] : memref<1x128xf32, #tpu.memory_space<vmem>>, vector<1x128xf32>
    %319 = arith.mulf %317, %318 : vector<1x128xf32>
    %c0_222 = arith.constant 0 : index
    %c0_223 = arith.constant 0 : index
    %320 = vector.load %arg36[%c0_222, %c0_223] : memref<1x128xf32, #tpu.memory_space<vmem>>, vector<1x128xf32>
    %321 = arith.mulf %308, %319 : vector<1x128xf32>
    %322 = arith.subf %320, %321 : vector<1x128xf32>
    %c0_224 = arith.constant 0 : index
    %c0_225 = arith.constant 0 : index
    %323 = vector.load %arg34[%c0_224, %c0_225] : memref<128x128xf32, #tpu.memory_space<vmem>>, vector<128x128xf32>
    %cst_226 = arith.constant dense<0.000000e+00> : vector<1x128xf32>
    %324 = tpu.matmul %319, %323, %cst_226 {dimension_numbers = #tpu.dot_dimension_numbers<[1], [0], [0], [1], [0, 0, 1, 1], [], []>} : vector<1x128xf32>, vector<128x128xf32>, vector<1x128xf32> -> vector<1x128xf32>
    %c0_227 = arith.constant 0 : index
    %c0_228 = arith.constant 0 : index
    %325 = vector.load %arg34[%c0_227, %c0_228] : memref<128x128xf32, #tpu.memory_space<vmem>>, vector<128x128xf32>
    %cst_229 = arith.constant dense<0.000000e+00> : vector<1x128xf32>
    %326 = tpu.matmul %322, %325, %cst_229 {dimension_numbers = #tpu.dot_dimension_numbers<[1], [0], [0], [1], [0, 0, 1, 1], [], []>} : vector<1x128xf32>, vector<128x128xf32>, vector<1x128xf32> -> vector<1x128xf32>
    %327 = vector.broadcast %324 : vector<1x128xf32> to vector<2x128xf32>
    %328 = arith.mulf %297, %327 : vector<2x128xf32>
    %329 = vector.broadcast %326 : vector<1x128xf32> to vector<2x128xf32>
    %330 = arith.addf %328, %329 : vector<2x128xf32>
    %cst_230 = arith.constant 0.000000e+00 : f32
    %331 = vector.broadcast %cst_230 : f32 to vector<2x128xf32>
    %332 = arith.cmpf ogt, %330, %331 : vector<2x128xf32>
    %cst_231 = arith.constant 2.000000e-01 : f32
    %333 = vector.broadcast %cst_231 : f32 to vector<2x128xf32>
    %334 = arith.mulf %333, %330 : vector<2x128xf32>
    %335 = arith.select %332, %330, %334 : vector<2x128xi1>, vector<2x128xf32>
    %336 = arith.truncf %335 : vector<2x128xf32> to vector<2x128xbf16>
    %c0_232 = arith.constant 0 : index
    %c0_233 = arith.constant 0 : index
    %337 = vector.load %arg37[%c0_232, %c0_233] : memref<128x128xbf16, #tpu.memory_space<vmem>>, vector<128x128xbf16>
    %cst_234 = arith.constant dense<0.000000e+00> : vector<2x128xf32>
    %338 = tpu.matmul %336, %337, %cst_234 {dimension_numbers = #tpu.dot_dimension_numbers<[1], [0], [0], [1], [0, 0, 1, 1], [], []>} : vector<2x128xbf16>, vector<128x128xbf16>, vector<2x128xf32> -> vector<2x128xf32>
    %c0_235 = arith.constant 0 : index
    %c0_236 = arith.constant 0 : index
    %339 = vector.load %arg38[%c0_235, %c0_236] : memref<1x128xf32, #tpu.memory_space<vmem>>, vector<1x128xf32>
    %340 = vector.broadcast %339 : vector<1x128xf32> to vector<2x128xf32>
    %341 = arith.addf %338, %340 : vector<2x128xf32>
    %342 = vector.extract_strided_slice %341 {offsets = [0, 0], sizes = [2, 10], strides = [1, 1]} : vector<2x128xf32> to vector<2x10xf32>
    %343 = vector.extract_strided_slice %341 {offsets = [0, 10], sizes = [2, 1], strides = [1, 1]} : vector<2x128xf32> to vector<2x1xf32>
    %c0_237 = arith.constant 0 : index
    %c0_238 = arith.constant 0 : index
    %344 = vector.load %arg39[%c0_237, %c0_238] : memref<2x1xf32, #tpu.memory_space<vmem>>, vector<2x1xf32>
    tpu.vector_store %arg39[%c0_237, %c0_238], %343 {strides = array<i32>} : memref<2x1xf32, #tpu.memory_space<vmem>>, vector<2x1xf32>,
    %cst_239 = arith.constant dense<0xFF800000> : vector<2xf32>
    %345 = vector.multi_reduction <maximumf>, %342, %cst_239 [1] : vector<2x10xf32> to vector<2xf32>
    %346 = vector.shape_cast %345 : vector<2xf32> to vector<2x1xf32>
    %347 = vector.broadcast %346 : vector<2x1xf32> to vector<2x10xf32>
    %348 = arith.subf %342, %347 : vector<2x10xf32>
    %349 = math.exp %348 : vector<2x10xf32>
    %cst_240 = arith.constant dense<0.000000e+00> : vector<2xf32>
    %350 = vector.multi_reduction <add>, %349, %cst_240 [1] : vector<2x10xf32> to vector<2xf32>
    %351 = vector.shape_cast %350 : vector<2xf32> to vector<2x1xf32>
    %352 = math.log %351 : vector<2x1xf32>
    %353 = arith.addf %352, %346 : vector<2x1xf32>
    %354 = vector.broadcast %353 : vector<2x1xf32> to vector<2x10xf32>
    %355 = arith.subf %342, %354 : vector<2x10xf32>
    %c0_241 = arith.constant 0 : index
    %c0_242 = arith.constant 0 : index
    %356 = vector.load %arg40[%c0_241, %c0_242] : memref<2x10xf32, #tpu.memory_space<vmem>>, vector<2x10xf32>
    tpu.vector_store %arg40[%c0_241, %c0_242], %355 {strides = array<i32>} : memref<2x10xf32, #tpu.memory_space<vmem>>, vector<2x10xf32>,
    return
  }
}

</mosaic_0001>

<bundles_post_ra>
// kernel: discriminator_forward.1
= control target key start
LH: loop header
LB: loop body
LE: loop exit
PB: predicated region body
PF: predicated region fallthrough
CT: control target
= control target key end

     0   :  { %s11557_s6 = smov 1   ;;  %s11558_s10 = smov 2   ;;  %s13395_s0 = inlined_call_operand.smem [shape: u32[41], index: -1, kind: input, shape index: {}] }
   0x1   :  { %s11638_s5 = sld [smem:[%s13395_s0]]   ;;  %s11559_s14 = smov 3  }
   0x2   :  { %s11643_s9 = sld [smem:[%s13395_s0 + %s11557_s6]]   ;;  %s11560_s18 = smov 4  }
   0x3   :  { %s11648_s13 = sld [smem:[%s13395_s0 + %s11558_s10]]   ;;  %s11561_s22 = smov 5  }
   0x4   :  { %s11653_s17 = sld [smem:[%s13395_s0 + %s11559_s14]]   ;;  %s11562_s26 = smov 6  }
   0x5   :  { %s11658_s21 = sld [smem:[%s13395_s0 + %s11560_s18]]   ;;  %s11563_s30 = smov 7  }
   0x6   :  { %s11663_s25 = sld [smem:[%s13395_s0 + %s11561_s22]]   ;;  %s11564_s4 = smov 8  }
   0x7   :  { %13414 = sst [smem:[#allocation48_spill]] %s11638_s5  ;;  %s11565_s10 = smov 9  }
   0x8   :  { %s11668_s29 = sld [smem:[%s13395_s0 + %s11562_s26]]   ;;  %s11566_s15 = smov 10  }
   0x9   :  { %13415 = sst [smem:[#allocation49_spill]] %s11648_s13  ;;  %s11567_s20 = smov 11  }
   0xa   :  { %13416 = sst [smem:[#allocation50_spill]] %s11653_s17  ;;  %s11568_s26 = smov 12  }
   0xb   :  { %s11673_s3 = sld [smem:[%s13395_s0 + %s11563_s30]]   ;;  %s11569_s1 = smov 13  }
   0xc   :  { %13417 = sst [smem:[#allocation51_spill]] %s11663_s25  ;;  %s11570_s7 = smov 14  }
   0xd   :  { %s11678_s8 = sld [smem:[%s13395_s0 + %s11564_s4]]   ;;  %s11572_s22 = smov 16  }
   0xe   :  { %13418 = sst [smem:[#allocation52_spill]] %s11668_s29  ;;  %s11573_s28 = smov 17  }
   0xf   :  { %s11683_s14 = sld [smem:[%s13395_s0 + %s11565_s10]]  }
  0x10   :  { %s11688_s19 = sld [smem:[%s13395_s0 + %s11566_s15]]   ;;  %s11571_s15 = smov 15  }
  0x11   :  { %13419 = sst [smem:[#allocation53_spill]] %s11673_s3 }
  0x12   :  { %s11693_s24 = sld [smem:[%s13395_s0 + %s11567_s20]]  }
  0x13   :  { %13420 = sst [smem:[#allocation54_spill]] %s11678_s8 }
  0x14   :  { %s11698_s30 = sld [smem:[%s13395_s0 + %s11568_s26]]  }
  0x15   :  { %13421 = sst [smem:[#allocation55_spill]] %s11683_s14 }
  0x16   :  { %s11703_s6 = sld [smem:[%s13395_s0 + %s11569_s1]]  }
  0x17   :  { %s11708_s12 = sld [smem:[%s13395_s0 + %s11570_s7]]   ;;  %s11574_s7 = smov 18  }
  0x18   :  { %13422 = sst [smem:[#allocation56_spill]] %s11693_s24 }
  0x19   :  { %s11713_s20 = sld [smem:[%s13395_s0 + %s11571_s15]]   ;;  %s11575_s15 = smov 19  }
  0x1a   :  { %s11718_s27 = sld [smem:[%s13395_s0 + %s11572_s22]]   ;;  %s11576_s22 = smov 20  }
  0x1b   :  { %s11723_s4 = sld [smem:[%s13395_s0 + %s11573_s28]]   ;;  %s11577_s28 = smov 21  }
  0x1c   :  { %13423 = sst [smem:[#allocation57_spill]] %s11703_s6 }
  0x1d   :  { %13424 = sst [smem:[#allocation58_spill]] %s11708_s12 }
  0x1e   :  { %s11728_s6 = sld [smem:[%s13395_s0 + %s11574_s7]]   ;;  %s11578_s7 = smov 22  }
  0x1f   :  { %13425 = sst [smem:[#allocation59_spill]] %s11713_s20 }
  0x20   :  { %s11733_s20 = sld [smem:[%s13395_s0 + %s11575_s15]]   ;;  %s11579_s15 = smov 23  }
  0x21   :  { %s11738_s12 = sld [smem:[%s13395_s0 + %s11576_s22]]   ;;  %s11580_s22 = smov 24  }
  0x22   :  { %s11743_s24 = sld [smem:[%s13395_s0 + %s11577_s28]]   ;;  %s11581_s28 = smov 25  }
  0x23   :  { %s11748_s14 = sld [smem:[%s13395_s0 + %s11578_s7]]   ;;  %s11582_s7 = smov 26  }
  0x24   :  { %s11768_s3 = sld [smem:[%s13395_s0 + %s11582_s7]]   ;;  %s11586_s7 = smov 30  }
  0x25   :  { %s11788_s25 = sld [smem:[%s13395_s0 + %s11586_s7]]   ;;  %s11590_s7 = smov 34  }
  0x26   :  { %13426 = sst [smem:[#allocation60_spill]] %s11733_s20 }
  0x27   :  { %13427 = sst [smem:[#allocation61_spill]] %s11738_s12 }
  0x28   :  { %13428 = sst [smem:[#allocation62_spill]] %s11743_s24 }
  0x29   :  { %s11753_s20 = sld [smem:[%s13395_s0 + %s11579_s15]]   ;;  %s11583_s15 = smov 27  }
  0x2a   :  { %s11758_s12 = sld [smem:[%s13395_s0 + %s11580_s22]]   ;;  %s11584_s22 = smov 28  }
  0x2b   :  { %s11763_s24 = sld [smem:[%s13395_s0 + %s11581_s28]]   ;;  %s11585_s28 = smov 29  }
  0x2c   :  { %13430 = sst [smem:[#allocation64_spill]] %s11768_s3 }
  0x2d   :  { %s11773_s8 = sld [smem:[%s13395_s0 + %s11583_s15]]   ;;  %s11587_s15 = smov 31  }
  0x2e   :  { %s11778_s29 = sld [smem:[%s13395_s0 + %s11584_s22]]   ;;  %s11588_s22 = smov 32  }
  0x2f   :  { %13432 = sst [smem:[#allocation66_spill]] %s11788_s25 }
  0x30   :  { %s11793_s17 = sld [smem:[%s13395_s0 + %s11587_s15]]   ;;  %s11591_s15 = smov 35  }
  0x31   :  { %13429 = sst [smem:[#allocation63_spill]] %s11763_s24 }
  0x32   :  { %s11783_s24 = sld [smem:[%s13395_s0 + %s11585_s28]]   ;;  %s11589_s28 = smov 33  }
  0x33   :  { %s11798_s13 = sld [smem:[%s13395_s0 + %s11588_s22]]   ;;  %s11592_s22 = smov 36  }
  0x34   :  { %13431 = sst [smem:[#allocation65_spill]] %s11778_s29 }
  0x35   :  { %s11803_s5 = sld [smem:[%s13395_s0 + %s11589_s28]]   ;;  %s11593_s28 = smov 37  }
  0x36   :  { %13433 = sst [smem:[#allocation67_spill]] %s11793_s17 }
  0x37   :  { %s11808_s25 = sld [smem:[%s13395_s0 + %s11590_s7]]   ;;  %s11594_s7 = smov 38  }
  0x38   :  { %s11813_s17 = sld [smem:[%s13395_s0 + %s11591_s15]]   ;;  %s11595_s15 = smov 39  }
  0x39   :  { %s11818_s29 = sld [smem:[%s13395_s0 + %s11592_s22]]   ;;  %s11596_s22 = smov 40  }
  0x3a   :  { %s11833_s3 = sld [smem:[%s13395_s0 + %s11595_s15]]  }
  0x3b   :  { %13434 = sst [smem:[#allocation68_spill]] %s11803_s5 }
  0x3c   :  { %s11823_s5 = sld [smem:[%s13395_s0 + %s11593_s28]]  }
  0x3d   :  { %13435 = sst [smem:[#allocation69_spill]] %s11808_s25 }
  0x3e   :  { %s11828_s25 = sld [smem:[%s13395_s0 + %s11594_s7]]  }
  0x3f   :  { %13436 = sst [smem:[#allocation70_spill]] %s11818_s29 }
  0x40   :  { %s11838_s29 = sld [smem:[%s13395_s0 + %s11596_s22]]  }
  0x41   :  { %87 = vsyncpa [#allocation3], 0 }
  0x42   :  { %88 = vsyncpa [#allocation6], 0 }
  0x43   :  { %89 = vsyncpa [#allocation9], 0 }
  0x44   :  { %90 = vsyncpa [#allocation12], 0 }
  0x45   :  { %91 = vsyncpa [#allocation15], 0 }
  0x46   :  { %92 = vsyncpa [#allocation18], 0 }
  0x47   :  { %93 = vsyncpa [#allocation21], 0 }
  0x48   :  { %94 = vsyncpa [#allocation24], 0 }
  0x49   :  { %95 = vsyncpa [#allocation27], 0 }
  0x4a   :  { %96 = vsyncpa [#allocation30], 0 }
  0x4b   :  { %97 = vsyncpa [#allocation33], 0 }
  0x4c   :  { %98 = vsyncpa [#allocation4], 0  ;;  %s11597_s28 = smov [#allocation5]   ;;  %s11598_s2 = smov [#allocation8]  }
  0x4d   :  { %s123_s1 = sshll.u32 %s11597_s28, 4  ;;  %s157_s0 = sshll.u32 %s11598_s2, 4  ;;  %s124_s1 = int_to_ptr.vmem [resolvable:$true] %s123_s1  ;;  %s158_s0 = int_to_ptr.vmem [resolvable:$true] %s157_s0 }
  0x4e   :  { %s11049_s7 = scalar_lea.hbm %s11658_s21, 256 }
  0x4f   :  { %p11050_p0 = scmp.ne.s32.totalorder %s11658_s21, %s11049_s7  ;;  %p11053_p1 = scmp.lt.u32.totalorder %s11049_s7, %s11658_s21 }
  0x51   :  { %p11055_p2 = pnand %p11053_p1, %p11050_p0 }
  0x53   :  { %11058 = shalt.err (!%p11055_p2)
}
  0x54   :  { %s11059_s10 = scalar_lea.vmem %s124_s1, 256  ;;  %p11064_p4 = scmp.lt.s32.totalorder %s124_s1, %s124_s1 }
  0x55   :  { %p11060_p3 = scmp.ne.s32.totalorder %s124_s1, %s11059_s10  ;;  %p11065_p5 = scmp.lt.s32.totalorder %s11059_s10, %s11059_s10 }
  0x57   :  { %p11066_p6 = por %p11065_p5, %p11064_p4 }
  0x59   :  { %p11067_p7 = pnand %p11066_p6, %p11060_p3 }
  0x5b   :  { %11070 = shalt.err (!%p11067_p7)
}
  0x5c   :  { %126 = dma.hbm_to_vmem [thread:$0]  %s11658_s21, 256, %s124_s1, [#allocation6]  }
  0x5d   :  { %s11071_s11 = scalar_lea.hbm %s11698_s30, 16 }
  0x5e   :  { %p11072_p8 = scmp.ne.s32.totalorder %s11698_s30, %s11071_s11  ;;  %p11075_p9 = scmp.lt.u32.totalorder %s11071_s11, %s11698_s30 }
  0x60   :  { %p11077_p10 = pnand %p11075_p9, %p11072_p8 }
  0x62   :  { %11080 = shalt.err (!%p11077_p10)
}
  0x63   :  { %s11081_s15 = scalar_lea.vmem %s158_s0, 16  ;;  %s11085_s16 = scalar_lea.vmem %s158_s0, 32 }
  0x64   :  { %p11082_p11 = scmp.ne.s32.totalorder %s158_s0, %s11081_s15  ;;  %p11086_p12 = scmp.lt.s32.totalorder %s158_s0, %s158_s0 }
  0x65   :  { %p11087_p13 = scmp.lt.s32.totalorder %s11085_s16, %s11081_s15 }
  0x67   :  { %p11088_p0 = por %p11087_p13, %p11086_p12 }
  0x69   :  { %p11089_p1 = pnand %p11088_p0, %p11082_p11 }
  0x6b   :  { %11092 = shalt.err (!%p11089_p1)
}
  0x6c   :  { %160 = dma.hbm_to_vmem [thread:$0]  %s11698_s30, 16, %s158_s0, [#allocation9]  }
  0x6d   :  { %s11599_s18 = smov [#allocation11]   ;;  %s11093_s22 = scalar_lea.hbm %s11723_s4, 16 }
  0x6e   :  { %s185_s21 = sshll.u32 %s11599_s18, 4  ;;  %p11094_p2 = scmp.ne.s32.totalorder %s11723_s4, %s11093_s22  ;;  %s186_s21 = int_to_ptr.vmem [resolvable:$true] %s185_s21 }
  0x6f   :  { %p11097_p3 = scmp.lt.u32.totalorder %s11093_s22, %s11723_s4 }
  0x71   :  { %p11099_p4 = pnand %p11097_p3, %p11094_p2 }
  0x73   :  { %11102 = shalt.err (!%p11099_p4)
}
  0x74   :  { %s11103_s23 = scalar_lea.vmem %s186_s21, 16  ;;  %s11107_s26 = scalar_lea.vmem %s186_s21, 32 }
  0x75   :  { %p11104_p5 = scmp.ne.s32.totalorder %s186_s21, %s11103_s23  ;;  %p11108_p6 = scmp.lt.s32.totalorder %s186_s21, %s186_s21 }
  0x76   :  { %p11109_p7 = scmp.lt.s32.totalorder %s11107_s26, %s11103_s23 }
  0x78   :  { %p11110_p8 = por %p11109_p7, %p11108_p6 }
  0x7a   :  { %p11111_p9 = pnand %p11110_p8, %p11104_p5 }
  0x7c   :  { %11114 = shalt.err (!%p11111_p9)
}
  0x7d   :  { %188 = dma.hbm_to_vmem [thread:$0]  %s11723_s4, 16, %s186_s21, [#allocation12]  }
  0x7e   :  { %s11600_s30 = smov [#allocation14]   ;;  %s11601_s1 = smov [#allocation17]  }
  0x7f   :  { %s210_s28 = sshll.u32 %s11600_s30, 4  ;;  %s233_s2 = sshll.u32 %s11601_s1, 4  ;;  %s211_s28 = int_to_ptr.vmem [resolvable:$true] %s210_s28  ;;  %s234_s2 = int_to_ptr.vmem [resolvable:$true] %s233_s2 }
  0x80   :  { %s11115_s0 = scalar_lea.hbm %s11748_s14, 2048 }
  0x81   :  { %p11116_p10 = scmp.ne.s32.totalorder %s11748_s14, %s11115_s0  ;;  %p11119_p11 = scmp.lt.u32.totalorder %s11115_s0, %s11748_s14 }
  0x83   :  { %p11121_p12 = pnand %p11119_p11, %p11116_p10 }
  0x85   :  { %11124 = shalt.err (!%p11121_p12)
}
  0x86   :  { %s11125_s7 = scalar_lea.vmem %s211_s28, 2048  ;;  %p11130_p0 = scmp.lt.s32.totalorder %s211_s28, %s211_s28 }
  0x87   :  { %p11126_p13 = scmp.ne.s32.totalorder %s211_s28, %s11125_s7  ;;  %p11131_p1 = scmp.lt.s32.totalorder %s11125_s7, %s11125_s7 }
  0x89   :  { %p11132_p2 = por %p11131_p1, %p11130_p0 }
  0x8b   :  { %p11133_p3 = pnand %p11132_p2, %p11126_p13 }
  0x8d   :  { %11136 = shalt.err (!%p11133_p3)
}
  0x8e   :  { %s11602_s10 = smov 256   ;;  %s11603_s4 = smov 16  }
  0x8f   :  { %216 = dma.hbm_to_vmem [thread:$0]  %s11748_s14, 2048, %s211_s28, [#allocation15], %s11602_s10, %s11602_s10, %s11603_s4  }
  0x90   :  { %s11137_s11 = scalar_lea.hbm %s11758_s12, 16 }
  0x91   :  { %p11138_p4 = scmp.ne.s32.totalorder %s11758_s12, %s11137_s11  ;;  %p11141_p5 = scmp.lt.u32.totalorder %s11137_s11, %s11758_s12 }
  0x93   :  { %p11143_p6 = pnand %p11141_p5, %p11138_p4 }
  0x95   :  { %11146 = shalt.err (!%p11143_p6)
}
  0x96   :  { %s11147_s15 = scalar_lea.vmem %s234_s2, 16  ;;  %s11151_s16 = scalar_lea.vmem %s234_s2, 32 }
  0x97   :  { %p11148_p7 = scmp.ne.s32.totalorder %s234_s2, %s11147_s15  ;;  %p11152_p8 = scmp.lt.s32.totalorder %s234_s2, %s234_s2 }
  0x98   :  { %p11153_p9 = scmp.lt.s32.totalorder %s11151_s16, %s11147_s15 }
  0x9a   :  { %p11154_p10 = por %p11153_p9, %p11152_p8 }
  0x9c   :  { %p11155_p11 = pnand %p11154_p10, %p11148_p7 }
  0x9e   :  { %11158 = shalt.err (!%p11155_p11)
}
  0x9f   :  { %236 = dma.hbm_to_vmem [thread:$0]  %s11758_s12, 16, %s234_s2, [#allocation18]  }
  0xa0   :  { %s11604_s14 = smov [#allocation20]   ;;  %s11605_s21 = smov [#allocation23]  }
  0xa1   :  { %s256_s18 = sshll.u32 %s11604_s14, 4  ;;  %s281_s22 = sshll.u32 %s11605_s21, 4  ;;  %s257_s18 = int_to_ptr.vmem [resolvable:$true] %s256_s18  ;;  %s282_s22 = int_to_ptr.vmem [resolvable:$true] %s281_s22 }
  0xa2   :  { %s11159_s23 = scalar_lea.hbm %s11773_s8, 4096 }
  0xa3   :  { %p11160_p12 = scmp.ne.s32.totalorder %s11773_s8, %s11159_s23  ;;  %p11163_p13 = scmp.lt.u32.totalorder %s11159_s23, %s11773_s8 }
  0xa5   :  { %p11165_p0 = pnand %p11163_p13, %p11160_p12 }
  0xa7   :  { %11168 = shalt.err (!%p11165_p0)
}
  0xa8   :  { %s11169_s26 = scalar_lea.vmem %s257_s18, 4096  ;;  %p11174_p2 = scmp.lt.s32.totalorder %s257_s18, %s257_s18 }
  0xa9   :  { %p11170_p1 = scmp.ne.s32.totalorder %s257_s18, %s11169_s26  ;;  %p11175_p3 = scmp.lt.s32.totalorder %s11169_s26, %s11169_s26 }
  0xab   :  { %p11176_p4 = por %p11175_p3, %p11174_p2 }
  0xad   :  { %p11177_p5 = pnand %p11176_p4, %p11170_p1 }
  0xaf   :  { %11180 = shalt.err (!%p11177_p5)
}
  0xb0   :  { %s11606_s30 = smov 128   ;;  %s11607_s12 = smov 8  }
  0xb1   :  { %262 = dma.hbm_to_vmem [thread:$0]  %s11773_s8, 4096, %s257_s18, [#allocation21], %s11606_s30, %s11606_s30, %s11607_s12  }
  0xb2   :  { %s11181_s28 = scalar_lea.hbm %s11783_s24, 16 }
  0xb3   :  { %p11182_p6 = scmp.ne.s32.totalorder %s11783_s24, %s11181_s28  ;;  %p11185_p7 = scmp.lt.u32.totalorder %s11181_s28, %s11783_s24 }
  0xb5   :  { %p11187_p8 = pnand %p11185_p7, %p11182_p6 }
  0xb7   :  { %11190 = shalt.err (!%p11187_p8)
}
  0xb8   :  { %s11191_s1 = scalar_lea.vmem %s282_s22, 16  ;;  %s11195_s2 = scalar_lea.vmem %s282_s22, 32 }
  0xb9   :  { %p11192_p9 = scmp.ne.s32.totalorder %s282_s22, %s11191_s1  ;;  %p11196_p10 = scmp.lt.s32.totalorder %s282_s22, %s282_s22 }
  0xba   :  { %p11197_p11 = scmp.lt.s32.totalorder %s11195_s2, %s11191_s1 }
  0xbc   :  { %p11198_p12 = por %p11197_p11, %p11196_p10 }
  0xbe   :  { %p11199_p13 = pnand %p11198_p12, %p11192_p9 }
  0xc0   :  { %11202 = shalt.err (!%p11199_p13)
}
  0xc1   :  { %284 = dma.hbm_to_vmem [thread:$0]  %s11783_s24, 16, %s282_s22, [#allocation24]  }
  0xc2   :  { %s11608_s8 = smov [#allocation26]   ;;  %s11609_s7 = smov [#allocation29]  }
  0xc3   :  { %s302_s0 = sshll.u32 %s11608_s8, 4  ;;  %s329_s11 = sshll.u32 %s11609_s7, 4  ;;  %s303_s0 = int_to_ptr.vmem [resolvable:$true] %s302_s0  ;;  %s330_s11 = int_to_ptr.vmem [resolvable:$true] %s329_s11 }
  0xc4   :  { %s11203_s15 = scalar_lea.hbm %s11798_s13, 6144 }
  0xc5   :  { %p11204_p0 = scmp.ne.s32.totalorder %s11798_s13, %s11203_s15  ;;  %p11207_p1 = scmp.lt.u32.totalorder %s11203_s15, %s11798_s13 }
  0xc7   :  { %p11209_p2 = pnand %p11207_p1, %p11204_p0 }
  0xc9   :  { %11212 = shalt.err (!%p11209_p2)
}
  0xca   :  { %s11213_s16 = scalar_lea.vmem %s303_s0, 6144  ;;  %p11218_p4 = scmp.lt.s32.totalorder %s303_s0, %s303_s0 }
  0xcb   :  { %p11214_p3 = scmp.ne.s32.totalorder %s303_s0, %s11213_s16  ;;  %p11219_p5 = scmp.lt.s32.totalorder %s11213_s16, %s11213_s16 }
  0xcd   :  { %p11220_p6 = por %p11219_p5, %p11218_p4 }
  0xcf   :  { %p11221_p7 = pnand %p11220_p6, %p11214_p3 }
  0xd1   :  { %11224 = shalt.err (!%p11221_p7)
}
  0xd2   :  { %s11610_s14 = smov 64   ;;  %s11611_s24 = smov 4  }
  0xd3   :  { %308 = dma.hbm_to_vmem [thread:$0]  %s11798_s13, 6144, %s303_s0, [#allocation27], %s11610_s14, %s11610_s14, %s11611_s24  }
  0xd4   :  { %s11225_s18 = scalar_lea.hbm %s11813_s17, 16 }
  0xd5   :  { %p11226_p8 = scmp.ne.s32.totalorder %s11813_s17, %s11225_s18  ;;  %p11229_p9 = scmp.lt.u32.totalorder %s11225_s18, %s11813_s17 }
  0xd7   :  { %p11231_p10 = pnand %p11229_p9, %p11226_p8 }
  0xd9   :  { %11234 = shalt.err (!%p11231_p10)
}
  0xda   :  { %s11235_s21 = scalar_lea.vmem %s330_s11, 16  ;;  %s11239_s22 = scalar_lea.vmem %s330_s11, 32 }
  0xdb   :  { %p11236_p11 = scmp.ne.s32.totalorder %s330_s11, %s11235_s21  ;;  %p11240_p12 = scmp.lt.s32.totalorder %s330_s11, %s330_s11 }
  0xdc   :  { %p11241_p13 = scmp.lt.s32.totalorder %s11239_s22, %s11235_s21 }
  0xde   :  { %p11242_p0 = por %p11241_p13, %p11240_p12 }
  0xe0   :  { %p11243_p1 = pnand %p11242_p0, %p11236_p11 }
  0xe2   :  { %11246 = shalt.err (!%p11243_p1)
}
  0xe3   :  { %332 = dma.hbm_to_vmem [thread:$0]  %s11813_s17, 16, %s330_s11, [#allocation30]  }
  0xe4   :  { %s11612_s13 = smov [#allocation32]   ;;  %s11613_s26 = smov [#allocation2]  }
  0xe5   :  { %s348_s23 = sshll.u32 %s11612_s13, 4  ;;  %s106_s28 = sshll.u32 %s11613_s26, 4  ;;  %s349_s23 = int_to_ptr.vmem [resolvable:$true] %s348_s23  ;;  %s107_s28 = int_to_ptr.vmem [resolvable:$true] %s106_s28 }
  0xe6   :  { %s11247_s1 = scalar_lea.hbm %s11823_s5, 1024 }
  0xe7   :  { %p11248_p2 = scmp.ne.s32.totalorder %s11823_s5, %s11247_s1  ;;  %p11251_p3 = scmp.lt.u32.totalorder %s11247_s1, %s11823_s5 }
  0xe9   :  { %p11253_p4 = pnand %p11251_p3, %p11248_p2 }
  0xeb   :  { %11256 = shalt.err (!%p11253_p4)
}
  0xec   :  { %s11257_s2 = scalar_lea.vmem %s349_s23, 1024  ;;  %p11262_p6 = scmp.lt.s32.totalorder %s349_s23, %s349_s23 }
  0xed   :  { %p11258_p5 = scmp.ne.s32.totalorder %s349_s23, %s11257_s2  ;;  %p11263_p7 = scmp.lt.s32.totalorder %s11257_s2, %s11257_s2 }
  0xef   :  { %p11264_p8 = por %p11263_p7, %p11262_p6 }
  0xf1   :  { %p11265_p9 = pnand %p11264_p8, %p11258_p5 }
  0xf3   :  { %11268 = shalt.err (!%p11265_p9)
}
  0xf4   :  { %354 = dma.hbm_to_vmem [thread:$0]  %s11823_s5, 1024, %s349_s23, [#allocation33], %s11610_s14, %s11610_s14, %s11611_s24  }
  0xf5   :  { %s11269_s17 = scalar_lea.hbm %s11643_s9, 1536 }
  0xf6   :  { %p11270_p10 = scmp.ne.s32.totalorder %s11643_s9, %s11269_s17  ;;  %p11273_p11 = scmp.lt.u32.totalorder %s11269_s17, %s11643_s9 }
  0xf8   :  { %p11275_p12 = pnand %p11273_p11, %p11270_p10 }
  0xfa   :  { %11278 = shalt.err (!%p11275_p12)
}
  0xfb   :  { %s11279_s8 = scalar_lea.vmem %s107_s28, 1536  ;;  %p11284_p0 = scmp.lt.s32.totalorder %s107_s28, %s107_s28 }
  0xfc   :  { %p11280_p13 = scmp.ne.s32.totalorder %s107_s28, %s11279_s8  ;;  %p11285_p1 = scmp.lt.s32.totalorder %s11279_s8, %s11279_s8 }
  0xfe   :  { %p11286_p2 = por %p11285_p1, %p11284_p0 }
 0x100   :  { %p11287_p3 = pnand %p11286_p2, %p11280_p13 }
 0x102   :  { %11290 = shalt.err (!%p11287_p3)
}
 0x103   :  { %112 = dma.hbm_to_vmem [thread:$0]  %s11643_s9, 1536, %s107_s28, [#allocation3], %s11610_s14, %s11610_s14, %s11611_s24  }
 0x104   :  { %s11614_s5 = smov [#allocation7]   ;;  %s11615_s7 = smov [#allocation10]  }
 0x105   :  { %s142_s0 = sshll.u32 %s11614_s5, 4  ;;  %s172_s11 = sshll.u32 %s11615_s7, 4  ;;  %s143_s0 = int_to_ptr.vmem [resolvable:$true] %s142_s0  ;;  %s173_s11 = int_to_ptr.vmem [resolvable:$true] %s172_s11 }
 0x106   :  { %s11291_s15 = scalar_lea.hbm %s11688_s19, 512 }
 0x107   :  { %p11292_p4 = scmp.ne.s32.totalorder %s11688_s19, %s11291_s15  ;;  %p11295_p5 = scmp.lt.u32.totalorder %s11291_s15, %s11688_s19 }
 0x109   :  { %p11297_p6 = pnand %p11295_p5, %p11292_p4 }
 0x10b   :  { %11300 = shalt.err (!%p11297_p6)
}
 0x10c   :  { %s11301_s16 = scalar_lea.vmem %s143_s0, 512  ;;  %p11306_p8 = scmp.lt.s32.totalorder %s143_s0, %s143_s0 }
 0x10d   :  { %p11302_p7 = scmp.ne.s32.totalorder %s143_s0, %s11301_s16  ;;  %p11307_p9 = scmp.lt.s32.totalorder %s11301_s16, %s11301_s16 }
 0x10f   :  { %p11308_p10 = por %p11307_p9, %p11306_p8 }
 0x111   :  { %p11309_p11 = pnand %p11308_p10, %p11302_p7 }
 0x113   :  { %11312 = shalt.err (!%p11309_p11)
}
 0x114   :  { %148 = dma.hbm_to_vmem [thread:$0]  %s11688_s19, 512, %s143_s0, [#allocation6], %s11602_s10, %s11602_s10, %s11603_s4  }
 0x115   :  { %s11313_s9 = scalar_lea.hbm %s11718_s27, 1024 }
 0x116   :  { %p11314_p12 = scmp.ne.s32.totalorder %s11718_s27, %s11313_s9  ;;  %p11317_p13 = scmp.lt.u32.totalorder %s11313_s9, %s11718_s27 }
 0x118   :  { %p11319_p0 = pnand %p11317_p13, %p11314_p12 }
 0x11a   :  { %11322 = shalt.err (!%p11319_p0)
}
 0x11b   :  { %s11323_s14 = scalar_lea.vmem %s173_s11, 1024  ;;  %p11328_p2 = scmp.lt.s32.totalorder %s173_s11, %s173_s11 }
 0x11c   :  { %p11324_p1 = scmp.ne.s32.totalorder %s173_s11, %s11323_s14  ;;  %p11329_p3 = scmp.lt.s32.totalorder %s11323_s14, %s11323_s14 }
 0x11e   :  { %p11330_p4 = por %p11329_p3, %p11328_p2 }
 0x120   :  { %p11331_p5 = pnand %p11330_p4, %p11324_p1 }
 0x122   :  { %11334 = shalt.err (!%p11331_p5)
}
 0x123   :  { %178 = dma.hbm_to_vmem [thread:$0]  %s11718_s27, 1024, %s173_s11, [#allocation9], %s11602_s10, %s11602_s10, %s11603_s4  }
 0x124   :  { %s11616_s19 = smov [#allocation13]   ;;  %s11617_s18 = smov [#allocation16]  }
 0x125   :  { %s195_s24 = sshll.u32 %s11616_s19, 4  ;;  %s223_s21 = sshll.u32 %s11617_s18, 4  ;;  %s196_s24 = int_to_ptr.vmem [resolvable:$true] %s195_s24  ;;  %s224_s21 = int_to_ptr.vmem [resolvable:$true] %s223_s21 }
 0x126   :  { %s11335_s22 = scalar_lea.hbm %s11728_s6, 16 }
 0x127   :  { %p11336_p6 = scmp.ne.s32.totalorder %s11728_s6, %s11335_s22  ;;  %p11339_p7 = scmp.lt.u32.totalorder %s11335_s22, %s11728_s6 }
 0x129   :  { %p11341_p8 = pnand %p11339_p7, %p11336_p6 }
 0x12b   :  { %11344 = shalt.err (!%p11341_p8)
}
 0x12c   :  { %s11345_s13 = scalar_lea.vmem %s196_s24, 16  ;;  %s11349_s23 = scalar_lea.vmem %s196_s24, 32 }
 0x12d   :  { %p11346_p9 = scmp.ne.s32.totalorder %s196_s24, %s11345_s13  ;;  %p11350_p10 = scmp.lt.s32.totalorder %s196_s24, %s196_s24 }
 0x12e   :  { %p11351_p11 = scmp.lt.s32.totalorder %s11349_s23, %s11345_s13 }
 0x130   :  { %p11352_p12 = por %p11351_p11, %p11350_p10 }
 0x132   :  { %p11353_p13 = pnand %p11352_p12, %p11346_p9 }
 0x134   :  { %11356 = shalt.err (!%p11353_p13)
}
 0x135   :  { %198 = dma.hbm_to_vmem [thread:$0]  %s11728_s6, 16, %s196_s24, [#allocation12]  }
 0x136   :  { %s11357_s27 = scalar_lea.hbm %s11753_s20, 16 }
 0x137   :  { %p11358_p0 = scmp.ne.s32.totalorder %s11753_s20, %s11357_s27  ;;  %p11361_p1 = scmp.lt.u32.totalorder %s11357_s27, %s11753_s20 }
 0x139   :  { %p11363_p2 = pnand %p11361_p1, %p11358_p0 }
 0x13b   :  { %11366 = shalt.err (!%p11363_p2)
}
 0x13c   :  { %s11367_s26 = scalar_lea.vmem %s224_s21, 16  ;;  %s11371_s28 = scalar_lea.vmem %s224_s21, 32 }
 0x13d   :  { %p11368_p3 = scmp.ne.s32.totalorder %s224_s21, %s11367_s26  ;;  %p11372_p4 = scmp.lt.s32.totalorder %s224_s21, %s224_s21 }
 0x13e   :  { %p11373_p5 = scmp.lt.s32.totalorder %s11371_s28, %s11367_s26 }
 0x140   :  { %p11374_p6 = por %p11373_p5, %p11372_p4 }
 0x142   :  { %p11375_p7 = pnand %p11374_p6, %p11368_p3 }
 0x144   :  { %11378 = shalt.err (!%p11375_p7)
}
 0x145   :  { %s13437_s1 = sld [smem:[#allocation64_spill]]  ;;  %s11618_s6 = smov [#allocation19]  }
 0x146   :  { %226 = dma.hbm_to_vmem [thread:$0]  %s11753_s20, 16, %s224_s21, [#allocation15]  }
 0x147   :  { %s244_s2 = sshll.u32 %s11618_s6, 4  ;;  %s11619_s17 = smov [#allocation22]   ;;  %s245_s2 = int_to_ptr.vmem [resolvable:$true] %s244_s2 }
 0x148   :  { %s268_s8 = sshll.u32 %s11619_s17, 4  ;;  %s269_s8 = int_to_ptr.vmem [resolvable:$true] %s268_s8 }
 0x14b   :  { %s11379_s5 = scalar_lea.hbm %s13437_s1, 12288 }
 0x14c   :  { %p11380_p8 = scmp.ne.s32.totalorder %s13437_s1, %s11379_s5  ;;  %p11383_p9 = scmp.lt.u32.totalorder %s11379_s5, %s13437_s1 }
 0x14e   :  { %p11385_p10 = pnand %p11383_p9, %p11380_p8 }
 0x150   :  { %11388 = shalt.err (!%p11385_p10)
}
 0x151   :  { %s11389_s0 = scalar_lea.vmem %s245_s2, 12288  ;;  %p11394_p12 = scmp.lt.s32.totalorder %s245_s2, %s245_s2 }
 0x152   :  { %p11390_p11 = scmp.ne.s32.totalorder %s245_s2, %s11389_s0  ;;  %p11395_p13 = scmp.lt.s32.totalorder %s11389_s0, %s11389_s0 }
 0x154   :  { %p11396_p0 = por %p11395_p13, %p11394_p12 }
 0x156   :  { %p11397_p1 = pnand %p11396_p0, %p11390_p11 }
 0x158   :  { %11400 = shalt.err (!%p11397_p1)
}
 0x159   :  { %s13438_s20 = sld [smem:[#allocation65_spill]] }
 0x15a   :  { %250 = dma.hbm_to_vmem [thread:$0]  %s13437_s1, 12288, %s245_s2, [#allocation18], %s11606_s30, %s11606_s30, %s11607_s12  }
 0x15f   :  { %s11401_s7 = scalar_lea.hbm %s13438_s20, 4096 }
 0x160   :  { %p11402_p2 = scmp.ne.s32.totalorder %s13438_s20, %s11401_s7  ;;  %p11405_p3 = scmp.lt.u32.totalorder %s11401_s7, %s13438_s20 }
 0x162   :  { %p11407_p4 = pnand %p11405_p3, %p11402_p2 }
 0x164   :  { %11410 = shalt.err (!%p11407_p4)
}
 0x165   :  { %s11411_s11 = scalar_lea.vmem %s269_s8, 4096  ;;  %p11416_p6 = scmp.lt.s32.totalorder %s269_s8, %s269_s8 }
 0x166   :  { %p11412_p5 = scmp.ne.s32.totalorder %s269_s8, %s11411_s11  ;;  %p11417_p7 = scmp.lt.s32.totalorder %s11411_s11, %s11411_s11 }
 0x168   :  { %p11418_p8 = por %p11417_p7, %p11416_p6 }
 0x16a   :  { %p11419_p9 = pnand %p11418_p8, %p11412_p5 }
 0x16c   :  { %11422 = shalt.err (!%p11419_p9)
}
 0x16d   :  { %s13439_s15 = sld [smem:[#allocation66_spill]]  ;;  %s11620_s16 = smov [#allocation25]  }
 0x16e   :  { %274 = dma.hbm_to_vmem [thread:$0]  %s13438_s20, 4096, %s269_s8, [#allocation21], %s11602_s10, %s11602_s10, %s11603_s4  }
 0x16f   :  { %s291_s9 = sshll.u32 %s11620_s16, 4  ;;  %s11621_s14 = smov [#allocation28]   ;;  %s292_s9 = int_to_ptr.vmem [resolvable:$true] %s291_s9 }
 0x170   :  { %s316_s19 = sshll.u32 %s11621_s14, 4  ;;  %s317_s19 = int_to_ptr.vmem [resolvable:$true] %s316_s19 }
 0x173   :  { %s11423_s24 = scalar_lea.hbm %s13439_s15, 16 }
 0x174   :  { %p11424_p10 = scmp.ne.s32.totalorder %s13439_s15, %s11423_s24  ;;  %p11427_p11 = scmp.lt.u32.totalorder %s11423_s24, %s13439_s15 }
 0x176   :  { %p11429_p12 = pnand %p11427_p11, %p11424_p10 }
 0x178   :  { %11432 = shalt.err (!%p11429_p12)
}
 0x179   :  { %s11433_s18 = scalar_lea.vmem %s292_s9, 16  ;;  %s11437_s21 = scalar_lea.vmem %s292_s9, 32 }
 0x17a   :  { %p11434_p13 = scmp.ne.s32.totalorder %s292_s9, %s11433_s18  ;;  %p11438_p0 = scmp.lt.s32.totalorder %s292_s9, %s292_s9 }
 0x17b   :  { %p11439_p1 = scmp.lt.s32.totalorder %s11437_s21, %s11433_s18 }
 0x17d   :  { %p11440_p2 = por %p11439_p1, %p11438_p0 }
 0x17f   :  { %p11441_p3 = pnand %p11440_p2, %p11434_p13 }
 0x181   :  { %11444 = shalt.err (!%p11441_p3)
}
 0x182   :  { %s13440_s10 = sld [smem:[#allocation69_spill]] }
 0x183   :  { %294 = dma.hbm_to_vmem [thread:$0]  %s13439_s15, 16, %s292_s9, [#allocation24]  }
 0x188   :  { %s11445_s4 = scalar_lea.hbm %s13440_s10, 2048 }
 0x189   :  { %p11446_p4 = scmp.ne.s32.totalorder %s13440_s10, %s11445_s4  ;;  %p11449_p5 = scmp.lt.u32.totalorder %s11445_s4, %s13440_s10 }
 0x18b   :  { %p11451_p6 = pnand %p11449_p5, %p11446_p4 }
 0x18d   :  { %11454 = shalt.err (!%p11451_p6)
}
 0x18e   :  { %s11455_s22 = scalar_lea.vmem %s317_s19, 2048  ;;  %p11460_p8 = scmp.lt.s32.totalorder %s317_s19, %s317_s19 }
 0x18f   :  { %p11456_p7 = scmp.ne.s32.totalorder %s317_s19, %s11455_s22  ;;  %p11461_p9 = scmp.lt.s32.totalorder %s11455_s22, %s11455_s22 }
 0x191   :  { %p11462_p10 = por %p11461_p9, %p11460_p8 }
 0x193   :  { %p11463_p11 = pnand %p11462_p10, %p11456_p7 }
 0x195   :  { %11466 = shalt.err (!%p11463_p11)
}
 0x196   :  { %s13441_s13 = sld [smem:[#allocation70_spill]]  ;;  %s11622_s23 = smov [#allocation31]  }
 0x197   :  { %322 = dma.hbm_to_vmem [thread:$0]  %s13440_s10, 2048, %s317_s19, [#allocation27], %s11606_s30, %s11606_s30, %s11607_s12  }
 0x198   :  { %s339_s27 = sshll.u32 %s11622_s23, 4  ;;  %s11623_s26 = smov [#allocation34]   ;;  %s340_s27 = int_to_ptr.vmem [resolvable:$true] %s339_s27 }
 0x199   :  { %s361_s28 = sshll.u32 %s11623_s26, 4  ;;  %s362_s28 = int_to_ptr.vmem [resolvable:$true] %s361_s28 }
 0x19c   :  { %s11467_s1 = scalar_lea.hbm %s13441_s13, 16 }
 0x19d   :  { %p11468_p12 = scmp.ne.s32.totalorder %s13441_s13, %s11467_s1  ;;  %p11471_p13 = scmp.lt.u32.totalorder %s11467_s1, %s13441_s13 }
 0x19f   :  { %p11473_p0 = pnand %p11471_p13, %p11468_p12 }
 0x1a1   :  { %11476 = shalt.err (!%p11473_p0)
}
 0x1a2   :  { %s11477_s6 = scalar_lea.vmem %s340_s27, 16  ;;  %s11481_s2 = scalar_lea.vmem %s340_s27, 32 }
 0x1a3   :  { %p11478_p1 = scmp.ne.s32.totalorder %s340_s27, %s11477_s6  ;;  %p11482_p2 = scmp.lt.s32.totalorder %s340_s27, %s340_s27 }
 0x1a4   :  { %p11483_p3 = scmp.lt.s32.totalorder %s11481_s2, %s11477_s6 }
 0x1a6   :  { %p11484_p4 = por %p11483_p3, %p11482_p2 }
 0x1a8   :  { %p11485_p5 = pnand %p11484_p4, %p11478_p1 }
 0x1aa   :  { %11488 = shalt.err (!%p11485_p5)
}
 0x1ab   :  { %342 = dma.hbm_to_vmem [thread:$0]  %s13441_s13, 16, %s340_s27, [#allocation30]  }
 0x1ac   :  { %s11489_s30 = scalar_lea.hbm %s11828_s25, 16 }
 0x1ad   :  { %p11490_p6 = scmp.ne.s32.totalorder %s11828_s25, %s11489_s30  ;;  %p11493_p7 = scmp.lt.u32.totalorder %s11489_s30, %s11828_s25 }
 0x1af   :  { %p11495_p8 = pnand %p11493_p7, %p11490_p6 }
 0x1b1   :  { %11498 = shalt.err (!%p11495_p8)
}
 0x1b2   :  { %s11499_s12 = scalar_lea.vmem %s362_s28, 16  ;;  %s11503_s17 = scalar_lea.vmem %s362_s28, 32 }
 0x1b3   :  { %p11500_p9 = scmp.ne.s32.totalorder %s362_s28, %s11499_s12  ;;  %p11504_p10 = scmp.lt.s32.totalorder %s362_s28, %s362_s28 }
 0x1b4   :  { %p11505_p11 = scmp.lt.s32.totalorder %s11503_s17, %s11499_s12 }
 0x1b6   :  { %p11506_p12 = por %p11505_p11, %p11504_p10 }
 0x1b8   :  { %p11507_p13 = pnand %p11506_p12, %p11500_p9 }
 0x1ba   :  { %11510 = shalt.err (!%p11507_p13)
}
 0x1bb   :  { %364 = dma.hbm_to_vmem [thread:$0]  %s11828_s25, 16, %s362_s28, [#allocation33]  }
 0x1bc   :  { %11533 = dma.done.wait [#allocation3], 1536  }
 0x1bd   :  { %11534 = vsyncadd [#allocation3], 4294965760 }
 0x1be   :  { %11535 = dma.done.wait [#allocation6], 768  }
 0x1bf   :  { %11536 = vsyncadd [#allocation6], 4294966528 }
 0x1c0   :  { %11537 = dma.done.wait [#allocation9], 1040  }
 0x1c1   :  { %11538 = vsyncadd [#allocation9], 4294966256 }
 0x1c2   :  { %11539 = dma.done.wait [#allocation12], 32  }
 0x1c3   :  { %11540 = vsyncadd [#allocation12], 4294967264 }
 0x1c4   :  { %11541 = dma.done.wait [#allocation15], 2064  }
 0x1c5   :  { %11542 = vsyncadd [#allocation15], 4294965232 }
 0x1c6   :  { %11543 = dma.done.wait [#allocation18], 12304  }
 0x1c7   :  { %11544 = vsyncadd [#allocation18], 4294954992 }
 0x1c8   :  { %11545 = dma.done.wait [#allocation21], 8192  }
 0x1c9   :  { %11546 = vsyncadd [#allocation21], 4294959104 }
 0x1ca   :  { %11547 = dma.done.wait [#allocation24], 32  }
 0x1cb   :  { %11548 = vsyncadd [#allocation24], 4294967264 }
 0x1cc   :  { %11549 = dma.done.wait [#allocation27], 8192  }
 0x1cd   :  { %11550 = vsyncadd [#allocation27], 4294959104 }
 0x1ce   :  { %11551 = dma.done.wait [#allocation30], 32  }
 0x1cf   :  { %11552 = vsyncadd [#allocation30], 4294967264 }
 0x1d0   :  { %11553 = dma.done.wait [#allocation33], 1040  }
 0x1d1   :  { %11554 = vsyncadd [#allocation33], 4294966256  ;;  %s13442_s25 = sld [smem:[#allocation48_spill]]  ;;  %v11624_v0 = vmov 0   ;;  %s13443_s8 = sld [smem:[#allocation49_spill]]  ;;  %v10269_v22 = vld [vmem:[#allocation2] sm:$0xff]  }
 0x1d2   :  { %653 = vmatprep.mubr.bf16.mxu0 %v11624_v0  ;;  %v10270_v24 = vld [vmem:[#allocation2 + $0x8] sm:$0xff]   ;;  %v10271_v25 = vld [vmem:[#allocation2 + $0x10] sm:$0xff]   ;;  %v10272_v26 = vld [vmem:[#allocation2 + $0x18] sm:$0xff]   ;;  %s13444_s5 = sld [smem:[#allocation50_spill]]  ;;  %vm967_vm0 = vcmask 523264   ;;  %s13445_s0 = sld [smem:[#allocation51_spill]] }
 0x1d3   :  { %v10273_v27 = vld [vmem:[#allocation2 + $0x20] sm:$0xff]   ;;  %v10274_v28 = vld [vmem:[#allocation2 + $0x28] sm:$0xff]   ;;  %v10275_v29 = vld [vmem:[#allocation2 + $0x30] sm:$0xff]   ;;  %s13446_s20 = sld [smem:[#allocation52_spill]]  ;;  %s13447_s7 = sld [smem:[#allocation54_spill]]  ;;  %vm1758_vm1 = vcmask 64512  }
 0x1d4   :  { %v10276_v30 = vld [vmem:[#allocation2 + $0x38] sm:$0xff]   ;;  %v10277_v31 = vld [vmem:[#allocation2 + $0x40] sm:$0xff]   ;;  %v10278_v32 = vld [vmem:[#allocation2 + $0x48] sm:$0xff]   ;;  %s13448_s11 = sld [smem:[#allocation53_spill]]  ;;  %s13449_s15 = sld [smem:[#allocation55_spill]] }
 0x1d5   :  { %v10279_v33 = vld [vmem:[#allocation2 + $0x50] sm:$0xff]   ;;  %v10280_v34 = vld [vmem:[#allocation2 + $0x58] sm:$0xff]   ;;  %s13450_s16 = sld [smem:[#allocation56_spill]]  ;;  %s13451_s9 = sld [smem:[#allocation58_spill]] }
 0x1d6   :  { %s13452_s14 = sld [smem:[#allocation57_spill]]  ;;  %s13453_s19 = sld [smem:[#allocation59_spill]] }
 0x1d7   :  { %v10245_v1 = vld [vmem:[%s13442_s25 + $0x4] ss:$8 sps:$4 sm:$0xff]   ;;  %v10247_v2 = vld [vmem:[%s13442_s25] ss:$8 sps:$4 sm:$0xff]   ;;  %v10248_v3 = vld [vmem:[%s13442_s25 + $0x14] ss:$8 sps:$4 sm:$0xff]  }
 0x1d8   :  { %621 = vmatprep.subr.bf16.mxu0 %v10245_v1  ;;  %v10250_v4 = vld [vmem:[%s13442_s25 + $0x10] ss:$8 sps:$4 sm:$0xff]   ;;  %v10251_v5 = vld [vmem:[%s13442_s25 + $0x24] ss:$8 sps:$4 sm:$0xff]   ;;  %v10253_v6 = vld [vmem:[%s13442_s25 + $0x20] ss:$8 sps:$4 sm:$0xff]  }
 0x1d9   :  { %622 = vmatpush1.bf16.msra.mxu0 %v10247_v2  ;;  %v10254_v7 = vld [vmem:[%s13442_s25 + $0x34] ss:$8 sps:$4 sm:$0xff]   ;;  %v10256_v8 = vld [vmem:[%s13442_s25 + $0x30] ss:$8 sps:$4 sm:$0xff]   ;;  %v10257_v9 = vld [vmem:[%s13442_s25 + $0x44] ss:$8 sps:$4 sm:$0xff]  }
 0x1da   :  { %623 = vmatprep.subr.bf16.mxu0 %v10248_v3  ;;  %v10259_v10 = vld [vmem:[%s13442_s25 + $0x40] ss:$8 sps:$4 sm:$0xff]   ;;  %v10260_v11 = vld [vmem:[%s13442_s25 + $0x54] ss:$8 sps:$4 sm:$0xff]   ;;  %v10262_v12 = vld [vmem:[%s13442_s25 + $0x50] ss:$8 sps:$4 sm:$0xff]  }
 0x1db   :  { %v10263_v13 = vld [vmem:[%s13442_s25 + $0x64] ss:$8 sps:$4 sm:$0xff]   ;;  %v10265_v14 = vld [vmem:[%s13442_s25 + $0x60] ss:$8 sps:$4 sm:$0xff]   ;;  %v10266_v15 = vld [vmem:[%s13442_s25 + $0x74] ss:$8 sps:$4 sm:$0xff]  }
 0x1dc   :  { %v10281_v16 = vld [vmem:[%s13443_s8 + $0xc4] ss:$8 sps:$4 sm:$0xff]   ;;  %v10283_v17 = vld [vmem:[%s13443_s8 + $0xc0] ss:$8 sps:$4 sm:$0xff]   ;;  %v10284_v18 = vld [vmem:[%s13443_s8 + $0xd4] ss:$8 sps:$4 sm:$0xff]  }
 0x1dd   :  { %624 = vmatpush1.bf16.msra.mxu0 %v10250_v4  ;;  %v10268_v19 = vld [vmem:[%s13442_s25 + $0x70] ss:$8 sps:$4 sm:$0xff]   ;;  %980 = vmatprep.subr.bf16.mxu1 %v10281_v16  ;;  %v10287_v21 = vld [vmem:[%s13443_s8 + $0xe4] ss:$8 sps:$4 sm:$0xff]   ;;  %v10289_v23 = vld [vmem:[%s13443_s8 + $0xe0] ss:$8 sps:$4 sm:$0xff]  }
 0x1de   :  { %625 = vmatprep.subr.bf16.mxu0 %v10251_v5  ;;  %981 = vmatpush1.bf16.msra.mxu1 %v10283_v17  ;;  %v10286_v20 = vld [vmem:[%s13443_s8 + $0xd0] ss:$8 sps:$4 sm:$0xff]   ;;  %v10290_v35 = vld [vmem:[%s13443_s8 + $0xf4] ss:$8 sps:$4 sm:$0xff]   ;;  %v10293_v37 = vld [vmem:[%s13443_s8 + $0x104] ss:$8 sps:$4 sm:$0xff]  }
 0x1df   :  { %982 = vmatprep.subr.bf16.mxu1 %v10284_v18  ;;  %v10292_v36 = vld [vmem:[%s13443_s8 + $0xf0] ss:$8 sps:$4 sm:$0xff]   ;;  %v10295_v38 = vld [vmem:[%s13443_s8 + $0x100] ss:$8 sps:$4 sm:$0xff]   ;;  %v10296_v39 = vld [vmem:[%s13443_s8 + $0x114] ss:$8 sps:$4 sm:$0xff]  }
 0x1e0   :  { %v10298_v40 = vld [vmem:[%s13443_s8 + $0x110] ss:$8 sps:$4 sm:$0xff]   ;;  %v10299_v41 = vld [vmem:[%s13443_s8 + $0x124] ss:$8 sps:$4 sm:$0xff]   ;;  %v10301_v42 = vld [vmem:[%s13443_s8 + $0x120] ss:$8 sps:$4 sm:$0xff]  }
 0x1e1   :  { %626 = vmatpush1.bf16.msra.mxu0 %v10253_v6  ;;  %v10302_v43 = vld [vmem:[%s13443_s8 + $0x134] ss:$8 sps:$4 sm:$0xff]   ;;  %v10304_v44 = vld [vmem:[%s13443_s8 + $0x130] ss:$8 sps:$4 sm:$0xff]   ;;  %v10305_v45 = vld [vmem:[%s13443_s8 + $0x144] ss:$8 sps:$4 sm:$0xff]  }
 0x1e2   :  { %627 = vmatprep.subr.bf16.mxu0 %v10254_v7  ;;  %983 = vmatpush1.bf16.msra.mxu1 %v10286_v20  ;;  %v10307_v46 = vld [vmem:[%s13443_s8 + $0x140] ss:$8 sps:$4 sm:$0xff]   ;;  %v10308_v47 = vld [vmem:[%s13443_s8 + $0x154] ss:$8 sps:$4 sm:$0xff]   ;;  %v10310_v48 = vld [vmem:[%s13443_s8 + $0x150] ss:$8 sps:$4 sm:$0xff]  }
 0x1e3   :  { %984 = vmatprep.subr.bf16.mxu1 %v10287_v21  ;;  %v10311_v49 = vld [vmem:[%s13443_s8 + $0x164] ss:$8 sps:$4 sm:$0xff]   ;;  %v10313_v50 = vld [vmem:[%s13443_s8 + $0x160] ss:$8 sps:$4 sm:$0xff]   ;;  %v10314_v51 = vld [vmem:[%s13443_s8 + $0x174] ss:$8 sps:$4 sm:$0xff]  }
 0x1e4   :  { %v10316_v52 = vld [vmem:[%s13443_s8 + $0x170] ss:$8 sps:$4 sm:$0xff]   ;;  %v10319_v53 = vld [vmem:[%s13443_s8 + $0x4] ss:$8 sps:$4 sm:$0xff]   ;;  %s13454_s24 = sld [smem:[#allocation61_spill]]  ;;  %s13455_s18 = sld [smem:[#allocation60_spill]] }
 0x1e5   :  { %628 = vmatpush1.bf16.msra.mxu0 %v10256_v8  ;;  %v1589_v16 = vld [vmem:[%s13444_s5 + $0x88] sm:$0xff]  ;;  %v1572_v17 = vld [vmem:[%s13444_s5] sm:$0xff]  ;;  %v1590_v21 = vld [vmem:[%s13444_s5 + $0x90] sm:$0xff]  ;;  %s13456_s21 = sld [smem:[#allocation62_spill]]  ;;  %s13457_s10 = sld [smem:[#allocation63_spill]] }
 0x1e6   :  { %629 = vmatprep.subr.bf16.mxu0 %v10257_v9  ;;  %985 = vmatpush1.bf16.msra.mxu1 %v10289_v23  ;;  %v1573_v20 = vld [vmem:[%s13444_s5 + $0x8] sm:$0xff]  ;;  %s13458_s4 = sld [smem:[#allocation67_spill]]  ;;  %s13459_s22 = sld [smem:[#allocation68_spill]] }
 0x1e7   :  { %986 = vmatprep.subr.bf16.mxu1 %v10290_v35  ;;  %v10317_v35 = vld [vmem:[%s13443_s8] ss:$8 sps:$4 sm:$0xff]   ;;  %s11628_s13 = smov 118   ;;  %s11629_s23 = smov [#allocation35]  }
 0x1e8   :  { %s8022_s27 = sshll.u32 %s11629_s23, 4  ;;  %s8023_s27 = int_to_ptr.vmem [resolvable:$true] %s8022_s27 }
 0x1e9   :  { %630 = vmatpush1.bf16.msra.mxu0 %v10259_v10  ;;  %p11516_p1 = scmp.lt.s32.totalorder %s8023_s27, %s8023_s27 }
 0x1ea   :  { %631 = vmatprep.subr.bf16.mxu0 %v10260_v11  ;;  %987 = vmatpush1.bf16.msra.mxu1 %v10292_v36 }
 0x1eb   :  { %988 = vmatprep.subr.bf16.mxu1 %v10293_v37  ;;  %v1576_v37 = vld [vmem:[%s13444_s5 + $0x20] sm:$0xff] }
 0x1ed   :  { %632 = vmatpush1.bf16.msra.mxu0 %v10262_v12 }
 0x1ee   :  { %633 = vmatprep.subr.bf16.mxu0 %v10263_v13  ;;  %989 = vmatpush1.bf16.msra.mxu1 %v10295_v38  ;;  %v1577_v38 = vld [vmem:[%s13444_s5 + $0x28] sm:$0xff] }
 0x1ef   :  { %990 = vmatprep.subr.bf16.mxu1 %v10296_v39  ;;  %v10322_v39 = vld [vmem:[%s13443_s8 + $0x14] ss:$8 sps:$4 sm:$0xff]  }
 0x1f1   :  { %634 = vmatpush1.bf16.msra.mxu0 %v10265_v14 }
 0x1f2   :  { %635 = vmatprep.subr.bf16.mxu0 %v10266_v15  ;;  %991 = vmatpush1.bf16.msra.mxu1 %v10298_v40  ;;  %v1588_v15 = vld [vmem:[%s13444_s5 + $0x80] sm:$0xff]  ;;  %v1594_v40 = vld [vmem:[%s13444_s5 + $0xb0] sm:$0xff] }
 0x1f3   :  { %992 = vmatprep.subr.bf16.mxu1 %v10299_v41  ;;  %v1595_v41 = vld [vmem:[%s13444_s5 + $0xb8] sm:$0xff] }
 0x1f5   :  { %636 = vmatpush1.bf16.msra.mxu0 %v10268_v19  ;;  %v12058_v19 = vpack.c.bf16 %v1589_v16, %v1588_v15  ;;  %v10326_v16 = vld [vmem:[%s13443_s8 + $0x30] ss:$8 sps:$4 sm:$0xff]  }
 0x1f6   :  { %993 = vmatpush1.bf16.msra.mxu1 %v10301_v42  ;;  %v12086_v42 = vpack.c.bf16 %v1577_v38, %v1576_v37  ;;  %v10335_v38 = vld [vmem:[%s13443_s8 + $0x60] ss:$8 sps:$4 sm:$0xff]  }
 0x1f7   :  { %994 = vmatprep.subr.bf16.mxu1 %v10302_v43  ;;  %9565 = vmatprep.subr.bf16.mxu0 %v12058_v19 }
 0x1f8   :  { %654 = vmatmul.mubr.bf16.vlgmr.msra.gmra.mrb[0].mxu0 %v10269_v22  ;;  %v1591_v22 = vld [vmem:[%s13444_s5 + $0x98] sm:$0xff] }
 0x1f9   :  { %663 = vmatprep.mubr.bf16.mxu0 %v11624_v0 }
 0x1fa   :  { %995 = vmatpush1.bf16.msra.mxu1 %v10304_v44  ;;  %v10320_v44 = vld [vmem:[%s13443_s8 + $0x10] ss:$8 sps:$4 sm:$0xff]  }
 0x1fb   :  { %996 = vmatprep.subr.bf16.mxu1 %v10305_v45  ;;  %v12090_v45 = vpack.c.bf16 %v1595_v41, %v1594_v40  ;;  %v10338_v40 = vld [vmem:[%s13443_s8 + $0x70] ss:$8 sps:$4 sm:$0xff]  }
 0x1fe   :  { %997 = vmatpush1.bf16.msra.mxu1 %v10307_v46 }
 0x1ff   :  { %998 = vmatprep.subr.bf16.mxu1 %v10308_v47  ;;  %v10325_v47 = vld [vmem:[%s13443_s8 + $0x24] ss:$8 sps:$4 sm:$0xff]  }
 0x200   :  { %664 = vmatmul.mubr.bf16.gmra.mrb[4].mxu0 %v10270_v24  ;;  %v12063_v24 = vpack.c.bf16 %v1573_v20, %v1572_v17 }
 0x201   :  { %673 = vmatprep.mubr.bf16.mxu0 %v11624_v0 }
 0x202   :  { %999 = vmatpush1.bf16.msra.mxu1 %v10310_v48  ;;  %9567 = vmatpush3.bf16.msra.mxu0 %v12063_v24 }
 0x203   :  { %1000 = vmatprep.subr.bf16.mxu1 %v10311_v49 }
 0x206   :  { %1001 = vmatpush1.bf16.msra.mxu1 %v10313_v50 }
 0x207   :  { %1002 = vmatprep.subr.bf16.mxu1 %v10314_v51 }
 0x208   :  { %674 = vmatmul.mubr.bf16.gmra.mrb[8].mxu0 %v10271_v25  ;;  %v12065_v25 = vpack.c.bf16 %v1591_v22, %v1590_v21 }
 0x209   :  { %683 = vmatprep.mubr.bf16.mxu0 %v11624_v0 }
 0x20a   :  { %1003 = vmatpush1.bf16.msra.mxu1 %v10316_v52  ;;  %9569 = vmatprep.subr.bf16.mxu0 %v12065_v25  ;;  %v10323_v52 = vld [vmem:[%s13443_s8 + $0x20] ss:$8 sps:$4 sm:$0xff]  }
 0x20b   :  { %1185 = vmatprep.subr.bf16.mxu1 %v10319_v53  ;;  %v10328_v53 = vld [vmem:[%s13443_s8 + $0x34] ss:$8 sps:$4 sm:$0xff]  }
 0x210   :  { %684 = vmatmul.mubr.bf16.gmra.mrb[12].mxu0 %v10272_v26  ;;  %v1574_v26 = vld [vmem:[%s13444_s5 + $0x10] sm:$0xff] }
 0x211   :  { %693 = vmatprep.mubr.bf16.mxu0 %v11624_v0 }
 0x218   :  { %694 = vmatmul.mubr.bf16.gmra.mrb[16].mxu0 %v10273_v27  ;;  %v1575_v27 = vld [vmem:[%s13444_s5 + $0x18] sm:$0xff] }
 0x219   :  { %703 = vmatprep.mubr.bf16.mxu0 %v11624_v0 }
 0x220   :  { %704 = vmatmul.mubr.bf16.gmra.mrb[20].mxu0 %v10274_v28  ;;  %v1592_v28 = vld [vmem:[%s13444_s5 + $0xa0] sm:$0xff] }
 0x221   :  { %713 = vmatprep.mubr.bf16.mxu0 %v11624_v0 }
 0x228   :  { %714 = vmatmul.mubr.bf16.gmra.mrb[24].mxu0 %v10275_v29 }
 0x229   :  { %723 = vmatprep.mubr.bf16.mxu0 %v11624_v0 }
 0x230   :  { %724 = vmatmul.mubr.bf16.gmra.mrb[28].mxu0 %v10276_v30  ;;  %v1593_v30 = vld [vmem:[%s13444_s5 + $0xa8] sm:$0xff] }
 0x231   :  { %733 = vmatprep.mubr.bf16.mxu0 %v11624_v0  ;;  %v12077_v36 = vpack.c.bf16 %v1593_v30, %v1592_v28 }
 0x238   :  { %734 = vmatmul.mubr.bf16.gmra.mrb[32].mxu0 %v10277_v31 }
 0x239   :  { %743 = vmatprep.mubr.bf16.mxu0 %v11624_v0 }
 0x240   :  { %744 = vmatmul.mubr.bf16.gmra.mrb[36].mxu0 %v10278_v32 }
 0x241   :  { %753 = vmatprep.mubr.bf16.mxu0 %v11624_v0 }
 0x248   :  { %754 = vmatmul.mubr.bf16.gmra.mrb[40].mxu0 %v10279_v33  ;;  %v12073_v33 = vpack.c.bf16 %v1575_v27, %v1574_v26  ;;  %v10329_v26 = vld [vmem:[%s13443_s8 + $0x40] ss:$8 sps:$4 sm:$0xff]   ;;  %v10334_v27 = vld [vmem:[%s13443_s8 + $0x54] ss:$8 sps:$4 sm:$0xff]  }
 0x249   :  { %763 = vmatprep.mubr.bf16.mxu0 %v11624_v0 }
 0x24a   :  { %9571 = vmatpush3.bf16.msra.mxu0 %v12073_v33 }
 0x24b   :  { %9573 = vmatprep.subr.bf16.mxu0 %v12077_v36 }
 0x24e   :  { %9575 = vmatpush3.bf16.msra.mxu0 %v12086_v42 }
 0x24f   :  { %9577 = vmatprep.subr.bf16.mxu0 %v12090_v45 }
 0x250   :  { %764 = vmatmul.mubr.bf16.gmra.mrb[44].mxu0 %v10280_v34 }
 0x2cb   :  { %v12007_v54 = vpop.f32.mrb[0].mxu0 }
 0x2cc   :  { %v12009_v55 = vpop.f32.mrb[1].mxu0 }
 0x2cd   :  { %v12011_v56 = vpop.f32.mrb[2].mxu0 }
 0x2ce   :  { %v774_v57 = vpack.c.bf16 %v12011_v56, %v12007_v54  ;;  %v12015_v58 = vpop.f32.mrb[3].mxu0  ;;  %v10359_v56 = vld [vmem:[%s13443_s8 + $0x1a0] ss:$8 sps:$4 sm:$0xff]  }
 0x2cf   :  { %v775_v59 = vpack.c.bf16 %v12015_v58, %v12009_v55  ;;  %v10341_v55 = vld [vmem:[%s13443_s8 + $0x80] ss:$8 sps:$4 sm:$0xff]  }
 0x2d3   :  { %v12019_v60 = vpop.f32.mrb[4].mxu0 }
 0x2d4   :  { %v12021_v61 = vpop.f32.mrb[5].mxu0 }
 0x2d5   :  { %v12023_v62 = vpop.f32.mrb[6].mxu0 }
 0x2d6   :  { %v776_v63 = vpack.c.bf16 %v12023_v62, %v12019_v60  ;;  %v12027_v1 = vpop.f32.mrb[7].mxu0  ;;  %v10368_v60 = vld [vmem:[%s13443_s8 + $0x1d0] ss:$8 sps:$4 sm:$0xff]   ;;  %v10373_v62 = vld [vmem:[%s13443_s8 + $0x1e4] ss:$8 sps:$4 sm:$0xff]  }
 0x2d7   :  { %v777_v2 = vpack.c.bf16 %v12027_v1, %v12021_v61  ;;  %v10364_v61 = vld [vmem:[%s13443_s8 + $0x1b4] ss:$8 sps:$4 sm:$0xff]   ;;  %v10362_v1 = vld [vmem:[%s13443_s8 + $0x1b0] ss:$8 sps:$4 sm:$0xff]  }
 0x2db   :  { %v12031_v3 = vpop.f32.mrb[8].mxu0 }
 0x2dc   :  { %v12033_v4 = vpop.f32.mrb[9].mxu0 }
 0x2dd   :  { %v12035_v5 = vpop.f32.mrb[10].mxu0 }
 0x2de   :  { %v778_v6 = vpack.c.bf16 %v12035_v5, %v12031_v3  ;;  %v12039_v7 = vpop.f32.mrb[11].mxu0  ;;  %v10374_v3 = vld [vmem:[%s13443_s8 + $0x1f0] ss:$8 sps:$4 sm:$0xff]   ;;  %v10379_v5 = vld [vmem:[%s13443_s8 + $0x204] ss:$8 sps:$4 sm:$0xff]  }
 0x2df   :  { %v779_v8 = vpack.c.bf16 %v12039_v7, %v12033_v4  ;;  %v10376_v4 = vld [vmem:[%s13443_s8 + $0x1f4] ss:$8 sps:$4 sm:$0xff]  }
 0x2e0   :  { %v10382_v7 = vld [vmem:[%s13443_s8 + $0x214] ss:$8 sps:$4 sm:$0xff]  }
 0x2e3   :  { %v12043_v9 = vpop.f32.mrb[12].mxu0 }
 0x2e4   :  { %v12045_v10 = vpop.f32.mrb[13].mxu0 }
 0x2e5   :  { %v12047_v11 = vpop.f32.mrb[14].mxu0 }
 0x2e6   :  { %v780_v12 = vpack.c.bf16 %v12047_v11, %v12043_v9  ;;  %v12051_v13 = vpop.f32.mrb[15].mxu0  ;;  %v10385_v9 = vld [vmem:[%s13443_s8 + $0x224] ss:$8 sps:$4 sm:$0xff]   ;;  %v10388_v11 = vld [vmem:[%s13443_s8 + $0x234] ss:$8 sps:$4 sm:$0xff]  }
 0x2e7   :  { %v781_v14 = vpack.c.bf16 %v12051_v13, %v12045_v10  ;;  %v10383_v10 = vld [vmem:[%s13443_s8 + $0x220] ss:$8 sps:$4 sm:$0xff]   ;;  %v1578_v13 = vld [vmem:[%s13444_s5 + $0x30] sm:$0xff] }
 0x2eb   :  { %v695_v18 = vpop.f32.mrb[16].mxu0 }
 0x2ec   :  { %v697_v23 = vpop.f32.mrb[17].mxu0 }
 0x2ed   :  { %v699_v29 = vpop.f32.mrb[18].mxu0 }
 0x2ee   :  { %v782_v31 = vpack.c.bf16 %v699_v29, %v695_v18  ;;  %v701_v32 = vpop.f32.mrb[19].mxu0  ;;  %v10331_v18 = vld [vmem:[%s13443_s8 + $0x44] ss:$8 sps:$4 sm:$0xff]   ;;  %v10332_v29 = vld [vmem:[%s13443_s8 + $0x50] ss:$8 sps:$4 sm:$0xff]  }
 0x2ef   :  { %v783_v34 = vpack.c.bf16 %v701_v32, %v697_v23 }
 0x2f1   :  { %8159 = vmatprep.mubr.msk.bf16.mxu1 %vm967_vm0, %v783_v34 }
 0x2f2   :  { %1013 = vmatmul.mubr.bf16.vlgmr.msra.gmra.mrb[0].mxu1 %v782_v31  ;;  %v10337_v31 = vld [vmem:[%s13443_s8 + $0x64] ss:$8 sps:$4 sm:$0xff]  }
 0x2f3   :  { %1186 = vmatpush1.bf16.msra.mxu1 %v10317_v35  ;;  %v705_v43 = vpop.f32.mrb[20].mxu0 }
 0x2f4   :  { %v707_v46 = vpop.f32.mrb[21].mxu0  ;;  %1187 = vmatprep.subr.bf16.mxu1 %v10322_v39  ;;  %v10340_v39 = vld [vmem:[%s13443_s8 + $0x74] ss:$8 sps:$4 sm:$0xff]  }
 0x2f5   :  { %v709_v48 = vpop.f32.mrb[22].mxu0 }
 0x2f6   :  { %v784_v49 = vpack.c.bf16 %v709_v48, %v705_v43  ;;  %v711_v50 = vpop.f32.mrb[23].mxu0  ;;  %v10343_v43 = vld [vmem:[%s13443_s8 + $0x84] ss:$8 sps:$4 sm:$0xff]  }
 0x2f7   :  { %v785_v51 = vpack.c.bf16 %v711_v50, %v707_v46  ;;  %1188 = vmatpush1.bf16.msra.mxu1 %v10320_v44 }
 0x2f8   :  { %1189 = vmatprep.subr.bf16.mxu1 %v10325_v47 }
 0x2f9   :  { %8160 = vmatprep.mubr.msk.bf16.mxu1 %vm967_vm0, %v785_v51  ;;  %v10349_v51 = vld [vmem:[%s13443_s8 + $0xa4] ss:$8 sps:$4 sm:$0xff]  }
 0x2fa   :  { %1023 = vmatmul.mubr.bf16.gmra.mrb[4].mxu1 %v784_v49  ;;  %v10344_v49 = vld [vmem:[%s13443_s8 + $0x90] ss:$8 sps:$4 sm:$0xff]  }
 0x2fb   :  { %1190 = vmatpush1.bf16.msra.mxu1 %v10323_v52  ;;  %v715_v15 = vpop.f32.mrb[24].mxu0 }
 0x2fc   :  { %v717_v17 = vpop.f32.mrb[25].mxu0  ;;  %1191 = vmatprep.subr.bf16.mxu1 %v10328_v53 }
 0x2fd   :  { %v719_v20 = vpop.f32.mrb[26].mxu0 }
 0x2fe   :  { %v786_v21 = vpack.c.bf16 %v719_v20, %v715_v15  ;;  %v721_v22 = vpop.f32.mrb[27].mxu0  ;;  %v10352_v20 = vld [vmem:[%s13443_s8 + $0xb4] ss:$8 sps:$4 sm:$0xff]  }
 0x2ff   :  { %v787_v23 = vpack.c.bf16 %v721_v22, %v717_v17  ;;  %1192 = vmatpush1.bf16.msra.mxu1 %v10326_v16  ;;  %v10347_v17 = vld [vmem:[%s13443_s8 + $0xa0] ss:$8 sps:$4 sm:$0xff]  }
 0x300   :  { %1193 = vmatprep.subr.bf16.mxu1 %v10331_v18 }
 0x301   :  { %8161 = vmatprep.mubr.msk.bf16.mxu1 %vm967_vm0, %v787_v23  ;;  %v10355_v23 = vld [vmem:[%s13443_s8 + $0x184] ss:$8 sps:$4 sm:$0xff]  }
 0x302   :  { %1033 = vmatmul.mubr.bf16.gmra.mrb[8].mxu1 %v786_v21  ;;  %v10350_v21 = vld [vmem:[%s13443_s8 + $0xb0] ss:$8 sps:$4 sm:$0xff]  }
 0x303   :  { %1194 = vmatpush1.bf16.msra.mxu1 %v10329_v26  ;;  %v725_v28 = vpop.f32.mrb[28].mxu0 }
 0x304   :  { %v727_v30 = vpop.f32.mrb[29].mxu0  ;;  %1195 = vmatprep.subr.bf16.mxu1 %v10334_v27 }
 0x305   :  { %v729_v32 = vpop.f32.mrb[30].mxu0 }
 0x306   :  { %v788_v34 = vpack.c.bf16 %v729_v32, %v725_v28  ;;  %v731_v35 = vpop.f32.mrb[31].mxu0  ;;  %v10358_v32 = vld [vmem:[%s13443_s8 + $0x194] ss:$8 sps:$4 sm:$0xff]  }
 0x307   :  { %v789_v37 = vpack.c.bf16 %v731_v35, %v727_v30  ;;  %1196 = vmatpush1.bf16.msra.mxu1 %v10332_v29  ;;  %v10353_v30 = vld [vmem:[%s13443_s8 + $0x180] ss:$8 sps:$4 sm:$0xff]  }
 0x308   :  { %1197 = vmatprep.subr.bf16.mxu1 %v10337_v31 }
 0x309   :  { %8162 = vmatprep.mubr.msk.bf16.mxu1 %vm967_vm0, %v789_v37  ;;  %v10361_v37 = vld [vmem:[%s13443_s8 + $0x1a4] ss:$8 sps:$4 sm:$0xff]  }
 0x30a   :  { %1043 = vmatmul.mubr.bf16.gmra.mrb[12].mxu1 %v788_v34  ;;  %v10356_v34 = vld [vmem:[%s13443_s8 + $0x190] ss:$8 sps:$4 sm:$0xff]  }
 0x30b   :  { %1198 = vmatpush1.bf16.msra.mxu1 %v10335_v38  ;;  %8187 = vmatprep.mubr.msk.bf16.mxu1 %vm967_vm0, %v775_v59  ;;  %v12113_v41 = vpop.f32.mrb[32].mxu0  ;;  %v10346_v59 = vld [vmem:[%s13443_s8 + $0x94] ss:$8 sps:$4 sm:$0xff]  }
 0x30c   :  { %1199 = vmatprep.subr.bf16.mxu1 %v10340_v39  ;;  %v12116_v44 = vpop.f32.mrb[33].mxu0 }
 0x30d   :  { %v12118_v46 = vpop.f32.mrb[34].mxu0 }
 0x30e   :  { %v790_v47 = vpack.c.bf16 %v12118_v46, %v12113_v41  ;;  %v12122_v48 = vpop.f32.mrb[35].mxu0  ;;  %v1597_v46 = vld [vmem:[%s13444_s5 + $0xc8] sm:$0xff] }
 0x30f   :  { %1200 = vmatpush1.bf16.msra.mxu1 %v10338_v40  ;;  %v791_v58 = vpack.c.bf16 %v12122_v48, %v12116_v44  ;;  %v1596_v44 = vld [vmem:[%s13444_s5 + $0xc0] sm:$0xff] }
 0x310   :  { %1201 = vmatprep.subr.bf16.mxu1 %v10343_v43  ;;  %v10365_v43 = vld [vmem:[%s13443_s8 + $0x1c0] ss:$8 sps:$4 sm:$0xff]   ;;  %v12236_v48 = vpack.c.bf16 %v1597_v46, %v1596_v44 }
 0x313   :  { %1202 = vmatpush1.bf16.msra.mxu1 %v10341_v55  ;;  %v12129_v50 = vpop.f32.mrb[36].mxu0  ;;  %v10370_v55 = vld [vmem:[%s13443_s8 + $0x1d4] ss:$8 sps:$4 sm:$0xff]  }
 0x314   :  { %1203 = vmatprep.subr.bf16.mxu1 %v10346_v59  ;;  %v12132_v52 = vpop.f32.mrb[37].mxu0 }
 0x315   :  { %v12134_v53 = vpop.f32.mrb[38].mxu0 }
 0x316   :  { %v792_v15 = vpack.c.bf16 %v12134_v53, %v12129_v50  ;;  %v12138_v16 = vpop.f32.mrb[39].mxu0  ;;  %v1599_v50 = vld [vmem:[%s13444_s5 + $0xd8] sm:$0xff] }
 0x317   :  { %1204 = vmatpush1.bf16.msra.mxu1 %v10344_v49  ;;  %v793_v18 = vpack.c.bf16 %v12138_v16, %v12132_v52  ;;  %v1598_v49 = vld [vmem:[%s13444_s5 + $0xd0] sm:$0xff]  ;;  %v1583_v53 = vld [vmem:[%s13444_s5 + $0x58] sm:$0xff]  ;;  %v1600_v16 = vld [vmem:[%s13444_s5 + $0xe0] sm:$0xff] }
 0x318   :  { %1205 = vmatprep.subr.bf16.mxu1 %v10349_v51  ;;  %v12245_v51 = vpack.c.bf16 %v1599_v50, %v1598_v49  ;;  %v1582_v52 = vld [vmem:[%s13444_s5 + $0x50] sm:$0xff] }
 0x31b   :  { %1206 = vmatpush1.bf16.msra.mxu1 %v10347_v17  ;;  %v12145_v22 = vpop.f32.mrb[40].mxu0  ;;  %v1601_v17 = vld [vmem:[%s13444_s5 + $0xe8] sm:$0xff] }
 0x31c   :  { %1207 = vmatprep.subr.bf16.mxu1 %v10352_v20  ;;  %v12148_v26 = vpop.f32.mrb[41].mxu0  ;;  %v1584_v20 = vld [vmem:[%s13444_s5 + $0x60] sm:$0xff] }
 0x31d   :  { %v12150_v27 = vpop.f32.mrb[42].mxu0 }
 0x31e   :  { %v794_v28 = vpack.c.bf16 %v12150_v27, %v12145_v22  ;;  %v12154_v29 = vpop.f32.mrb[43].mxu0 }
 0x31f   :  { %1208 = vmatpush1.bf16.msra.mxu1 %v10350_v21  ;;  %v795_v31 = vpack.c.bf16 %v12154_v29, %v12148_v26  ;;  %v1585_v21 = vld [vmem:[%s13444_s5 + $0x68] sm:$0xff]  ;;  %v1603_v26 = vld [vmem:[%s13444_s5 + $0xf8] sm:$0xff] }
 0x320   :  { %1415 = vmatprep.subr.bf16.mxu1 %v10355_v23  ;;  %v12259_v22 = vpack.c.bf16 %v1585_v21, %v1584_v20  ;;  %v1602_v23 = vld [vmem:[%s13444_s5 + $0xf0] sm:$0xff]  ;;  %v1587_v29 = vld [vmem:[%s13444_s5 + $0x78] sm:$0xff] }
 0x321   :  { %v12265_v27 = vpack.c.bf16 %v1603_v26, %v1602_v23 }
 0x322   :  { %1218 = vmatmul.mubr.bf16.vlgmr.msra.gmra.mrb[0].mxu1 %v774_v57 }
 0x323   :  { %8188 = vmatprep.mubr.msk.bf16.mxu1 %vm967_vm0, %v777_v2  ;;  %1416 = vmatpush1.bf16.msra.mxu1 %v10353_v30  ;;  %v765_v35 = vpop.f32.mrb[44].mxu0  ;;  %v10367_v2 = vld [vmem:[%s13443_s8 + $0x1c4] ss:$8 sps:$4 sm:$0xff]  }
 0x324   :  { %1417 = vmatprep.subr.bf16.mxu1 %v10358_v32  ;;  %v767_v38 = vpop.f32.mrb[45].mxu0 }
 0x325   :  { %v769_v39 = vpop.f32.mrb[46].mxu0 }
 0x326   :  { %v796_v40 = vpack.c.bf16 %v769_v39, %v765_v35  ;;  %v771_v54 = vpop.f32.mrb[47].mxu0 }
 0x327   :  { %1418 = vmatpush1.bf16.msra.mxu1 %v10356_v34  ;;  %v797_v57 = vpack.c.bf16 %v771_v54, %v767_v38 }
 0x328   :  { %1419 = vmatprep.subr.bf16.mxu1 %v10361_v37 }
 0x32a   :  { %1228 = vmatmul.mubr.bf16.gmra.mrb[4].mxu1 %v776_v63  ;;  %v10371_v63 = vld [vmem:[%s13443_s8 + $0x1e0] ss:$8 sps:$4 sm:$0xff]  }
 0x32b   :  { %8189 = vmatprep.mubr.msk.bf16.mxu1 %vm967_vm0, %v779_v8  ;;  %1420 = vmatpush1.bf16.msra.mxu1 %v10359_v56  ;;  %v10380_v8 = vld [vmem:[%s13443_s8 + $0x210] ss:$8 sps:$4 sm:$0xff]  }
 0x32c   :  { %1421 = vmatprep.subr.bf16.mxu1 %v10364_v61 }
 0x32f   :  { %1422 = vmatpush1.bf16.msra.mxu1 %v10362_v1 }
 0x330   :  { %1423 = vmatprep.subr.bf16.mxu1 %v10367_v2 }
 0x332   :  { %1238 = vmatmul.mubr.bf16.gmra.mrb[8].mxu1 %v778_v6  ;;  %v10377_v6 = vld [vmem:[%s13443_s8 + $0x200] ss:$8 sps:$4 sm:$0xff]  }
 0x333   :  { %8190 = vmatprep.mubr.msk.bf16.mxu1 %vm967_vm0, %v781_v14  ;;  %1424 = vmatpush1.bf16.msra.mxu1 %v10365_v43  ;;  %v1579_v14 = vld [vmem:[%s13444_s5 + $0x38] sm:$0xff] }
 0x334   :  { %1425 = vmatprep.subr.bf16.mxu1 %v10370_v55  ;;  %v12230_v41 = vpack.c.bf16 %v1579_v14, %v1578_v13 }
 0x336   :  { %9579 = vmatpush3.bf16.msra.mxu0 %v12230_v41 }
 0x337   :  { %1426 = vmatpush1.bf16.msra.mxu1 %v10368_v60  ;;  %9581 = vmatprep.subr.bf16.mxu0 %v12236_v48 }
 0x338   :  { %1427 = vmatprep.subr.bf16.mxu1 %v10373_v62 }
 0x33a   :  { %1248 = vmatmul.mubr.bf16.gmra.mrb[12].mxu1 %v780_v12  ;;  %v10386_v12 = vld [vmem:[%s13443_s8 + $0x230] ss:$8 sps:$4 sm:$0xff]  }
 0x33b   :  { %1428 = vmatpush1.bf16.msra.mxu1 %v10371_v63  ;;  %8239 = vmatprep.mubr.msk.bf16.mxu1 %vm967_vm0, %v791_v58  ;;  %v1581_v58 = vld [vmem:[%s13444_s5 + $0x48] sm:$0xff] }
 0x33c   :  { %1429 = vmatprep.subr.bf16.mxu1 %v10376_v4 }
 0x33f   :  { %1430 = vmatpush1.bf16.msra.mxu1 %v10374_v3 }
 0x340   :  { %1431 = vmatprep.subr.bf16.mxu1 %v10379_v5 }
 0x343   :  { %1432 = vmatpush1.bf16.msra.mxu1 %v10377_v6 }
 0x344   :  { %1433 = vmatprep.subr.bf16.mxu1 %v10382_v7 }
 0x347   :  { %1434 = vmatpush1.bf16.msra.mxu1 %v10380_v8 }
 0x348   :  { %1435 = vmatprep.subr.bf16.mxu1 %v10385_v9 }
 0x34b   :  { %1436 = vmatpush1.bf16.msra.mxu1 %v10383_v10 }
 0x34c   :  { %1437 = vmatprep.subr.bf16.mxu1 %v10388_v11 }
 0x34f   :  { %1438 = vmatpush1.bf16.msra.mxu1 %v10386_v12 }
 0x352   :  { %1448 = vmatmul.mubr.bf16.vlgmr.msra.gmra.mrb[0].mxu1 %v790_v47  ;;  %v1580_v47 = vld [vmem:[%s13444_s5 + $0x40] sm:$0xff] }
 0x353   :  { %8240 = vmatprep.mubr.msk.bf16.mxu1 %vm967_vm0, %v793_v18  ;;  %v12239_v59 = vpack.c.bf16 %v1581_v58, %v1580_v47  ;;  %v12255_v18 = vpack.c.bf16 %v1601_v17, %v1600_v16 }
 0x355   :  { %9583 = vmatpush3.bf16.msra.mxu0 %v12239_v59 }
 0x356   :  { %9585 = vmatprep.subr.bf16.mxu0 %v12245_v51 }
 0x35a   :  { %1458 = vmatmul.mubr.bf16.gmra.mrb[4].mxu1 %v792_v15  ;;  %v12250_v15 = vpack.c.bf16 %v1583_v53, %v1582_v52 }
 0x35b   :  { %8241 = vmatprep.mubr.msk.bf16.mxu1 %vm967_vm0, %v795_v31 }
 0x35c   :  { %9587 = vmatpush3.bf16.msra.mxu0 %v12250_v15 }
 0x35d   :  { %9589 = vmatprep.subr.bf16.mxu0 %v12255_v18 }
 0x360   :  { %9591 = vmatpush3.bf16.msra.mxu0 %v12259_v22 }
 0x361   :  { %9593 = vmatprep.subr.bf16.mxu0 %v12265_v27 }
 0x362   :  { %1468 = vmatmul.mubr.bf16.gmra.mrb[8].mxu1 %v794_v28  ;;  %v1586_v28 = vld [vmem:[%s13444_s5 + $0x70] sm:$0xff] }
 0x363   :  { %8242 = vmatprep.mubr.msk.bf16.mxu1 %vm967_vm0, %v797_v57  ;;  %v12269_v30 = vpack.c.bf16 %v1587_v29, %v1586_v28 }
 0x365   :  { %9595 = vmatpush3.bf16.msra.mxu0 %v12269_v30 }
 0x366   :  { %9597 = vmatprep.subr.bf16.mxu0 %v12058_v19 }
 0x36a   :  { %1478 = vmatmul.mubr.bf16.gmra.mrb[12].mxu1 %v796_v40 }
 0x36b   :  { %2103 = vmatprep.mubr.bf16.mxu1 %v11624_v0 }
 0x425   :  { %v12274_v31 = vpop.f32.mrb[0].mxu1 }
 0x426   :  { %v12276_v32 = vpop.f32.mrb[1].mxu1  ;;  %v1530_v35 = vmul.f32 %v12274_v31, %v12274_v31 }
 0x427   :  { %v12278_v34 = vpop.f32.mrb[2].mxu1  ;;  %v1531_v19 = vmul.f32 %v12276_v32, %v12276_v32 }
 0x428   :  { %v1504_v37 = vadd.f32 %v12278_v34, %v12274_v31  ;;  %v1532_v38 = vmul.f32 %v12278_v34, %v12278_v34  ;;  %v12286_v39 = vpop.f32.mrb[3].mxu1 }
 0x429   :  { %v1517_v40 = vadd.f32 %v12286_v39, %v12276_v32  ;;  %v1533_v54 = vmul.f32 %v12286_v39, %v12286_v39 }
 0x42a   :  { %v1546_v56 = vadd.f32 %v1532_v38, %v1530_v35 }
 0x42b   :  { %v1559_v57 = vadd.f32 %v1533_v54, %v1531_v19 }
 0x42d   :  { %v12294_v61 = vpop.f32.mrb[4].mxu1 }
 0x42e   :  { %v1505_v1 = vadd.f32 %v1504_v37, %v12294_v61  ;;  %v1534_v2 = vmul.f32 %v12294_v61, %v12294_v61  ;;  %v12299_v43 = vpop.f32.mrb[5].mxu1 }
 0x42f   :  { %v1518_v55 = vadd.f32 %v1517_v40, %v12299_v43  ;;  %v1535_v60 = vmul.f32 %v12299_v43, %v12299_v43  ;;  %v12304_v62 = vpop.f32.mrb[6].mxu1 }
 0x430   :  { %v1547_v63 = vadd.f32 %v1546_v56, %v1534_v2  ;;  %v1506_v4 = vadd.f32 %v1505_v1, %v12304_v62  ;;  %v1536_v3 = vmul.f32 %v12304_v62, %v12304_v62  ;;  %v12309_v5 = vpop.f32.mrb[7].mxu1 }
 0x431   :  { %v1560_v6 = vadd.f32 %v1559_v57, %v1535_v60  ;;  %v1519_v7 = vadd.f32 %v1518_v55, %v12309_v5  ;;  %v1537_v8 = vmul.f32 %v12309_v5, %v12309_v5 }
 0x432   :  { %v1548_v9 = vadd.f32 %v1547_v63, %v1536_v3 }
 0x433   :  { %v1561_v10 = vadd.f32 %v1560_v6, %v1537_v8 }
 0x435   :  { %v12314_v11 = vpop.f32.mrb[8].mxu1 }
 0x436   :  { %v1507_v12 = vadd.f32 %v1506_v4, %v12314_v11  ;;  %v1538_v13 = vmul.f32 %v12314_v11, %v12314_v11  ;;  %v12319_v14 = vpop.f32.mrb[9].mxu1 }
 0x437   :  { %v1520_v44 = vadd.f32 %v1519_v7, %v12319_v14  ;;  %v1539_v46 = vmul.f32 %v12319_v14, %v12319_v14  ;;  %v12324_v47 = vpop.f32.mrb[10].mxu1 }
 0x438   :  { %v1549_v58 = vadd.f32 %v1548_v9, %v1538_v13  ;;  %v1508_v49 = vadd.f32 %v1507_v12, %v12324_v47  ;;  %v1540_v50 = vmul.f32 %v12324_v47, %v12324_v47  ;;  %v12329_v52 = vpop.f32.mrb[11].mxu1 }
 0x439   :  { %v1562_v53 = vadd.f32 %v1561_v10, %v1539_v46  ;;  %v1521_v16 = vadd.f32 %v1520_v44, %v12329_v52  ;;  %v1541_v17 = vmul.f32 %v12329_v52, %v12329_v52 }
 0x43a   :  { %v1550_v20 = vadd.f32 %v1549_v58, %v1540_v50 }
 0x43b   :  { %v1563_v21 = vadd.f32 %v1562_v53, %v1541_v17 }
 0x43d   :  { %v12334_v23 = vpop.f32.mrb[12].mxu1 }
 0x43e   :  { %v1509_v26 = vadd.f32 %v1508_v49, %v12334_v23  ;;  %v1542_v28 = vmul.f32 %v12334_v23, %v12334_v23  ;;  %v12339_v29 = vpop.f32.mrb[13].mxu1 }
 0x43f   :  { %v1522_v35 = vadd.f32 %v1521_v16, %v12339_v29  ;;  %v1543_v37 = vmul.f32 %v12339_v29, %v12339_v29  ;;  %v12344_v38 = vpop.f32.mrb[14].mxu1 }
 0x440   :  { %v1551_v19 = vadd.f32 %v1550_v20, %v1542_v28  ;;  %v1510_v40 = vadd.f32 %v1509_v26, %v12344_v38  ;;  %v1544_v54 = vmul.f32 %v12344_v38, %v12344_v38  ;;  %v12349_v56 = vpop.f32.mrb[15].mxu1 }
 0x441   :  { %v1564_v57 = vadd.f32 %v1563_v21, %v1543_v37  ;;  %v1523_v1 = vadd.f32 %v1522_v35, %v12349_v56  ;;  %v1545_v2 = vmul.f32 %v12349_v56, %v12349_v56 }
 0x442   :  { %v1511_v55 = vrot.slane %v1510_v40, 4  ;;  %v1552_v60 = vadd.f32 %v1551_v19, %v1544_v54  ;;  %v1751_v19 = vld [vmem:[%s13445_s0] sm:$0x1] }
 0x443   :  { %v1524_v63 = vrot.slane %v1523_v1, 4  ;;  %v1565_v4 = vadd.f32 %v1564_v57, %v1545_v2  ;;  %v1753_v57 = vld [vmem:[%s13446_s20] sm:$0x1] }
 0x444   :  { %v1512_v3 = vadd.f32 %v1511_v55, %v1510_v40  ;;  %v1553_v20 = vrot.slane %v1552_v60, 4  ;;  %v10395_v55 = vld [vmem:[%s13447_s7 + $0x100] ss:$8 sps:$4 sm:$0xff]  }
 0x445   :  { %v1525_v6 = vadd.f32 %v1524_v63, %v1523_v1  ;;  %v1566_v7 = vrot.slane %v1565_v4, 4  ;;  %v10400_v63 = vld [vmem:[%s13447_s7 + $0x114] ss:$8 sps:$4 sm:$0xff]  }
 0x446   :  { %v1513_v8 = vrot.slane %v1512_v3, 2  ;;  %v1554_v21 = vadd.f32 %v1553_v20, %v1552_v60  ;;  %v10397_v60 = vld [vmem:[%s13447_s7 + $0x104] ss:$8 sps:$4 sm:$0xff]  }
 0x447   :  { %v1526_v9 = vrot.slane %v1525_v6, 2  ;;  %v1567_v10 = vadd.f32 %v1566_v7, %v1565_v4  ;;  %v10398_v4 = vld [vmem:[%s13447_s7 + $0x110] ss:$8 sps:$4 sm:$0xff]   ;;  %v10406_v7 = vld [vmem:[%s13447_s7 + $0x134] ss:$8 sps:$4 sm:$0xff]  }
 0x448   :  { %v1514_v12 = vadd.f32 %v1513_v8, %v1512_v3  ;;  %v10403_v3 = vld [vmem:[%s13447_s7 + $0x124] ss:$8 sps:$4 sm:$0xff]   ;;  %v10404_v8 = vld [vmem:[%s13447_s7 + $0x130] ss:$8 sps:$4 sm:$0xff]  }
 0x449   :  { %v1527_v13 = vadd.f32 %v1526_v9, %v1525_v6  ;;  %v1568_v44 = vrot.slane %v1567_v10, 2  ;;  %v10401_v6 = vld [vmem:[%s13447_s7 + $0x120] ss:$8 sps:$4 sm:$0xff]   ;;  %v10409_v9 = vld [vmem:[%s13447_s7 + $0x144] ss:$8 sps:$4 sm:$0xff]  }
 0x44a   :  { %v1515_v46 = vrot.slane %v1514_v12, 1  ;;  %v10427_v20 = vld [vmem:[%s13447_s7 + $0x1a4] ss:$8 sps:$4 sm:$0xff]  }
 0x44b   :  { %v1528_v58 = vrot.slane %v1527_v13, 1  ;;  %v1569_v49 = vadd.f32 %v1568_v44, %v1567_v10  ;;  %v10407_v10 = vld [vmem:[%s13447_s7 + $0x140] ss:$8 sps:$4 sm:$0xff]   ;;  %v10415_v44 = vld [vmem:[%s13447_s7 + $0x164] ss:$8 sps:$4 sm:$0xff]  }
 0x44c   :  { %v1516_v16 = vadd.f32 %v1515_v46, %v1514_v12  ;;  %v10412_v12 = vld [vmem:[%s13447_s7 + $0x154] ss:$8 sps:$4 sm:$0xff]   ;;  %v10413_v46 = vld [vmem:[%s13447_s7 + $0x160] ss:$8 sps:$4 sm:$0xff]  }
 0x44d   :  { %v1529_v50 = vadd.f32 %v1528_v58, %v1527_v13  ;;  %v1570_v53 = vrot.slane %v1569_v49, 1  ;;  %v10410_v13 = vld [vmem:[%s13447_s7 + $0x150] ss:$8 sps:$4 sm:$0xff]   ;;  %v10418_v58 = vld [vmem:[%s13447_s7 + $0x174] ss:$8 sps:$4 sm:$0xff]  }
 0x44f   :  { %1668 = vmatprep.mubr.f32.mxu0 %v1529_v50  ;;  %v1571_v17 = vadd.f32 %v1570_v53, %v1569_v49  ;;  %v10416_v49 = vld [vmem:[%s13447_s7 + $0x170] ss:$8 sps:$4 sm:$0xff]   ;;  %v10421_v50 = vld [vmem:[%s13447_s7 + $0x184] ss:$8 sps:$4 sm:$0xff]   ;;  %v10419_v53 = vld [vmem:[%s13447_s7 + $0x180] ss:$8 sps:$4 sm:$0xff]  }
 0x450   :  { %1669 = vmatmul.mubr.f32.vlgmr.msra.gmra.mrb[48].mxu0 %v1516_v16  ;;  %v10424_v16 = vld [vmem:[%s13447_s7 + $0x194] ss:$8 sps:$4 sm:$0xff]  }
 0x451   :  { %9599 = vmatpush3.bf16.msra.mxu0 %v12063_v24  ;;  %1738 = vmatprep.mubr.f32.mxu0 %v1571_v17  ;;  %v1555_v24 = vrot.slane %v1554_v21, 2  ;;  %v10422_v17 = vld [vmem:[%s13447_s7 + $0x190] ss:$8 sps:$4 sm:$0xff]  }
 0x452   :  { %9601 = vmatprep.subr.bf16.mxu0 %v12065_v25 }
 0x453   :  { %v1556_v25 = vadd.f32 %v1555_v24, %v1554_v21  ;;  %v10425_v21 = vld [vmem:[%s13447_s7 + $0x1a0] ss:$8 sps:$4 sm:$0xff]   ;;  %v10430_v24 = vld [vmem:[%s13447_s7 + $0x1b4] ss:$8 sps:$4 sm:$0xff]  }
 0x455   :  { %9603 = vmatpush3.bf16.msra.mxu0 %v12073_v33  ;;  %v1557_v33 = vrot.slane %v1556_v25, 1 }
 0x456   :  { %9605 = vmatprep.subr.bf16.mxu0 %v12077_v36 }
 0x457   :  { %v1558_v36 = vadd.f32 %v1557_v33, %v1556_v25  ;;  %v1907_v25 = vlaneseq  ;;  %v10428_v33 = vld [vmem:[%s13447_s7 + $0x1b0] ss:$8 sps:$4 sm:$0xff]  }
 0x459   :  { %9607 = vmatpush3.bf16.msra.mxu0 %v12086_v42  ;;  %v1757_v42 = vld [vmem:[#allocation5 + $0x8] sm:$0xff] }
 0x45a   :  { %9609 = vmatprep.subr.bf16.mxu0 %v12090_v45  ;;  %v1756_v45 = vld [vmem:[#allocation5] sm:$0xff] }
 0x45d   :  { %9611 = vmatpush3.bf16.msra.mxu0 %v12230_v41  ;;  %v11625_v41 = vmov 0.0  }
 0x45e   :  { %9613 = vmatprep.subr.bf16.mxu0 %v12236_v48 }
 0x461   :  { %9615 = vmatpush3.bf16.msra.mxu0 %v12239_v59 }
 0x462   :  { %9617 = vmatprep.subr.bf16.mxu0 %v12245_v51 }
 0x465   :  { %9619 = vmatpush3.bf16.msra.mxu0 %v12250_v15 }
 0x466   :  { %9621 = vmatprep.subr.bf16.mxu0 %v12255_v18 }
 0x469   :  { %9623 = vmatpush3.bf16.msra.mxu0 %v12259_v22 }
 0x46a   :  { %9625 = vmatprep.subr.bf16.mxu0 %v12265_v27 }
 0x46d   :  { %9627 = vmatpush3.bf16.msra.mxu0 %v12269_v30 }
 0x46e   :  { %1762 = vmatprep.subr.mxu0 %v1757_v42 }
 0x470   :  { %1739 = vmatmul.mubr.f32.vlgmr.msra.gmra.mrb[50].mxu0 %v1558_v36  ;;  %v10433_v36 = vld [vmem:[%s13447_s7 + $0x1c4] ss:$8 sps:$4 sm:$0xff]  }
 0x471   :  { %1826 = vmatprep.mubr.f32.mxu0 %v11625_v41  ;;  %1763 = vmatpush1.msra.mxu0 %v1756_v45 }
 0x472   :  { %1836 = vmatprep.subr.mxu0 %v1757_v42  ;;  %v1908_v42 = vshrl.u32 %v1907_v25, 7 }
 0x523   :  { %v8943_v48 = vpop.f32.mrb[48].mxu0 }
 0x524   :  { %v8944_v59 = vpop.f32.mrb[49].mxu0 }
 0x525   :  { %v8945_v51 = vadd.f32 %v8944_v59, %v8943_v48  ;;  %v12401_v48 = vsub.s32 0, %v1908_v42 }
 0x527   :  { %v1744_v15 = vmul.f32 0.00048828125, %v8945_v51 }
 0x529   :  { %v1746_v30 = vmul.f32 %v1744_v15, %v1744_v15 }
 0x543   :  { %v8978_v18 = vpop.f32.mrb[50].mxu0 }
 0x544   :  { %v8979_v22 = vpop.f32.mrb[51].mxu0 }
 0x545   :  { %v8980_v27 = vadd.f32 %v8979_v22, %v8978_v18 }
 0x547   :  { %v1745_v26 = vmul.f32 0.00048828125, %v8980_v27 }
 0x549   :  { %v1747_v28 = vsub.f32 %v1745_v26, %v1746_v30 }
 0x54b   :  { %v1748_v35 = vmax.f32 %v1747_v28, 0.0 }
 0x54d   :  { %v1749_v37 = vadd.f32 1e-05, %v1748_v35 }
 0x54f   :  { %11033 = vrsqrt.f32 %v1749_v37 }
 0x559   :  { %v11034_v40 = vpop.eup %11033 }
 0x55a   :  { %v1752_v54 = vmul.f32 %v11034_v40, %v1751_v19 }
 0x55c   :  { %8243 = vmatmul.mubr.msk.f32.vlgmr.msra.gmra.mrb[52].mxu0 %vm1758_vm1, %v1752_v54  ;;  %v1754_v1 = vmul.f32 %v1752_v54, %v1744_v15 }
 0x55d   :  { %1837 = vmatpush1.msra.mxu0 %v1756_v45  ;;  %1900 = vmatprep.mubr.f32.mxu0 %v11625_v41  ;;  %v10431_v45 = vld [vmem:[%s13447_s7 + $0x1c0] ss:$8 sps:$4 sm:$0xff]  }
 0x55e   :  { %v1755_v2 = vsub.f32 %v1753_v57, %v1754_v1  ;;  %2401 = vmatprep.subr.bf16.mxu0 %v10397_v60 }
 0x560   :  { %8244 = vmatmul.mubr.msk.f32.vlgmr.msra.gmra.mrb[54].mxu0 %vm1758_vm1, %v1755_v2 }
 0x561   :  { %2402 = vmatpush1.bf16.msra.mxu0 %v10395_v55 }
 0x562   :  { %2403 = vmatprep.subr.bf16.mxu0 %v10400_v63 }
 0x565   :  { %2404 = vmatpush1.bf16.msra.mxu0 %v10398_v4 }
 0x566   :  { %2405 = vmatprep.subr.bf16.mxu0 %v10403_v3 }
 0x569   :  { %2406 = vmatpush1.bf16.msra.mxu0 %v10401_v6 }
 0x56a   :  { %2407 = vmatprep.subr.bf16.mxu0 %v10406_v7 }
 0x56d   :  { %2408 = vmatpush1.bf16.msra.mxu0 %v10404_v8 }
 0x56e   :  { %2409 = vmatprep.subr.bf16.mxu0 %v10409_v9 }
 0x571   :  { %2410 = vmatpush1.bf16.msra.mxu0 %v10407_v10 }
 0x572   :  { %2411 = vmatprep.subr.bf16.mxu0 %v10412_v12 }
 0x575   :  { %2412 = vmatpush1.bf16.msra.mxu0 %v10410_v13 }
 0x576   :  { %2413 = vmatprep.subr.bf16.mxu0 %v10415_v44 }
 0x579   :  { %2414 = vmatpush1.bf16.msra.mxu0 %v10413_v46 }
 0x57a   :  { %2415 = vmatprep.subr.bf16.mxu0 %v10418_v58 }
 0x57d   :  { %2416 = vmatpush1.bf16.msra.mxu0 %v10416_v49 }
 0x57e   :  { %2417 = vmatprep.subr.bf16.mxu0 %v10421_v50 }
 0x581   :  { %2418 = vmatpush1.bf16.msra.mxu0 %v10419_v53 }
 0x582   :  { %2419 = vmatprep.subr.bf16.mxu0 %v10424_v16 }
 0x585   :  { %2420 = vmatpush1.bf16.msra.mxu0 %v10422_v17 }
 0x586   :  { %2421 = vmatprep.subr.bf16.mxu0 %v10427_v20 }
 0x589   :  { %2422 = vmatpush1.bf16.msra.mxu0 %v10425_v21 }
 0x58a   :  { %2423 = vmatprep.subr.bf16.mxu0 %v10430_v24 }
 0x58d   :  { %2424 = vmatpush1.bf16.msra.mxu0 %v10428_v33 }
 0x58e   :  { %2425 = vmatprep.subr.bf16.mxu0 %v10433_v36 }
 0x591   :  { %2426 = vmatpush1.bf16.msra.mxu0 %v10431_v45 }
 0x62f   :  { %v1828_v59 = vpop.f32.mrb[52].mxu0 }
 0x630   :  { %v12404_v51 = vrot.slane %v1828_v59, %v12401_v48  ;;  %v1830_v15 = vpop.f32.mrb[53].mxu0 }
 0x631   :  { %v1914_v18 = vrot.slane %v1830_v15, %v12401_v48 }
 0x632   :  { %v1915_v22 = vmul.f32 %v12404_v51, %v12274_v31  ;;  %v1917_v27 = vmul.f32 %v12404_v51, %v12278_v34  ;;  %v1919_v30 = vmul.f32 %v12404_v51, %v12294_v61  ;;  %v1921_v26 = vmul.f32 %v12404_v51, %v12304_v62 }
 0x633   :  { %v1902_v28 = vpop.f32.mrb[54].mxu0  ;;  %v1916_v35 = vmul.f32 %v1914_v18, %v12276_v32  ;;  %v1918_v37 = vmul.f32 %v1914_v18, %v12286_v39  ;;  %v1920_v19 = vmul.f32 %v1914_v18, %v12299_v43  ;;  %v1922_v40 = vmul.f32 %v1914_v18, %v12309_v5 }
 0x634   :  { %v12420_v31 = vrot.slane %v1902_v28, %v12401_v48  ;;  %v1904_v54 = vpop.f32.mrb[55].mxu0  ;;  %v1924_v34 = vmul.f32 %v1914_v18, %v12319_v14  ;;  %v1926_v61 = vmul.f32 %v1914_v18, %v12329_v52  ;;  %v1923_v62 = vmul.f32 %v12404_v51, %v12314_v11 }
 0x635   :  { %v1938_v57 = vrot.slane %v1904_v54, %v12401_v48  ;;  %v1925_v32 = vmul.f32 %v12404_v51, %v12324_v47  ;;  %v1928_v39 = vmul.f32 %v1914_v18, %v12339_v29  ;;  %v1930_v43 = vmul.f32 %v1914_v18, %v12349_v56 }
 0x636   :  { %v1939_v5 = vadd.f32 %v12420_v31, %v1915_v22  ;;  %v1941_v1 = vadd.f32 %v12420_v31, %v1917_v27  ;;  %v1943_v14 = vadd.f32 %v12420_v31, %v1919_v30  ;;  %v1945_v52 = vadd.f32 %v12420_v31, %v1921_v26 }
 0x637   :  { %v1940_v2 = vadd.f32 %v1938_v57, %v1916_v35  ;;  %v1942_v55 = vadd.f32 %v1938_v57, %v1918_v37  ;;  %v1944_v11 = vadd.f32 %v1938_v57, %v1920_v19  ;;  %v1946_v60 = vadd.f32 %v1938_v57, %v1922_v40 }
 0x638   :  { %vm1955_vm2 = vcmp.gt.f32.partialorder %v1939_v5, 0.0  ;;  %vm1957_vm3 = vcmp.gt.f32.partialorder %v1941_v1, 0.0  ;;  %v1971_v63 = vmul.f32 0.2, %v1939_v5  ;;  %v1973_v47 = vmul.f32 0.2, %v1941_v1 }
 0x639   :  { %vm1956_vm4 = vcmp.gt.f32.partialorder %v1940_v2, 0.0  ;;  %vm1958_vm5 = vcmp.gt.f32.partialorder %v1942_v55, 0.0  ;;  %v1972_v29 = vmul.f32 0.2, %v1940_v2  ;;  %v1974_v56 = vmul.f32 0.2, %v1942_v55 }
 0x63a   :  { %v1987_v4 = vsel %vm1955_vm2, %v1939_v5, %v1971_v63  ;;  %v1989_v3 = vsel %vm1957_vm3, %v1941_v1, %v1973_v47  ;;  %vm1960_vm6 = vcmp.gt.f32.partialorder %v1944_v11, 0.0  ;;  %vm1962_vm7 = vcmp.gt.f32.partialorder %v1946_v60, 0.0  ;;  %v10392_v5 = vld [vmem:[%s13448_s11 + $0x18] sm:$0xff]   ;;  %v10393_v1 = vld [vmem:[%s13448_s11 + $0x20] sm:$0xff]  }
 0x63b   :  { %v1988_v6 = vsel %vm1956_vm4, %v1940_v2, %v1972_v29  ;;  %v1990_v7 = vsel %vm1958_vm5, %v1942_v55, %v1974_v56  ;;  %v2003_v8 = vpack.c.bf16 %v1989_v3, %v1987_v4  ;;  %v1976_v9 = vmul.f32 0.2, %v1944_v11  ;;  %v10436_v2 = vld [vmem:[%s13447_s7 + $0x1d4] ss:$8 sps:$4 sm:$0xff]   ;;  %v10437_v55 = vld [vmem:[%s13447_s7 + $0x1e0] ss:$8 sps:$4 sm:$0xff]  }
 0x63c   :  { %v2004_v10 = vpack.c.bf16 %v1990_v7, %v1988_v6  ;;  %v1978_v12 = vmul.f32 0.2, %v1946_v60  ;;  %vm1959_vm8 = vcmp.gt.f32.partialorder %v1943_v14, 0.0  ;;  %vm1961_vm9 = vcmp.gt.f32.partialorder %v1945_v52, 0.0  ;;  %2427 = vmatprep.subr.bf16.mxu0 %v10436_v2  ;;  %v10442_v63 = vld [vmem:[%s13447_s7 + $0x1f4] ss:$8 sps:$4 sm:$0xff]  }
 0x63d   :  { %v1992_v13 = vsel %vm1960_vm6, %v1944_v11, %v1976_v9  ;;  %v1975_v44 = vmul.f32 0.2, %v1943_v14  ;;  %v1977_v46 = vmul.f32 0.2, %v1945_v52  ;;  %v1948_v58 = vadd.f32 %v1938_v57, %v1924_v34  ;;  %v10439_v11 = vld [vmem:[%s13447_s7 + $0x1e4] ss:$8 sps:$4 sm:$0xff]  }
 0x63e   :  { %2071 = vmatprep.subr.bf16.mxu1 %v2004_v10  ;;  %v1994_v49 = vsel %vm1962_vm7, %v1946_v60, %v1978_v12  ;;  %v1950_v50 = vadd.f32 %v1938_v57, %v1926_v61  ;;  %v1947_v53 = vadd.f32 %v12420_v31, %v1923_v62  ;;  %v1949_v16 = vadd.f32 %v12420_v31, %v1925_v32  ;;  %v10440_v60 = vld [vmem:[%s13447_s7 + $0x1f0] ss:$8 sps:$4 sm:$0xff]   ;;  %v10445_v47 = vld [vmem:[%s13447_s7 + $0x4] ss:$8 sps:$4 sm:$0xff]  }
 0x63f   :  { %2072 = vmatpush1.bf16.msra.mxu1 %v2003_v8  ;;  %v2006_v17 = vpack.c.bf16 %v1994_v49, %v1992_v13  ;;  %v1991_v20 = vsel %vm1959_vm8, %v1943_v14, %v1975_v44  ;;  %v1993_v21 = vsel %vm1961_vm9, %v1945_v52, %v1977_v46  ;;  %vm1964_vm10 = vcmp.gt.f32.partialorder %v1948_v58, 0.0  ;;  %v10394_v14 = vld [vmem:[%s13448_s11 + $0x28] sm:$0xff]   ;;  %v10434_v52 = vld [vmem:[%s13447_s7 + $0x1d0] ss:$8 sps:$4 sm:$0xff]  }
 0x640   :  { %v2005_v24 = vpack.c.bf16 %v1993_v21, %v1991_v20  ;;  %vm1966_vm11 = vcmp.gt.f32.partialorder %v1950_v50, 0.0  ;;  %v1980_v25 = vmul.f32 0.2, %v1948_v58  ;;  %v1982_v33 = vmul.f32 0.2, %v1950_v50  ;;  %2428 = vmatpush1.bf16.msra.mxu0 %v10434_v52 }
 0x641   :  { %2073 = vmatprep.subr.bf16.mxu1 %v2006_v17  ;;  %vm1963_vm12 = vcmp.gt.f32.partialorder %v1947_v53, 0.0  ;;  %vm1965_vm13 = vcmp.gt.f32.partialorder %v1949_v16, 0.0  ;;  %v1979_v36 = vmul.f32 0.2, %v1947_v53  ;;  %v1981_v42 = vmul.f32 0.2, %v1949_v16  ;;  %2429 = vmatprep.subr.bf16.mxu0 %v10439_v11 }
 0x642   :  { %v1996_v45 = vsel %vm1964_vm10, %v1948_v58, %v1980_v25  ;;  %v1998_v59 = vsel %vm1966_vm11, %v1950_v50, %v1982_v33  ;;  %v1952_v15 = vadd.f32 %v1938_v57, %v1928_v39  ;;  %v1954_v18 = vadd.f32 %v1938_v57, %v1930_v43  ;;  %v10391_v43 = vld [vmem:[%s13448_s11 + $0x10] sm:$0xff]   ;;  %v10443_v17 = vld [vmem:[%s13447_s7] ss:$8 sps:$4 sm:$0xff]   ;;  %v10451_v33 = vld [vmem:[%s13447_s7 + $0x24] ss:$8 sps:$4 sm:$0xff]  }
 0x643   :  { %2074 = vmatpush1.bf16.msra.mxu1 %v2005_v24  ;;  %v2008_v22 = vpack.c.bf16 %v1998_v59, %v1996_v45  ;;  %v1995_v27 = vsel %vm1963_vm12, %v1947_v53, %v1979_v36  ;;  %v1997_v30 = vsel %vm1965_vm13, %v1949_v16, %v1981_v42  ;;  %v1927_v26 = vmul.f32 %v12404_v51, %v12334_v23  ;;  %v10448_v20 = vld [vmem:[%s13447_s7 + $0x14] ss:$8 sps:$4 sm:$0xff]   ;;  %v10446_v24 = vld [vmem:[%s13447_s7 + $0x10] ss:$8 sps:$4 sm:$0xff]   ;;  %v10463_v52 = vld [vmem:[%s13447_s7 + $0x64] ss:$8 sps:$4 sm:$0xff]  }
 0x644   :  { %v2007_v28 = vpack.c.bf16 %v1997_v30, %v1995_v27  ;;  %vm1968_vm14 = vcmp.gt.f32.partialorder %v1952_v15, 0.0  ;;  %vm1970_vm15 = vcmp.gt.f32.partialorder %v1954_v18, 0.0  ;;  %v1984_v35 = vmul.f32 0.2, %v1952_v15  ;;  %2430 = vmatpush1.bf16.msra.mxu0 %v10437_v55  ;;  %v2981_v27 = vld [vmem:[%s13449_s15 + $0x80] sm:$0xff]  ;;  %v2982_v30 = vld [vmem:[%s13449_s15 + $0x88] sm:$0xff] }
 0x645   :  { %2075 = vmatprep.subr.bf16.mxu1 %v2008_v22  ;;  %v1986_v37 = vmul.f32 0.2, %v1954_v18  ;;  %v1929_v19 = vmul.f32 %v12404_v51, %v12344_v38  ;;  %v1951_v40 = vadd.f32 %v12420_v31, %v1927_v26  ;;  %v10389_v51 = vld [vmem:[%s13448_s11] sm:$0xff]   ;;  %2431 = vmatprep.subr.bf16.mxu0 %v10442_v63  ;;  %v10452_v22 = vld [vmem:[%s13447_s7 + $0x30] ss:$8 sps:$4 sm:$0xff]   ;;  %vm3153_vm4 = vcmask 130048  }
 0x646   :  { %v2000_v54 = vsel %vm1968_vm14, %v1952_v15, %v1984_v35  ;;  %v10449_v15 = vld [vmem:[%s13447_s7 + $0x20] ss:$8 sps:$4 sm:$0xff]   ;;  %v12497_v35 = vpack.c.bf16 %v2982_v30, %v2981_v27  ;;  %v10499_v27 = vld [vmem:[%s13447_s7 + $0x224] ss:$8 sps:$4 sm:$0xff]   ;;  %vm3383_vm13 = vcmask 261120  }
 0x647   :  { %2076 = vmatpush1.bf16.msra.mxu1 %v2007_v28  ;;  %v2002_v34 = vsel %vm1970_vm15, %v1954_v18, %v1986_v37  ;;  %v1953_v61 = vadd.f32 %v12420_v31, %v1929_v19  ;;  %vm1967_vm2 = vcmp.gt.f32.partialorder %v1951_v40, 0.0  ;;  %v1983_v23 = vmul.f32 0.2, %v1951_v40  ;;  %v10390_v31 = vld [vmem:[%s13448_s11 + $0x8] sm:$0xff]   ;;  %v10454_v18 = vld [vmem:[%s13447_s7 + $0x34] ss:$8 sps:$4 sm:$0xff]  }
 0x648   :  { %v2010_v62 = vpack.c.bf16 %v2002_v34, %v2000_v54  ;;  %2432 = vmatpush1.bf16.msra.mxu0 %v10440_v60  ;;  %v2965_v26 = vld [vmem:[%s13449_s15] sm:$0xff]  ;;  %v2966_v37 = vld [vmem:[%s13449_s15 + $0x8] sm:$0xff]  ;;  %v2983_v19 = vld [vmem:[%s13449_s15 + $0x90] sm:$0xff] }
 0x649   :  { %vm1969_vm3 = vcmp.gt.f32.partialorder %v1953_v61, 0.0  ;;  %v1985_v57 = vmul.f32 0.2, %v1953_v61  ;;  %v1999_v32 = vsel %vm1967_vm2, %v1951_v40, %v1983_v23  ;;  %2614 = vmatprep.subr.bf16.mxu0 %v10445_v47  ;;  %v2984_v40 = vld [vmem:[%s13449_s15 + $0x98] sm:$0xff]  ;;  %v10457_v54 = vld [vmem:[%s13447_s7 + $0x44] ss:$8 sps:$4 sm:$0xff]  }
 0x64a   :  { %2077 = vmatprep.subr.bf16.mxu1 %v2010_v62  ;;  %v12507_v23 = vpack.c.bf16 %v2984_v40, %v2983_v19  ;;  %v2967_v62 = vld [vmem:[%s13449_s15 + $0x10] sm:$0xff]  ;;  %v10461_v63 = vld [vmem:[%s13447_s7 + $0x60] ss:$8 sps:$4 sm:$0xff]  }
 0x64b   :  { %v2001_v39 = vsel %vm1969_vm3, %v1953_v61, %v1985_v57  ;;  %v12505_v61 = vpack.c.bf16 %v2966_v37, %v2965_v26  ;;  %v2968_v57 = vld [vmem:[%s13449_s15 + $0x18] sm:$0xff]  ;;  %v10497_v30 = vld [vmem:[%s13447_s7 + $0x220] ss:$8 sps:$4 sm:$0xff]   ;;  %v10517_v37 = vld [vmem:[%s13447_s7 + $0x284] ss:$8 sps:$4 sm:$0xff]  }
 0x64c   :  { %v2009_v38 = vpack.c.bf16 %v2001_v39, %v1999_v32  ;;  %v10502_v26 = vld [vmem:[%s13447_s7 + $0x234] ss:$8 sps:$4 sm:$0xff]   ;;  %v10515_v19 = vld [vmem:[%s13447_s7 + $0x280] ss:$8 sps:$4 sm:$0xff]  }
 0x64d   :  { %v10520_v40 = vld [vmem:[%s13447_s7 + $0x294] ss:$8 sps:$4 sm:$0xff]  }
 0x64e   :  { %2078 = vmatpush1.bf16.msra.mxu1 %v2009_v38 }
 0x64f   :  { %9629 = vmatprep.subr.bf16.mxu1 %v12497_v35 }
 0x651   :  { %8251 = vmatmul.mubr.msk.bf16.vlgmr.msra.gmra.mrb[16].mxu1 %vm967_vm0, %v10389_v51  ;;  %v12519_v51 = vpack.c.bf16 %v2968_v57, %v2967_v62  ;;  %v10521_v62 = vld [vmem:[%s13447_s7 + $0x2a0] ss:$8 sps:$4 sm:$0xff]   ;;  %v10526_v57 = vld [vmem:[%s13447_s7 + $0x2b4] ss:$8 sps:$4 sm:$0xff]  }
 0x652   :  { %2113 = vmatprep.mubr.bf16.mxu1 %v11624_v0  ;;  %9631 = vmatpush3.bf16.msra.mxu1 %v12505_v61 }
 0x653   :  { %9633 = vmatprep.subr.bf16.mxu1 %v12507_v23 }
 0x656   :  { %9635 = vmatpush3.bf16.msra.mxu1 %v12519_v51 }
 0x659   :  { %8252 = vmatmul.mubr.msk.bf16.gmra.mrb[20].mxu1 %vm967_vm0, %v10390_v31  ;;  %v10455_v31 = vld [vmem:[%s13447_s7 + $0x40] ss:$8 sps:$4 sm:$0xff]  }
 0x65a   :  { %2123 = vmatprep.mubr.bf16.mxu1 %v11624_v0 }
 0x661   :  { %8253 = vmatmul.mubr.msk.bf16.gmra.mrb[24].mxu1 %vm967_vm0, %v10391_v43 }
 0x662   :  { %2133 = vmatprep.mubr.bf16.mxu1 %v11624_v0 }
 0x669   :  { %8254 = vmatmul.mubr.msk.bf16.gmra.mrb[28].mxu1 %vm967_vm0, %v10392_v5  ;;  %v10460_v5 = vld [vmem:[%s13447_s7 + $0x54] ss:$8 sps:$4 sm:$0xff]  }
 0x66a   :  { %2143 = vmatprep.mubr.bf16.mxu1 %v11624_v0 }
 0x671   :  { %8255 = vmatmul.mubr.msk.bf16.gmra.mrb[32].mxu1 %vm967_vm0, %v10393_v1  ;;  %v10458_v1 = vld [vmem:[%s13447_s7 + $0x50] ss:$8 sps:$4 sm:$0xff]  }
 0x672   :  { %2153 = vmatprep.mubr.bf16.mxu1 %v11624_v0 }
 0x679   :  { %8256 = vmatmul.mubr.msk.bf16.gmra.mrb[36].mxu1 %vm967_vm0, %v10394_v14 }
 0x724   :  { %v12467_v29 = vpop.f32.mrb[16].mxu1 }
 0x725   :  { %v2107_v56 = vpop.f32.mrb[17].mxu1 }
 0x726   :  { %v12469_v4 = vpop.f32.mrb[18].mxu1 }
 0x727   :  { %v2164_v3 = vpack.c.bf16 %v12469_v4, %v12467_v29  ;;  %v2111_v6 = vpop.f32.mrb[19].mxu1  ;;  %v10500_v29 = vld [vmem:[%s13447_s7 + $0x230] ss:$8 sps:$4 sm:$0xff]   ;;  %v10505_v4 = vld [vmem:[%s13447_s7 + $0x244] ss:$8 sps:$4 sm:$0xff]  }
 0x728   :  { %v2165_v7 = vpack.c.bf16 %v2111_v6, %v2107_v56  ;;  %v10466_v56 = vld [vmem:[%s13447_s7 + $0x74] ss:$8 sps:$4 sm:$0xff]   ;;  %v10464_v6 = vld [vmem:[%s13447_s7 + $0x70] ss:$8 sps:$4 sm:$0xff]  }
 0x72c   :  { %v12473_v8 = vpop.f32.mrb[20].mxu1 }
 0x72d   :  { %v12475_v9 = vpop.f32.mrb[21].mxu1 }
 0x72e   :  { %v12477_v10 = vpop.f32.mrb[22].mxu1 }
 0x72f   :  { %v2166_v12 = vpack.c.bf16 %v12477_v10, %v12473_v8  ;;  %v12481_v13 = vpop.f32.mrb[23].mxu1  ;;  %v10506_v8 = vld [vmem:[%s13447_s7 + $0x250] ss:$8 sps:$4 sm:$0xff]   ;;  %v10511_v10 = vld [vmem:[%s13447_s7 + $0x264] ss:$8 sps:$4 sm:$0xff]  }
 0x730   :  { %v2167_v44 = vpack.c.bf16 %v12481_v13, %v12475_v9  ;;  %v10508_v9 = vld [vmem:[%s13447_s7 + $0x254] ss:$8 sps:$4 sm:$0xff]  }
 0x731   :  { %v10514_v13 = vld [vmem:[%s13447_s7 + $0x274] ss:$8 sps:$4 sm:$0xff]  }
 0x734   :  { %v2125_v46 = vpop.f32.mrb[24].mxu1 }
 0x735   :  { %v2127_v58 = vpop.f32.mrb[25].mxu1 }
 0x736   :  { %v2129_v49 = vpop.f32.mrb[26].mxu1 }
 0x737   :  { %v2168_v50 = vpack.c.bf16 %v2129_v49, %v2125_v46  ;;  %v2131_v53 = vpop.f32.mrb[27].mxu1  ;;  %v10467_v46 = vld [vmem:[%s13447_s7 + $0x80] ss:$8 sps:$4 sm:$0xff]   ;;  %v10470_v49 = vld [vmem:[%s13447_s7 + $0x90] ss:$8 sps:$4 sm:$0xff]  }
 0x738   :  { %v2169_v16 = vpack.c.bf16 %v2131_v53, %v2127_v58  ;;  %v10472_v58 = vld [vmem:[%s13447_s7 + $0x94] ss:$8 sps:$4 sm:$0xff]   ;;  %v10473_v53 = vld [vmem:[%s13447_s7 + $0xa0] ss:$8 sps:$4 sm:$0xff]  }
 0x73a   :  { %2433 = vmatprep.mubr.bf16.mxu0 %v2169_v16  ;;  %v10478_v16 = vld [vmem:[%s13447_s7 + $0xb4] ss:$8 sps:$4 sm:$0xff]  }
 0x73b   :  { %2434 = vmatmul.mubr.bf16.vlgmr.msra.gmra.mrb[56].mxu0 %v2168_v50  ;;  %v10475_v50 = vld [vmem:[%s13447_s7 + $0xa4] ss:$8 sps:$4 sm:$0xff]  }
 0x73c   :  { %2615 = vmatpush1.bf16.msra.mxu0 %v10443_v17  ;;  %v2135_v21 = vpop.f32.mrb[28].mxu1  ;;  %v10476_v17 = vld [vmem:[%s13447_s7 + $0xb0] ss:$8 sps:$4 sm:$0xff]  }
 0x73d   :  { %v2137_v25 = vpop.f32.mrb[29].mxu1  ;;  %2616 = vmatprep.subr.bf16.mxu0 %v10448_v20  ;;  %v10481_v20 = vld [vmem:[%s13447_s7 + $0xc4] ss:$8 sps:$4 sm:$0xff]  }
 0x73e   :  { %v2139_v36 = vpop.f32.mrb[30].mxu1 }
 0x73f   :  { %v2170_v42 = vpack.c.bf16 %v2139_v36, %v2135_v21  ;;  %v2141_v45 = vpop.f32.mrb[31].mxu1  ;;  %v10479_v21 = vld [vmem:[%s13447_s7 + $0xc0] ss:$8 sps:$4 sm:$0xff]  }
 0x740   :  { %v2171_v59 = vpack.c.bf16 %v2141_v45, %v2137_v25  ;;  %2617 = vmatpush1.bf16.msra.mxu0 %v10446_v24  ;;  %v10484_v24 = vld [vmem:[%s13447_s7 + $0xd4] ss:$8 sps:$4 sm:$0xff]   ;;  %v10482_v25 = vld [vmem:[%s13447_s7 + $0xd0] ss:$8 sps:$4 sm:$0xff]   ;;  %v10485_v36 = vld [vmem:[%s13447_s7 + $0xe0] ss:$8 sps:$4 sm:$0xff]  }
 0x741   :  { %2618 = vmatprep.subr.bf16.mxu0 %v10451_v33  ;;  %v10487_v33 = vld [vmem:[%s13447_s7 + $0xe4] ss:$8 sps:$4 sm:$0xff]   ;;  %v10488_v45 = vld [vmem:[%s13447_s7 + $0xf0] ss:$8 sps:$4 sm:$0xff]  }
 0x742   :  { %2443 = vmatprep.mubr.bf16.mxu0 %v2171_v59  ;;  %v10493_v59 = vld [vmem:[%s13447_s7 + $0x204] ss:$8 sps:$4 sm:$0xff]  }
 0x743   :  { %2444 = vmatmul.mubr.bf16.gmra.mrb[60].mxu0 %v2170_v42  ;;  %v10490_v42 = vld [vmem:[%s13447_s7 + $0xf4] ss:$8 sps:$4 sm:$0xff]  }
 0x744   :  { %2619 = vmatpush1.bf16.msra.mxu0 %v10449_v15  ;;  %2646 = vmatprep.mubr.bf16.mxu0 %v2165_v7  ;;  %v12495_v28 = vpop.f32.mrb[32].mxu1  ;;  %v10469_v7 = vld [vmem:[%s13447_s7 + $0x84] ss:$8 sps:$4 sm:$0xff]   ;;  %v10491_v15 = vld [vmem:[%s13447_s7 + $0x200] ss:$8 sps:$4 sm:$0xff]  }
 0x745   :  { %2620 = vmatprep.subr.bf16.mxu0 %v10454_v18  ;;  %v12503_v34 = vpop.f32.mrb[33].mxu1  ;;  %v10496_v18 = vld [vmem:[%s13447_s7 + $0x214] ss:$8 sps:$4 sm:$0xff]  }
 0x746   :  { %v12511_v32 = vpop.f32.mrb[34].mxu1 }
 0x747   :  { %v2172_v39 = vpack.c.bf16 %v12511_v32, %v12495_v28  ;;  %v12516_v38 = vpop.f32.mrb[35].mxu1  ;;  %v2987_v28 = vld [vmem:[%s13449_s15 + $0xb0] sm:$0xff] }
 0x748   :  { %2621 = vmatpush1.bf16.msra.mxu0 %v10452_v22  ;;  %v2173_v43 = vpack.c.bf16 %v12516_v38, %v12503_v34  ;;  %v10494_v22 = vld [vmem:[%s13447_s7 + $0x210] ss:$8 sps:$4 sm:$0xff]   ;;  %v10523_v34 = vld [vmem:[%s13447_s7 + $0x2a4] ss:$8 sps:$4 sm:$0xff]  }
 0x749   :  { %2622 = vmatprep.subr.bf16.mxu0 %v10457_v54  ;;  %v10518_v54 = vld [vmem:[%s13447_s7 + $0x290] ss:$8 sps:$4 sm:$0xff]  }
 0x74a   :  { %v10524_v38 = vld [vmem:[%s13447_s7 + $0x2b0] ss:$8 sps:$4 sm:$0xff]  }
 0x74c   :  { %2623 = vmatpush1.bf16.msra.mxu0 %v10455_v31  ;;  %v12528_v14 = vpop.f32.mrb[36].mxu1  ;;  %v10529_v31 = vld [vmem:[%s13447_s7 + $0x2c4] ss:$8 sps:$4 sm:$0xff]  }
 0x74d   :  { %2624 = vmatprep.subr.bf16.mxu0 %v10460_v5  ;;  %v12531_v2 = vpop.f32.mrb[37].mxu1  ;;  %v10532_v5 = vld [vmem:[%s13447_s7 + $0x2d4] ss:$8 sps:$4 sm:$0xff]  }
 0x74e   :  { %v12533_v55 = vpop.f32.mrb[38].mxu1 }
 0x74f   :  { %v2174_v11 = vpack.c.bf16 %v12533_v55, %v12528_v14  ;;  %v12537_v60 = vpop.f32.mrb[39].mxu1  ;;  %v2972_v14 = vld [vmem:[%s13449_s15 + $0x38] sm:$0xff] }
 0x750   :  { %2625 = vmatpush1.bf16.msra.mxu0 %v10458_v1  ;;  %v2175_v47 = vpack.c.bf16 %v12537_v60, %v12531_v2  ;;  %v10530_v1 = vld [vmem:[%s13447_s7 + $0x2d0] ss:$8 sps:$4 sm:$0xff]   ;;  %v2989_v60 = vld [vmem:[%s13449_s15 + $0xc0] sm:$0xff] }
 0x751   :  { %2626 = vmatprep.subr.bf16.mxu0 %v10463_v52  ;;  %v10535_v52 = vld [vmem:[%s13447_s7 + $0x2e4] ss:$8 sps:$4 sm:$0xff]   ;;  %v2971_v2 = vld [vmem:[%s13449_s15 + $0x30] sm:$0xff] }
 0x754   :  { %2627 = vmatpush1.bf16.msra.mxu0 %v10461_v63  ;;  %v10533_v63 = vld [vmem:[%s13447_s7 + $0x2e0] ss:$8 sps:$4 sm:$0xff]  }
 0x755   :  { %2628 = vmatprep.subr.bf16.mxu0 %v10466_v56  ;;  %v10538_v56 = vld [vmem:[%s13447_s7 + $0x2f4] ss:$8 sps:$4 sm:$0xff]  }
 0x758   :  { %2629 = vmatpush1.bf16.msra.mxu0 %v10464_v6  ;;  %v10536_v6 = vld [vmem:[%s13447_s7 + $0x2f0] ss:$8 sps:$4 sm:$0xff]  }
 0x759   :  { %2630 = vmatprep.subr.bf16.mxu0 %v10469_v7  ;;  %v2985_v7 = vld [vmem:[%s13449_s15 + $0xa0] sm:$0xff] }
 0x75c   :  { %2631 = vmatpush1.bf16.msra.mxu0 %v10467_v46  ;;  %v2986_v46 = vld [vmem:[%s13449_s15 + $0xa8] sm:$0xff] }
 0x75d   :  { %2632 = vmatprep.subr.bf16.mxu0 %v10472_v58  ;;  %v12615_v58 = vpack.c.bf16 %v2986_v46, %v2985_v7 }
 0x75f   :  { %9637 = vmatprep.subr.bf16.mxu1 %v12615_v58 }
 0x760   :  { %2633 = vmatpush1.bf16.msra.mxu0 %v10470_v49  ;;  %v2969_v49 = vld [vmem:[%s13449_s15 + $0x20] sm:$0xff] }
 0x761   :  { %2634 = vmatprep.subr.bf16.mxu0 %v10475_v50  ;;  %v2970_v50 = vld [vmem:[%s13449_s15 + $0x28] sm:$0xff] }
 0x762   :  { %v12620_v32 = vpack.c.bf16 %v2970_v50, %v2969_v49 }
 0x764   :  { %2635 = vmatpush1.bf16.msra.mxu0 %v10473_v53  ;;  %9639 = vmatpush3.bf16.msra.mxu1 %v12620_v32 }
 0x765   :  { %2636 = vmatprep.subr.bf16.mxu0 %v10478_v16  ;;  %v2973_v16 = vld [vmem:[%s13449_s15 + $0x40] sm:$0xff] }
 0x768   :  { %2637 = vmatpush1.bf16.msra.mxu0 %v10476_v17  ;;  %v2974_v17 = vld [vmem:[%s13449_s15 + $0x48] sm:$0xff] }
 0x769   :  { %2638 = vmatprep.subr.bf16.mxu0 %v10481_v20  ;;  %v2991_v20 = vld [vmem:[%s13449_s15 + $0xd0] sm:$0xff] }
 0x76c   :  { %2639 = vmatpush1.bf16.msra.mxu0 %v10479_v21  ;;  %v12640_v21 = vpack.c.bf16 %v2974_v17, %v2973_v16 }
 0x76d   :  { %2640 = vmatprep.subr.bf16.mxu0 %v10484_v24  ;;  %v2992_v24 = vld [vmem:[%s13449_s15 + $0xd8] sm:$0xff] }
 0x770   :  { %2641 = vmatpush1.bf16.msra.mxu0 %v10482_v25  ;;  %v2975_v25 = vld [vmem:[%s13449_s15 + $0x50] sm:$0xff] }
 0x771   :  { %2642 = vmatprep.subr.bf16.mxu0 %v10487_v33  ;;  %v2976_v33 = vld [vmem:[%s13449_s15 + $0x58] sm:$0xff] }
 0x774   :  { %2643 = vmatpush1.bf16.msra.mxu0 %v10485_v36  ;;  %v12646_v36 = vpack.c.bf16 %v2992_v24, %v2991_v20 }
 0x775   :  { %2644 = vmatprep.subr.bf16.mxu0 %v10490_v42  ;;  %v2993_v42 = vld [vmem:[%s13449_s15 + $0xe0] sm:$0xff] }
 0x778   :  { %2645 = vmatpush1.bf16.msra.mxu0 %v10488_v45  ;;  %v2994_v45 = vld [vmem:[%s13449_s15 + $0xe8] sm:$0xff] }
 0x779   :  { %2860 = vmatprep.subr.bf16.mxu0 %v10493_v59  ;;  %v12651_v59 = vpack.c.bf16 %v2976_v33, %v2975_v25 }
 0x77b   :  { %2647 = vmatmul.mubr.bf16.vlgmr.msra.gmra.mrb[56].mxu0 %v2164_v3  ;;  %v10503_v3 = vld [vmem:[%s13447_s7 + $0x240] ss:$8 sps:$4 sm:$0xff]  }
 0x77c   :  { %2656 = vmatprep.mubr.bf16.mxu0 %v2167_v44  ;;  %2861 = vmatpush1.bf16.msra.mxu0 %v10491_v15  ;;  %v10512_v44 = vld [vmem:[%s13447_s7 + $0x270] ss:$8 sps:$4 sm:$0xff]   ;;  %v12654_v15 = vpack.c.bf16 %v2994_v45, %v2993_v42 }
 0x77d   :  { %2862 = vmatprep.subr.bf16.mxu0 %v10496_v18  ;;  %v2977_v18 = vld [vmem:[%s13449_s15 + $0x60] sm:$0xff] }
 0x780   :  { %2863 = vmatpush1.bf16.msra.mxu0 %v10494_v22  ;;  %v2978_v22 = vld [vmem:[%s13449_s15 + $0x68] sm:$0xff] }
 0x781   :  { %2864 = vmatprep.subr.bf16.mxu0 %v10499_v27  ;;  %v2995_v27 = vld [vmem:[%s13449_s15 + $0xf0] sm:$0xff] }
 0x783   :  { %2657 = vmatmul.mubr.bf16.gmra.mrb[60].mxu0 %v2166_v12  ;;  %v10509_v12 = vld [vmem:[%s13447_s7 + $0x260] ss:$8 sps:$4 sm:$0xff]  }
 0x784   :  { %2865 = vmatpush1.bf16.msra.mxu0 %v10497_v30  ;;  %2892 = vmatprep.mubr.bf16.mxu0 %v2173_v43  ;;  %v10527_v43 = vld [vmem:[%s13447_s7 + $0x2c0] ss:$8 sps:$4 sm:$0xff]   ;;  %v2996_v30 = vld [vmem:[%s13449_s15 + $0xf8] sm:$0xff] }
 0x785   :  { %2866 = vmatprep.subr.bf16.mxu0 %v10502_v26  ;;  %v12661_v26 = vpack.c.bf16 %v2978_v22, %v2977_v18 }
 0x788   :  { %2867 = vmatpush1.bf16.msra.mxu0 %v10500_v29  ;;  %v12664_v29 = vpack.c.bf16 %v2996_v30, %v2995_v27 }
 0x789   :  { %2868 = vmatprep.subr.bf16.mxu0 %v10505_v4  ;;  %v2979_v4 = vld [vmem:[%s13449_s15 + $0x70] sm:$0xff] }
 0x78c   :  { %2869 = vmatpush1.bf16.msra.mxu0 %v10503_v3  ;;  %v2980_v3 = vld [vmem:[%s13449_s15 + $0x78] sm:$0xff] }
 0x78d   :  { %2870 = vmatprep.subr.bf16.mxu0 %v10508_v9  ;;  %v12669_v9 = vpack.c.bf16 %v2980_v3, %v2979_v4 }
 0x790   :  { %2871 = vmatpush1.bf16.msra.mxu0 %v10506_v8 }
 0x791   :  { %2872 = vmatprep.subr.bf16.mxu0 %v10511_v10 }
 0x794   :  { %2873 = vmatpush1.bf16.msra.mxu0 %v10509_v12 }
 0x795   :  { %2874 = vmatprep.subr.bf16.mxu0 %v10514_v13 }
 0x798   :  { %2875 = vmatpush1.bf16.msra.mxu0 %v10512_v44 }
 0x799   :  { %2876 = vmatprep.subr.bf16.mxu0 %v10517_v37 }
 0x79c   :  { %2877 = vmatpush1.bf16.msra.mxu0 %v10515_v19 }
 0x79d   :  { %2878 = vmatprep.subr.bf16.mxu0 %v10520_v40 }
 0x7a0   :  { %2879 = vmatpush1.bf16.msra.mxu0 %v10518_v54 }
 0x7a1   :  { %2880 = vmatprep.subr.bf16.mxu0 %v10523_v34 }
 0x7a4   :  { %2881 = vmatpush1.bf16.msra.mxu0 %v10521_v62 }
 0x7a5   :  { %2882 = vmatprep.subr.bf16.mxu0 %v10526_v57 }
 0x7a8   :  { %2883 = vmatpush1.bf16.msra.mxu0 %v10524_v38 }
 0x7a9   :  { %2884 = vmatprep.subr.bf16.mxu0 %v10529_v31 }
 0x7ac   :  { %2885 = vmatpush1.bf16.msra.mxu0 %v10527_v43 }
 0x7ad   :  { %2886 = vmatprep.subr.bf16.mxu0 %v10532_v5 }
 0x7b0   :  { %2887 = vmatpush1.bf16.msra.mxu0 %v10530_v1 }
 0x7b1   :  { %2888 = vmatprep.subr.bf16.mxu0 %v10535_v52 }
 0x7b4   :  { %2889 = vmatpush1.bf16.msra.mxu0 %v10533_v63 }
 0x7b5   :  { %2890 = vmatprep.subr.bf16.mxu0 %v10538_v56 }
 0x7b8   :  { %2891 = vmatpush1.bf16.msra.mxu0 %v10536_v6 }
 0x7bb   :  { %2893 = vmatmul.mubr.bf16.vlgmr.msra.gmra.mrb[56].mxu0 %v2172_v39  ;;  %v2988_v39 = vld [vmem:[%s13449_s15 + $0xb8] sm:$0xff] }
 0x7bc   :  { %2902 = vmatprep.mubr.bf16.mxu0 %v2175_v47  ;;  %v12626_v55 = vpack.c.bf16 %v2988_v39, %v2987_v28  ;;  %v2990_v47 = vld [vmem:[%s13449_s15 + $0xc8] sm:$0xff] }
 0x7bd   :  { %v12635_v53 = vpack.c.bf16 %v2990_v47, %v2989_v60 }
 0x7be   :  { %9641 = vmatprep.subr.bf16.mxu1 %v12626_v55 }
 0x7c3   :  { %2903 = vmatmul.mubr.bf16.gmra.mrb[60].mxu0 %v2174_v11  ;;  %v12629_v11 = vpack.c.bf16 %v2972_v14, %v2971_v2 }
 0x7c5   :  { %9643 = vmatpush3.bf16.msra.mxu1 %v12629_v11 }
 0x7c6   :  { %9645 = vmatprep.subr.bf16.mxu1 %v12635_v53 }
 0x7c9   :  { %9647 = vmatpush3.bf16.msra.mxu1 %v12640_v21 }
 0x7ca   :  { %9649 = vmatprep.subr.bf16.mxu1 %v12646_v36 }
 0x7cd   :  { %9651 = vmatpush3.bf16.msra.mxu1 %v12651_v59 }
 0x7ce   :  { %9653 = vmatprep.subr.bf16.mxu1 %v12654_v15 }
 0x7d1   :  { %9655 = vmatpush3.bf16.msra.mxu1 %v12661_v26 }
 0x7d2   :  { %9657 = vmatprep.subr.bf16.mxu1 %v12664_v29 }
 0x7d5   :  { %9659 = vmatpush3.bf16.msra.mxu1 %v12669_v9 }
 0x7d6   :  { %9661 = vmatprep.subr.bf16.mxu1 %v12497_v35 }
 0x88e   :  { %v12674_v8 = vpop.f32.mrb[56].mxu0 }
 0x88f   :  { %v12676_v10 = vpop.f32.mrb[57].mxu0  ;;  %v2939_v13 = vmul.f32 %v12674_v8, %v12674_v8 }
 0x890   :  { %v12678_v12 = vpop.f32.mrb[58].mxu0  ;;  %v2940_v35 = vmul.f32 %v12676_v10, %v12676_v10 }
 0x891   :  { %v2921_v44 = vadd.f32 %v12678_v12, %v12674_v8  ;;  %v2941_v37 = vmul.f32 %v12678_v12, %v12678_v12  ;;  %v12686_v19 = vpop.f32.mrb[59].mxu0 }
 0x892   :  { %v2930_v40 = vadd.f32 %v12686_v19, %v12676_v10  ;;  %v2942_v54 = vmul.f32 %v12686_v19, %v12686_v19 }
 0x893   :  { %v2947_v34 = vadd.f32 %v2941_v37, %v2939_v13 }
 0x894   :  { %v2956_v62 = vadd.f32 %v2942_v54, %v2940_v35 }
 0x896   :  { %v12694_v57 = vpop.f32.mrb[60].mxu0 }
 0x897   :  { %v2922_v38 = vadd.f32 %v2921_v44, %v12694_v57  ;;  %v2943_v31 = vmul.f32 %v12694_v57, %v12694_v57  ;;  %v12699_v43 = vpop.f32.mrb[61].mxu0 }
 0x898   :  { %v2931_v5 = vadd.f32 %v2930_v40, %v12699_v43  ;;  %v2944_v1 = vmul.f32 %v12699_v43, %v12699_v43  ;;  %v12704_v52 = vpop.f32.mrb[62].mxu0 }
 0x899   :  { %v2948_v63 = vadd.f32 %v2947_v34, %v2943_v31  ;;  %v2923_v56 = vadd.f32 %v2922_v38, %v12704_v52  ;;  %v2945_v6 = vmul.f32 %v12704_v52, %v12704_v52  ;;  %v12709_v7 = vpop.f32.mrb[63].mxu0  ;;  %v3144_v31 = vld [vmem:[%s13450_s16] sm:$0x1] }
 0x89a   :  { %v2957_v46 = vadd.f32 %v2956_v62, %v2944_v1  ;;  %v2932_v49 = vadd.f32 %v2931_v5, %v12709_v7  ;;  %v2946_v50 = vmul.f32 %v12709_v7, %v12709_v7 }
 0x89b   :  { %v2924_v28 = vrot.slane %v2923_v56, 4  ;;  %v2949_v39 = vadd.f32 %v2948_v63, %v2945_v6  ;;  %v3146_v63 = vld [vmem:[#allocation8] sm:$0x1] }
 0x89c   :  { %v2933_v2 = vrot.slane %v2932_v49, 4  ;;  %v2958_v14 = vadd.f32 %v2957_v46, %v2946_v50 }
 0x89d   :  { %v2925_v60 = vadd.f32 %v2924_v28, %v2923_v56  ;;  %v2950_v13 = vrot.slane %v2949_v39, 4 }
 0x89e   :  { %v2934_v47 = vadd.f32 %v2933_v2, %v2932_v49  ;;  %v2959_v16 = vrot.slane %v2958_v14, 4 }
 0x89f   :  { %v2926_v17 = vrot.slane %v2925_v60, 2  ;;  %v2951_v44 = vadd.f32 %v2950_v13, %v2949_v39 }
 0x8a0   :  { %v2935_v20 = vrot.slane %v2934_v47, 2  ;;  %v2960_v24 = vadd.f32 %v2959_v16, %v2958_v14 }
 0x8a1   :  { %v2927_v25 = vadd.f32 %v2926_v17, %v2925_v60 }
 0x8a2   :  { %v2936_v33 = vadd.f32 %v2935_v20, %v2934_v47  ;;  %v2961_v42 = vrot.slane %v2960_v24, 2 }
 0x8a3   :  { %v2928_v45 = vrot.slane %v2927_v25, 1 }
 0x8a4   :  { %v2937_v18 = vrot.slane %v2936_v33, 1  ;;  %v2962_v22 = vadd.f32 %v2961_v42, %v2960_v24 }
 0x8a5   :  { %v2929_v4 = vadd.f32 %v2928_v45, %v2927_v25 }
 0x8a6   :  { %v2938_v27 = vadd.f32 %v2937_v18, %v2936_v33  ;;  %v2963_v30 = vrot.slane %v2962_v22, 1 }
 0x8a8   :  { %3061 = vmatprep.mubr.f32.mxu1 %v2938_v27  ;;  %v2964_v3 = vadd.f32 %v2963_v30, %v2962_v22 }
 0x8a9   :  { %3062 = vmatmul.mubr.f32.vlgmr.msra.gmra.mrb[40].mxu1 %v2929_v4 }
 0x8aa   :  { %9663 = vmatpush3.bf16.msra.mxu1 %v12505_v61  ;;  %3131 = vmatprep.mubr.f32.mxu1 %v2964_v3  ;;  %v2952_v61 = vrot.slane %v2951_v44, 2 }
 0x8ab   :  { %9665 = vmatprep.subr.bf16.mxu1 %v12507_v23 }
 0x8ac   :  { %v2953_v23 = vadd.f32 %v2952_v61, %v2951_v44 }
 0x8ae   :  { %9667 = vmatpush3.bf16.msra.mxu1 %v12519_v51  ;;  %v2954_v51 = vrot.slane %v2953_v23, 1 }
 0x8af   :  { %9669 = vmatprep.subr.bf16.mxu1 %v12615_v58 }
 0x8b0   :  { %v2955_v58 = vadd.f32 %v2954_v51, %v2953_v23 }
 0x8b2   :  { %9671 = vmatpush3.bf16.msra.mxu1 %v12620_v32  ;;  %v3150_v32 = vld [vmem:[#allocation7 + $0x8] sm:$0xff] }
 0x8b3   :  { %9673 = vmatprep.subr.bf16.mxu1 %v12626_v55  ;;  %v3152_v55 = vld [vmem:[#allocation7 + $0x18] sm:$0xff] }
 0x8b6   :  { %9675 = vmatpush3.bf16.msra.mxu1 %v12629_v11  ;;  %v3149_v11 = vld [vmem:[#allocation7] sm:$0xff] }
 0x8b7   :  { %9677 = vmatprep.subr.bf16.mxu1 %v12635_v53  ;;  %v9692_v53 = vpack.c.bf16 %v3152_v55, %v3150_v32 }
 0x8ba   :  { %9679 = vmatpush3.bf16.msra.mxu1 %v12640_v21  ;;  %v3151_v21 = vld [vmem:[#allocation7 + $0x10] sm:$0xff] }
 0x8bb   :  { %9681 = vmatprep.subr.bf16.mxu1 %v12646_v36  ;;  %v9694_v36 = vpack.c.bf16 %v3151_v21, %v3149_v11 }
 0x8be   :  { %9683 = vmatpush3.bf16.msra.mxu1 %v12651_v59 }
 0x8bf   :  { %9685 = vmatprep.subr.bf16.mxu1 %v12654_v15 }
 0x8c2   :  { %9687 = vmatpush3.bf16.msra.mxu1 %v12661_v26 }
 0x8c3   :  { %9689 = vmatprep.subr.bf16.mxu1 %v12664_v29 }
 0x8c6   :  { %9691 = vmatpush3.bf16.msra.mxu1 %v12669_v9 }
 0x8c7   :  { %9693 = vmatprep.subr.bf16.mxu1 %v9692_v53 }
 0x8c9   :  { %3132 = vmatmul.mubr.f32.vlgmr.msra.gmra.mrb[42].mxu1 %v2955_v58 }
 0x8ca   :  { %3221 = vmatprep.mubr.f32.mxu1 %v11625_v41  ;;  %9695 = vmatpush1.bf16.msra.mxu1 %v9694_v36 }
 0x8cb   :  { %9697 = vmatprep.subr.bf16.mxu1 %v9692_v53 }
 0x97c   :  { %v9013_v59 = vpop.f32.mrb[40].mxu1 }
 0x97d   :  { %v9014_v15 = vpop.f32.mrb[41].mxu1 }
 0x97e   :  { %v9015_v26 = vadd.f32 %v9014_v15, %v9013_v59  ;;  %v10544_v15 = vld [vmem:[%s13451_s9 + $0x104] ss:$8 sps:$4 sm:$0xff]  }
 0x980   :  { %v3137_v29 = vmul.f32 0.001953125, %v9015_v26  ;;  %v10539_v26 = vld [vmem:[%s13452_s14] sm:$0xff]  }
 0x982   :  { %v3139_v40 = vmul.f32 %v3137_v29, %v3137_v29 }
 0x99c   :  { %v9048_v37 = vpop.f32.mrb[42].mxu1 }
 0x99d   :  { %v9049_v9 = vpop.f32.mrb[43].mxu1 }
 0x99e   :  { %v9050_v35 = vadd.f32 %v9049_v9, %v9048_v37  ;;  %v10547_v37 = vld [vmem:[%s13451_s9 + $0x114] ss:$8 sps:$4 sm:$0xff]   ;;  %v10545_v9 = vld [vmem:[%s13451_s9 + $0x110] ss:$8 sps:$4 sm:$0xff]  }
 0x9a0   :  { %v3138_v54 = vmul.f32 0.001953125, %v9050_v35  ;;  %v10550_v35 = vld [vmem:[%s13451_s9 + $0x124] ss:$8 sps:$4 sm:$0xff]  }
 0x9a2   :  { %v3140_v34 = vsub.f32 %v3138_v54, %v3139_v40  ;;  %v10540_v40 = vld [vmem:[%s13452_s14 + $0x8] sm:$0xff]  }
 0x9a3   :  { %v10548_v54 = vld [vmem:[%s13451_s9 + $0x120] ss:$8 sps:$4 sm:$0xff]  }
 0x9a4   :  { %v3141_v62 = vmax.f32 %v3140_v34, 0.0  ;;  %v10553_v34 = vld [vmem:[%s13451_s9 + $0x134] ss:$8 sps:$4 sm:$0xff]  }
 0x9a6   :  { %v3142_v38 = vadd.f32 1e-05, %v3141_v62  ;;  %v10551_v62 = vld [vmem:[%s13451_s9 + $0x130] ss:$8 sps:$4 sm:$0xff]  }
 0x9a8   :  { %11035 = vrsqrt.f32 %v3142_v38  ;;  %v10556_v38 = vld [vmem:[%s13451_s9 + $0x144] ss:$8 sps:$4 sm:$0xff]  }
 0x9b2   :  { %v11036_v5 = vpop.eup %11035 }
 0x9b3   :  { %v3145_v1 = vmul.f32 %v11036_v5, %v3144_v31  ;;  %v10541_v31 = vld [vmem:[%s13452_s14 + $0x10] sm:$0xff]   ;;  %v10554_v5 = vld [vmem:[%s13451_s9 + $0x140] ss:$8 sps:$4 sm:$0xff]  }
 0x9b5   :  { %8417 = vmatmul.mubr.msk.f32.vlgmr.msra.gmra.mrb[44].mxu1 %vm3153_vm4, %v3145_v1  ;;  %v3147_v56 = vmul.f32 %v3145_v1, %v3137_v29  ;;  %v10542_v29 = vld [vmem:[%s13451_s9 + $0x100] ss:$8 sps:$4 sm:$0xff]   ;;  %v10559_v1 = vld [vmem:[%s13451_s9 + $0x154] ss:$8 sps:$4 sm:$0xff]  }
 0x9b6   :  { %9699 = vmatpush1.bf16.msra.mxu1 %v9694_v36  ;;  %3295 = vmatprep.mubr.f32.mxu1 %v11625_v41 }
 0x9b7   :  { %v3148_v6 = vsub.f32 %v3146_v63, %v3147_v56  ;;  %v10557_v63 = vld [vmem:[%s13451_s9 + $0x150] ss:$8 sps:$4 sm:$0xff]   ;;  %v10562_v56 = vld [vmem:[%s13451_s9 + $0x164] ss:$8 sps:$4 sm:$0xff]  }
 0x9b9   :  { %8418 = vmatmul.mubr.msk.f32.vlgmr.msra.gmra.mrb[46].mxu1 %vm3153_vm4, %v3148_v6  ;;  %v10560_v6 = vld [vmem:[%s13451_s9 + $0x160] ss:$8 sps:$4 sm:$0xff]  }
 0x9ba   :  { %3425 = vmatprep.mubr.bf16.mxu1 %v11624_v0 }
 0xa88   :  { %v3223_v46 = vpop.f32.mrb[44].mxu1 }
 0xa89   :  { %v3305_v49 = vrot.slane %v3223_v46, %v12401_v48  ;;  %v3225_v50 = vpop.f32.mrb[45].mxu1  ;;  %v10565_v46 = vld [vmem:[%s13451_s9 + $0x174] ss:$8 sps:$4 sm:$0xff]  }
 0xa8a   :  { %v3309_v28 = vrot.slane %v3225_v50, %v12401_v48  ;;  %v10568_v50 = vld [vmem:[%s13451_s9 + $0x184] ss:$8 sps:$4 sm:$0xff]  }
 0xa8b   :  { %v3310_v39 = vmul.f32 %v3305_v49, %v12674_v8  ;;  %v3312_v2 = vmul.f32 %v3305_v49, %v12678_v12  ;;  %v3314_v14 = vmul.f32 %v3305_v49, %v12694_v57  ;;  %v3316_v60 = vmul.f32 %v3305_v49, %v12704_v52  ;;  %v10563_v49 = vld [vmem:[%s13451_s9 + $0x170] ss:$8 sps:$4 sm:$0xff]  }
 0xa8c   :  { %v3311_v47 = vmul.f32 %v3309_v28, %v12676_v10  ;;  %v3313_v16 = vmul.f32 %v3309_v28, %v12686_v19  ;;  %v3315_v17 = vmul.f32 %v3309_v28, %v12699_v43  ;;  %v3317_v20 = vmul.f32 %v3309_v28, %v12709_v7  ;;  %v3297_v24 = vpop.f32.mrb[46].mxu1  ;;  %v10566_v28 = vld [vmem:[%s13451_s9 + $0x180] ss:$8 sps:$4 sm:$0xff]  }
 0xa8d   :  { %v3321_v25 = vrot.slane %v3297_v24, %v12401_v48  ;;  %v3299_v33 = vpop.f32.mrb[47].mxu1  ;;  %v10583_v24 = vld [vmem:[%s13451_s9 + $0x1d4] ss:$8 sps:$4 sm:$0xff]  }
 0xa8e   :  { %v3325_v8 = vrot.slane %v3299_v33, %v12401_v48  ;;  %v10584_v33 = vld [vmem:[%s13451_s9 + $0x1e0] ss:$8 sps:$4 sm:$0xff]  }
 0xa8f   :  { %v3326_v42 = vadd.f32 %v3321_v25, %v3310_v39  ;;  %v3328_v12 = vadd.f32 %v3321_v25, %v3312_v2  ;;  %v3330_v45 = vadd.f32 %v3321_v25, %v3314_v14  ;;  %v3332_v57 = vadd.f32 %v3321_v25, %v3316_v60  ;;  %v10571_v39 = vld [vmem:[%s13451_s9 + $0x194] ss:$8 sps:$4 sm:$0xff]   ;;  %v10569_v2 = vld [vmem:[%s13451_s9 + $0x190] ss:$8 sps:$4 sm:$0xff]   ;;  %v10574_v14 = vld [vmem:[%s13451_s9 + $0x1a4] ss:$8 sps:$4 sm:$0xff]  }
 0xa90   :  { %v3327_v18 = vadd.f32 %v3325_v8, %v3311_v47  ;;  %v3329_v52 = vadd.f32 %v3325_v8, %v3313_v16  ;;  %v3331_v22 = vadd.f32 %v3325_v8, %v3315_v17  ;;  %v3333_v10 = vadd.f32 %v3325_v8, %v3317_v20  ;;  %v10572_v60 = vld [vmem:[%s13451_s9 + $0x1a0] ss:$8 sps:$4 sm:$0xff]   ;;  %v10577_v47 = vld [vmem:[%s13451_s9 + $0x1b4] ss:$8 sps:$4 sm:$0xff]   ;;  %v10575_v16 = vld [vmem:[%s13451_s9 + $0x1b0] ss:$8 sps:$4 sm:$0xff]  }
 0xa91   :  { %vm3334_vm5 = vcmp.gt.f32.partialorder %v3326_v42, 0.0  ;;  %vm3336_vm6 = vcmp.gt.f32.partialorder %v3328_v12, 0.0  ;;  %v3342_v19 = vmul.f32 0.2, %v3326_v42  ;;  %v3344_v43 = vmul.f32 0.2, %v3328_v12 }
 0xa92   :  { %vm3335_vm7 = vcmp.gt.f32.partialorder %v3327_v18, 0.0  ;;  %vm3337_vm8 = vcmp.gt.f32.partialorder %v3329_v52, 0.0  ;;  %v3343_v7 = vmul.f32 0.2, %v3327_v18  ;;  %v3345_v27 = vmul.f32 0.2, %v3329_v52 }
 0xa93   :  { %v3350_v30 = vsel %vm3334_vm5, %v3326_v42, %v3342_v19  ;;  %v3352_v4 = vsel %vm3336_vm6, %v3328_v12, %v3344_v43  ;;  %vm3339_vm9 = vcmp.gt.f32.partialorder %v3331_v22, 0.0  ;;  %vm3341_vm10 = vcmp.gt.f32.partialorder %v3333_v10, 0.0  ;;  %v10580_v17 = vld [vmem:[%s13451_s9 + $0x1c4] ss:$8 sps:$4 sm:$0xff]   ;;  %v10578_v20 = vld [vmem:[%s13451_s9 + $0x1c0] ss:$8 sps:$4 sm:$0xff]  }
 0xa94   :  { %v3351_v3 = vsel %vm3335_vm7, %v3327_v18, %v3343_v7  ;;  %v3353_v13 = vsel %vm3337_vm8, %v3329_v52, %v3345_v27  ;;  %v3358_v44 = vpack.c.bf16 %v3352_v4, %v3350_v30  ;;  %v3347_v61 = vmul.f32 0.2, %v3331_v22  ;;  %v10581_v25 = vld [vmem:[%s13451_s9 + $0x1d0] ss:$8 sps:$4 sm:$0xff]   ;;  %v10586_v8 = vld [vmem:[%s13451_s9 + $0x1e4] ss:$8 sps:$4 sm:$0xff]  }
 0xa95   :  { %v3359_v23 = vpack.c.bf16 %v3353_v13, %v3351_v3  ;;  %v3349_v51 = vmul.f32 0.2, %v3333_v10  ;;  %vm3338_vm11 = vcmp.gt.f32.partialorder %v3330_v45, 0.0  ;;  %vm3340_vm12 = vcmp.gt.f32.partialorder %v3332_v57, 0.0  ;;  %v10587_v42 = vld [vmem:[%s13451_s9 + $0x1f0] ss:$8 sps:$4 sm:$0xff]  }
 0xa96   :  { %v3355_v58 = vsel %vm3339_vm9, %v3331_v22, %v3347_v61  ;;  %v3346_v32 = vmul.f32 0.2, %v3330_v45  ;;  %v3348_v55 = vmul.f32 0.2, %v3332_v57  ;;  %v10589_v12 = vld [vmem:[%s13451_s9 + $0x1f4] ss:$8 sps:$4 sm:$0xff]  }
 0xa97   :  { %3393 = vmatprep.subr.bf16.mxu1 %v3359_v23  ;;  %v3357_v11 = vsel %vm3341_vm10, %v3333_v10, %v3349_v51  ;;  %v10590_v13 = vld [vmem:[%s13451_s9] ss:$8 sps:$4 sm:$0xff]   ;;  %v10593_v61 = vld [vmem:[%s13451_s9 + $0x10] ss:$8 sps:$4 sm:$0xff]   ;;  %v10598_v23 = vld [vmem:[%s13451_s9 + $0x24] ss:$8 sps:$4 sm:$0xff]  }
 0xa98   :  { %3394 = vmatpush1.bf16.msra.mxu1 %v3358_v44  ;;  %v3361_v53 = vpack.c.bf16 %v3357_v11, %v3355_v58  ;;  %v3354_v21 = vsel %vm3338_vm11, %v3330_v45, %v3346_v32  ;;  %v3356_v36 = vsel %vm3340_vm12, %v3332_v57, %v3348_v55  ;;  %v10592_v45 = vld [vmem:[%s13451_s9 + $0x4] ss:$8 sps:$4 sm:$0xff]   ;;  %v10595_v44 = vld [vmem:[%s13451_s9 + $0x14] ss:$8 sps:$4 sm:$0xff]   ;;  %vm5776_vm5 = vcmask 1043456  }
 0xa99   :  { %v3360_v59 = vpack.c.bf16 %v3356_v36, %v3354_v21  ;;  %v4221_v51 = vld [vmem:[%s13453_s19 + $0x80] sm:$0xff]  ;;  %v4222_v58 = vld [vmem:[%s13453_s19 + $0x88] sm:$0xff]  ;;  %v4223_v21 = vld [vmem:[%s13453_s19 + $0x90] sm:$0xff]  ;;  %vm6962_vm7 = vcmask 1041408   ;;  %vm6958_vm8 = vcmask 31744   ;;  %vm11627_vm9 = vmmov 0  }
 0xa9a   :  { %3395 = vmatprep.subr.bf16.mxu1 %v3361_v53  ;;  %v4205_v32 = vld [vmem:[%s13453_s19] sm:$0xff]  ;;  %v12803_v11 = vpack.c.bf16 %v4222_v58, %v4221_v51  ;;  %v4206_v53 = vld [vmem:[%s13453_s19 + $0x8] sm:$0xff]  ;;  %v4224_v36 = vld [vmem:[%s13453_s19 + $0x98] sm:$0xff]  ;;  %vm7999_vm11 = vcmask 74752   ;;  %vm7997_vm12 = vcmask 1024  }
 0xa9b   :  { %v10638_v51 = vld [vmem:[%s13451_s9 + $0x200] ss:$8 sps:$4 sm:$0xff]   ;;  %v10643_v58 = vld [vmem:[%s13451_s9 + $0x214] ss:$8 sps:$4 sm:$0xff]  }
 0xa9c   :  { %3396 = vmatpush1.bf16.msra.mxu1 %v3360_v59  ;;  %9701 = vmatprep.subr.bf16.mxu0 %v12803_v11 }
 0xa9d   :  { %3687 = vmatprep.subr.bf16.mxu1 %v10544_v15  ;;  %v12810_v15 = vpack.c.bf16 %v4206_v53, %v4205_v32  ;;  %v10641_v32 = vld [vmem:[%s13451_s9 + $0x210] ss:$8 sps:$4 sm:$0xff]   ;;  %v10646_v53 = vld [vmem:[%s13451_s9 + $0x224] ss:$8 sps:$4 sm:$0xff]  }
 0xa9f   :  { %8422 = vmatmul.mubr.msk.bf16.vlgmr.msra.gmra.mrb[48].mxu1 %vm3383_vm13, %v10539_v26  ;;  %v12812_v26 = vpack.c.bf16 %v4224_v36, %v4223_v21  ;;  %9703 = vmatpush3.bf16.msra.mxu0 %v12810_v15  ;;  %v10644_v21 = vld [vmem:[%s13451_s9 + $0x220] ss:$8 sps:$4 sm:$0xff]   ;;  %v10649_v36 = vld [vmem:[%s13451_s9 + $0x234] ss:$8 sps:$4 sm:$0xff]  }
 0xaa0   :  { %3435 = vmatprep.mubr.bf16.mxu1 %v11624_v0  ;;  %3688 = vmatpush1.bf16.msra.mxu1 %v10542_v29  ;;  %v4207_v29 = vld [vmem:[%s13453_s19 + $0x10] sm:$0xff] }
 0xaa1   :  { %3689 = vmatprep.subr.bf16.mxu1 %v10547_v37  ;;  %v4208_v37 = vld [vmem:[%s13453_s19 + $0x18] sm:$0xff]  ;;  %9705 = vmatprep.subr.bf16.mxu0 %v12812_v26 }
 0xaa4   :  { %3690 = vmatpush1.bf16.msra.mxu1 %v10545_v9  ;;  %v4225_v9 = vld [vmem:[%s13453_s19 + $0xa0] sm:$0xff] }
 0xaa5   :  { %3691 = vmatprep.subr.bf16.mxu1 %v10550_v35 }
 0xaa7   :  { %8423 = vmatmul.mubr.msk.bf16.gmra.mrb[52].mxu1 %vm3383_vm13, %v10540_v40  ;;  %v4226_v40 = vld [vmem:[%s13453_s19 + $0xa8] sm:$0xff] }
 0xaa8   :  { %3445 = vmatprep.mubr.bf16.mxu1 %v11624_v0  ;;  %3692 = vmatpush1.bf16.msra.mxu1 %v10548_v54 }
 0xaa9   :  { %3693 = vmatprep.subr.bf16.mxu1 %v10553_v34 }
 0xaac   :  { %3694 = vmatpush1.bf16.msra.mxu1 %v10551_v62  ;;  %v12826_v62 = vpack.c.bf16 %v4208_v37, %v4207_v29  ;;  %v10653_v29 = vld [vmem:[%s13451_s9 + $0x250] ss:$8 sps:$4 sm:$0xff]   ;;  %v10658_v37 = vld [vmem:[%s13451_s9 + $0x264] ss:$8 sps:$4 sm:$0xff]  }
 0xaad   :  { %3695 = vmatprep.subr.bf16.mxu1 %v10556_v38  ;;  %v10596_v38 = vld [vmem:[%s13451_s9 + $0x20] ss:$8 sps:$4 sm:$0xff]  }
 0xaae   :  { %9707 = vmatpush3.bf16.msra.mxu0 %v12826_v62 }
 0xaaf   :  { %8424 = vmatmul.mubr.msk.bf16.gmra.mrb[56].mxu1 %vm3383_vm13, %v10541_v31 }
 0xab0   :  { %3696 = vmatpush1.bf16.msra.mxu1 %v10554_v5  ;;  %v12832_v5 = vpack.c.bf16 %v4226_v40, %v4225_v9  ;;  %v10656_v9 = vld [vmem:[%s13451_s9 + $0x260] ss:$8 sps:$4 sm:$0xff]   ;;  %v10661_v40 = vld [vmem:[%s13451_s9 + $0x274] ss:$8 sps:$4 sm:$0xff]  }
 0xab1   :  { %3697 = vmatprep.subr.bf16.mxu1 %v10559_v1  ;;  %v4209_v1 = vld [vmem:[%s13453_s19 + $0x20] sm:$0xff] }
 0xab2   :  { %9709 = vmatprep.subr.bf16.mxu0 %v12832_v5 }
 0xab4   :  { %3698 = vmatpush1.bf16.msra.mxu1 %v10557_v63  ;;  %v4210_v63 = vld [vmem:[%s13453_s19 + $0x28] sm:$0xff] }
 0xab5   :  { %3699 = vmatprep.subr.bf16.mxu1 %v10562_v56  ;;  %v10601_v56 = vld [vmem:[%s13451_s9 + $0x34] ss:$8 sps:$4 sm:$0xff]  }
 0xab8   :  { %3700 = vmatpush1.bf16.msra.mxu1 %v10560_v6  ;;  %v4227_v6 = vld [vmem:[%s13453_s19 + $0xb0] sm:$0xff] }
 0xab9   :  { %3701 = vmatprep.subr.bf16.mxu1 %v10565_v46  ;;  %v4228_v46 = vld [vmem:[%s13453_s19 + $0xb8] sm:$0xff] }
 0xabc   :  { %3702 = vmatpush1.bf16.msra.mxu1 %v10563_v49  ;;  %v12840_v49 = vpack.c.bf16 %v4210_v63, %v4209_v1  ;;  %v10667_v1 = vld [vmem:[%s13451_s9 + $0x294] ss:$8 sps:$4 sm:$0xff]   ;;  %v10665_v63 = vld [vmem:[%s13451_s9 + $0x290] ss:$8 sps:$4 sm:$0xff]  }
 0xabd   :  { %3703 = vmatprep.subr.bf16.mxu1 %v10568_v50  ;;  %v10599_v50 = vld [vmem:[%s13451_s9 + $0x30] ss:$8 sps:$4 sm:$0xff]  }
 0xabe   :  { %9711 = vmatpush3.bf16.msra.mxu0 %v12840_v49 }
 0xac0   :  { %3704 = vmatpush1.bf16.msra.mxu1 %v10566_v28  ;;  %v12844_v28 = vpack.c.bf16 %v4228_v46, %v4227_v6  ;;  %v10668_v6 = vld [vmem:[%s13451_s9 + $0x2a0] ss:$8 sps:$4 sm:$0xff]   ;;  %v10673_v46 = vld [vmem:[%s13451_s9 + $0x2b4] ss:$8 sps:$4 sm:$0xff]  }
 0xac1   :  { %3705 = vmatprep.subr.bf16.mxu1 %v10571_v39  ;;  %v4211_v39 = vld [vmem:[%s13453_s19 + $0x30] sm:$0xff] }
 0xac2   :  { %9713 = vmatprep.subr.bf16.mxu0 %v12844_v28 }
 0xac4   :  { %3706 = vmatpush1.bf16.msra.mxu1 %v10569_v2  ;;  %v4212_v2 = vld [vmem:[%s13453_s19 + $0x38] sm:$0xff] }
 0xac5   :  { %3707 = vmatprep.subr.bf16.mxu1 %v10574_v14  ;;  %v10604_v14 = vld [vmem:[%s13451_s9 + $0x44] ss:$8 sps:$4 sm:$0xff]  }
 0xac8   :  { %3708 = vmatpush1.bf16.msra.mxu1 %v10572_v60  ;;  %v12850_v60 = vpack.c.bf16 %v4212_v2, %v4211_v39  ;;  %v10676_v39 = vld [vmem:[%s13451_s9 + $0x2c4] ss:$8 sps:$4 sm:$0xff]   ;;  %v10674_v2 = vld [vmem:[%s13451_s9 + $0x2c0] ss:$8 sps:$4 sm:$0xff]  }
 0xac9   :  { %3709 = vmatprep.subr.bf16.mxu1 %v10577_v47  ;;  %v10602_v47 = vld [vmem:[%s13451_s9 + $0x40] ss:$8 sps:$4 sm:$0xff]  }
 0xaca   :  { %9715 = vmatpush3.bf16.msra.mxu0 %v12850_v60 }
 0xacc   :  { %3710 = vmatpush1.bf16.msra.mxu1 %v10575_v16  ;;  %v10607_v16 = vld [vmem:[%s13451_s9 + $0x54] ss:$8 sps:$4 sm:$0xff]  }
 0xacd   :  { %3711 = vmatprep.subr.bf16.mxu1 %v10580_v17  ;;  %v10605_v17 = vld [vmem:[%s13451_s9 + $0x50] ss:$8 sps:$4 sm:$0xff]  }
 0xad0   :  { %3712 = vmatpush1.bf16.msra.mxu1 %v10578_v20  ;;  %v10610_v20 = vld [vmem:[%s13451_s9 + $0x64] ss:$8 sps:$4 sm:$0xff]  }
 0xad1   :  { %3713 = vmatprep.subr.bf16.mxu1 %v10583_v24  ;;  %v10608_v24 = vld [vmem:[%s13451_s9 + $0x60] ss:$8 sps:$4 sm:$0xff]  }
 0xad4   :  { %3714 = vmatpush1.bf16.msra.mxu1 %v10581_v25  ;;  %v10613_v25 = vld [vmem:[%s13451_s9 + $0x74] ss:$8 sps:$4 sm:$0xff]  }
 0xad5   :  { %3715 = vmatprep.subr.bf16.mxu1 %v10586_v8  ;;  %v10616_v8 = vld [vmem:[%s13451_s9 + $0x84] ss:$8 sps:$4 sm:$0xff]  }
 0xad8   :  { %3716 = vmatpush1.bf16.msra.mxu1 %v10584_v33  ;;  %v10611_v33 = vld [vmem:[%s13451_s9 + $0x70] ss:$8 sps:$4 sm:$0xff]  }
 0xad9   :  { %3717 = vmatprep.subr.bf16.mxu1 %v10589_v12  ;;  %v10619_v12 = vld [vmem:[%s13451_s9 + $0x94] ss:$8 sps:$4 sm:$0xff]  }
 0xadc   :  { %3718 = vmatpush1.bf16.msra.mxu1 %v10587_v42  ;;  %v10614_v42 = vld [vmem:[%s13451_s9 + $0x80] ss:$8 sps:$4 sm:$0xff]  }
 0xadd   :  { %3890 = vmatprep.subr.bf16.mxu1 %v10592_v45  ;;  %v10617_v45 = vld [vmem:[%s13451_s9 + $0x90] ss:$8 sps:$4 sm:$0xff]  }
 0xb72   :  { %v12788_v57 = vpop.f32.mrb[48].mxu1 }
 0xb73   :  { %v3429_v18 = vpop.f32.mrb[49].mxu1 }
 0xb74   :  { %v12790_v52 = vpop.f32.mrb[50].mxu1 }
 0xb75   :  { %v3456_v22 = vpack.c.bf16 %v12790_v52, %v12788_v57  ;;  %v3433_v10 = vpop.f32.mrb[51].mxu1  ;;  %v10647_v57 = vld [vmem:[%s13451_s9 + $0x230] ss:$8 sps:$4 sm:$0xff]   ;;  %v10652_v52 = vld [vmem:[%s13451_s9 + $0x244] ss:$8 sps:$4 sm:$0xff]  }
 0xb76   :  { %v3457_v19 = vpack.c.bf16 %v3433_v10, %v3429_v18  ;;  %v10622_v18 = vld [vmem:[%s13451_s9 + $0xa4] ss:$8 sps:$4 sm:$0xff]   ;;  %v10620_v10 = vld [vmem:[%s13451_s9 + $0xa0] ss:$8 sps:$4 sm:$0xff]  }
 0xb7a   :  { %v3437_v43 = vpop.f32.mrb[52].mxu1 }
 0xb7b   :  { %v3439_v7 = vpop.f32.mrb[53].mxu1 }
 0xb7c   :  { %v3441_v27 = vpop.f32.mrb[54].mxu1 }
 0xb7d   :  { %v3458_v30 = vpack.c.bf16 %v3441_v27, %v3437_v43  ;;  %v3443_v4 = vpop.f32.mrb[55].mxu1  ;;  %v10623_v43 = vld [vmem:[%s13451_s9 + $0xb0] ss:$8 sps:$4 sm:$0xff]   ;;  %v10626_v27 = vld [vmem:[%s13451_s9 + $0xc0] ss:$8 sps:$4 sm:$0xff]  }
 0xb7e   :  { %v3459_v3 = vpack.c.bf16 %v3443_v4, %v3439_v7  ;;  %v10628_v7 = vld [vmem:[%s13451_s9 + $0xc4] ss:$8 sps:$4 sm:$0xff]   ;;  %v10629_v4 = vld [vmem:[%s13451_s9 + $0xd0] ss:$8 sps:$4 sm:$0xff]  }
 0xb80   :  { %3719 = vmatprep.mubr.bf16.mxu1 %v3459_v3  ;;  %v10634_v3 = vld [vmem:[%s13451_s9 + $0xe4] ss:$8 sps:$4 sm:$0xff]  }
 0xb81   :  { %3720 = vmatmul.mubr.bf16.vlgmr.msra.gmra.mrb[60].mxu1 %v3458_v30  ;;  %v10631_v30 = vld [vmem:[%s13451_s9 + $0xd4] ss:$8 sps:$4 sm:$0xff]  }
 0xb82   :  { %3891 = vmatpush1.bf16.msra.mxu1 %v10590_v13  ;;  %3922 = vmatprep.mubr.bf16.mxu1 %v3457_v19  ;;  %v12801_v55 = vpop.f32.mrb[56].mxu1  ;;  %v10625_v19 = vld [vmem:[%s13451_s9 + $0xb4] ss:$8 sps:$4 sm:$0xff]   ;;  %v10632_v13 = vld [vmem:[%s13451_s9 + $0xe0] ss:$8 sps:$4 sm:$0xff]  }
 0xb83   :  { %3892 = vmatprep.subr.bf16.mxu1 %v10595_v44  ;;  %v12808_v59 = vpop.f32.mrb[57].mxu1  ;;  %v10637_v44 = vld [vmem:[%s13451_s9 + $0xf4] ss:$8 sps:$4 sm:$0xff]  }
 0xb84   :  { %v12817_v35 = vpop.f32.mrb[58].mxu1 }
 0xb85   :  { %v3460_v54 = vpack.c.bf16 %v12817_v35, %v12801_v55  ;;  %v12823_v34 = vpop.f32.mrb[59].mxu1  ;;  %v4216_v35 = vld [vmem:[%s13453_s19 + $0x58] sm:$0xff] }
 0xb86   :  { %3893 = vmatpush1.bf16.msra.mxu1 %v10593_v61  ;;  %v3461_v31 = vpack.c.bf16 %v12823_v34, %v12808_v59  ;;  %v10635_v61 = vld [vmem:[%s13451_s9 + $0xf0] ss:$8 sps:$4 sm:$0xff]   ;;  %v10655_v59 = vld [vmem:[%s13451_s9 + $0x254] ss:$8 sps:$4 sm:$0xff]  }
 0xb87   :  { %3894 = vmatprep.subr.bf16.mxu1 %v10598_v23  ;;  %v10640_v23 = vld [vmem:[%s13451_s9 + $0x204] ss:$8 sps:$4 sm:$0xff]   ;;  %v10659_v34 = vld [vmem:[%s13451_s9 + $0x270] ss:$8 sps:$4 sm:$0xff]  }
 0xb8a   :  { %3895 = vmatpush1.bf16.msra.mxu1 %v10596_v38  ;;  %v10664_v38 = vld [vmem:[%s13451_s9 + $0x284] ss:$8 sps:$4 sm:$0xff]  }
 0xb8b   :  { %3896 = vmatprep.subr.bf16.mxu1 %v10601_v56  ;;  %v10670_v56 = vld [vmem:[%s13451_s9 + $0x2a4] ss:$8 sps:$4 sm:$0xff]  }
 0xb8e   :  { %3897 = vmatpush1.bf16.msra.mxu1 %v10599_v50  ;;  %v10671_v50 = vld [vmem:[%s13451_s9 + $0x2b0] ss:$8 sps:$4 sm:$0xff]  }
 0xb8f   :  { %3898 = vmatprep.subr.bf16.mxu1 %v10604_v14  ;;  %v10679_v14 = vld [vmem:[%s13451_s9 + $0x2d4] ss:$8 sps:$4 sm:$0xff]  }
 0xb92   :  { %3899 = vmatpush1.bf16.msra.mxu1 %v10602_v47  ;;  %v10677_v47 = vld [vmem:[%s13451_s9 + $0x2d0] ss:$8 sps:$4 sm:$0xff]  }
 0xb93   :  { %3900 = vmatprep.subr.bf16.mxu1 %v10607_v16  ;;  %v10682_v16 = vld [vmem:[%s13451_s9 + $0x2e4] ss:$8 sps:$4 sm:$0xff]  }
 0xb96   :  { %3901 = vmatpush1.bf16.msra.mxu1 %v10605_v17  ;;  %v10680_v17 = vld [vmem:[%s13451_s9 + $0x2e0] ss:$8 sps:$4 sm:$0xff]  }
 0xb97   :  { %3902 = vmatprep.subr.bf16.mxu1 %v10610_v20  ;;  %v10685_v20 = vld [vmem:[%s13451_s9 + $0x2f4] ss:$8 sps:$4 sm:$0xff]  }
 0xb9a   :  { %3903 = vmatpush1.bf16.msra.mxu1 %v10608_v24  ;;  %v10683_v24 = vld [vmem:[%s13451_s9 + $0x2f0] ss:$8 sps:$4 sm:$0xff]  }
 0xb9b   :  { %3904 = vmatprep.subr.bf16.mxu1 %v10613_v25  ;;  %v4229_v25 = vld [vmem:[%s13453_s19 + $0xc0] sm:$0xff] }
 0xb9e   :  { %3905 = vmatpush1.bf16.msra.mxu1 %v10611_v33  ;;  %v4230_v33 = vld [vmem:[%s13453_s19 + $0xc8] sm:$0xff] }
 0xb9f   :  { %3906 = vmatprep.subr.bf16.mxu1 %v10616_v8  ;;  %v12920_v8 = vpack.c.bf16 %v4230_v33, %v4229_v25 }
 0xba1   :  { %9717 = vmatprep.subr.bf16.mxu0 %v12920_v8 }
 0xba2   :  { %3907 = vmatpush1.bf16.msra.mxu1 %v10614_v42  ;;  %v4213_v42 = vld [vmem:[%s13453_s19 + $0x40] sm:$0xff] }
 0xba3   :  { %3908 = vmatprep.subr.bf16.mxu1 %v10619_v12  ;;  %v4214_v12 = vld [vmem:[%s13453_s19 + $0x48] sm:$0xff] }
 0xba6   :  { %3909 = vmatpush1.bf16.msra.mxu1 %v10617_v45  ;;  %v12924_v45 = vpack.c.bf16 %v4214_v12, %v4213_v42  ;;  %v4391_v42 = vld [vmem:[#allocation10 + $0x10] sm:$0xff]  ;;  %v4394_v12 = vld [vmem:[#allocation10 + $0x28] sm:$0xff] }
 0xba7   :  { %3910 = vmatprep.subr.bf16.mxu1 %v10622_v18  ;;  %v4231_v18 = vld [vmem:[%s13453_s19 + $0xd0] sm:$0xff] }
 0xba8   :  { %9719 = vmatpush3.bf16.msra.mxu0 %v12924_v45 }
 0xbaa   :  { %3911 = vmatpush1.bf16.msra.mxu1 %v10620_v10  ;;  %v4232_v10 = vld [vmem:[%s13453_s19 + $0xd8] sm:$0xff] }
 0xbab   :  { %3912 = vmatprep.subr.bf16.mxu1 %v10625_v19  ;;  %v4215_v19 = vld [vmem:[%s13453_s19 + $0x50] sm:$0xff]  ;;  %v12931_v55 = vpack.c.bf16 %v4232_v10, %v4231_v18 }
 0xbad   :  { %9721 = vmatprep.subr.bf16.mxu0 %v12931_v55 }
 0xbae   :  { %3913 = vmatpush1.bf16.msra.mxu1 %v10623_v43  ;;  %v4234_v43 = vld [vmem:[%s13453_s19 + $0xe8] sm:$0xff] }
 0xbaf   :  { %3914 = vmatprep.subr.bf16.mxu1 %v10628_v7  ;;  %v12936_v7 = vpack.c.bf16 %v4216_v35, %v4215_v19  ;;  %v4393_v19 = vld [vmem:[#allocation10 + $0x20] sm:$0xff] }
 0xbb1   :  { %9723 = vmatpush3.bf16.msra.mxu0 %v12936_v7 }
 0xbb2   :  { %3915 = vmatpush1.bf16.msra.mxu1 %v10626_v27 }
 0xbb3   :  { %3916 = vmatprep.subr.bf16.mxu1 %v10631_v30  ;;  %v4217_v30 = vld [vmem:[%s13453_s19 + $0x60] sm:$0xff] }
 0xbb6   :  { %3917 = vmatpush1.bf16.msra.mxu1 %v10629_v4  ;;  %v4218_v4 = vld [vmem:[%s13453_s19 + $0x68] sm:$0xff] }
 0xbb7   :  { %3918 = vmatprep.subr.bf16.mxu1 %v10634_v3  ;;  %v4235_v3 = vld [vmem:[%s13453_s19 + $0xf0] sm:$0xff] }
 0xbba   :  { %3919 = vmatpush1.bf16.msra.mxu1 %v10632_v13  ;;  %v4236_v13 = vld [vmem:[%s13453_s19 + $0xf8] sm:$0xff] }
 0xbbb   :  { %3920 = vmatprep.subr.bf16.mxu1 %v10637_v44  ;;  %v9726_v44 = vpack.c.bf16 %v4218_v4, %v4217_v30 }
 0xbbe   :  { %3921 = vmatpush1.bf16.msra.mxu1 %v10635_v61  ;;  %v9728_v61 = vpack.c.bf16 %v4236_v13, %v4235_v3 }
 0xbbf   :  { %4126 = vmatprep.subr.bf16.mxu1 %v10640_v23  ;;  %v4219_v23 = vld [vmem:[%s13453_s19 + $0x70] sm:$0xff] }
 0xbc1   :  { %3923 = vmatmul.mubr.bf16.vlgmr.msra.gmra.mrb[60].mxu1 %v3456_v22  ;;  %v10650_v22 = vld [vmem:[%s13451_s9 + $0x240] ss:$8 sps:$4 sm:$0xff]  }
 0xbc2   :  { %4127 = vmatpush1.bf16.msra.mxu1 %v10638_v51  ;;  %4158 = vmatprep.mubr.bf16.mxu1 %v3461_v31  ;;  %v10662_v31 = vld [vmem:[%s13451_s9 + $0x280] ss:$8 sps:$4 sm:$0xff]   ;;  %v4220_v51 = vld [vmem:[%s13453_s19 + $0x78] sm:$0xff] }
 0xbc3   :  { %4128 = vmatprep.subr.bf16.mxu1 %v10643_v58  ;;  %v9730_v58 = vpack.c.bf16 %v4220_v51, %v4219_v23 }
 0xbc6   :  { %4129 = vmatpush1.bf16.msra.mxu1 %v10641_v32 }
 0xbc7   :  { %4130 = vmatprep.subr.bf16.mxu1 %v10646_v53 }
 0xbca   :  { %4131 = vmatpush1.bf16.msra.mxu1 %v10644_v21 }
 0xbcb   :  { %4132 = vmatprep.subr.bf16.mxu1 %v10649_v36 }
 0xbce   :  { %4133 = vmatpush1.bf16.msra.mxu1 %v10647_v57 }
 0xbcf   :  { %4134 = vmatprep.subr.bf16.mxu1 %v10652_v52 }
 0xbd2   :  { %4135 = vmatpush1.bf16.msra.mxu1 %v10650_v22 }
 0xbd3   :  { %4136 = vmatprep.subr.bf16.mxu1 %v10655_v59 }
 0xbd6   :  { %4137 = vmatpush1.bf16.msra.mxu1 %v10653_v29 }
 0xbd7   :  { %4138 = vmatprep.subr.bf16.mxu1 %v10658_v37 }
 0xbda   :  { %4139 = vmatpush1.bf16.msra.mxu1 %v10656_v9 }
 0xbdb   :  { %4140 = vmatprep.subr.bf16.mxu1 %v10661_v40 }
 0xbde   :  { %4141 = vmatpush1.bf16.msra.mxu1 %v10659_v34 }
 0xbdf   :  { %4142 = vmatprep.subr.bf16.mxu1 %v10664_v38 }
 0xbe2   :  { %4143 = vmatpush1.bf16.msra.mxu1 %v10662_v31 }
 0xbe3   :  { %4144 = vmatprep.subr.bf16.mxu1 %v10667_v1 }
 0xbe6   :  { %4145 = vmatpush1.bf16.msra.mxu1 %v10665_v63 }
 0xbe7   :  { %4146 = vmatprep.subr.bf16.mxu1 %v10670_v56 }
 0xbea   :  { %4147 = vmatpush1.bf16.msra.mxu1 %v10668_v6 }
 0xbeb   :  { %4148 = vmatprep.subr.bf16.mxu1 %v10673_v46 }
 0xbee   :  { %4149 = vmatpush1.bf16.msra.mxu1 %v10671_v50 }
 0xbef   :  { %4150 = vmatprep.subr.bf16.mxu1 %v10676_v39 }
 0xbf2   :  { %4151 = vmatpush1.bf16.msra.mxu1 %v10674_v2 }
 0xbf3   :  { %4152 = vmatprep.subr.bf16.mxu1 %v10679_v14 }
 0xbf6   :  { %4153 = vmatpush1.bf16.msra.mxu1 %v10677_v47 }
 0xbf7   :  { %4154 = vmatprep.subr.bf16.mxu1 %v10682_v16 }
 0xbfa   :  { %4155 = vmatpush1.bf16.msra.mxu1 %v10680_v17 }
 0xbfb   :  { %4156 = vmatprep.subr.bf16.mxu1 %v10685_v20 }
 0xbfe   :  { %4157 = vmatpush1.bf16.msra.mxu1 %v10683_v24 }
 0xc01   :  { %4159 = vmatmul.mubr.bf16.vlgmr.msra.gmra.mrb[60].mxu1 %v3460_v54  ;;  %v4233_v54 = vld [vmem:[%s13453_s19 + $0xe0] sm:$0xff] }
 0xc02   :  { %v12938_v27 = vpack.c.bf16 %v4234_v43, %v4233_v54 }
 0xc04   :  { %9725 = vmatprep.subr.bf16.mxu0 %v12938_v27 }
 0xc05   :  { %9727 = vmatpush3.bf16.msra.mxu0 %v9726_v44 }
 0xc06   :  { %9729 = vmatprep.subr.bf16.mxu0 %v9728_v61 }
 0xc09   :  { %9731 = vmatpush3.bf16.msra.mxu0 %v9730_v58 }
 0xc0a   :  { %9733 = vmatprep.subr.bf16.mxu0 %v12803_v11 }
 0xcd4   :  { %v12950_v32 = vpop.f32.mrb[60].mxu1 }
 0xcd5   :  { %v12952_v53 = vpop.f32.mrb[61].mxu1  ;;  %v4187_v36 = vmul.f32 %v12950_v32, %v12950_v32 }
 0xcd6   :  { %v12954_v21 = vpop.f32.mrb[62].mxu1  ;;  %v4188_v11 = vmul.f32 %v12952_v53, %v12952_v53 }
 0xcd7   :  { %v4173_v57 = vadd.f32 %v12954_v21, %v12950_v32  ;;  %v4189_v52 = vmul.f32 %v12954_v21, %v12954_v21  ;;  %v12962_v22 = vpop.f32.mrb[63].mxu1 }
 0xcd8   :  { %v4180_v59 = vadd.f32 %v12962_v22, %v12952_v53  ;;  %v4190_v29 = vmul.f32 %v12962_v22, %v12962_v22 }
 0xcd9   :  { %v4174_v37 = vrot.slane %v4173_v57, 4  ;;  %v4191_v9 = vadd.f32 %v4189_v52, %v4187_v36 }
 0xcda   :  { %v4181_v40 = vrot.slane %v4180_v59, 4  ;;  %v4198_v34 = vadd.f32 %v4190_v29, %v4188_v11  ;;  %v4386_v11 = vld [vmem:[#allocation13] sm:$0x1] }
 0xcdb   :  { %v4175_v38 = vadd.f32 %v4174_v37, %v4173_v57  ;;  %v4192_v25 = vrot.slane %v4191_v9, 4 }
 0xcdc   :  { %v4182_v31 = vadd.f32 %v4181_v40, %v4180_v59  ;;  %v4199_v1 = vrot.slane %v4198_v34, 4 }
 0xcdd   :  { %v4176_v63 = vrot.slane %v4175_v38, 2  ;;  %v4193_v33 = vadd.f32 %v4192_v25, %v4191_v9 }
 0xcde   :  { %v4183_v56 = vrot.slane %v4182_v31, 2  ;;  %v4200_v6 = vadd.f32 %v4199_v1, %v4198_v34 }
 0xcdf   :  { %v4177_v46 = vadd.f32 %v4176_v63, %v4175_v38 }
 0xce0   :  { %v4184_v50 = vadd.f32 %v4183_v56, %v4182_v31  ;;  %v4201_v39 = vrot.slane %v4200_v6, 2 }
 0xce1   :  { %v4178_v2 = vrot.slane %v4177_v46, 1 }
 0xce2   :  { %v4185_v14 = vrot.slane %v4184_v50, 1  ;;  %v4202_v47 = vadd.f32 %v4201_v39, %v4200_v6 }
 0xce3   :  { %v4179_v20 = vadd.f32 %v4178_v2, %v4177_v46 }
 0xce4   :  { %v4186_v16 = vadd.f32 %v4185_v14, %v4184_v50  ;;  %v4203_v17 = vrot.slane %v4202_v47, 1 }
 0xce6   :  { %4301 = vmatprep.mubr.f32.mxu0 %v4186_v16  ;;  %v4204_v24 = vadd.f32 %v4203_v17, %v4202_v47 }
 0xce7   :  { %4302 = vmatmul.mubr.f32.vlgmr.msra.gmra.mrb[64].mxu0 %v4179_v20 }
 0xce8   :  { %9735 = vmatpush3.bf16.msra.mxu0 %v12810_v15  ;;  %4371 = vmatprep.mubr.f32.mxu0 %v4204_v24  ;;  %v4194_v15 = vrot.slane %v4193_v33, 2 }
 0xce9   :  { %9737 = vmatprep.subr.bf16.mxu0 %v12812_v26 }
 0xcea   :  { %v4195_v26 = vadd.f32 %v4194_v15, %v4193_v33  ;;  %v10690_v33 = vld [vmem:[%s13454_s24 + $0x104] ss:$8 sps:$4 sm:$0xff]  }
 0xceb   :  { %v10686_v15 = vld [vmem:[%s13455_s18] sm:$0xff]  }
 0xcec   :  { %9739 = vmatpush3.bf16.msra.mxu0 %v12826_v62  ;;  %v4196_v62 = vrot.slane %v4195_v26, 1 }
 0xced   :  { %9741 = vmatprep.subr.bf16.mxu0 %v12832_v5 }
 0xcee   :  { %v4197_v5 = vadd.f32 %v4196_v62, %v4195_v26  ;;  %v10688_v26 = vld [vmem:[%s13454_s24 + $0x100] ss:$8 sps:$4 sm:$0xff]   ;;  %v10693_v62 = vld [vmem:[%s13454_s24 + $0x114] ss:$8 sps:$4 sm:$0xff]  }
 0xcf0   :  { %9743 = vmatpush3.bf16.msra.mxu0 %v12840_v49  ;;  %v4390_v49 = vld [vmem:[#allocation10 + $0x8] sm:$0xff] }
 0xcf1   :  { %9745 = vmatprep.subr.bf16.mxu0 %v12844_v28  ;;  %v4392_v28 = vld [vmem:[#allocation10 + $0x18] sm:$0xff] }
 0xcf4   :  { %9747 = vmatpush3.bf16.msra.mxu0 %v12850_v60  ;;  %v4389_v60 = vld [vmem:[#allocation10] sm:$0xff] }
 0xcf5   :  { %9749 = vmatprep.subr.bf16.mxu0 %v12920_v8  ;;  %v9764_v8 = vpack.c.bf16 %v4392_v28, %v4390_v49  ;;  %v9766_v18 = vpack.c.bf16 %v4391_v42, %v4389_v60  ;;  %v10696_v49 = vld [vmem:[%s13454_s24 + $0x124] ss:$8 sps:$4 sm:$0xff]   ;;  %v10687_v28 = vld [vmem:[%s13455_s18 + $0x8] ss:$0 sps:$4 sm:$0xff]   ;;  %v10697_v42 = vld [vmem:[%s13454_s24 + $0x130] ss:$8 sps:$4 sm:$0xff]  }
 0xcf6   :  { %v10694_v60 = vld [vmem:[%s13454_s24 + $0x120] ss:$8 sps:$4 sm:$0xff]  }
 0xcf8   :  { %9751 = vmatpush3.bf16.msra.mxu0 %v12924_v45  ;;  %v4396_v45 = vld [vmem:[#allocation10 + $0x38] sm:$0xff] }
 0xcf9   :  { %9753 = vmatprep.subr.bf16.mxu0 %v12931_v55  ;;  %v9768_v10 = vpack.c.bf16 %v4396_v45, %v4394_v12  ;;  %v4395_v55 = vld [vmem:[#allocation10 + $0x30] sm:$0xff] }
 0xcfa   :  { %v9770_v35 = vpack.c.bf16 %v4395_v55, %v4393_v19  ;;  %v10702_v12 = vld [vmem:[%s13454_s24 + $0x144] ss:$8 sps:$4 sm:$0xff]   ;;  %v10700_v45 = vld [vmem:[%s13454_s24 + $0x140] ss:$8 sps:$4 sm:$0xff]  }
 0xcfb   :  { %v10708_v19 = vld [vmem:[%s13454_s24 + $0x164] ss:$8 sps:$4 sm:$0xff]   ;;  %v10706_v55 = vld [vmem:[%s13454_s24 + $0x160] ss:$8 sps:$4 sm:$0xff]  }
 0xcfc   :  { %9755 = vmatpush3.bf16.msra.mxu0 %v12936_v7 }
 0xcfd   :  { %9757 = vmatprep.subr.bf16.mxu0 %v12938_v27 }
 0xd00   :  { %9759 = vmatpush3.bf16.msra.mxu0 %v9726_v44 }
 0xd01   :  { %9761 = vmatprep.subr.bf16.mxu0 %v9728_v61 }
 0xd04   :  { %9763 = vmatpush3.bf16.msra.mxu0 %v9730_v58  ;;  %v4384_v58 = vld [vmem:[#allocation11] sm:$0x1] }
 0xd05   :  { %9765 = vmatprep.subr.bf16.mxu0 %v9764_v8 }
 0xd07   :  { %4372 = vmatmul.mubr.f32.vlgmr.msra.gmra.mrb[66].mxu0 %v4197_v5  ;;  %v10691_v5 = vld [vmem:[%s13454_s24 + $0x110] ss:$8 sps:$4 sm:$0xff]  }
 0xd08   :  { %4464 = vmatprep.mubr.f32.mxu0 %v11625_v41  ;;  %9767 = vmatpush1.bf16.msra.mxu0 %v9766_v18 }
 0xd09   :  { %9769 = vmatprep.subr.bf16.mxu0 %v9768_v10 }
 0xd0c   :  { %9771 = vmatpush1.bf16.msra.mxu0 %v9770_v35 }
 0xd0d   :  { %9773 = vmatprep.subr.bf16.mxu0 %v9764_v8  ;;  %v10699_v8 = vld [vmem:[%s13454_s24 + $0x134] ss:$8 sps:$4 sm:$0xff]  }
 0xdba   :  { %v9083_v54 = vpop.f32.mrb[64].mxu0 }
 0xdbb   :  { %v9084_v43 = vpop.f32.mrb[65].mxu0 }
 0xdbc   :  { %v9085_v7 = vadd.f32 %v9084_v43, %v9083_v54  ;;  %v10709_v54 = vld [vmem:[%s13454_s24 + $0x170] ss:$8 sps:$4 sm:$0xff]   ;;  %v10714_v43 = vld [vmem:[%s13454_s24 + $0x184] ss:$8 sps:$4 sm:$0xff]  }
 0xdbe   :  { %v4377_v27 = vmul.f32 0.0078125, %v9085_v7  ;;  %v10712_v7 = vld [vmem:[%s13454_s24 + $0x180] ss:$8 sps:$4 sm:$0xff]  }
 0xdc0   :  { %v4379_v13 = vmul.f32 %v4377_v27, %v4377_v27 }
 0xdda   :  { %v9118_v30 = vpop.f32.mrb[66].mxu0 }
 0xddb   :  { %v9119_v4 = vpop.f32.mrb[67].mxu0 }
 0xddc   :  { %v9120_v3 = vadd.f32 %v9119_v4, %v9118_v30  ;;  %v10715_v30 = vld [vmem:[%s13454_s24 + $0x190] ss:$8 sps:$4 sm:$0xff]   ;;  %v10720_v4 = vld [vmem:[%s13454_s24 + $0x1a4] ss:$8 sps:$4 sm:$0xff]  }
 0xdde   :  { %v4378_v44 = vmul.f32 0.0078125, %v9120_v3  ;;  %v10718_v3 = vld [vmem:[%s13454_s24 + $0x1a0] ss:$8 sps:$4 sm:$0xff]  }
 0xde0   :  { %v4380_v61 = vsub.f32 %v4378_v44, %v4379_v13  ;;  %v10723_v13 = vld [vmem:[%s13454_s24 + $0x1b4] ss:$8 sps:$4 sm:$0xff]   ;;  %v10721_v44 = vld [vmem:[%s13454_s24 + $0x1b0] ss:$8 sps:$4 sm:$0xff]  }
 0xde2   :  { %v4381_v23 = vmax.f32 %v4380_v61, 0.0  ;;  %v10726_v61 = vld [vmem:[%s13454_s24 + $0x1c4] ss:$8 sps:$4 sm:$0xff]  }
 0xde4   :  { %v4382_v51 = vadd.f32 1e-05, %v4381_v23  ;;  %v10724_v23 = vld [vmem:[%s13454_s24 + $0x1c0] ss:$8 sps:$4 sm:$0xff]  }
 0xde6   :  { %11037 = vrsqrt.f32 %v4382_v51  ;;  %v10729_v51 = vld [vmem:[%s13454_s24 + $0x1d4] ss:$8 sps:$4 sm:$0xff]  }
 0xdf0   :  { %v11038_v36 = vpop.eup %11037 }
 0xdf1   :  { %v4385_v57 = vmul.f32 %v11038_v36, %v4384_v58  ;;  %v10727_v58 = vld [vmem:[%s13454_s24 + $0x1d0] ss:$8 sps:$4 sm:$0xff]   ;;  %v10730_v36 = vld [vmem:[%s13454_s24 + $0x1e0] ss:$8 sps:$4 sm:$0xff]  }
 0xdf3   :  { %8585 = vmatmul.mubr.msk.f32.vlgmr.msra.gmra.mrb[68].mxu0 %vm3383_vm13, %v4385_v57  ;;  %v4387_v52 = vmul.f32 %v4385_v57, %v4377_v27  ;;  %v10717_v27 = vld [vmem:[%s13454_s24 + $0x194] ss:$8 sps:$4 sm:$0xff]   ;;  %v10732_v57 = vld [vmem:[%s13454_s24 + $0x1e4] ss:$8 sps:$4 sm:$0xff]  }
 0xdf4   :  { %9775 = vmatpush1.bf16.msra.mxu0 %v9766_v18  ;;  %4538 = vmatprep.mubr.f32.mxu0 %v11625_v41  ;;  %v10705_v18 = vld [vmem:[%s13454_s24 + $0x154] ss:$8 sps:$4 sm:$0xff]  }
 0xdf5   :  { %9777 = vmatprep.subr.bf16.mxu0 %v9768_v10  ;;  %v4388_v59 = vsub.f32 %v4386_v11, %v4387_v52  ;;  %v10703_v10 = vld [vmem:[%s13454_s24 + $0x150] ss:$8 sps:$4 sm:$0xff]   ;;  %v10735_v11 = vld [vmem:[%s13454_s24 + $0x1f4] ss:$8 sps:$4 sm:$0xff]  }
 0xdf6   :  { %v10733_v52 = vld [vmem:[%s13454_s24 + $0x1f0] ss:$8 sps:$4 sm:$0xff]  }
 0xdf8   :  { %9779 = vmatpush1.bf16.msra.mxu0 %v9770_v35  ;;  %v10711_v35 = vld [vmem:[%s13454_s24 + $0x174] ss:$8 sps:$4 sm:$0xff]  }
 0xdfb   :  { %8586 = vmatmul.mubr.msk.f32.vlgmr.msra.gmra.mrb[70].mxu0 %vm3383_vm13, %v4388_v59  ;;  %v10738_v59 = vld [vmem:[%s13454_s24 + $0x4] ss:$8 sps:$4 sm:$0xff]  }
 0xdfc   :  { %4632 = vmatprep.mubr.bf16.mxu0 %v11624_v0 }
 0xec6   :  { %v4466_v29 = vpop.f32.mrb[68].mxu0 }
 0xec7   :  { %v4548_v37 = vrot.slane %v4466_v29, %v12401_v48  ;;  %v4468_v9 = vpop.f32.mrb[69].mxu0 }
 0xec8   :  { %v4552_v40 = vrot.slane %v4468_v9, %v12401_v48 }
 0xec9   :  { %v4553_v34 = vmul.f32 %v4548_v37, %v12950_v32  ;;  %v4555_v38 = vmul.f32 %v4548_v37, %v12954_v21 }
 0xeca   :  { %v4554_v31 = vmul.f32 %v4552_v40, %v12952_v53  ;;  %v4556_v1 = vmul.f32 %v4552_v40, %v12962_v22 }
 0xece   :  { %v4540_v63 = vpop.f32.mrb[70].mxu0 }
 0xecf   :  { %v4560_v56 = vrot.slane %v4540_v63, %v12401_v48  ;;  %v4542_v6 = vpop.f32.mrb[71].mxu0 }
 0xed0   :  { %v4564_v46 = vrot.slane %v4542_v6, %v12401_v48  ;;  %v10739_v6 = vld [vmem:[%s13454_s24 + $0x10] ss:$8 sps:$4 sm:$0xff]  }
 0xed1   :  { %v4565_v50 = vadd.f32 %v4560_v56, %v4553_v34  ;;  %v4567_v39 = vadd.f32 %v4560_v56, %v4555_v38  ;;  %v10741_v56 = vld [vmem:[%s13454_s24 + $0x14] ss:$8 sps:$4 sm:$0xff]  }
 0xed2   :  { %v4566_v2 = vadd.f32 %v4564_v46, %v4554_v31  ;;  %v4568_v14 = vadd.f32 %v4564_v46, %v4556_v1  ;;  %v10736_v1 = vld [vmem:[%s13454_s24] ss:$8 sps:$4 sm:$0xff]  }
 0xed3   :  { %vm4569_vm14 = vcmp.gt.f32.partialorder %v4565_v50, 0.0  ;;  %vm4571_vm15 = vcmp.gt.f32.partialorder %v4567_v39, 0.0  ;;  %v4573_v32 = vmul.f32 0.2, %v4565_v50  ;;  %v4575_v21 = vmul.f32 0.2, %v4567_v39 }
 0xed4   :  { %vm4570_vm2 = vcmp.gt.f32.partialorder %v4566_v2, 0.0  ;;  %vm4572_vm3 = vcmp.gt.f32.partialorder %v4568_v14, 0.0  ;;  %v4574_v53 = vmul.f32 0.2, %v4566_v2  ;;  %v4576_v22 = vmul.f32 0.2, %v4568_v14 }
 0xed5   :  { %v4577_v47 = vsel %vm4569_vm14, %v4565_v50, %v4573_v32  ;;  %v4579_v16 = vsel %vm4571_vm15, %v4567_v39, %v4575_v21  ;;  %v10744_v50 = vld [vmem:[%s13454_s24 + $0x24] ss:$8 sps:$4 sm:$0xff]  }
 0xed6   :  { %v4578_v17 = vsel %vm4570_vm2, %v4566_v2, %v4574_v53  ;;  %v4580_v20 = vsel %vm4572_vm3, %v4568_v14, %v4576_v22  ;;  %v4581_v24 = vpack.c.bf16 %v4579_v16, %v4577_v47  ;;  %v5406_v2 = vld [vmem:[%s13456_s21 + $0x80] sm:$0xff]  ;;  %v5407_v14 = vld [vmem:[%s13456_s21 + $0x88] sm:$0xff]  ;;  %v5408_v47 = vld [vmem:[%s13456_s21 + $0x90] sm:$0xff] }
 0xed7   :  { %v4582_v25 = vpack.c.bf16 %v4580_v20, %v4578_v17  ;;  %v5390_v32 = vld [vmem:[%s13456_s21] sm:$0xff]  ;;  %v13047_v53 = vpack.c.bf16 %v5407_v14, %v5406_v2  ;;  %v5391_v22 = vld [vmem:[%s13456_s21 + $0x8] sm:$0xff]  ;;  %v5409_v16 = vld [vmem:[%s13456_s21 + $0x98] sm:$0xff] }
 0xed8   :  { %v13052_v20 = vpack.c.bf16 %v5391_v22, %v5390_v32  ;;  %v10781_v2 = vld [vmem:[%s13454_s24 + $0xf0] ss:$8 sps:$4 sm:$0xff]   ;;  %v10786_v14 = vld [vmem:[%s13454_s24 + $0x204] ss:$8 sps:$4 sm:$0xff]   ;;  %v10784_v32 = vld [vmem:[%s13454_s24 + $0x200] ss:$8 sps:$4 sm:$0xff]  }
 0xed9   :  { %4600 = vmatprep.subr.bf16.mxu0 %v4582_v25  ;;  %v5392_v25 = vld [vmem:[%s13456_s21 + $0x10] sm:$0xff]  ;;  %9781 = vmatprep.subr.bf16.mxu1 %v13047_v53 }
 0xeda   :  { %4601 = vmatpush1.bf16.msra.mxu0 %v4581_v24  ;;  %v13054_v24 = vpack.c.bf16 %v5409_v16, %v5408_v47  ;;  %9783 = vmatpush3.bf16.msra.mxu1 %v13052_v20  ;;  %v10789_v22 = vld [vmem:[%s13454_s24 + $0x214] ss:$8 sps:$4 sm:$0xff]   ;;  %v10787_v47 = vld [vmem:[%s13454_s24 + $0x210] ss:$8 sps:$4 sm:$0xff]   ;;  %v10792_v16 = vld [vmem:[%s13454_s24 + $0x224] ss:$8 sps:$4 sm:$0xff]  }
 0xedb   :  { %4886 = vmatprep.subr.bf16.mxu0 %v10690_v33  ;;  %v5393_v33 = vld [vmem:[%s13456_s21 + $0x18] sm:$0xff] }
 0xedc   :  { %9785 = vmatprep.subr.bf16.mxu1 %v13054_v24 }
 0xedd   :  { %8589 = vmatmul.mubr.msk.bf16.vlgmr.msra.gmra.mrb[72].mxu0 %vm3153_vm4, %v10686_v15  ;;  %v5410_v15 = vld [vmem:[%s13456_s21 + $0xa0] sm:$0xff] }
 0xede   :  { %4642 = vmatprep.mubr.bf16.mxu0 %v11624_v0  ;;  %4887 = vmatpush1.bf16.msra.mxu0 %v10688_v26  ;;  %v5411_v26 = vld [vmem:[%s13456_s21 + $0xa8] sm:$0xff] }
 0xedf   :  { %4888 = vmatprep.subr.bf16.mxu0 %v10693_v62  ;;  %v13062_v62 = vpack.c.bf16 %v5393_v33, %v5392_v25  ;;  %v10795_v25 = vld [vmem:[%s13454_s24 + $0x234] ss:$8 sps:$4 sm:$0xff]   ;;  %v10798_v33 = vld [vmem:[%s13454_s24 + $0x244] ss:$8 sps:$4 sm:$0xff]  }
 0xee1   :  { %9787 = vmatpush3.bf16.msra.mxu1 %v13062_v62 }
 0xee2   :  { %4889 = vmatpush1.bf16.msra.mxu0 %v10691_v5  ;;  %v10742_v5 = vld [vmem:[%s13454_s24 + $0x20] ss:$8 sps:$4 sm:$0xff]  }
 0xee3   :  { %4890 = vmatprep.subr.bf16.mxu0 %v10696_v49  ;;  %v13066_v49 = vpack.c.bf16 %v5411_v26, %v5410_v15  ;;  %v10801_v15 = vld [vmem:[%s13454_s24 + $0x254] ss:$8 sps:$4 sm:$0xff]   ;;  %v10799_v26 = vld [vmem:[%s13454_s24 + $0x250] ss:$8 sps:$4 sm:$0xff]  }
 0xee5   :  { %8590 = vmatmul.mubr.msk.bf16.gmra.mrb[76].mxu0 %vm3153_vm4, %v10687_v28  ;;  %v5394_v28 = vld [vmem:[%s13456_s21 + $0x20] sm:$0xff]  ;;  %9789 = vmatprep.subr.bf16.mxu1 %v13066_v49 }
 0xee6   :  { %4891 = vmatpush1.bf16.msra.mxu0 %v10694_v60  ;;  %v5395_v60 = vld [vmem:[%s13456_s21 + $0x28] sm:$0xff] }
 0xee7   :  { %4892 = vmatprep.subr.bf16.mxu0 %v10699_v8  ;;  %v10747_v8 = vld [vmem:[%s13454_s24 + $0x34] ss:$8 sps:$4 sm:$0xff]  }
 0xeea   :  { %4893 = vmatpush1.bf16.msra.mxu0 %v10697_v42  ;;  %v5412_v42 = vld [vmem:[%s13456_s21 + $0xb0] sm:$0xff] }
 0xeeb   :  { %4894 = vmatprep.subr.bf16.mxu0 %v10702_v12  ;;  %v5413_v12 = vld [vmem:[%s13456_s21 + $0xb8] sm:$0xff] }
 0xeee   :  { %4895 = vmatpush1.bf16.msra.mxu0 %v10700_v45  ;;  %v13074_v45 = vpack.c.bf16 %v5395_v60, %v5394_v28  ;;  %v10802_v28 = vld [vmem:[%s13454_s24 + $0x260] ss:$8 sps:$4 sm:$0xff]   ;;  %v10807_v60 = vld [vmem:[%s13454_s24 + $0x274] ss:$8 sps:$4 sm:$0xff]  }
 0xeef   :  { %4896 = vmatprep.subr.bf16.mxu0 %v10705_v18  ;;  %v10745_v18 = vld [vmem:[%s13454_s24 + $0x30] ss:$8 sps:$4 sm:$0xff]  }
 0xef0   :  { %9791 = vmatpush3.bf16.msra.mxu1 %v13074_v45 }
 0xef2   :  { %4897 = vmatpush1.bf16.msra.mxu0 %v10703_v10  ;;  %v13078_v10 = vpack.c.bf16 %v5413_v12, %v5412_v42  ;;  %v10810_v42 = vld [vmem:[%s13454_s24 + $0x284] ss:$8 sps:$4 sm:$0xff]   ;;  %v10808_v12 = vld [vmem:[%s13454_s24 + $0x280] ss:$8 sps:$4 sm:$0xff]  }
 0xef3   :  { %4898 = vmatprep.subr.bf16.mxu0 %v10708_v19  ;;  %v5396_v19 = vld [vmem:[%s13456_s21 + $0x30] sm:$0xff] }
 0xef4   :  { %9793 = vmatprep.subr.bf16.mxu1 %v13078_v10 }
 0xef6   :  { %4899 = vmatpush1.bf16.msra.mxu0 %v10706_v55  ;;  %v5397_v55 = vld [vmem:[%s13456_s21 + $0x38] sm:$0xff] }
 0xef7   :  { %4900 = vmatprep.subr.bf16.mxu0 %v10711_v35  ;;  %v10750_v35 = vld [vmem:[%s13454_s24 + $0x44] ss:$8 sps:$4 sm:$0xff]  }
 0xefa   :  { %4901 = vmatpush1.bf16.msra.mxu0 %v10709_v54  ;;  %v5414_v54 = vld [vmem:[%s13456_s21 + $0xc0] sm:$0xff] }
 0xefb   :  { %4902 = vmatprep.subr.bf16.mxu0 %v10714_v43  ;;  %v5415_v43 = vld [vmem:[%s13456_s21 + $0xc8] sm:$0xff] }
 0xefe   :  { %4903 = vmatpush1.bf16.msra.mxu0 %v10712_v7  ;;  %v13086_v7 = vpack.c.bf16 %v5397_v55, %v5396_v19  ;;  %v10811_v19 = vld [vmem:[%s13454_s24 + $0x290] ss:$8 sps:$4 sm:$0xff]   ;;  %v10816_v55 = vld [vmem:[%s13454_s24 + $0x2a4] ss:$8 sps:$4 sm:$0xff]  }
 0xeff   :  { %4904 = vmatprep.subr.bf16.mxu0 %v10717_v27  ;;  %v10748_v27 = vld [vmem:[%s13454_s24 + $0x40] ss:$8 sps:$4 sm:$0xff]  }
 0xf00   :  { %9795 = vmatpush3.bf16.msra.mxu1 %v13086_v7 }
 0xf02   :  { %4905 = vmatpush1.bf16.msra.mxu0 %v10715_v30  ;;  %v13090_v30 = vpack.c.bf16 %v5415_v43, %v5414_v54  ;;  %v10819_v54 = vld [vmem:[%s13454_s24 + $0x2b4] ss:$8 sps:$4 sm:$0xff]   ;;  %v10817_v43 = vld [vmem:[%s13454_s24 + $0x2b0] ss:$8 sps:$4 sm:$0xff]  }
 0xf03   :  { %4906 = vmatprep.subr.bf16.mxu0 %v10720_v4  ;;  %v5398_v4 = vld [vmem:[%s13456_s21 + $0x40] sm:$0xff] }
 0xf04   :  { %9797 = vmatprep.subr.bf16.mxu1 %v13090_v30 }
 0xf06   :  { %4907 = vmatpush1.bf16.msra.mxu0 %v10718_v3  ;;  %v5399_v3 = vld [vmem:[%s13456_s21 + $0x48] sm:$0xff] }
 0xf07   :  { %4908 = vmatprep.subr.bf16.mxu0 %v10723_v13  ;;  %v10753_v13 = vld [vmem:[%s13454_s24 + $0x54] ss:$8 sps:$4 sm:$0xff]  }
 0xf0a   :  { %4909 = vmatpush1.bf16.msra.mxu0 %v10721_v44  ;;  %v13096_v44 = vpack.c.bf16 %v5399_v3, %v5398_v4  ;;  %v10820_v4 = vld [vmem:[%s13454_s24 + $0x2c0] ss:$8 sps:$4 sm:$0xff]   ;;  %v10825_v3 = vld [vmem:[%s13454_s24 + $0x2d4] ss:$8 sps:$4 sm:$0xff]  }
 0xf0b   :  { %4910 = vmatprep.subr.bf16.mxu0 %v10726_v61  ;;  %v10751_v61 = vld [vmem:[%s13454_s24 + $0x50] ss:$8 sps:$4 sm:$0xff]  }
 0xf0c   :  { %9799 = vmatpush3.bf16.msra.mxu1 %v13096_v44 }
 0xf0e   :  { %4911 = vmatpush1.bf16.msra.mxu0 %v10724_v23  ;;  %v10756_v23 = vld [vmem:[%s13454_s24 + $0x64] ss:$8 sps:$4 sm:$0xff]  }
 0xf0f   :  { %4912 = vmatprep.subr.bf16.mxu0 %v10729_v51  ;;  %v10754_v51 = vld [vmem:[%s13454_s24 + $0x60] ss:$8 sps:$4 sm:$0xff]  }
 0xf12   :  { %4913 = vmatpush1.bf16.msra.mxu0 %v10727_v58  ;;  %v10759_v58 = vld [vmem:[%s13454_s24 + $0x74] ss:$8 sps:$4 sm:$0xff]  }
 0xf13   :  { %4914 = vmatprep.subr.bf16.mxu0 %v10732_v57  ;;  %v10762_v57 = vld [vmem:[%s13454_s24 + $0x84] ss:$8 sps:$4 sm:$0xff]  }
 0xf16   :  { %4915 = vmatpush1.bf16.msra.mxu0 %v10730_v36  ;;  %v10757_v36 = vld [vmem:[%s13454_s24 + $0x70] ss:$8 sps:$4 sm:$0xff]  }
 0xf17   :  { %4916 = vmatprep.subr.bf16.mxu0 %v10735_v11  ;;  %v10765_v11 = vld [vmem:[%s13454_s24 + $0x94] ss:$8 sps:$4 sm:$0xff]  }
 0xf1a   :  { %4917 = vmatpush1.bf16.msra.mxu0 %v10733_v52  ;;  %v10760_v52 = vld [vmem:[%s13454_s24 + $0x80] ss:$8 sps:$4 sm:$0xff]  }
 0xf1b   :  { %5087 = vmatprep.subr.bf16.mxu0 %v10738_v59  ;;  %v10763_v59 = vld [vmem:[%s13454_s24 + $0x90] ss:$8 sps:$4 sm:$0xff]  }
 0xfb0   :  { %v4634_v29 = vpop.f32.mrb[72].mxu0 }
 0xfb1   :  { %v4636_v37 = vpop.f32.mrb[73].mxu0 }
 0xfb2   :  { %v4638_v9 = vpop.f32.mrb[74].mxu0 }
 0xfb3   :  { %v13033_v40 = vpack.c.bf16 %v4638_v9, %v4634_v29  ;;  %v4640_v34 = vpop.f32.mrb[75].mxu0  ;;  %v10768_v29 = vld [vmem:[%s13454_s24 + $0xa4] ss:$8 sps:$4 sm:$0xff]   ;;  %v10771_v9 = vld [vmem:[%s13454_s24 + $0xb4] ss:$8 sps:$4 sm:$0xff]  }
 0xfb4   :  { %v4652_v38 = vpack.c.bf16 %v4640_v34, %v4636_v37  ;;  %v10766_v37 = vld [vmem:[%s13454_s24 + $0xa0] ss:$8 sps:$4 sm:$0xff]   ;;  %v10769_v34 = vld [vmem:[%s13454_s24 + $0xb0] ss:$8 sps:$4 sm:$0xff]  }
 0xfb5   :  { %v4722_v63 = vrot.slane %v13033_v40, 4 }
 0xfb6   :  { %v4723_v31 = vrot.slane %v4652_v38, 4 }
 0xfb8   :  { %4918 = vmatprep.mubr.bf16.mxu0 %v4723_v31  ;;  %v13039_v46 = vpop.f32.mrb[76].mxu0  ;;  %v10772_v31 = vld [vmem:[%s13454_s24 + $0xc0] ss:$8 sps:$4 sm:$0xff]  }
 0xfb9   :  { %4919 = vmatmul.mubr.bf16.vlgmr.msra.gmra.mrb[80].mxu0 %v4722_v63  ;;  %v13042_v39 = vpop.f32.mrb[77].mxu0  ;;  %v10775_v63 = vld [vmem:[%s13454_s24 + $0xd0] ss:$8 sps:$4 sm:$0xff]  }
 0xfba   :  { %5088 = vmatpush1.bf16.msra.mxu0 %v10736_v1  ;;  %5119 = vmatprep.mubr.bf16.mxu0 %v4652_v38  ;;  %v4648_v21 = vpop.f32.mrb[78].mxu0  ;;  %v10774_v38 = vld [vmem:[%s13454_s24 + $0xc4] ss:$8 sps:$4 sm:$0xff]   ;;  %v10777_v1 = vld [vmem:[%s13454_s24 + $0xd4] ss:$8 sps:$4 sm:$0xff]  }
 0xfbb   :  { %5089 = vmatprep.subr.bf16.mxu0 %v10741_v56  ;;  %v4649_v17 = vpop.f32.mrb[79].mxu0  ;;  %v10780_v56 = vld [vmem:[%s13454_s24 + $0xe4] ss:$8 sps:$4 sm:$0xff]   ;;  %v4654_v21 = vpack.c.bf16 %v13042_v39, %v13042_v39  ;;  %v10793_v39 = vld [vmem:[%s13454_s24 + $0x230] ss:$8 sps:$4 sm:$0xff]  }
 0xfbc   :  { %v10790_v17 = vld [vmem:[%s13454_s24 + $0x220] ss:$8 sps:$4 sm:$0xff]  }
 0xfbe   :  { %5090 = vmatpush1.bf16.msra.mxu0 %v10739_v6  ;;  %v10778_v6 = vld [vmem:[%s13454_s24 + $0xe0] ss:$8 sps:$4 sm:$0xff]  }
 0xfbf   :  { %5091 = vmatprep.subr.bf16.mxu0 %v10744_v50  ;;  %v10783_v50 = vld [vmem:[%s13454_s24 + $0xf4] ss:$8 sps:$4 sm:$0xff]  }
 0xfc2   :  { %5092 = vmatpush1.bf16.msra.mxu0 %v10742_v5  ;;  %v10804_v5 = vld [vmem:[%s13454_s24 + $0x264] ss:$8 sps:$4 sm:$0xff]  }
 0xfc3   :  { %5093 = vmatprep.subr.bf16.mxu0 %v10747_v8  ;;  %v10805_v8 = vld [vmem:[%s13454_s24 + $0x270] ss:$8 sps:$4 sm:$0xff]  }
 0xfc6   :  { %5094 = vmatpush1.bf16.msra.mxu0 %v10745_v18  ;;  %v10813_v18 = vld [vmem:[%s13454_s24 + $0x294] ss:$8 sps:$4 sm:$0xff]  }
 0xfc7   :  { %5095 = vmatprep.subr.bf16.mxu0 %v10750_v35  ;;  %v10814_v35 = vld [vmem:[%s13454_s24 + $0x2a0] ss:$8 sps:$4 sm:$0xff]  }
 0xfca   :  { %5096 = vmatpush1.bf16.msra.mxu0 %v10748_v27  ;;  %v10822_v27 = vld [vmem:[%s13454_s24 + $0x2c4] ss:$8 sps:$4 sm:$0xff]  }
 0xfcb   :  { %5097 = vmatprep.subr.bf16.mxu0 %v10753_v13  ;;  %v10823_v13 = vld [vmem:[%s13454_s24 + $0x2d0] ss:$8 sps:$4 sm:$0xff]  }
 0xfce   :  { %5098 = vmatpush1.bf16.msra.mxu0 %v10751_v61  ;;  %v10828_v61 = vld [vmem:[%s13454_s24 + $0x2e4] ss:$8 sps:$4 sm:$0xff]  }
 0xfcf   :  { %5099 = vmatprep.subr.bf16.mxu0 %v10756_v23  ;;  %v10826_v23 = vld [vmem:[%s13454_s24 + $0x2e0] ss:$8 sps:$4 sm:$0xff]  }
 0xfd2   :  { %5100 = vmatpush1.bf16.msra.mxu0 %v10754_v51  ;;  %v10831_v51 = vld [vmem:[%s13454_s24 + $0x2f4] ss:$8 sps:$4 sm:$0xff]  }
 0xfd3   :  { %5101 = vmatprep.subr.bf16.mxu0 %v10759_v58  ;;  %v10829_v58 = vld [vmem:[%s13454_s24 + $0x2f0] ss:$8 sps:$4 sm:$0xff]  }
 0xfd6   :  { %5102 = vmatpush1.bf16.msra.mxu0 %v10757_v36  ;;  %v4653_v36 = vpack.c.bf16 %v13039_v46, %v13039_v46 }
 0xfd7   :  { %5103 = vmatprep.subr.bf16.mxu0 %v10762_v57  ;;  %v5416_v57 = vld [vmem:[%s13456_s21 + $0xd0] sm:$0xff] }
 0xfda   :  { %5104 = vmatpush1.bf16.msra.mxu0 %v10760_v52  ;;  %v5417_v52 = vld [vmem:[%s13456_s21 + $0xd8] sm:$0xff] }
 0xfdb   :  { %5105 = vmatprep.subr.bf16.mxu0 %v10765_v11  ;;  %v5400_v11 = vld [vmem:[%s13456_s21 + $0x50] sm:$0xff] }
 0xfde   :  { %5106 = vmatpush1.bf16.msra.mxu0 %v10763_v59  ;;  %v9800_v59 = vpack.c.bf16 %v5417_v52, %v5416_v57 }
 0xfdf   :  { %5107 = vmatprep.subr.bf16.mxu0 %v10768_v29  ;;  %v5401_v29 = vld [vmem:[%s13456_s21 + $0x58] sm:$0xff] }
 0xfe0   :  { %9801 = vmatprep.subr.bf16.mxu1 %v9800_v59 }
 0xfe2   :  { %5108 = vmatpush1.bf16.msra.mxu0 %v10766_v37  ;;  %v5418_v37 = vld [vmem:[%s13456_s21 + $0xe0] sm:$0xff] }
 0xfe3   :  { %5109 = vmatprep.subr.bf16.mxu0 %v10771_v9  ;;  %v5419_v9 = vld [vmem:[%s13456_s21 + $0xe8] sm:$0xff] }
 0xfe6   :  { %5110 = vmatpush1.bf16.msra.mxu0 %v10769_v34  ;;  %v9802_v34 = vpack.c.bf16 %v5401_v29, %v5400_v11  ;;  %v5582_v11 = vld [vmem:[#allocation14 + $0x40] sm:$0xff]  ;;  %v5587_v29 = vld [vmem:[#allocation14 + $0x68] sm:$0xff] }
 0xfe7   :  { %5111 = vmatprep.subr.bf16.mxu0 %v10774_v38  ;;  %v9804_v38 = vpack.c.bf16 %v5419_v9, %v5418_v37  ;;  %v5589_v37 = vld [vmem:[#allocation14 + $0x78] sm:$0xff] }
 0xfe8   :  { %9803 = vmatpush3.bf16.msra.mxu1 %v9802_v34 }
 0xfe9   :  { %9805 = vmatprep.subr.bf16.mxu1 %v9804_v38 }
 0xfea   :  { %5112 = vmatpush1.bf16.msra.mxu0 %v10772_v31  ;;  %v5402_v31 = vld [vmem:[%s13456_s21 + $0x60] sm:$0xff] }
 0xfeb   :  { %5113 = vmatprep.subr.bf16.mxu0 %v10777_v1  ;;  %v5403_v1 = vld [vmem:[%s13456_s21 + $0x68] sm:$0xff] }
 0xfee   :  { %5114 = vmatpush1.bf16.msra.mxu0 %v10775_v63  ;;  %v5420_v63 = vld [vmem:[%s13456_s21 + $0xf0] sm:$0xff] }
 0xfef   :  { %5115 = vmatprep.subr.bf16.mxu0 %v10780_v56  ;;  %v5421_v56 = vld [vmem:[%s13456_s21 + $0xf8] sm:$0xff] }
 0xff0   :  { %v9808_v46 = vpack.c.bf16 %v5421_v56, %v5420_v63 }
 0xff2   :  { %5116 = vmatpush1.bf16.msra.mxu0 %v10778_v6  ;;  %v9806_v6 = vpack.c.bf16 %v5403_v1, %v5402_v31  ;;  %v5588_v31 = vld [vmem:[#allocation14 + $0x70] sm:$0xff] }
 0xff3   :  { %5117 = vmatprep.subr.bf16.mxu0 %v10783_v50  ;;  %v5404_v50 = vld [vmem:[%s13456_s21 + $0x70] sm:$0xff] }
 0xff4   :  { %9807 = vmatpush3.bf16.msra.mxu1 %v9806_v6 }
 0xff5   :  { %9809 = vmatprep.subr.bf16.mxu1 %v9808_v46 }
 0xff6   :  { %5118 = vmatpush1.bf16.msra.mxu0 %v10781_v2  ;;  %v5405_v2 = vld [vmem:[%s13456_s21 + $0x78] sm:$0xff] }
 0xff7   :  { %5321 = vmatprep.subr.bf16.mxu0 %v10786_v14  ;;  %v9810_v14 = vpack.c.bf16 %v5405_v2, %v5404_v50 }
 0xff9   :  { %5120 = vmatmul.mubr.bf16.vlgmr.msra.gmra.mrb[80].mxu0 %v13033_v40  ;;  %v10796_v40 = vld [vmem:[%s13454_s24 + $0x240] ss:$8 sps:$4 sm:$0xff]   ;;  %9811 = vmatpush3.bf16.msra.mxu1 %v9810_v14 }
 0xffa   :  { %5322 = vmatpush1.bf16.msra.mxu0 %v10784_v32  ;;  %5353 = vmatprep.mubr.bf16.mxu0 %v4654_v21 }
 0xffb   :  { %5323 = vmatprep.subr.bf16.mxu0 %v10789_v22  ;;  %9813 = vmatprep.subr.bf16.mxu1 %v13047_v53 }
 0xffe   :  { %5324 = vmatpush1.bf16.msra.mxu0 %v10787_v47 }
 0xfff   :  { %5325 = vmatprep.subr.bf16.mxu0 %v10792_v16 }
0x1002   :  { %5326 = vmatpush1.bf16.msra.mxu0 %v10790_v17 }
0x1003   :  { %5327 = vmatprep.subr.bf16.mxu0 %v10795_v25 }
0x1006   :  { %5328 = vmatpush1.bf16.msra.mxu0 %v10793_v39 }
0x1007   :  { %5329 = vmatprep.subr.bf16.mxu0 %v10798_v33 }
0x100a   :  { %5330 = vmatpush1.bf16.msra.mxu0 %v10796_v40 }
0x100b   :  { %5331 = vmatprep.subr.bf16.mxu0 %v10801_v15 }
0x100e   :  { %5332 = vmatpush1.bf16.msra.mxu0 %v10799_v26 }
0x100f   :  { %5333 = vmatprep.subr.bf16.mxu0 %v10804_v5 }
0x1012   :  { %5334 = vmatpush1.bf16.msra.mxu0 %v10802_v28 }
0x1013   :  { %5335 = vmatprep.subr.bf16.mxu0 %v10807_v60 }
0x1016   :  { %5336 = vmatpush1.bf16.msra.mxu0 %v10805_v8 }
0x1017   :  { %5337 = vmatprep.subr.bf16.mxu0 %v10810_v42 }
0x101a   :  { %5338 = vmatpush1.bf16.msra.mxu0 %v10808_v12 }
0x101b   :  { %5339 = vmatprep.subr.bf16.mxu0 %v10813_v18 }
0x101e   :  { %5340 = vmatpush1.bf16.msra.mxu0 %v10811_v19 }
0x101f   :  { %5341 = vmatprep.subr.bf16.mxu0 %v10816_v55 }
0x1022   :  { %5342 = vmatpush1.bf16.msra.mxu0 %v10814_v35 }
0x1023   :  { %5343 = vmatprep.subr.bf16.mxu0 %v10819_v54 }
0x1026   :  { %5344 = vmatpush1.bf16.msra.mxu0 %v10817_v43 }
0x1027   :  { %5345 = vmatprep.subr.bf16.mxu0 %v10822_v27 }
0x102a   :  { %5346 = vmatpush1.bf16.msra.mxu0 %v10820_v4 }
0x102b   :  { %5347 = vmatprep.subr.bf16.mxu0 %v10825_v3  ;;  %v5579_v3 = vld [vmem:[#allocation14 + $0x28] sm:$0xff] }
0x102e   :  { %5348 = vmatpush1.bf16.msra.mxu0 %v10823_v13 }
0x102f   :  { %5349 = vmatprep.subr.bf16.mxu0 %v10828_v61 }
0x1032   :  { %5350 = vmatpush1.bf16.msra.mxu0 %v10826_v23  ;;  %v5578_v23 = vld [vmem:[#allocation14 + $0x20] sm:$0xff] }
0x1033   :  { %5351 = vmatprep.subr.bf16.mxu0 %v10831_v51  ;;  %v5580_v51 = vld [vmem:[#allocation14 + $0x30] sm:$0xff] }
0x1034   :  { %v9850_v57 = vpack.c.bf16 %v5580_v51, %v5578_v23  ;;  %v10847_v23 = vld [vmem:[#allocation19 + $0x144] ss:$8 sps:$4 sm:$0xff]   ;;  %v10845_v51 = vld [vmem:[#allocation19 + $0x140] ss:$8 sps:$4 sm:$0xff]  }
0x1036   :  { %5352 = vmatpush1.bf16.msra.mxu0 %v10829_v58  ;;  %v5583_v58 = vld [vmem:[#allocation14 + $0x48] sm:$0xff] }
0x1039   :  { %5354 = vmatmul.mubr.bf16.vlgmr.msra.gmra.mrb[80].mxu0 %v4653_v36  ;;  %v5585_v36 = vld [vmem:[#allocation14 + $0x58] sm:$0xff] }
0x103a   :  { %v9852_v52 = vpack.c.bf16 %v5585_v36, %v5583_v58  ;;  %v10850_v58 = vld [vmem:[#allocation19 + $0x154] ss:$8 sps:$4 sm:$0xff]   ;;  %v10848_v36 = vld [vmem:[#allocation19 + $0x150] ss:$8 sps:$4 sm:$0xff]  }
0x110c   :  { %v13171_v32 = vpop.f32.mrb[80].mxu0 }
0x110d   :  { %v5364_v21 = vrot.slane %v13171_v32, 4  ;;  %v13174_v22 = vpop.f32.mrb[81].mxu0  ;;  %v5376_v54 = vmul.f32 %v13171_v32, %v13171_v32 }
0x110e   :  { %v5370_v47 = vrot.slane %v13174_v22, 4  ;;  %v5377_v16 = vmul.f32 %v13174_v22, %v13174_v22  ;;  %v5359_v17 = vpop.f32.mrb[82].mxu0 }
0x110f   :  { %v5365_v25 = vadd.f32 %v5364_v21, %v13171_v32  ;;  %v5360_v39 = vpop.f32.mrb[83].mxu0  ;;  %v5378_v43 = vrot.slane %v5376_v54, 4 }
0x1110   :  { %v5371_v33 = vadd.f32 %v5370_v47, %v13174_v22  ;;  %v5384_v40 = vrot.slane %v5377_v16, 4  ;;  %v5569_v39 = vld [vmem:[#allocation16] sm:$0x1] }
0x1111   :  { %v5366_v15 = vrot.slane %v5365_v25, 2  ;;  %v5379_v27 = vadd.f32 %v5378_v43, %v5376_v54 }
0x1112   :  { %v5372_v53 = vrot.slane %v5371_v33, 2  ;;  %v5385_v26 = vadd.f32 %v5384_v40, %v5377_v16 }
0x1113   :  { %v5367_v5 = vadd.f32 %v5366_v15, %v5365_v25 }
0x1114   :  { %v5373_v28 = vadd.f32 %v5372_v53, %v5371_v33  ;;  %v5386_v60 = vrot.slane %v5385_v26, 2  ;;  %v5571_v53 = vld [vmem:[#allocation17] sm:$0x1] }
0x1115   :  { %v5368_v8 = vrot.slane %v5367_v5, 1 }
0x1116   :  { %v5374_v42 = vrot.slane %v5373_v28, 1  ;;  %v5387_v12 = vadd.f32 %v5386_v60, %v5385_v26 }
0x1117   :  { %v5369_v55 = vadd.f32 %v5368_v8, %v5367_v5 }
0x1118   :  { %v5375_v18 = vadd.f32 %v5374_v42, %v5373_v28  ;;  %v5388_v19 = vrot.slane %v5387_v12, 1 }
0x111a   :  { %5486 = vmatprep.mubr.f32.mxu1 %v5375_v18  ;;  %v5389_v35 = vadd.f32 %v5388_v19, %v5387_v12 }
0x111b   :  { %5487 = vmatmul.mubr.f32.vlgmr.msra.gmra.mrb[64].mxu1 %v5369_v55 }
0x111c   :  { %9815 = vmatpush3.bf16.msra.mxu1 %v13052_v20  ;;  %5556 = vmatprep.mubr.f32.mxu1 %v5389_v35  ;;  %v5380_v20 = vrot.slane %v5379_v27, 2 }
0x111d   :  { %9817 = vmatprep.subr.bf16.mxu1 %v13054_v24 }
0x111e   :  { %v5381_v24 = vadd.f32 %v5380_v20, %v5379_v27 }
0x1120   :  { %9819 = vmatpush3.bf16.msra.mxu1 %v13062_v62  ;;  %v5382_v62 = vrot.slane %v5381_v24, 1 }
0x1121   :  { %9821 = vmatprep.subr.bf16.mxu1 %v13066_v49 }
0x1122   :  { %v5383_v49 = vadd.f32 %v5382_v62, %v5381_v24 }
0x1124   :  { %9823 = vmatpush3.bf16.msra.mxu1 %v13074_v45  ;;  %v5575_v45 = vld [vmem:[#allocation14 + $0x8] sm:$0xff] }
0x1125   :  { %9825 = vmatprep.subr.bf16.mxu1 %v13078_v10  ;;  %v5577_v10 = vld [vmem:[#allocation14 + $0x18] sm:$0xff] }
0x1126   :  { %v9844_v4 = vpack.c.bf16 %v5577_v10, %v5575_v45  ;;  %v10835_v45 = vld [vmem:[#allocation19 + $0x104] ss:$8 sps:$4 sm:$0xff]  }
0x1127   :  { %v10832_v10 = vld [vmem:[%s13457_s10] sm:$0x3f]  }
0x1128   :  { %9827 = vmatpush3.bf16.msra.mxu1 %v13086_v7  ;;  %v5574_v7 = vld [vmem:[#allocation14] sm:$0xff] }
0x1129   :  { %9829 = vmatprep.subr.bf16.mxu1 %v13090_v30  ;;  %v5576_v30 = vld [vmem:[#allocation14 + $0x10] sm:$0xff] }
0x112a   :  { %v9846_v13 = vpack.c.bf16 %v5576_v30, %v5574_v7  ;;  %v10833_v7 = vld [vmem:[#allocation19 + $0x100] ss:$8 sps:$4 sm:$0xff]   ;;  %v10836_v30 = vld [vmem:[#allocation19 + $0x110] ss:$8 sps:$4 sm:$0xff]  }
0x112c   :  { %9831 = vmatpush3.bf16.msra.mxu1 %v13096_v44  ;;  %v5581_v44 = vld [vmem:[#allocation14 + $0x38] sm:$0xff] }
0x112d   :  { %9833 = vmatprep.subr.bf16.mxu1 %v9800_v59  ;;  %v9848_v61 = vpack.c.bf16 %v5581_v44, %v5579_v3  ;;  %v5584_v59 = vld [vmem:[#allocation14 + $0x50] sm:$0xff]  ;;  %v10839_v44 = vld [vmem:[#allocation19 + $0x120] ss:$8 sps:$4 sm:$0xff]  }
0x112e   :  { %v9854_v9 = vpack.c.bf16 %v5584_v59, %v5582_v11  ;;  %v10841_v3 = vld [vmem:[#allocation19 + $0x124] ss:$8 sps:$4 sm:$0xff]   ;;  %v10856_v11 = vld [vmem:[#allocation19 + $0x174] ss:$8 sps:$4 sm:$0xff]   ;;  %v10854_v59 = vld [vmem:[#allocation19 + $0x170] ss:$8 sps:$4 sm:$0xff]  }
0x1130   :  { %9835 = vmatpush3.bf16.msra.mxu1 %v9802_v34  ;;  %v9856_v34 = vpack.c.bf16 %v5589_v37, %v5587_v29  ;;  %v10859_v29 = vld [vmem:[#allocation19 + $0x184] ss:$8 sps:$4 sm:$0xff]   ;;  %v10857_v37 = vld [vmem:[#allocation19 + $0x180] ss:$8 sps:$4 sm:$0xff]  }
0x1131   :  { %9837 = vmatprep.subr.bf16.mxu1 %v9804_v38  ;;  %v5586_v38 = vld [vmem:[#allocation14 + $0x60] sm:$0xff] }
0x1132   :  { %v9858_v1 = vpack.c.bf16 %v5588_v31, %v5586_v38  ;;  %v10865_v38 = vld [vmem:[#allocation19 + $0x1a4] ss:$8 sps:$4 sm:$0xff]   ;;  %v10863_v31 = vld [vmem:[#allocation19 + $0x1a0] ss:$8 sps:$4 sm:$0xff]  }
0x1134   :  { %9839 = vmatpush3.bf16.msra.mxu1 %v9806_v6 }
0x1135   :  { %9841 = vmatprep.subr.bf16.mxu1 %v9808_v46 }
0x1138   :  { %9843 = vmatpush3.bf16.msra.mxu1 %v9810_v14 }
0x1139   :  { %9845 = vmatprep.subr.bf16.mxu1 %v9844_v4 }
0x113b   :  { %5557 = vmatmul.mubr.f32.vlgmr.msra.gmra.mrb[66].mxu1 %v5383_v49 }
0x113c   :  { %5657 = vmatprep.mubr.f32.mxu1 %v11625_v41  ;;  %9847 = vmatpush1.bf16.msra.mxu1 %v9846_v13 }
0x113d   :  { %9849 = vmatprep.subr.bf16.mxu1 %v9848_v61 }
0x1140   :  { %9851 = vmatpush1.bf16.msra.mxu1 %v9850_v57 }
0x1141   :  { %9853 = vmatprep.subr.bf16.mxu1 %v9852_v52 }
0x1144   :  { %9855 = vmatpush1.bf16.msra.mxu1 %v9854_v9 }
0x1145   :  { %9857 = vmatprep.subr.bf16.mxu1 %v9856_v34 }
0x1148   :  { %9859 = vmatpush1.bf16.msra.mxu1 %v9858_v1 }
0x1149   :  { %9861 = vmatprep.subr.bf16.mxu1 %v9844_v4  ;;  %v10838_v4 = vld [vmem:[#allocation19 + $0x114] ss:$8 sps:$4 sm:$0xff]  }
0x11ee   :  { %v9153_v63 = vpop.f32.mrb[64].mxu1 }
0x11ef   :  { %v9154_v56 = vpop.f32.mrb[65].mxu1 }
0x11f0   :  { %v9155_v6 = vadd.f32 %v9154_v56, %v9153_v63  ;;  %v10866_v63 = vld [vmem:[#allocation19 + $0x1b0] ss:$8 sps:$4 sm:$0xff]   ;;  %v10871_v56 = vld [vmem:[#allocation19 + $0x1c4] ss:$8 sps:$4 sm:$0xff]  }
0x11f2   :  { %v5562_v46 = vmul.f32 0.03125, %v9155_v6  ;;  %v10869_v6 = vld [vmem:[#allocation19 + $0x1c0] ss:$8 sps:$4 sm:$0xff]  }
0x11f4   :  { %v5564_v21 = vmul.f32 %v5562_v46, %v5562_v46 }
0x120e   :  { %v9188_v50 = vpop.f32.mrb[66].mxu1 }
0x120f   :  { %v9189_v2 = vpop.f32.mrb[67].mxu1 }
0x1210   :  { %v9190_v14 = vadd.f32 %v9189_v2, %v9188_v50  ;;  %v10872_v50 = vld [vmem:[#allocation19 + $0x1d0] ss:$8 sps:$4 sm:$0xff]   ;;  %v10875_v2 = vld [vmem:[#allocation19 + $0x1e0] ss:$8 sps:$4 sm:$0xff]  }
0x1212   :  { %v5563_v47 = vmul.f32 0.03125, %v9190_v14  ;;  %v10877_v14 = vld [vmem:[#allocation19 + $0x1e4] ss:$8 sps:$4 sm:$0xff]  }
0x1214   :  { %v5565_v16 = vsub.f32 %v5563_v47, %v5564_v21  ;;  %v10878_v21 = vld [vmem:[#allocation19 + $0x1f0] ss:$8 sps:$4 sm:$0xff]   ;;  %v10880_v47 = vld [vmem:[#allocation19 + $0x1f4] ss:$8 sps:$4 sm:$0xff]  }
0x1216   :  { %v5566_v17 = vmax.f32 %v5565_v16, 0.0  ;;  %v10883_v16 = vld [vmem:[#allocation19 + $0x4] ss:$8 sps:$4 sm:$0xff]  }
0x1218   :  { %v5567_v25 = vadd.f32 1e-05, %v5566_v17 }
0x121a   :  { %11039 = vrsqrt.f32 %v5567_v25 }
0x1224   :  { %v11040_v33 = vpop.eup %11039 }
0x1225   :  { %v5570_v40 = vmul.f32 %v11040_v33, %v5569_v39 }
0x1227   :  { %8751 = vmatmul.mubr.msk.f32.vlgmr.msra.gmra.mrb[68].mxu1 %vm967_vm0, %v5570_v40  ;;  %v5572_v15 = vmul.f32 %v5570_v40, %v5562_v46  ;;  %v10874_v46 = vld [vmem:[#allocation19 + $0x1d4] ss:$8 sps:$4 sm:$0xff]  }
0x1228   :  { %9863 = vmatpush1.bf16.msra.mxu1 %v9846_v13  ;;  %5731 = vmatprep.mubr.f32.mxu1 %v11625_v41  ;;  %v10844_v13 = vld [vmem:[#allocation19 + $0x134] ss:$8 sps:$4 sm:$0xff]  }
0x1229   :  { %9865 = vmatprep.subr.bf16.mxu1 %v9848_v61  ;;  %v5573_v26 = vsub.f32 %v5571_v53, %v5572_v15  ;;  %v10842_v61 = vld [vmem:[#allocation19 + $0x130] ss:$8 sps:$4 sm:$0xff]  }
0x122c   :  { %9867 = vmatpush1.bf16.msra.mxu1 %v9850_v57  ;;  %v10853_v57 = vld [vmem:[#allocation19 + $0x164] ss:$8 sps:$4 sm:$0xff]  }
0x122d   :  { %9869 = vmatprep.subr.bf16.mxu1 %v9852_v52  ;;  %v10851_v52 = vld [vmem:[#allocation19 + $0x160] ss:$8 sps:$4 sm:$0xff]  }
0x1230   :  { %9871 = vmatpush1.bf16.msra.mxu1 %v9854_v9  ;;  %v10862_v9 = vld [vmem:[#allocation19 + $0x194] ss:$8 sps:$4 sm:$0xff]  }
0x1231   :  { %9873 = vmatprep.subr.bf16.mxu1 %v9856_v34  ;;  %v10860_v34 = vld [vmem:[#allocation19 + $0x190] ss:$8 sps:$4 sm:$0xff]  }
0x1234   :  { %9875 = vmatpush1.bf16.msra.mxu1 %v9858_v1  ;;  %v10868_v1 = vld [vmem:[#allocation19 + $0x1b4] ss:$8 sps:$4 sm:$0xff]  }
0x1237   :  { %8752 = vmatmul.mubr.msk.f32.vlgmr.msra.gmra.mrb[70].mxu1 %vm967_vm0, %v5573_v26  ;;  %v10881_v26 = vld [vmem:[#allocation19] ss:$8 sps:$4 sm:$0xff]  }
0x1238   :  { %5815 = vmatprep.mubr.bf16.mxu1 %v11624_v0 }
0x12fa   :  { %v5659_v5 = vpop.f32.mrb[68].mxu1 }
0x12fb   :  { %v5741_v28 = vrot.slane %v5659_v5, %v12401_v48  ;;  %v5661_v60 = vpop.f32.mrb[69].mxu1 }
0x12fc   :  { %v5745_v8 = vrot.slane %v5661_v60, %v12401_v48  ;;  %v10884_v60 = vld [vmem:[#allocation19 + $0x10] ss:$8 sps:$4 sm:$0xff]  }
0x12fd   :  { %v5746_v42 = vmul.f32 %v5741_v28, %v13171_v32  ;;  %v10886_v28 = vld [vmem:[#allocation19 + $0x14] ss:$8 sps:$4 sm:$0xff]  }
0x12fe   :  { %v5747_v12 = vmul.f32 %v5745_v8, %v13174_v22  ;;  %v10889_v8 = vld [vmem:[#allocation19 + $0x24] ss:$8 sps:$4 sm:$0xff]  }
0x130a   :  { %v5733_v18 = vpop.f32.mrb[70].mxu1 }
0x130b   :  { %v5751_v19 = vrot.slane %v5733_v18, %v12401_v48  ;;  %v5735_v55 = vpop.f32.mrb[71].mxu1  ;;  %v6571_v18 = vld [vmem:[#allocation20] sm:$0xff] }
0x130c   :  { %v5755_v35 = vrot.slane %v5735_v55, %v12401_v48  ;;  %v6572_v55 = vld [vmem:[#allocation20 + $0x8] sm:$0xff] }
0x130d   :  { %v5756_v54 = vadd.f32 %v5751_v19, %v5746_v42  ;;  %v6587_v42 = vld [vmem:[#allocation20 + $0x80] sm:$0xff] }
0x130e   :  { %v5757_v43 = vadd.f32 %v5755_v35, %v5747_v12  ;;  %v6588_v12 = vld [vmem:[#allocation20 + $0x88] sm:$0xff]  ;;  %v6589_v35 = vld [vmem:[#allocation20 + $0x90] sm:$0xff] }
0x130f   :  { %vm5758_vm0 = vcmp.gt.f32.partialorder %v5756_v54, 0.0  ;;  %v5760_v27 = vmul.f32 0.2, %v5756_v54  ;;  %v13214_v19 = vpack.c.bf16 %v6588_v12, %v6587_v42  ;;  %v10937_v42 = vld [vmem:[#allocation19 + $0x224] ss:$8 sps:$4 sm:$0xff]  }
0x1310   :  { %vm5759_vm4 = vcmp.gt.f32.partialorder %v5757_v43, 0.0  ;;  %v5761_v20 = vmul.f32 0.2, %v5757_v43  ;;  %v10935_v12 = vld [vmem:[#allocation19 + $0x220] ss:$8 sps:$4 sm:$0xff]  }
0x1311   :  { %v5762_v24 = vsel %vm5758_vm0, %v5756_v54, %v5760_v27  ;;  %v6590_v54 = vld [vmem:[#allocation20 + $0x98] sm:$0xff]  ;;  %9877 = vmatprep.subr.bf16.mxu0 %v13214_v19 }
0x1312   :  { %v5763_v62 = vsel %vm5759_vm4, %v5757_v43, %v5761_v20  ;;  %v5764_v49 = vpack.c.bf16 %v5762_v24, %v5762_v24  ;;  %v13216_v43 = vpack.c.bf16 %v6572_v55, %v6571_v18  ;;  %v13218_v27 = vpack.c.bf16 %v6590_v54, %v6589_v35  ;;  %v6573_v20 = vld [vmem:[#allocation20 + $0x10] sm:$0xff]  ;;  %v6574_v24 = vld [vmem:[#allocation20 + $0x18] sm:$0xff]  ;;  %v10943_v35 = vld [vmem:[#allocation19 + $0x244] ss:$8 sps:$4 sm:$0xff]  }
0x1313   :  { %v5765_v32 = vpack.c.bf16 %v5763_v62, %v5763_v62  ;;  %v6591_v62 = vld [vmem:[#allocation20 + $0xa0] sm:$0xff]  ;;  %v10940_v18 = vld [vmem:[#allocation19 + $0x234] ss:$8 sps:$4 sm:$0xff]   ;;  %v10938_v55 = vld [vmem:[#allocation19 + $0x230] ss:$8 sps:$4 sm:$0xff]  }
0x1314   :  { %v5778_v22 = vsel %vm5776_vm5, %v5764_v49, 0  ;;  %v6592_v49 = vld [vmem:[#allocation20 + $0xa8] sm:$0xff]  ;;  %9879 = vmatpush3.bf16.msra.mxu0 %v13216_v43 }
0x1315   :  { %8754 = vmatprep.subr.msk.bf16.mxu1 %vm5776_vm5, %v5765_v32  ;;  %v13222_v32 = vpack.c.bf16 %v6574_v24, %v6573_v20  ;;  %9881 = vmatprep.subr.bf16.mxu0 %v13218_v27  ;;  %v10941_v54 = vld [vmem:[#allocation19 + $0x240] ss:$8 sps:$4 sm:$0xff]   ;;  %v10946_v20 = vld [vmem:[#allocation19 + $0x254] ss:$8 sps:$4 sm:$0xff]   ;;  %v10949_v24 = vld [vmem:[#allocation19 + $0x264] ss:$8 sps:$4 sm:$0xff]  }
0x1316   :  { %5784 = vmatpush1.bf16.msra.mxu1 %v5778_v22  ;;  %v13225_v22 = vpack.c.bf16 %v6592_v49, %v6591_v62  ;;  %v10947_v62 = vld [vmem:[#allocation19 + $0x260] ss:$8 sps:$4 sm:$0xff]   ;;  %v10952_v49 = vld [vmem:[#allocation19 + $0x274] ss:$8 sps:$4 sm:$0xff]  }
0x1317   :  { %6059 = vmatprep.subr.bf16.mxu1 %v10835_v45  ;;  %v10887_v45 = vld [vmem:[#allocation19 + $0x20] ss:$8 sps:$4 sm:$0xff]  }
0x1318   :  { %9883 = vmatpush3.bf16.msra.mxu0 %v13222_v32 }
0x1319   :  { %8755 = vmatmul.mubr.msk.bf16.vlgmr.msra.gmra.mrb[72].mxu1 %vm1758_vm1, %v10832_v10  ;;  %v6575_v10 = vld [vmem:[#allocation20 + $0x20] sm:$0xff]  ;;  %9885 = vmatprep.subr.bf16.mxu0 %v13225_v22 }
0x131a   :  { %6060 = vmatpush1.bf16.msra.mxu1 %v10833_v7  ;;  %v6576_v7 = vld [vmem:[#allocation20 + $0x28] sm:$0xff] }
0x131b   :  { %6061 = vmatprep.subr.bf16.mxu1 %v10838_v4  ;;  %v10892_v4 = vld [vmem:[#allocation19 + $0x34] ss:$8 sps:$4 sm:$0xff]  }
0x131e   :  { %6062 = vmatpush1.bf16.msra.mxu1 %v10836_v30  ;;  %v6593_v30 = vld [vmem:[#allocation20 + $0xb0] sm:$0xff] }
0x131f   :  { %6063 = vmatprep.subr.bf16.mxu1 %v10841_v3  ;;  %v6594_v3 = vld [vmem:[#allocation20 + $0xb8] sm:$0xff] }
0x1322   :  { %6064 = vmatpush1.bf16.msra.mxu1 %v10839_v44  ;;  %v13228_v44 = vpack.c.bf16 %v6576_v7, %v6575_v10  ;;  %v10955_v10 = vld [vmem:[#allocation19 + $0x284] ss:$8 sps:$4 sm:$0xff]   ;;  %v10953_v7 = vld [vmem:[#allocation19 + $0x280] ss:$8 sps:$4 sm:$0xff]  }
0x1323   :  { %6065 = vmatprep.subr.bf16.mxu1 %v10844_v13  ;;  %v10890_v13 = vld [vmem:[#allocation19 + $0x30] ss:$8 sps:$4 sm:$0xff]  }
0x1324   :  { %9887 = vmatpush3.bf16.msra.mxu0 %v13228_v44 }
0x1326   :  { %6066 = vmatpush1.bf16.msra.mxu1 %v10842_v61  ;;  %v13231_v61 = vpack.c.bf16 %v6594_v3, %v6593_v30  ;;  %v10956_v30 = vld [vmem:[#allocation19 + $0x290] ss:$8 sps:$4 sm:$0xff]   ;;  %v10961_v3 = vld [vmem:[#allocation19 + $0x2a4] ss:$8 sps:$4 sm:$0xff]  }
0x1327   :  { %6067 = vmatprep.subr.bf16.mxu1 %v10847_v23  ;;  %v6577_v23 = vld [vmem:[#allocation20 + $0x30] sm:$0xff] }
0x1328   :  { %9889 = vmatprep.subr.bf16.mxu0 %v13231_v61 }
0x132a   :  { %6068 = vmatpush1.bf16.msra.mxu1 %v10845_v51  ;;  %v6578_v51 = vld [vmem:[#allocation20 + $0x38] sm:$0xff] }
0x132b   :  { %6069 = vmatprep.subr.bf16.mxu1 %v10850_v58  ;;  %v10895_v58 = vld [vmem:[#allocation19 + $0x44] ss:$8 sps:$4 sm:$0xff]  }
0x132e   :  { %6070 = vmatpush1.bf16.msra.mxu1 %v10848_v36  ;;  %v6595_v36 = vld [vmem:[#allocation20 + $0xc0] sm:$0xff] }
0x132f   :  { %6071 = vmatprep.subr.bf16.mxu1 %v10853_v57  ;;  %v6596_v57 = vld [vmem:[#allocation20 + $0xc8] sm:$0xff] }
0x1332   :  { %6072 = vmatpush1.bf16.msra.mxu1 %v10851_v52  ;;  %v13234_v52 = vpack.c.bf16 %v6578_v51, %v6577_v23  ;;  %v10964_v23 = vld [vmem:[#allocation19 + $0x2b4] ss:$8 sps:$4 sm:$0xff]   ;;  %v10962_v51 = vld [vmem:[#allocation19 + $0x2b0] ss:$8 sps:$4 sm:$0xff]  }
0x1333   :  { %6073 = vmatprep.subr.bf16.mxu1 %v10856_v11  ;;  %v10893_v11 = vld [vmem:[#allocation19 + $0x40] ss:$8 sps:$4 sm:$0xff]  }
0x1334   :  { %9891 = vmatpush3.bf16.msra.mxu0 %v13234_v52 }
0x1336   :  { %6074 = vmatpush1.bf16.msra.mxu1 %v10854_v59  ;;  %v13237_v59 = vpack.c.bf16 %v6596_v57, %v6595_v36  ;;  %v10965_v36 = vld [vmem:[#allocation19 + $0x2c0] ss:$8 sps:$4 sm:$0xff]   ;;  %v10970_v57 = vld [vmem:[#allocation19 + $0x2d4] ss:$8 sps:$4 sm:$0xff]  }
0x1337   :  { %6075 = vmatprep.subr.bf16.mxu1 %v10859_v29  ;;  %v10898_v29 = vld [vmem:[#allocation19 + $0x54] ss:$8 sps:$4 sm:$0xff]  }
0x1338   :  { %9893 = vmatprep.subr.bf16.mxu0 %v13237_v59 }
0x133a   :  { %6076 = vmatpush1.bf16.msra.mxu1 %v10857_v37  ;;  %v10896_v37 = vld [vmem:[#allocation19 + $0x50] ss:$8 sps:$4 sm:$0xff]  }
0x133b   :  { %6077 = vmatprep.subr.bf16.mxu1 %v10862_v9  ;;  %v10901_v9 = vld [vmem:[#allocation19 + $0x64] ss:$8 sps:$4 sm:$0xff]  }
0x133e   :  { %6078 = vmatpush1.bf16.msra.mxu1 %v10860_v34  ;;  %v10899_v34 = vld [vmem:[#allocation19 + $0x60] ss:$8 sps:$4 sm:$0xff]  }
0x133f   :  { %6079 = vmatprep.subr.bf16.mxu1 %v10865_v38  ;;  %v10904_v38 = vld [vmem:[#allocation19 + $0x74] ss:$8 sps:$4 sm:$0xff]  }
0x1342   :  { %6080 = vmatpush1.bf16.msra.mxu1 %v10863_v31  ;;  %v10902_v31 = vld [vmem:[#allocation19 + $0x70] ss:$8 sps:$4 sm:$0xff]  }
0x1343   :  { %6081 = vmatprep.subr.bf16.mxu1 %v10868_v1  ;;  %v10907_v1 = vld [vmem:[#allocation19 + $0x84] ss:$8 sps:$4 sm:$0xff]  }
0x1346   :  { %6082 = vmatpush1.bf16.msra.mxu1 %v10866_v63  ;;  %v10905_v63 = vld [vmem:[#allocation19 + $0x80] ss:$8 sps:$4 sm:$0xff]  }
0x1347   :  { %6083 = vmatprep.subr.bf16.mxu1 %v10871_v56  ;;  %v10910_v56 = vld [vmem:[#allocation19 + $0x94] ss:$8 sps:$4 sm:$0xff]  }
0x134a   :  { %6084 = vmatpush1.bf16.msra.mxu1 %v10869_v6  ;;  %v10908_v6 = vld [vmem:[#allocation19 + $0x90] ss:$8 sps:$4 sm:$0xff]  }
0x134b   :  { %6085 = vmatprep.subr.bf16.mxu1 %v10874_v46  ;;  %v10913_v46 = vld [vmem:[#allocation19 + $0xa4] ss:$8 sps:$4 sm:$0xff]  }
0x134e   :  { %6086 = vmatpush1.bf16.msra.mxu1 %v10872_v50  ;;  %v10911_v50 = vld [vmem:[#allocation19 + $0xa0] ss:$8 sps:$4 sm:$0xff]  }
0x134f   :  { %6087 = vmatprep.subr.bf16.mxu1 %v10877_v14  ;;  %v10914_v14 = vld [vmem:[#allocation19 + $0xb0] ss:$8 sps:$4 sm:$0xff]  }
0x1352   :  { %6088 = vmatpush1.bf16.msra.mxu1 %v10875_v2  ;;  %v10916_v2 = vld [vmem:[#allocation19 + $0xb4] ss:$8 sps:$4 sm:$0xff]  }
0x1353   :  { %6089 = vmatprep.subr.bf16.mxu1 %v10880_v47  ;;  %v10917_v47 = vld [vmem:[#allocation19 + $0xc0] ss:$8 sps:$4 sm:$0xff]  }
0x1356   :  { %6090 = vmatpush1.bf16.msra.mxu1 %v10878_v21  ;;  %v10919_v21 = vld [vmem:[#allocation19 + $0xc4] ss:$8 sps:$4 sm:$0xff]  }
0x1357   :  { %6260 = vmatprep.subr.bf16.mxu1 %v10883_v16  ;;  %v10922_v16 = vld [vmem:[#allocation19 + $0xd4] ss:$8 sps:$4 sm:$0xff]  }
0x13ec   :  { %v5817_v17 = vpop.f32.mrb[72].mxu1 }
0x13ed   :  { %v5819_v25 = vpop.f32.mrb[73].mxu1 }
0x13ee   :  { %v5821_v39 = vpop.f32.mrb[74].mxu1 }
0x13ef   :  { %v13207_v33 = vpack.c.bf16 %v5821_v39, %v5817_v17  ;;  %v5823_v40 = vpop.f32.mrb[75].mxu1  ;;  %v10920_v17 = vld [vmem:[#allocation19 + $0xd0] ss:$8 sps:$4 sm:$0xff]   ;;  %v10923_v39 = vld [vmem:[#allocation19 + $0xe0] ss:$8 sps:$4 sm:$0xff]  }
0x13f0   :  { %v13209_v15 = vpack.c.bf16 %v5823_v40, %v5819_v25  ;;  %v10925_v25 = vld [vmem:[#allocation19 + $0xe4] ss:$8 sps:$4 sm:$0xff]   ;;  %v10928_v40 = vld [vmem:[#allocation19 + $0xf4] ss:$8 sps:$4 sm:$0xff]  }
0x13f1   :  { %v5895_v5 = vrot.slane %v13207_v33, 2 }
0x13f2   :  { %v5896_v53 = vrot.slane %v13209_v15, 2 }
0x13f4   :  { %6091 = vmatprep.mubr.bf16.mxu1 %v5896_v53  ;;  %v10926_v53 = vld [vmem:[#allocation19 + $0xf0] ss:$8 sps:$4 sm:$0xff]  }
0x13f5   :  { %6092 = vmatmul.mubr.bf16.vlgmr.msra.gmra.mrb[76].mxu1 %v5895_v5  ;;  %v10929_v5 = vld [vmem:[#allocation19 + $0x200] ss:$8 sps:$4 sm:$0xff]  }
0x13f6   :  { %6261 = vmatpush1.bf16.msra.mxu1 %v10881_v26  ;;  %6292 = vmatprep.mubr.bf16.mxu1 %v13209_v15  ;;  %v10931_v26 = vld [vmem:[#allocation19 + $0x204] ss:$8 sps:$4 sm:$0xff]  }
0x13f7   :  { %6262 = vmatprep.subr.bf16.mxu1 %v10886_v28  ;;  %v10934_v28 = vld [vmem:[#allocation19 + $0x214] ss:$8 sps:$4 sm:$0xff]  }
0x13fa   :  { %6263 = vmatpush1.bf16.msra.mxu1 %v10884_v60  ;;  %v6335_v60 = vrot.slane %v13209_v15, 4  ;;  %v10944_v15 = vld [vmem:[#allocation19 + $0x250] ss:$8 sps:$4 sm:$0xff]  }
0x13fb   :  { %6264 = vmatprep.subr.bf16.mxu1 %v10889_v8  ;;  %v10932_v8 = vld [vmem:[#allocation19 + $0x210] ss:$8 sps:$4 sm:$0xff]  }
0x13fe   :  { %6265 = vmatpush1.bf16.msra.mxu1 %v10887_v45  ;;  %v10950_v45 = vld [vmem:[#allocation19 + $0x270] ss:$8 sps:$4 sm:$0xff]  }
0x13ff   :  { %6266 = vmatprep.subr.bf16.mxu1 %v10892_v4  ;;  %v10958_v4 = vld [vmem:[#allocation19 + $0x294] ss:$8 sps:$4 sm:$0xff]  }
0x1402   :  { %6267 = vmatpush1.bf16.msra.mxu1 %v10890_v13  ;;  %v10959_v13 = vld [vmem:[#allocation19 + $0x2a0] ss:$8 sps:$4 sm:$0xff]  }
0x1403   :  { %6268 = vmatprep.subr.bf16.mxu1 %v10895_v58  ;;  %v10967_v58 = vld [vmem:[#allocation19 + $0x2c4] ss:$8 sps:$4 sm:$0xff]  }
0x1406   :  { %6269 = vmatpush1.bf16.msra.mxu1 %v10893_v11  ;;  %v10968_v11 = vld [vmem:[#allocation19 + $0x2d0] ss:$8 sps:$4 sm:$0xff]  }
0x1407   :  { %6270 = vmatprep.subr.bf16.mxu1 %v10898_v29  ;;  %v10973_v29 = vld [vmem:[#allocation19 + $0x2e4] ss:$8 sps:$4 sm:$0xff]  }
0x140a   :  { %6271 = vmatpush1.bf16.msra.mxu1 %v10896_v37  ;;  %v10971_v37 = vld [vmem:[#allocation19 + $0x2e0] ss:$8 sps:$4 sm:$0xff]  }
0x140b   :  { %6272 = vmatprep.subr.bf16.mxu1 %v10901_v9  ;;  %v10976_v9 = vld [vmem:[#allocation19 + $0x2f4] ss:$8 sps:$4 sm:$0xff]  }
0x140e   :  { %6273 = vmatpush1.bf16.msra.mxu1 %v10899_v34  ;;  %v10974_v34 = vld [vmem:[#allocation19 + $0x2f0] ss:$8 sps:$4 sm:$0xff]  }
0x140f   :  { %6274 = vmatprep.subr.bf16.mxu1 %v10904_v38  ;;  %v6334_v38 = vrot.slane %v13207_v33, 4 }
0x1412   :  { %6275 = vmatpush1.bf16.msra.mxu1 %v10902_v31  ;;  %v6579_v31 = vld [vmem:[#allocation20 + $0x40] sm:$0xff] }
0x1413   :  { %6276 = vmatprep.subr.bf16.mxu1 %v10907_v1  ;;  %v6580_v1 = vld [vmem:[#allocation20 + $0x48] sm:$0xff] }
0x1416   :  { %6277 = vmatpush1.bf16.msra.mxu1 %v10905_v63  ;;  %v13245_v63 = vpack.c.bf16 %v6580_v1, %v6579_v31 }
0x1417   :  { %6278 = vmatprep.subr.bf16.mxu1 %v10910_v56  ;;  %v6597_v56 = vld [vmem:[#allocation20 + $0xd0] sm:$0xff] }
0x1418   :  { %9895 = vmatpush3.bf16.msra.mxu0 %v13245_v63 }
0x141a   :  { %6279 = vmatpush1.bf16.msra.mxu1 %v10908_v6  ;;  %v6598_v6 = vld [vmem:[#allocation20 + $0xd8] sm:$0xff] }
0x141b   :  { %6280 = vmatprep.subr.bf16.mxu1 %v10913_v46  ;;  %v13248_v46 = vpack.c.bf16 %v6598_v6, %v6597_v56  ;;  %v6761_v56 = vld [vmem:[#allocation22 + $0x30] sm:$0xff] }
0x141d   :  { %9897 = vmatprep.subr.bf16.mxu0 %v13248_v46 }
0x141e   :  { %6281 = vmatpush1.bf16.msra.mxu1 %v10911_v50  ;;  %v6581_v50 = vld [vmem:[#allocation20 + $0x50] sm:$0xff] }
0x141f   :  { %6282 = vmatprep.subr.bf16.mxu1 %v10916_v2  ;;  %v6582_v2 = vld [vmem:[#allocation20 + $0x58] sm:$0xff] }
0x1422   :  { %6283 = vmatpush1.bf16.msra.mxu1 %v10914_v14  ;;  %v13250_v14 = vpack.c.bf16 %v6582_v2, %v6581_v50  ;;  %v6766_v50 = vld [vmem:[#allocation22 + $0x58] sm:$0xff] }
0x1423   :  { %6284 = vmatprep.subr.bf16.mxu1 %v10919_v21  ;;  %v6600_v21 = vld [vmem:[#allocation20 + $0xe8] sm:$0xff] }
0x1424   :  { %9899 = vmatpush3.bf16.msra.mxu0 %v13250_v14 }
0x1426   :  { %6285 = vmatpush1.bf16.msra.mxu1 %v10917_v47  ;;  %v6583_v47 = vld [vmem:[#allocation20 + $0x60] sm:$0xff] }
0x1427   :  { %6286 = vmatprep.subr.bf16.mxu1 %v10922_v16  ;;  %v6584_v16 = vld [vmem:[#allocation20 + $0x68] sm:$0xff] }
0x142a   :  { %6287 = vmatpush1.bf16.msra.mxu1 %v10920_v17  ;;  %v6601_v17 = vld [vmem:[#allocation20 + $0xf0] sm:$0xff] }
0x142b   :  { %6288 = vmatprep.subr.bf16.mxu1 %v10925_v25  ;;  %v6602_v25 = vld [vmem:[#allocation20 + $0xf8] sm:$0xff] }
0x142e   :  { %6289 = vmatpush1.bf16.msra.mxu1 %v10923_v39  ;;  %v9902_v39 = vpack.c.bf16 %v6584_v16, %v6583_v47  ;;  %v6768_v47 = vld [vmem:[#allocation22 + $0x68] sm:$0xff] }
0x142f   :  { %6290 = vmatprep.subr.bf16.mxu1 %v10928_v40  ;;  %v9904_v40 = vpack.c.bf16 %v6602_v25, %v6601_v17  ;;  %v6767_v17 = vld [vmem:[#allocation22 + $0x60] sm:$0xff]  ;;  %v6769_v25 = vld [vmem:[#allocation22 + $0x70] sm:$0xff] }
0x1432   :  { %6291 = vmatpush1.bf16.msra.mxu1 %v10926_v53  ;;  %v6585_v53 = vld [vmem:[#allocation20 + $0x70] sm:$0xff] }
0x1433   :  { %6498 = vmatprep.subr.bf16.mxu1 %v10931_v26  ;;  %v6586_v26 = vld [vmem:[#allocation20 + $0x78] sm:$0xff] }
0x1435   :  { %6293 = vmatmul.mubr.bf16.vlgmr.msra.gmra.mrb[76].mxu1 %v13207_v33  ;;  %v6599_v33 = vld [vmem:[#allocation20 + $0xe0] sm:$0xff] }
0x1436   :  { %6499 = vmatpush1.bf16.msra.mxu1 %v10929_v5  ;;  %6530 = vmatprep.mubr.bf16.mxu1 %v6335_v60  ;;  %v9906_v5 = vpack.c.bf16 %v6586_v26, %v6585_v53  ;;  %v6774_v53 = vld [vmem:[#allocation22 + $0x98] sm:$0xff] }
0x1437   :  { %6500 = vmatprep.subr.bf16.mxu1 %v10934_v28 }
0x143a   :  { %6501 = vmatpush1.bf16.msra.mxu1 %v10932_v8 }
0x143b   :  { %6502 = vmatprep.subr.bf16.mxu1 %v10937_v42 }
0x143e   :  { %6503 = vmatpush1.bf16.msra.mxu1 %v10935_v12 }
0x143f   :  { %6504 = vmatprep.subr.bf16.mxu1 %v10940_v18 }
0x1442   :  { %6505 = vmatpush1.bf16.msra.mxu1 %v10938_v55 }
0x1443   :  { %6506 = vmatprep.subr.bf16.mxu1 %v10943_v35 }
0x1446   :  { %6507 = vmatpush1.bf16.msra.mxu1 %v10941_v54 }
0x1447   :  { %6508 = vmatprep.subr.bf16.mxu1 %v10946_v20 }
0x144a   :  { %6509 = vmatpush1.bf16.msra.mxu1 %v10944_v15 }
0x144b   :  { %6510 = vmatprep.subr.bf16.mxu1 %v10949_v24 }
0x144e   :  { %6511 = vmatpush1.bf16.msra.mxu1 %v10947_v62 }
0x144f   :  { %6512 = vmatprep.subr.bf16.mxu1 %v10952_v49 }
0x1452   :  { %6513 = vmatpush1.bf16.msra.mxu1 %v10950_v45 }
0x1453   :  { %6514 = vmatprep.subr.bf16.mxu1 %v10955_v10 }
0x1456   :  { %6515 = vmatpush1.bf16.msra.mxu1 %v10953_v7 }
0x1457   :  { %6516 = vmatprep.subr.bf16.mxu1 %v10958_v4 }
0x145a   :  { %6517 = vmatpush1.bf16.msra.mxu1 %v10956_v30 }
0x145b   :  { %6518 = vmatprep.subr.bf16.mxu1 %v10961_v3 }
0x145e   :  { %6519 = vmatpush1.bf16.msra.mxu1 %v10959_v13 }
0x145f   :  { %6520 = vmatprep.subr.bf16.mxu1 %v10964_v23 }
0x1462   :  { %6521 = vmatpush1.bf16.msra.mxu1 %v10962_v51 }
0x1463   :  { %6522 = vmatprep.subr.bf16.mxu1 %v10967_v58 }
0x1466   :  { %6523 = vmatpush1.bf16.msra.mxu1 %v10965_v36 }
0x1467   :  { %6524 = vmatprep.subr.bf16.mxu1 %v10970_v57 }
0x146a   :  { %6525 = vmatpush1.bf16.msra.mxu1 %v10968_v11 }
0x146b   :  { %6526 = vmatprep.subr.bf16.mxu1 %v10973_v29 }
0x146e   :  { %6527 = vmatpush1.bf16.msra.mxu1 %v10971_v37 }
0x146f   :  { %6528 = vmatprep.subr.bf16.mxu1 %v10976_v9  ;;  %v6757_v9 = vld [vmem:[#allocation22 + $0x10] sm:$0xff] }
0x1472   :  { %6529 = vmatpush1.bf16.msra.mxu1 %v10974_v34  ;;  %v6760_v34 = vld [vmem:[#allocation22 + $0x28] sm:$0xff] }
0x1475   :  { %6531 = vmatmul.mubr.bf16.vlgmr.msra.gmra.mrb[76].mxu1 %v6334_v38  ;;  %v6762_v38 = vld [vmem:[#allocation22 + $0x38] sm:$0xff] }
0x1476   :  { %7001 = vmatprep.mubr.bf16.mxu1 %v11624_v0  ;;  %v9900_v0 = vpack.c.bf16 %v6600_v21, %v6599_v33  ;;  %v13283_v1 = vpack.c.bf16 %v6762_v38, %v6760_v34  ;;  %v6765_v33 = vld [vmem:[#allocation22 + $0x50] sm:$0xff]  ;;  %v10977_v38 = vld [vmem:[#allocation26 + $0xc0] sm:$0xff]  }
0x1478   :  { %9901 = vmatprep.subr.bf16.mxu0 %v9900_v0 }
0x1479   :  { %9903 = vmatpush3.bf16.msra.mxu0 %v9902_v39 }
0x147a   :  { %9905 = vmatprep.subr.bf16.mxu0 %v9904_v40 }
0x147d   :  { %9907 = vmatpush3.bf16.msra.mxu0 %v9906_v5 }
0x147e   :  { %9909 = vmatprep.subr.bf16.mxu0 %v13214_v19 }
0x1548   :  { %v13255_v28 = vpop.f32.mrb[76].mxu1 }
0x1549   :  { %v6541_v60 = vsel %vm5776_vm5, %v13255_v28, 0.0  ;;  %v13259_v8 = vpop.f32.mrb[77].mxu1  ;;  %v6555_v57 = vmul.f32 %v13255_v28, %v13255_v28 }
0x154a   :  { %v6542_v42 = vrot.slane %v6541_v60, 4  ;;  %v6548_v12 = vsel %vm5776_vm5, %v13259_v8, 0.0  ;;  %v6556_v18 = vmul.f32 %v13259_v8, %v13259_v8  ;;  %v6536_v55 = vpop.f32.mrb[78].mxu1 }
0x154b   :  { %v6549_v35 = vrot.slane %v6548_v12, 4  ;;  %v6537_v54 = vpop.f32.mrb[79].mxu1  ;;  %v6557_v11 = vsel %vm5776_vm5, %v6555_v57, 0.0  ;;  %v6775_v55 = vld [vmem:[#allocation22 + $0xa0] sm:$0xff] }
0x154c   :  { %v6543_v20 = vadd.f32 %v6542_v42, %v6541_v60  ;;  %v6564_v19 = vsel %vm5776_vm5, %v6556_v18, 0.0  ;;  %v6558_v29 = vrot.slane %v6557_v11, 4  ;;  %v6773_v60 = vld [vmem:[#allocation22 + $0x90] sm:$0xff]  ;;  %v6776_v42 = vld [vmem:[#allocation22 + $0xa8] sm:$0xff]  ;;  %v6778_v18 = vld [vmem:[#allocation22 + $0xb8] sm:$0xff] }
0x154d   :  { %v6550_v15 = vadd.f32 %v6549_v35, %v6548_v12  ;;  %v6565_v24 = vrot.slane %v6564_v19, 4  ;;  %v6777_v35 = vld [vmem:[#allocation22 + $0xb0] sm:$0xff]  ;;  %v9960_v54 = vpack.c.bf16 %v6778_v18, %v6776_v42 }
0x154e   :  { %v6544_v62 = vrot.slane %v6543_v20, 2 }
0x154f   :  { %v6551_v49 = vrot.slane %v6550_v15, 2  ;;  %v6566_v45 = vadd.f32 %v6565_v24, %v6564_v19  ;;  %v6782_v19 = vld [vmem:[#allocation22 + $0xd8] sm:$0xff] }
0x1550   :  { %v6545_v10 = vadd.f32 %v6544_v62, %v6543_v20  ;;  %v6780_v20 = vld [vmem:[#allocation22 + $0xc8] sm:$0xff]  ;;  %v6779_v62 = vld [vmem:[#allocation22 + $0xc0] sm:$0xff] }
0x1551   :  { %v6552_v7 = vadd.f32 %v6551_v49, %v6550_v15  ;;  %v6567_v4 = vrot.slane %v6566_v45, 2  ;;  %v9962_v15 = vpack.c.bf16 %v6777_v35, %v6775_v55  ;;  %v9964_v24 = vpack.c.bf16 %v6782_v19, %v6780_v20  ;;  %v6781_v49 = vld [vmem:[#allocation22 + $0xd0] sm:$0xff] }
0x1552   :  { %v6546_v30 = vrot.slane %v6545_v10, 1 }
0x1553   :  { %v6553_v3 = vrot.slane %v6552_v7, 1  ;;  %v6568_v13 = vadd.f32 %v6567_v4, %v6566_v45  ;;  %v6784_v45 = vld [vmem:[#allocation22 + $0xe8] sm:$0xff] }
0x1554   :  { %v6547_v58 = vadd.f32 %v6546_v30, %v6545_v10  ;;  %v6786_v10 = vld [vmem:[#allocation22 + $0xf8] sm:$0xff]  ;;  %v6783_v30 = vld [vmem:[#allocation22 + $0xe0] sm:$0xff] }
0x1555   :  { %v6554_v23 = vadd.f32 %v6553_v3, %v6552_v7  ;;  %v6569_v51 = vrot.slane %v6568_v13, 1  ;;  %v9966_v7 = vpack.c.bf16 %v6781_v49, %v6779_v62  ;;  %v9968_v4 = vpack.c.bf16 %v6786_v10, %v6784_v45  ;;  %v6785_v3 = vld [vmem:[#allocation22 + $0xf0] sm:$0xff]  ;;  %v10985_v62 = vld [vmem:[#allocation26] sm:$0xff]  }
0x1556   :  { %v10987_v49 = vld [vmem:[#allocation26 + $0x48] sm:$0xff]   ;;  %v10991_v10 = vld [vmem:[#allocation26 + $0x50] sm:$0xff]  }
0x1557   :  { %6667 = vmatprep.mubr.f32.mxu0 %v6554_v23  ;;  %v6570_v36 = vadd.f32 %v6569_v51, %v6568_v13  ;;  %v9970_v13 = vpack.c.bf16 %v6785_v3, %v6783_v30  ;;  %v10989_v45 = vld [vmem:[#allocation26 + $0x8] sm:$0xff]   ;;  %v10997_v30 = vld [vmem:[#allocation26 + $0x18] sm:$0xff]   ;;  %v10999_v3 = vld [vmem:[#allocation26 + $0x60] sm:$0xff]  }
0x1558   :  { %6668 = vmatmul.mubr.f32.vlgmr.msra.gmra.mrb[84].mxu0 %v6547_v58 }
0x1559   :  { %9911 = vmatpush3.bf16.msra.mxu0 %v13216_v43  ;;  %6737 = vmatprep.mubr.f32.mxu0 %v6570_v36  ;;  %v6559_v43 = vadd.f32 %v6558_v29, %v6557_v11 }
0x155a   :  { %9913 = vmatprep.subr.bf16.mxu0 %v13218_v27 }
0x155b   :  { %v6560_v27 = vrot.slane %v6559_v43, 2 }
0x155d   :  { %9915 = vmatpush3.bf16.msra.mxu0 %v13222_v32  ;;  %v6561_v32 = vadd.f32 %v6560_v27, %v6559_v43 }
0x155e   :  { %9917 = vmatprep.subr.bf16.mxu0 %v13225_v22 }
0x155f   :  { %v6562_v22 = vrot.slane %v6561_v32, 1 }
0x1561   :  { %9919 = vmatpush3.bf16.msra.mxu0 %v13228_v44  ;;  %v6563_v44 = vadd.f32 %v6562_v22, %v6561_v32 }
0x1562   :  { %9921 = vmatprep.subr.bf16.mxu0 %v13231_v61  ;;  %v6756_v61 = vld [vmem:[#allocation22 + $0x8] sm:$0xff] }
0x1565   :  { %9923 = vmatpush3.bf16.msra.mxu0 %v13234_v52  ;;  %v6758_v52 = vld [vmem:[#allocation22 + $0x18] sm:$0xff] }
0x1566   :  { %9925 = vmatprep.subr.bf16.mxu0 %v13237_v59  ;;  %v6755_v59 = vld [vmem:[#allocation22] sm:$0xff]  ;;  %v9940_v37 = vpack.c.bf16 %v6758_v52, %v6756_v61 }
0x1567   :  { %v13281_v31 = vpack.c.bf16 %v6757_v9, %v6755_v59  ;;  %v6750_v61 = vld [vmem:[#allocation23] sm:$0x1] }
0x1569   :  { %9927 = vmatpush3.bf16.msra.mxu0 %v13245_v63  ;;  %v6759_v63 = vld [vmem:[#allocation22 + $0x20] sm:$0xff] }
0x156a   :  { %9929 = vmatprep.subr.bf16.mxu0 %v13248_v46  ;;  %v13286_v6 = vpack.c.bf16 %v6761_v56, %v6759_v63  ;;  %v6764_v46 = vld [vmem:[#allocation22 + $0x48] sm:$0xff]  ;;  %v10981_v56 = vld [vmem:[#allocation26 + $0xd0] sm:$0xff]  }
0x156b   :  { %v13290_v2 = vpack.c.bf16 %v6766_v50, %v6764_v46  ;;  %v10980_v63 = vld [vmem:[#allocation26 + $0x88] sm:$0xff]   ;;  %v10984_v46 = vld [vmem:[#allocation26 + $0xd8] sm:$0xff]  }
0x156c   :  { %v10986_v50 = vld [vmem:[#allocation26 + $0x98] sm:$0xff]  }
0x156d   :  { %9931 = vmatpush3.bf16.msra.mxu0 %v13250_v14  ;;  %v6763_v14 = vld [vmem:[#allocation22 + $0x40] sm:$0xff] }
0x156e   :  { %9933 = vmatprep.subr.bf16.mxu0 %v9900_v0  ;;  %v13293_v21 = vpack.c.bf16 %v6765_v33, %v6763_v14  ;;  %v6770_v0 = vld [vmem:[#allocation22 + $0x78] sm:$0xff]  ;;  %v10990_v14 = vld [vmem:[#allocation26 + $0xa0] sm:$0xff]   ;;  %v10992_v33 = vld [vmem:[#allocation26 + $0xe8] sm:$0xff]  }
0x156f   :  { %v9952_v16 = vpack.c.bf16 %v6770_v0, %v6768_v47  ;;  %v10996_v47 = vld [vmem:[#allocation26 + $0xf0] sm:$0xff]  }
0x1570   :  { %v10998_v0 = vld [vmem:[#allocation26 + $0xb0] sm:$0xff]  }
0x1571   :  { %9935 = vmatpush3.bf16.msra.mxu0 %v9902_v39  ;;  %v9954_v39 = vpack.c.bf16 %v6769_v25, %v6767_v17 }
0x1572   :  { %9937 = vmatprep.subr.bf16.mxu0 %v9904_v40  ;;  %v6772_v40 = vld [vmem:[#allocation22 + $0x88] sm:$0xff] }
0x1573   :  { %v9956_v26 = vpack.c.bf16 %v6774_v53, %v6772_v40 }
0x1575   :  { %9939 = vmatpush3.bf16.msra.mxu0 %v9906_v5  ;;  %v6771_v5 = vld [vmem:[#allocation22 + $0x80] sm:$0xff] }
0x1576   :  { %9941 = vmatprep.subr.bf16.mxu0 %v9940_v37  ;;  %v9958_v12 = vpack.c.bf16 %v6773_v60, %v6771_v5 }
0x1578   :  { %6738 = vmatmul.mubr.f32.vlgmr.msra.gmra.mrb[86].mxu0 %v6563_v44 }
0x1579   :  { %6851 = vmatprep.mubr.f32.mxu0 %v11625_v41  ;;  %9943 = vmatpush1.bf16.msra.mxu0 %v13281_v31 }
0x157a   :  { %9945 = vmatprep.subr.bf16.mxu0 %v13283_v1 }
0x157d   :  { %9947 = vmatpush1.bf16.msra.mxu0 %v13286_v6 }
0x157e   :  { %9949 = vmatprep.subr.bf16.mxu0 %v13290_v2 }
0x1581   :  { %9951 = vmatpush1.bf16.msra.mxu0 %v13293_v21 }
0x1582   :  { %9953 = vmatprep.subr.bf16.mxu0 %v9952_v16 }
0x1585   :  { %9955 = vmatpush1.bf16.msra.mxu0 %v9954_v39 }
0x1586   :  { %9957 = vmatprep.subr.bf16.mxu0 %v9956_v26 }
0x1589   :  { %9959 = vmatpush1.bf16.msra.mxu0 %v9958_v12 }
0x158a   :  { %9961 = vmatprep.subr.bf16.mxu0 %v9960_v54 }
0x158d   :  { %9963 = vmatpush1.bf16.msra.mxu0 %v9962_v15 }
0x158e   :  { %9965 = vmatprep.subr.bf16.mxu0 %v9964_v24 }
0x1591   :  { %9967 = vmatpush1.bf16.msra.mxu0 %v9966_v7 }
0x1592   :  { %9969 = vmatprep.subr.bf16.mxu0 %v9968_v4 }
0x1595   :  { %9971 = vmatpush1.bf16.msra.mxu0 %v9970_v13 }
0x1596   :  { %9973 = vmatprep.subr.bf16.mxu0 %v9940_v37  ;;  %v6752_v37 = vld [vmem:[#allocation25] sm:$0x1] }
0x162b   :  { %v9223_v23 = vpop.f32.mrb[84].mxu0 }
0x162c   :  { %v9224_v51 = vpop.f32.mrb[85].mxu0 }
0x162d   :  { %v9225_v58 = vadd.f32 %v9224_v51, %v9223_v23  ;;  %v11003_v23 = vld [vmem:[#allocation26 + $0x68] sm:$0xff]  }
0x162e   :  { %v11004_v51 = vld [vmem:[#allocation26 + $0x28] sm:$0xff]  }
0x162f   :  { %v6743_v36 = vmul.f32 0.125, %v9225_v58  ;;  %v11007_v58 = vld [vmem:[#allocation26 + $0x70] sm:$0xff]  }
0x1631   :  { %v6745_v43 = vmul.f32 %v6743_v36, %v6743_v36 }
0x164b   :  { %v9258_v57 = vpop.f32.mrb[86].mxu0 }
0x164c   :  { %v9259_v11 = vpop.f32.mrb[87].mxu0 }
0x164d   :  { %v9260_v29 = vadd.f32 %v9259_v11, %v9258_v57  ;;  %v11000_v57 = vld [vmem:[#allocation26 + $0xf8] sm:$0xff]  }
0x164e   :  { %v11002_v11 = vld [vmem:[#allocation26 + $0xb8] sm:$0xff]  }
0x164f   :  { %v6744_v27 = vmul.f32 0.125, %v9260_v29  ;;  %v11011_v29 = vld [vmem:[#allocation26 + $0x78] sm:$0xff]  }
0x1651   :  { %v6746_v32 = vsub.f32 %v6744_v27, %v6745_v43  ;;  %v11012_v43 = vld [vmem:[#allocation26 + $0x38] sm:$0xff]   ;;  %v11005_v27 = vld [vmem:[#allocation26 + $0x140] sm:$0xff]  }
0x1653   :  { %v6747_v22 = vmax.f32 %v6746_v32, 0.0 }
0x1655   :  { %v6748_v44 = vadd.f32 1e-05, %v6747_v22 }
0x1657   :  { %11041 = vrsqrt.f32 %v6748_v44 }
0x1661   :  { %v11042_v52 = vpop.eup %11041 }
0x1662   :  { %v6751_v59 = vmul.f32 %v11042_v52, %v6750_v61 }
0x1664   :  { %6852 = vmatmul.mubr.f32.vlgmr.msra.gmra.mrb[88].mxu0 %v6751_v59  ;;  %v6753_v9 = vmul.f32 %v6751_v59, %v6743_v36  ;;  %v11008_v36 = vld [vmem:[#allocation26 + $0x30] sm:$0xff]  }
0x1665   :  { %9975 = vmatpush1.bf16.msra.mxu0 %v13281_v31  ;;  %6922 = vmatprep.mubr.f32.mxu0 %v11625_v41  ;;  %v10978_v31 = vld [vmem:[#allocation26 + $0x80] sm:$0xff]  }
0x1666   :  { %9977 = vmatprep.subr.bf16.mxu0 %v13283_v1  ;;  %v6754_v34 = vsub.f32 %v6752_v37, %v6753_v9  ;;  %v10979_v1 = vld [vmem:[#allocation26 + $0xc8] sm:$0xff]   ;;  %v11006_v37 = vld [vmem:[#allocation26 + $0x100] sm:$0xff]  }
0x1669   :  { %9979 = vmatpush1.bf16.msra.mxu0 %v13286_v6  ;;  %v10982_v6 = vld [vmem:[#allocation26 + $0x90] sm:$0xff]  }
0x166a   :  { %9981 = vmatprep.subr.bf16.mxu0 %v13290_v2  ;;  %v10988_v2 = vld [vmem:[#allocation26 + $0xe0] sm:$0xff]  }
0x166d   :  { %9983 = vmatpush1.bf16.msra.mxu0 %v13293_v21  ;;  %v10994_v21 = vld [vmem:[#allocation26 + $0xa8] sm:$0xff]  }
0x166e   :  { %9985 = vmatprep.subr.bf16.mxu0 %v9952_v16 }
0x1671   :  { %9987 = vmatpush1.bf16.msra.mxu0 %v9954_v39 }
0x1672   :  { %9989 = vmatprep.subr.bf16.mxu0 %v9956_v26 }
0x1675   :  { %9991 = vmatpush1.bf16.msra.mxu0 %v9958_v12 }
0x1676   :  { %9993 = vmatprep.subr.bf16.mxu0 %v9960_v54 }
0x1679   :  { %9995 = vmatpush1.bf16.msra.mxu0 %v9962_v15  ;;  %v10983_v15 = vld [vmem:[#allocation26 + $0x40] sm:$0xff]  }
0x167a   :  { %9997 = vmatprep.subr.bf16.mxu0 %v9964_v24  ;;  %v6957_v24 = vld [vmem:[%s13458_s4] sm:$0x7] }
0x167d   :  { %9999 = vmatpush1.bf16.msra.mxu0 %v9966_v7  ;;  %v10993_v7 = vld [vmem:[#allocation26 + $0x10] sm:$0xff]  }
0x167e   :  { %10001 = vmatprep.subr.bf16.mxu0 %v9968_v4  ;;  %v10995_v4 = vld [vmem:[#allocation26 + $0x58] sm:$0xff]  }
0x1681   :  { %10003 = vmatpush1.bf16.msra.mxu0 %v9970_v13  ;;  %v11001_v13 = vld [vmem:[#allocation26 + $0x20] sm:$0xff]  }
0x1682   :  { %9261 = vmatprep.subr.bf16.mxu0 %v10977_v38  ;;  %v11009_v38 = vld [vmem:[#allocation26 + $0x148] sm:$0xff]  }
0x1684   :  { %6923 = vmatmul.mubr.f32.vlgmr.msra.gmra.mrb[90].mxu0 %v6754_v34 }
0x1685   :  { %9262 = vmatpush3.bf16.msra.mxu0 %v10978_v31 }
0x1686   :  { %9263 = vmatprep.subr.bf16.mxu0 %v10979_v1  ;;  %v11010_v1 = vld [vmem:[#allocation26 + $0x108] sm:$0xff]  }
0x1689   :  { %9264 = vmatpush3.bf16.msra.mxu0 %v10980_v63  ;;  %v11013_v63 = vld [vmem:[#allocation26 + $0x150] sm:$0xff]  }
0x168a   :  { %9265 = vmatprep.subr.bf16.mxu0 %v10981_v56  ;;  %v11014_v56 = vld [vmem:[#allocation26 + $0x110] sm:$0xff]  }
0x168d   :  { %9266 = vmatpush3.bf16.msra.mxu0 %v10982_v6  ;;  %v11015_v6 = vld [vmem:[#allocation26 + $0x158] sm:$0xff]  }
0x168e   :  { %9267 = vmatprep.subr.bf16.mxu0 %v10984_v46  ;;  %v11016_v46 = vld [vmem:[#allocation26 + $0x118] sm:$0xff]  }
0x1691   :  { %9268 = vmatpush3.bf16.msra.mxu0 %v10986_v50  ;;  %v11017_v50 = vld [vmem:[#allocation26 + $0x160] sm:$0xff]  }
0x1692   :  { %9269 = vmatprep.subr.bf16.mxu0 %v10988_v2  ;;  %v11018_v2 = vld [vmem:[#allocation26 + $0x120] sm:$0xff]  }
0x1695   :  { %9270 = vmatpush3.bf16.msra.mxu0 %v10990_v14  ;;  %v11019_v14 = vld [vmem:[#allocation26 + $0x168] sm:$0xff]  }
0x1696   :  { %9271 = vmatprep.subr.bf16.mxu0 %v10992_v33  ;;  %v11020_v33 = vld [vmem:[#allocation26 + $0x128] sm:$0xff]  }
0x1699   :  { %9272 = vmatpush3.bf16.msra.mxu0 %v10994_v21  ;;  %v11021_v21 = vld [vmem:[#allocation26 + $0x170] sm:$0xff]  }
0x169a   :  { %9273 = vmatprep.subr.bf16.mxu0 %v10996_v47  ;;  %v11022_v47 = vld [vmem:[#allocation26 + $0x130] sm:$0xff]  }
0x169d   :  { %9274 = vmatpush3.bf16.msra.mxu0 %v10998_v0  ;;  %v11023_v0 = vld [vmem:[#allocation26 + $0x178] sm:$0xff]  }
0x169e   :  { %9275 = vmatprep.subr.bf16.mxu0 %v11000_v57 }
0x16a1   :  { %9276 = vmatpush3.bf16.msra.mxu0 %v11002_v11 }
0x16a2   :  { %9305 = vmatprep.subr.bf16.mxu0 %v11005_v27 }
0x1737   :  { %v6853_v16 = vpop.f32.mrb[88].mxu0 }
0x1738   :  { %v6932_v17 = vrot.slane %v6853_v16, %v12401_v48  ;;  %v6855_v25 = vpop.f32.mrb[89].mxu0  ;;  %v11024_v16 = vld [vmem:[#allocation26 + $0x138] sm:$0xff]  }
0x1739   :  { %v6936_v39 = vrot.slane %v6855_v25, %v12401_v48  ;;  %v7544_v25 = vld [vmem:[%s13459_s22] sm:$0xff] }
0x173a   :  { %v6937_v40 = vmul.f32 %v6932_v17, %v13255_v28 }
0x173b   :  { %v6938_v53 = vmul.f32 %v6936_v39, %v13259_v8  ;;  %v7545_v39 = vld [vmem:[%s13459_s22 + $0x8] sm:$0xff] }
0x1757   :  { %v6924_v26 = vpop.f32.mrb[90].mxu0 }
0x1758   :  { %v6942_v5 = vrot.slane %v6924_v26, %v12401_v48  ;;  %v6926_v60 = vpop.f32.mrb[91].mxu0  ;;  %v10005_v26 = vpack.c.bf16 %v7545_v39, %v7544_v25  ;;  %v7716_v39 = vld [vmem:[#allocation28 + $0x20] sm:$0xff] }
0x1759   :  { %v6946_v42 = vrot.slane %v6926_v60, %v12401_v48 }
0x175a   :  { %v6947_v12 = vadd.f32 %v6942_v5, %v6937_v40  ;;  %v7546_v40 = vld [vmem:[%s13459_s22 + $0x10] sm:$0xff]  ;;  %v7547_v5 = vld [vmem:[%s13459_s22 + $0x18] sm:$0xff] }
0x175b   :  { %v6948_v18 = vadd.f32 %v6946_v42, %v6938_v53  ;;  %v11626_v53 = vmov 0.0|0.0   ;;  %v10008_v60 = vpack.c.bf16 %v7547_v5, %v7546_v40  ;;  %v7548_v42 = vld [vmem:[%s13459_s22 + $0x20] sm:$0xff]  ;;  %v7718_v5 = vld [vmem:[#allocation28 + $0x30] sm:$0xff] }
0x175c   :  { %vm6949_vm1 = vcmp.gt.f32.partialorder %v6947_v12, 0.0  ;;  %v6951_v55 = vmul.f32 0.2, %v6947_v12  ;;  %v7717_v40 = vld [vmem:[#allocation28 + $0x28] sm:$0xff] }
0x175d   :  { %vm6950_vm6 = vcmp.gt.f32.partialorder %v6948_v18, 0.0  ;;  %v6952_v35 = vmul.f32 0.2, %v6948_v18 }
0x175e   :  { %v6953_v54 = vsel %vm6949_vm1, %v6947_v12, %v6951_v55  ;;  %v7549_v12 = vld [vmem:[%s13459_s22 + $0x28] sm:$0xff]  ;;  %v7550_v55 = vld [vmem:[%s13459_s22 + $0x30] sm:$0xff] }
0x175f   :  { %v6954_v20 = vsel %vm6950_vm6, %v6948_v18, %v6952_v35  ;;  %v6955_v19 = vpack.c.bf16 %v6953_v54, %v6953_v54  ;;  %v10011_v18 = vpack.c.bf16 %v7549_v12, %v7548_v42  ;;  %v7551_v35 = vld [vmem:[%s13459_s22 + $0x38] sm:$0xff] }
0x1760   :  { %v6956_v28 = vpack.c.bf16 %v6954_v20, %v6954_v20  ;;  %v10014_v54 = vpack.c.bf16 %v7551_v35, %v7550_v55  ;;  %v7552_v20 = vld [vmem:[%s13459_s22 + $0x40] sm:$0xff]  ;;  %v7722_v35 = vld [vmem:[#allocation28 + $0x50] sm:$0xff] }
0x1761   :  { %v6964_v8 = vsel %vm6962_vm7, %v6955_v19, 0  ;;  %v7553_v19 = vld [vmem:[%s13459_s22 + $0x48] sm:$0xff]  ;;  %v7720_v12 = vld [vmem:[#allocation28 + $0x40] sm:$0xff] }
0x1762   :  { %8852 = vmatprep.subr.msk.bf16.mxu1 %vm6962_vm7, %v6956_v28  ;;  %v10017_v28 = vpack.c.bf16 %v7553_v19, %v7552_v20  ;;  %v7724_v19 = vld [vmem:[#allocation28 + $0x60] sm:$0xff] }
0x1763   :  { %6970 = vmatpush1.bf16.msra.mxu1 %v6964_v8  ;;  %v7555_v8 = vld [vmem:[%s13459_s22 + $0x58] sm:$0xff] }
0x1764   :  { %9283 = vmatprep.subr.bf16.mxu1 %v10983_v15  ;;  %v7554_v15 = vld [vmem:[%s13459_s22 + $0x50] sm:$0xff] }
0x1766   :  { %8853 = vmatmul.mubr.msk.bf16.vlgmr.msra.gmra.mrb[80].mxu1 %vm6958_vm8, %v6957_v24  ;;  %v10020_v24 = vpack.c.bf16 %v7555_v8, %v7554_v15  ;;  %v7726_v8 = vld [vmem:[#allocation28 + $0x70] sm:$0xff] }
0x1767   :  { %9284 = vmatpush3.bf16.msra.mxu1 %v10985_v62  ;;  %v7556_v62 = vld [vmem:[%s13459_s22 + $0x60] sm:$0xff] }
0x1768   :  { %9285 = vmatprep.subr.bf16.mxu1 %v10987_v49  ;;  %v7557_v49 = vld [vmem:[%s13459_s22 + $0x68] sm:$0xff] }
0x176b   :  { %9286 = vmatpush3.bf16.msra.mxu1 %v10989_v45  ;;  %v10023_v45 = vpack.c.bf16 %v7557_v49, %v7556_v62 }
0x176c   :  { %9287 = vmatprep.subr.bf16.mxu1 %v10991_v10  ;;  %v7558_v10 = vld [vmem:[%s13459_s22 + $0x70] sm:$0xff] }
0x176f   :  { %9288 = vmatpush3.bf16.msra.mxu1 %v10993_v7  ;;  %v7559_v7 = vld [vmem:[%s13459_s22 + $0x78] sm:$0xff] }
0x1770   :  { %9289 = vmatprep.subr.bf16.mxu1 %v10995_v4  ;;  %v10026_v4 = vpack.c.bf16 %v7559_v7, %v7558_v10 }
0x1773   :  { %9290 = vmatpush3.bf16.msra.mxu1 %v10997_v30 }
0x1774   :  { %9291 = vmatprep.subr.bf16.mxu1 %v10999_v3 }
0x1777   :  { %9292 = vmatpush3.bf16.msra.mxu1 %v11001_v13 }
0x1778   :  { %9293 = vmatprep.subr.bf16.mxu1 %v11003_v23 }
0x177b   :  { %9294 = vmatpush3.bf16.msra.mxu1 %v11004_v51 }
0x177c   :  { %9295 = vmatprep.subr.bf16.mxu1 %v11007_v58 }
0x177f   :  { %9296 = vmatpush3.bf16.msra.mxu1 %v11008_v36 }
0x1780   :  { %9297 = vmatprep.subr.bf16.mxu1 %v11011_v29 }
0x1783   :  { %9298 = vmatpush3.bf16.msra.mxu1 %v11012_v43 }
0x1784   :  { %10004 = vmatprep.subr.bf16.mxu1 %v11626_v53 }
0x1839   :  { %v7003_v32 = vpop.f32.mrb[80].mxu1 }
0x183a   :  { %v7010_v22 = vpack.c.bf16 %v7003_v32, %v7003_v32  ;;  %v7005_v44 = vpop.f32.mrb[81].mxu1 }
0x183b   :  { %v7011_v61 = vpack.c.bf16 %v7005_v44, %v7005_v44  ;;  %v7007_v52 = vpop.f32.mrb[82].mxu1 }
0x183c   :  { %v7008_v59 = vpop.f32.mrb[83].mxu1  ;;  %v7079_v34 = vrot.slane %v7010_v22, 1  ;;  %v7388_v17 = vrot.slane %v7010_v22, 2 }
0x183d   :  { %v7080_v9 = vrot.slane %v7011_v61, 1  ;;  %7347 = vmatprep.mubr.bf16.mxu1 %v7011_v61  ;;  %v7389_v31 = vrot.slane %v7011_v61, 2 }
0x183e   :  { %7348 = vmatmul.mubr.bf16.vlgmr.msra.gmra.mrb[84].mxu1 %v7010_v22 }
0x183f   :  { %7211 = vmatprep.mubr.bf16.mxu0 %v7080_v9  ;;  %10006 = vmatpush3.bf16.msra.mxu1 %v10005_v26 }
0x1840   :  { %7212 = vmatmul.mubr.bf16.vlgmr.msra.gmra.mrb[92].mxu0 %v7079_v34  ;;  %10007 = vmatprep.subr.bf16.mxu1 %v11626_v53 }
0x1841   :  { %9306 = vmatpush3.bf16.msra.mxu0 %v11006_v37  ;;  %7520 = vmatprep.mubr.bf16.mxu0 %v7389_v31 }
0x1842   :  { %9307 = vmatprep.subr.bf16.mxu0 %v11009_v38  ;;  %9436 = vmatprep.mubr.msk.f32.mxu1 %vm11627_vm9, %v11625_v41 }
0x1843   :  { %10009 = vmatpush3.bf16.msra.mxu1 %v10008_v60 }
0x1844   :  { %10010 = vmatprep.subr.bf16.mxu1 %v11626_v53 }
0x1845   :  { %9308 = vmatpush3.bf16.msra.mxu0 %v11010_v1 }
0x1846   :  { %9309 = vmatprep.subr.bf16.mxu0 %v11013_v63 }
0x1847   :  { %10012 = vmatpush3.bf16.msra.mxu1 %v10011_v18 }
0x1848   :  { %10013 = vmatprep.subr.bf16.mxu1 %v11626_v53 }
0x1849   :  { %9310 = vmatpush3.bf16.msra.mxu0 %v11014_v56 }
0x184a   :  { %9311 = vmatprep.subr.bf16.mxu0 %v11015_v6 }
0x184b   :  { %10015 = vmatpush3.bf16.msra.mxu1 %v10014_v54 }
0x184c   :  { %10016 = vmatprep.subr.bf16.mxu1 %v11626_v53 }
0x184d   :  { %9312 = vmatpush3.bf16.msra.mxu0 %v11016_v46  ;;  %v7712_v46 = vld [vmem:[#allocation28] sm:$0xff] }
0x184e   :  { %9313 = vmatprep.subr.bf16.mxu0 %v11017_v50  ;;  %v7713_v50 = vld [vmem:[#allocation28 + $0x8] sm:$0xff] }
0x184f   :  { %10018 = vmatpush3.bf16.msra.mxu1 %v10017_v28 }
0x1850   :  { %10019 = vmatprep.subr.bf16.mxu1 %v11626_v53 }
0x1851   :  { %9314 = vmatpush3.bf16.msra.mxu0 %v11018_v2 }
0x1852   :  { %9315 = vmatprep.subr.bf16.mxu0 %v11019_v14 }
0x1853   :  { %10021 = vmatpush3.bf16.msra.mxu1 %v10020_v24 }
0x1854   :  { %10022 = vmatprep.subr.bf16.mxu1 %v11626_v53 }
0x1855   :  { %9316 = vmatpush3.bf16.msra.mxu0 %v11020_v33  ;;  %v10053_v33 = vpack.c.bf16 %v7713_v50, %v7712_v46 }
0x1856   :  { %9317 = vmatprep.subr.bf16.mxu0 %v11021_v21 }
0x1857   :  { %10024 = vmatpush3.bf16.msra.mxu1 %v10023_v45 }
0x1858   :  { %10025 = vmatprep.subr.bf16.mxu1 %v11626_v53 }
0x1859   :  { %9318 = vmatpush3.bf16.msra.mxu0 %v11022_v47 }
0x185a   :  { %9319 = vmatprep.subr.bf16.mxu0 %v11023_v0  ;;  %v7714_v0 = vld [vmem:[#allocation28 + $0x10] sm:$0xff] }
0x185b   :  { %10027 = vmatpush3.bf16.msra.mxu1 %v10026_v4 }
0x185c   :  { %10052 = vmatprep.subr.bf16.mxu1 %v11626_v53 }
0x185d   :  { %9320 = vmatpush3.bf16.msra.mxu0 %v11024_v16  ;;  %v7715_v16 = vld [vmem:[#allocation28 + $0x18] sm:$0xff] }
0x185e   :  { %10028 = vmatprep.subr.bf16.mxu0 %v11626_v53  ;;  %v10056_v25 = vpack.c.bf16 %v7715_v16, %v7714_v0 }
0x1860   :  { %7521 = vmatmul.mubr.bf16.vlgmr.msra.gmra.mrb[96].mxu0 %v7388_v17 }
0x1861   :  { %10030 = vmatpush3.bf16.msra.mxu0 %v10005_v26  ;;  %9471 = vmatprep.mubr.msk.f32.mxu0 %vm11627_vm9, %v11625_v41  ;;  %v10059_v26 = vpack.c.bf16 %v7717_v40, %v7716_v39 }
0x1862   :  { %10031 = vmatprep.subr.bf16.mxu0 %v11626_v53 }
0x1865   :  { %10033 = vmatpush3.bf16.msra.mxu0 %v10008_v60  ;;  %v7719_v60 = vld [vmem:[#allocation28 + $0x38] sm:$0xff] }
0x1866   :  { %10034 = vmatprep.subr.bf16.mxu0 %v11626_v53  ;;  %v10062_v42 = vpack.c.bf16 %v7719_v60, %v7718_v5 }
0x1869   :  { %10036 = vmatpush3.bf16.msra.mxu0 %v10011_v18  ;;  %v7721_v18 = vld [vmem:[#allocation28 + $0x48] sm:$0xff] }
0x186a   :  { %10037 = vmatprep.subr.bf16.mxu0 %v11626_v53  ;;  %v10065_v55 = vpack.c.bf16 %v7721_v18, %v7720_v12 }
0x186d   :  { %10039 = vmatpush3.bf16.msra.mxu0 %v10014_v54  ;;  %v7723_v54 = vld [vmem:[#allocation28 + $0x58] sm:$0xff] }
0x186e   :  { %10040 = vmatprep.subr.bf16.mxu0 %v11626_v53  ;;  %v10068_v20 = vpack.c.bf16 %v7723_v54, %v7722_v35 }
0x1871   :  { %10042 = vmatpush3.bf16.msra.mxu0 %v10017_v28  ;;  %v7725_v28 = vld [vmem:[#allocation28 + $0x68] sm:$0xff] }
0x1872   :  { %10043 = vmatprep.subr.bf16.mxu0 %v11626_v53  ;;  %v10071_v15 = vpack.c.bf16 %v7725_v28, %v7724_v19 }
0x1875   :  { %10045 = vmatpush3.bf16.msra.mxu0 %v10020_v24  ;;  %v7727_v24 = vld [vmem:[#allocation28 + $0x78] sm:$0xff] }
0x1876   :  { %10046 = vmatprep.subr.bf16.mxu0 %v11626_v53  ;;  %v10074_v62 = vpack.c.bf16 %v7727_v24, %v7726_v8 }
0x1879   :  { %10048 = vmatpush3.bf16.msra.mxu0 %v10023_v45 }
0x187a   :  { %10049 = vmatprep.subr.bf16.mxu0 %v11626_v53 }
0x187d   :  { %10051 = vmatpush3.bf16.msra.mxu0 %v10026_v4 }
0x187e   :  { %10076 = vmatprep.subr.bf16.mxu0 %v11626_v53 }
0x1911   :  { %v9299_v30 = vpop.f32.mrb[84].mxu1 }
0x1912   :  { %v9300_v3 = vpop.f32.mrb[85].mxu1 }
0x1913   :  { %v9301_v13 = vadd.f32 %v9300_v3, %v9299_v30  ;;  %v9277_v23 = vpop.f32.mrb[92].mxu0  ;;  %v9302_v51 = vpop.f32.mrb[86].mxu1 }
0x1914   :  { %v9278_v58 = vpop.f32.mrb[93].mxu0  ;;  %v9303_v36 = vpop.f32.mrb[87].mxu1 }
0x1915   :  { %v9279_v57 = vadd.f32 %v9278_v58, %v9277_v23  ;;  %v9280_v11 = vpop.f32.mrb[94].mxu0  ;;  %v7707_v58 = vld [vmem:[#allocation29] sm:$0x1] }
0x1916   :  { %v9281_v29 = vpop.f32.mrb[95].mxu0 }
0x1917   :  { %v7350_v43 = vadd.f32 %v9301_v13, %v9279_v57  ;;  %v11025_v57 = vld [vmem:[#allocation32] sm:$0xff]  }
0x1933   :  { %v9321_v27 = vpop.f32.mrb[96].mxu0 }
0x1934   :  { %v9322_v32 = vpop.f32.mrb[97].mxu0 }
0x1935   :  { %v9323_v22 = vadd.f32 %v9322_v32, %v9321_v27  ;;  %v9324_v44 = vpop.f32.mrb[98].mxu0  ;;  %v11027_v32 = vld [vmem:[#allocation32 + $0x10] sm:$0xff]  }
0x1936   :  { %v9325_v61 = vpop.f32.mrb[99].mxu0  ;;  %v11029_v44 = vld [vmem:[#allocation32 + $0x20] sm:$0xff]  }
0x1937   :  { %v13349_v52 = vadd.f32 %v9323_v22, %v7350_v43  ;;  %v11026_v43 = vld [vmem:[#allocation32 + $0x8] sm:$0xff]   ;;  %v11028_v22 = vld [vmem:[#allocation32 + $0x18] sm:$0xff]  }
0x1938   :  { %v11030_v61 = vld [vmem:[#allocation32 + $0x28] sm:$0xff]  }
0x1939   :  { %v7529_v59 = vsel %vm6962_vm7, %v13349_v52, 0.0  ;;  %v7536_v9 = vmul.f32 %v13349_v52, %v13349_v52 }
0x193a   :  { %v7530_v37 = vrot.slane %v7529_v59, 4 }
0x193b   :  { %v7537_v34 = vsel %vm6962_vm7, %v7536_v9, 0.0  ;;  %v11032_v9 = vld [vmem:[#allocation32 + $0x38] sm:$0xff]  }
0x193c   :  { %v7531_v38 = vadd.f32 %v7530_v37, %v7529_v59  ;;  %v7538_v31 = vrot.slane %v7537_v34, 4  ;;  %v11031_v59 = vld [vmem:[#allocation32 + $0x30] sm:$0xff]  }
0x193e   :  { %v7532_v1 = vrot.slane %v7531_v38, 2  ;;  %v7539_v63 = vadd.f32 %v7538_v31, %v7537_v34 }
0x1940   :  { %v7533_v56 = vadd.f32 %v7532_v1, %v7531_v38  ;;  %v7540_v6 = vrot.slane %v7539_v63, 2 }
0x1942   :  { %v7534_v2 = vrot.slane %v7533_v56, 1  ;;  %v7541_v14 = vadd.f32 %v7540_v6, %v7539_v63 }
0x1944   :  { %v7535_v21 = vadd.f32 %v7534_v2, %v7533_v56  ;;  %v7542_v47 = vrot.slane %v7541_v14, 1 }
0x1946   :  { %9437 = vmatmul.mubr.f32.vlgmr.msra.gmra.mrb[88].mxu1 %v7535_v21  ;;  %v7543_v17 = vadd.f32 %v7542_v47, %v7541_v14 }
0x1947   :  { %10054 = vmatpush3.bf16.msra.mxu1 %v10053_v33  ;;  %9506 = vmatprep.mubr.msk.f32.mxu1 %vm11627_vm9, %v11625_v41 }
0x1948   :  { %9472 = vmatmul.mubr.f32.vlgmr.msra.gmra.mrb[100].mxu0 %v7543_v17  ;;  %10055 = vmatprep.subr.bf16.mxu1 %v11626_v53 }
0x1949   :  { %10078 = vmatpush3.bf16.msra.mxu0 %v10053_v33  ;;  %9541 = vmatprep.mubr.msk.f32.mxu0 %vm11627_vm9, %v11625_v41 }
0x194a   :  { %10079 = vmatprep.subr.bf16.mxu0 %v11626_v53 }
0x194b   :  { %10057 = vmatpush3.bf16.msra.mxu1 %v10056_v25 }
0x194c   :  { %10058 = vmatprep.subr.bf16.mxu1 %v11626_v53 }
0x194d   :  { %10081 = vmatpush3.bf16.msra.mxu0 %v10056_v25 }
0x194e   :  { %10082 = vmatprep.subr.bf16.mxu0 %v11626_v53 }
0x194f   :  { %10060 = vmatpush3.bf16.msra.mxu1 %v10059_v26 }
0x1950   :  { %10061 = vmatprep.subr.bf16.mxu1 %v11626_v53 }
0x1951   :  { %10084 = vmatpush3.bf16.msra.mxu0 %v10059_v26 }
0x1952   :  { %10085 = vmatprep.subr.bf16.mxu0 %v11626_v53 }
0x1953   :  { %10063 = vmatpush3.bf16.msra.mxu1 %v10062_v42 }
0x1954   :  { %10064 = vmatprep.subr.bf16.mxu1 %v11626_v53 }
0x1955   :  { %10087 = vmatpush3.bf16.msra.mxu0 %v10062_v42 }
0x1956   :  { %10088 = vmatprep.subr.bf16.mxu0 %v11626_v53 }
0x1957   :  { %10066 = vmatpush3.bf16.msra.mxu1 %v10065_v55 }
0x1958   :  { %10067 = vmatprep.subr.bf16.mxu1 %v11626_v53 }
0x1959   :  { %10090 = vmatpush3.bf16.msra.mxu0 %v10065_v55 }
0x195a   :  { %10091 = vmatprep.subr.bf16.mxu0 %v11626_v53 }
0x195b   :  { %10069 = vmatpush3.bf16.msra.mxu1 %v10068_v20 }
0x195c   :  { %10070 = vmatprep.subr.bf16.mxu1 %v11626_v53 }
0x195d   :  { %10093 = vmatpush3.bf16.msra.mxu0 %v10068_v20 }
0x195e   :  { %10094 = vmatprep.subr.bf16.mxu0 %v11626_v53 }
0x195f   :  { %10072 = vmatpush3.bf16.msra.mxu1 %v10071_v15 }
0x1960   :  { %10073 = vmatprep.subr.bf16.mxu1 %v11626_v53 }
0x1961   :  { %10096 = vmatpush3.bf16.msra.mxu0 %v10071_v15 }
0x1962   :  { %10097 = vmatprep.subr.bf16.mxu0 %v11626_v53  ;;  %v7709_v53 = vld [vmem:[#allocation31] sm:$0x1] }
0x1963   :  { %10075 = vmatpush3.bf16.msra.mxu1 %v10074_v62 }
0x1964   :  { %9544 = vmatprep.subr.bf16.mxu1 %v11625_v41 }
0x1965   :  { %10099 = vmatpush3.bf16.msra.mxu0 %v10074_v62 }
0x1a19   :  { %v7626_v49 = vpop.f32.mrb[88].mxu1 }
0x1a1a   :  { %v7700_v45 = vmul.f32 0.5, %v7626_v49  ;;  %v9438_v10 = vpop.f32.mrb[89].mxu1 }
0x1a1b   :  { %v7696_v7 = vpop.f32.mrb[100].mxu0 }
0x1a1c   :  { %v7702_v4 = vmul.f32 %v7700_v45, %v7700_v45  ;;  %v7701_v30 = vmul.f32 0.5, %v7696_v7  ;;  %v9473_v3 = vpop.f32.mrb[101].mxu0 }
0x1a1e   :  { %v7703_v13 = vsub.f32 %v7701_v30, %v7702_v4 }
0x1a20   :  { %v7704_v23 = vmax.f32 %v7703_v13, 0.0 }
0x1a22   :  { %v7705_v51 = vadd.f32 1e-05, %v7704_v23 }
0x1a24   :  { %11043 = vrsqrt.f32 %v7705_v51 }
0x1a2e   :  { %v11044_v36 = vpop.eup %11043 }
0x1a2f   :  { %v7708_v11 = vmul.f32 %v11044_v36, %v7707_v58 }
0x1a31   :  { %9507 = vmatmul.mubr.f32.vlgmr.msra.gmra.mrb[90].mxu1 %v7708_v11  ;;  %v7710_v29 = vmul.f32 %v7708_v11, %v7700_v45 }
0x1a32   :  { %9545 = vmatpush3.bf16.msra.mxu1 %v11025_v57  ;;  %9560 = vmatprep.mubr.msk.bf16.mxu1 %vm11627_vm9, %v11625_v41 }
0x1a33   :  { %v7711_v27 = vsub.f32 %v7709_v53, %v7710_v29  ;;  %9546 = vmatprep.subr.bf16.mxu1 %v11625_v41 }
0x1a35   :  { %9542 = vmatmul.mubr.f32.vlgmr.msra.gmra.mrb[102].mxu0 %v7711_v27 }
0x1a36   :  { %9547 = vmatpush3.bf16.msra.mxu1 %v11026_v43 }
0x1a37   :  { %9548 = vmatprep.subr.bf16.mxu1 %v11625_v41 }
0x1a3a   :  { %9549 = vmatpush3.bf16.msra.mxu1 %v11027_v32 }
0x1a3b   :  { %9550 = vmatprep.subr.bf16.mxu1 %v11625_v41 }
0x1a3e   :  { %9551 = vmatpush3.bf16.msra.mxu1 %v11028_v22 }
0x1a3f   :  { %9552 = vmatprep.subr.bf16.mxu1 %v11625_v41 }
0x1a42   :  { %9553 = vmatpush3.bf16.msra.mxu1 %v11029_v44 }
0x1a43   :  { %9554 = vmatprep.subr.bf16.mxu1 %v11625_v41 }
0x1a46   :  { %9555 = vmatpush3.bf16.msra.mxu1 %v11030_v61 }
0x1a47   :  { %9556 = vmatprep.subr.bf16.mxu1 %v11625_v41 }
0x1a4a   :  { %9557 = vmatpush3.bf16.msra.mxu1 %v11031_v59 }
0x1a4b   :  { %9558 = vmatprep.subr.bf16.mxu1 %v11625_v41  ;;  %v8902_v41 = vld [vmem:[#allocation34] ss:$0 sm:$0xff] }
0x1a4e   :  { %9559 = vmatpush3.bf16.msra.mxu1 %v11032_v9 }
0x1b04   :  { %v7794_v37 = vpop.f32.mrb[90].mxu1 }
0x1b05   :  { %v7871_v34 = vrot.slane %v7794_v37, %v12401_v48  ;;  %v9508_v38 = vpop.f32.mrb[91].mxu1 }
0x1b07   :  { %v7872_v1 = vmul.f32 %v7871_v34, %v13349_v52 }
0x1b08   :  { %v7864_v31 = vpop.f32.mrb[102].mxu0 }
0x1b09   :  { %v7876_v63 = vrot.slane %v7864_v31, %v12401_v48  ;;  %v9543_v56 = vpop.f32.mrb[103].mxu0 }
0x1b0b   :  { %v7877_v6 = vadd.f32 %v7876_v63, %v7872_v1 }
0x1b0d   :  { %vm7878_vm10 = vcmp.gt.f32.partialorder %v7877_v6, 0.0  ;;  %v7879_v46 = vmul.f32 0.2, %v7877_v6 }
0x1b0f   :  { %v7880_v50 = vsel %vm7878_vm10, %v7877_v6, %v7879_v46 }
0x1b10   :  { %v7881_v2 = vpack.c.bf16 %v7880_v50, %v7880_v50 }
0x1b12   :  { %9561 = vmatmul.mubr.bf16.vlgmr.msra.gmra.mrb[92].mxu1 %v7881_v2 }
0x1be5   :  { %v7987_v14 = vpop.f32.mrb[92].mxu1 }
0x1be6   :  { %v7988_v33 = vadd.f32 %v8902_v41, %v7987_v14  ;;  %v9562_v21 = vpop.f32.mrb[93].mxu1 }
0x1be7   :  { %v7990_v47 = vpop.f32.mrb[94].mxu1 }
0x1be8   :  { %7994 = vrot.lane.b32.xlu1 %v7988_v33, %s11628_s13  ;;  %v9563_v0 = vpop.f32.mrb[95].mxu1  ;;  %v8000_v52 = vsel %vm7999_vm11, %v7988_v33, -inf }
0x1be9   :  { %8001 = vmax.xlane.f32.xlu0 %v8000_v52 }
0x1c5a   :  { %v7995_v48 = vpop.permute.xlu1 %7994 }
0x1c5b   :  { %7998 = vst.msk [vmem:[%s11833_s3] sm:$0x3] %vm7997_vm12, %v7995_v48  ;;  %s11511_s3 = scalar_lea.vmem %s8023_s27, 32 }
0x1c5c   :  { %p11512_p0 = scmp.ne.s32.totalorder %s8023_s27, %s11511_s3  ;;  %p11517_p2 = scmp.lt.s32.totalorder %s11511_s3, %s11511_s3 }
0x1c5e   :  { %p11518_p3 = por %p11517_p2, %p11516_p1 }
0x1c60   :  { %p11519_p4 = pnand %p11518_p3, %p11512_p0 }
0x1c76   :  { %v8002_v16 = vpop.xlane.xlu0 %8001 }
0x1c77   :  { %v8003_v17 = vsub.f32 %v7988_v33, %v8002_v16 }
0x1c79   :  { %v8004_v25 = vmul.f32 1.442695, %v8003_v17 }
0x1c7b   :  { %11045 = vpow2.f32 %v8004_v25 }
0x1c85   :  { %v11046_v39 = vpop.eup %11045 }
0x1c86   :  { %v8006_v40 = vsel %vm7999_vm11, %v11046_v39, 0.0 }
0x1c87   :  { %8007 = vadd.xlane.f32.xlu0 %v8006_v40 }
0x1d14   :  { %v8008_v26 = vpop.xlane.xlu0 %8007 }
0x1d15   :  { %11047 = vlog2.f32 %v8008_v26 }
0x1d1f   :  { %v11048_v5 = vpop.eup %11047 }
0x1d20   :  { %v8010_v60 = vmul.f32 0.6931472, %v11048_v5 }
0x1d22   :  { %v8011_v42 = vadd.f32 %v8010_v60, %v8002_v16 }
0x1d24   :  { %v8012_v12 = vsub.f32 %v7988_v33, %v8011_v42 }
0x1d26   :  { %8013 = vst.msk [vmem:[#allocation35] sm:$0x3] %vm7999_vm11, %v8012_v12 }
0x1d27   :  { %11522 = shalt.err (!%p11519_p4)
}
0x1d28   :  { %s11523_s26 = scalar_lea.hbm %s11838_s29, 32 }
0x1d29   :  { %p11524_p5 = scmp.ne.s32.totalorder %s11838_s29, %s11523_s26  ;;  %p11527_p6 = scmp.lt.u32.totalorder %s11523_s26, %s11838_s29 }
0x1d2b   :  { %p11529_p7 = pnand %p11527_p6, %p11524_p5 }
0x1d2d   :  { %11532 = shalt.err (!%p11529_p7)
}
0x1d2e   :  { %8025 = dma.vmem_to_hbm [thread:$0]  %s8023_s27, 32, %s11838_s29, [#allocation4]  }
0x1d2f   :  { %11555 = dma.done.wait [#allocation4], 32  }
0x1d30   :  { %11556 = vsyncadd [#allocation4], 4294967264 }
0x1d31   :  { %8031 = vsyncpa [#allocation3], 1 }
0x1d32   :  { %8032 = vsyncpa [#allocation6], 1 }
0x1d33   :  { %8033 = vsyncpa [#allocation9], 1 }
0x1d34   :  { %8034 = vsyncpa [#allocation12], 1 }
0x1d35   :  { %8035 = vsyncpa [#allocation15], 1 }
0x1d36   :  { %8036 = vsyncpa [#allocation18], 1 }
0x1d37   :  { %8037 = vsyncpa [#allocation21], 1 }
0x1d38   :  { %8038 = vsyncpa [#allocation24], 1 }
0x1d39   :  { %8039 = vsyncpa [#allocation27], 1 }
0x1d3a   :  { %8040 = vsyncpa [#allocation30], 1 }
0x1d3b   :  { %8041 = vsyncpa [#allocation33], 1 }
0x1d3c   :  { %8042 = vsyncpa [#allocation4], 1 }

</bundles_post_ra>
